<compile_context>
chip_gen: v6e
topology: v6e:2x2x1
jax: 0.10.0
libtpu: 0.0.40
codegen_flags: <defaults>
</compile_context>

<pallas_src>
import functools

import jax
import jax.numpy as jnp
from jax.experimental import pallas as pl
from jax.experimental.pallas import tpu as pltpu


# ----------------------------------------------------------------------------
# Kernel
# ----------------------------------------------------------------------------
def autoencoder_kernel(x_ref,
                       w0, w1, w2, w3, w4, w5, w6,   # (in, out) bf16, resident
                       b_ref,                        # (8, max_width) f32, resident
                       out_ref,
                       *, bf16_act):
    act_dtype = jnp.bfloat16 if bf16_act else jnp.float32

    def bias(layer, width):
        return b_ref[layer:layer + 1, :width]        # (1, width) f32

    def dense(h, w_ref, layer):
        width = w_ref.shape[1]
        acc = jnp.dot(h.astype(jnp.bfloat16), w_ref[...],
                      preferred_element_type=jnp.float32)
        return acc + bias(layer, width)

    def dense_relu(h, w_ref, layer):
        # Cast once to the activation dtype, relu there.  For bf16 this is
        # bit-identical to "f32 relu then bf16 cast" (round-to-nearest is
        # sign-preserving) but halves VPU element work on v6e/v7x.
        return jnp.maximum(dense(h, w_ref, layer).astype(act_dtype), 0)

    h = x_ref[...]                    # (tile_b, org_pad) f32

    # Encoder: org -> 512 -> 64 -> 16
    h = dense_relu(h, w0, 0)
    h = dense_relu(h, w1, 1)
    h = dense_relu(h, w2, 2)
    # Composed latent pair enc.fc4 (16->2, linear) o dec.fc1 (2->16, relu)
    h = dense_relu(h, w3, 3)
    # Decoder: 16 -> 64 -> 512 -> org
    h = dense_relu(h, w4, 4)
    h = dense_relu(h, w5, 5)
    h = jnp.tanh(dense(h, w6, 6))     # final layer, f32 tanh

    out_ref[...] = h.astype(out_ref.dtype)


# ----------------------------------------------------------------------------
# Wrapper helpers
# ----------------------------------------------------------------------------
def _vmem_capacity_bytes():
    try:
        return int(pltpu.get_tpu_info().vmem_capacity_bytes)
    except Exception:
        return 64 * 1024 * 1024      # conservative (v7x-sized) fallback


def _use_bf16_activations():
    try:
        kind = jax.devices()[0].device_kind.lower()
    except Exception:
        return True
    # v5e and older have no bf16 VPU path -> keep elementwise math in f32 there.
    return not any(tag in kind for tag in ("v2", "v3", "v4", "v5"))


def _resident_spec(shape):
    """Constant-index block: fetched once, stays resident in VMEM."""
    # NOTE: pipeline_mode=pl.Buffered(1) would make single-buffering explicit;
    # it is omitted here to keep the kernel compiling across jax versions, and
    # the VMEM budget below already counts resident weights only once.
    return pl.BlockSpec(shape, lambda i: tuple(0 for _ in shape))


def _select_tile_b(batch, org_pad, weight_bytes, bias_bytes, vmem_cap_bytes):
    """Largest batch tile that fits ~70% of VMEM, keeping >=2 tiles for v7x."""
    budget = int(0.70 * vmem_cap_bytes)
    batch_r8 = ((batch + 7) // 8) * 8
    candidates = [c for c in (1024, 512, 256, 128, 64, 32, 16, 8) if c <= batch_r8]
    if not candidates:
        candidates = [batch_r8]

    def estimate(tb):
        return (weight_bytes + bias_bytes            # resident weights + biases (1x)
                + 4 * tb * org_pad * 4               # double-buffered f32 x/out tiles
                + 3 * tb * 512 * 4)                  # intermediates / slack

    chosen = candidates[-1]
    for cand in candidates:
        if batch >= 256 and -(-batch // cand) < 2:
            continue  # keep >=2 batch tiles so both v7x TensorCores get work
        if estimate(cand) <= budget:
            chosen = cand
            break
    # TODO(synk): if even the smallest tile overflows (huge org on v7x's 64 MiB
    # VMEM), K/N-tile the two org_pad x 512 weights over an extra 'arbitrary'
    # grid axis instead of keeping them fully resident.
    return chosen, estimate(chosen)


# ----------------------------------------------------------------------------
# Forward pass
# ----------------------------------------------------------------------------
@jax.jit
def autoencoder_forward(x, weights, bias_packed):
    """x: (batch, org) f32.  weights: 7 bf16 (in, out) matrices (latent pair
    pre-composed).  bias_packed: (8, max_width) f32 (row 7 is zero padding)."""
    batch, org = x.shape
    org_pad = ((org + 127) // 128) * 128

    weights = list(weights)
    if org_pad != org:
        x = jnp.pad(x, ((0, 0), (0, org_pad - org)))
        weights[0] = jnp.pad(weights[0], ((0, org_pad - org), (0, 0)))    # input rows
        weights[-1] = jnp.pad(weights[-1], ((0, 0), (0, org_pad - org)))  # output cols

    weight_bytes = sum(w.size * w.dtype.itemsize for w in weights)
    bias_bytes = bias_packed.size * bias_packed.dtype.itemsize
    vmem_cap = _vmem_capacity_bytes()

    tile_b, est = _select_tile_b(batch, org_pad, weight_bytes, bias_bytes, vmem_cap)
    batch_pad = -(-batch // tile_b) * tile_b
    if batch_pad != batch:
        x = jnp.pad(x, ((0, batch_pad - batch), (0, 0)))
    n_tiles = batch_pad // tile_b

    vmem_limit = int(min(int(0.85 * vmem_cap),
                         max(32 * 1024 * 1024, int(1.5 * est))))

    flops = 2 * batch_pad * (org_pad * 512 + 512 * 64 + 64 * 16 + 16 * 16
                             + 16 * 64 + 64 * 512 + 512 * org_pad)
    cost = pl.CostEstimate(
        flops=flops,
        transcendentals=batch_pad * org_pad,                       # final tanh
        bytes_accessed=weight_bytes + bias_bytes + 2 * batch_pad * org_pad * 4,
    )

    kernel = functools.partial(autoencoder_kernel,
                               bf16_act=_use_bf16_activations())

    out = pl.pallas_call(
        kernel,
        out_shape=jax.ShapeDtypeStruct((batch_pad, org_pad), x.dtype),
        grid=(n_tiles,),
        in_specs=(
            [pl.BlockSpec((tile_b, org_pad), lambda i: (i, 0))]     # x tile (pipelined)
            + [_resident_spec(w.shape) for w in weights]            # resident weights
            + [_resident_spec(bias_packed.shape)]                   # resident biases
        ),
        out_specs=pl.BlockSpec((tile_b, org_pad), lambda i: (i, 0)),
        compiler_params=pltpu.CompilerParams(
            dimension_semantics=("parallel",),
            vmem_limit_bytes=vmem_limit,
        ),
        cost_estimate=cost,
    )(x, *weights, bias_packed)

    return out[:batch, :org]


# ----------------------------------------------------------------------------
# Parameters (torch.nn.Linear-style init) + plain-JAX reference
# ----------------------------------------------------------------------------
def make_params(key, org_size):
    """Init matching torch.nn.Linear (uniform +-1/sqrt(fan_in)).  Returns the 7
    composed (in, out) bf16 weights and an (8, max_width) f32 packed bias."""
    org_pad = ((org_size + 127) // 128) * 128
    dims = [
        (org_size, 512), (512, 64), (64, 16), (16, 2),   # encoder
        (2, 16), (16, 64), (64, 512), (512, org_size),   # decoder
    ]
    keys = jax.random.split(key, len(dims))
    ws, bs = [], []
    for k, (fi, fo) in zip(keys, dims):
        kw, kb = jax.random.split(k)
        bound = float(fi) ** -0.5
        ws.append(jax.random.uniform(kw, (fi, fo), jnp.float32, -bound, bound))
        bs.append(jax.random.uniform(kb, (fo,), jnp.float32, -bound, bound))

    # Pre-compose enc.fc4 (16->2, no activation) with dec.fc1 (2->16) in f32,
    # cast to bf16 once: mathematically identical to applying them in sequence.
    w_lat = ws[3] @ ws[4]                 # (16, 16)
    b_lat = bs[3] @ ws[4] + bs[4]         # (16,)
    ws = ws[:3] + [w_lat] + ws[5:]
    bs = bs[:3] + [b_lat] + bs[5:]

    weights = tuple(w.astype(jnp.bfloat16) for w in ws)
    max_out = max(512, org_pad)
    bias_rows = [jnp.pad(b, (0, max_out - b.shape[0])) for b in bs]
    bias_rows.append(jnp.zeros((max_out,), jnp.float32))   # pad to 8 rows
    return weights, jnp.stack(bias_rows)


def reference_forward(x, weights, bias_packed, org_size):
    """Plain-JAX reference mirroring kernel precision (bf16 dot inputs, f32
    accumulation, f32 bias; relu/tanh)."""
    relu = jax.nn.relu
    outs = [512, 64, 16, 16, 64, 512, org_size]
    acts = [relu] * 6 + [jnp.tanh]
    h = x.astype(jnp.float32)
    for i in range(7):
        h = jnp.dot(h.astype(jnp.bfloat16), weights[i],
                    preferred_element_type=jnp.float32) + bias_packed[i, :outs[i]]
        h = acts[i](h)
    return h


if __name__ == "__main__":
    key = jax.random.PRNGKey(0)
    k_x, k_p = jax.random.split(key)

    # org_size is the model parameter; batch chosen so the auto-tiler picks a
    # large tile (512) while keeping 2 batch tiles (both v7x TCs busy).
    batch, org_size = 1024, 128
    x = jax.random.normal(k_x, (batch, org_size), jnp.float32)
    weights, bias_packed = make_params(k_p, org_size)

    out = jax.block_until_ready(autoencoder_forward(x, weights, bias_packed))

    ref = reference_forward(x, weights, bias_packed, org_size)
    assert out.shape == (batch, org_size)
    max_err = float(jnp.max(jnp.abs(out - ref)))
    assert jnp.allclose(out, ref, atol=2e-3, rtol=2e-3), f"max abs err {max_err}"

    print("KERNEL_OK")
</pallas_src>

<mosaic_0001>
module attributes {stable_mosaic.version = 11 : i64} {
  func.func @autoencoder_kernel(%arg0: i32, %arg1: memref<512x128xf32, #tpu.memory_space<vmem>>, %arg2: memref<128x512xbf16, #tpu.memory_space<vmem>>, %arg3: memref<512x64xbf16, #tpu.memory_space<vmem>>, %arg4: memref<64x16xbf16, #tpu.memory_space<vmem>>, %arg5: memref<16x16xbf16, #tpu.memory_space<vmem>>, %arg6: memref<16x64xbf16, #tpu.memory_space<vmem>>, %arg7: memref<64x512xbf16, #tpu.memory_space<vmem>>, %arg8: memref<512x128xbf16, #tpu.memory_space<vmem>>, %arg9: memref<8x512xf32, #tpu.memory_space<vmem>>, %arg10: memref<512x128xf32, #tpu.memory_space<vmem>>) attributes {dimension_semantics = [#tpu.dimension_semantics<parallel>], iteration_bounds = array<i64: 2>, scalar_prefetch = 0 : i64, scratch_operands = 0 : i64, tpu.core_type = #tpu.core_type<tc>, window_params = [{transform_indices = @transform_0, window_bounds = array<i64: 512, 128>}, {pipeline_mode = #tpu.pipeline_mode<synchronous>, transform_indices = @transform_1, window_bounds = array<i64: 128, 512>}, {pipeline_mode = #tpu.pipeline_mode<synchronous>, transform_indices = @transform_2, window_bounds = array<i64: 512, 64>}, {pipeline_mode = #tpu.pipeline_mode<synchronous>, transform_indices = @transform_3, window_bounds = array<i64: 64, 16>}, {pipeline_mode = #tpu.pipeline_mode<synchronous>, transform_indices = @transform_4, window_bounds = array<i64: 16, 16>}, {pipeline_mode = #tpu.pipeline_mode<synchronous>, transform_indices = @transform_5, window_bounds = array<i64: 16, 64>}, {pipeline_mode = #tpu.pipeline_mode<synchronous>, transform_indices = @transform_6, window_bounds = array<i64: 64, 512>}, {pipeline_mode = #tpu.pipeline_mode<synchronous>, transform_indices = @transform_7, window_bounds = array<i64: 512, 128>}, {pipeline_mode = #tpu.pipeline_mode<synchronous>, transform_indices = @transform_8, window_bounds = array<i64: 8, 512>}, {transform_indices = @transform_9, window_bounds = array<i64: 512, 128>}]} {
    %c0 = arith.constant 0 : index
    %c0_0 = arith.constant 0 : index
    %0 = vector.load %arg1[%c0, %c0_0] : memref<512x128xf32, #tpu.memory_space<vmem>>, vector<512x128xf32>
    %1 = arith.truncf %0 : vector<512x128xf32> to vector<512x128xbf16>
    %c0_1 = arith.constant 0 : index
    %c0_2 = arith.constant 0 : index
    %2 = vector.load %arg2[%c0_1, %c0_2] : memref<128x512xbf16, #tpu.memory_space<vmem>>, vector<128x512xbf16>
    %cst = arith.constant dense<0.000000e+00> : vector<512x512xf32>
    %3 = tpu.matmul %1, %2, %cst {dimension_numbers = #tpu.dot_dimension_numbers<[1], [0], [0], [1], [0, 0, 1, 1], [], []>} : vector<512x128xbf16>, vector<128x512xbf16>, vector<512x512xf32> -> vector<512x512xf32>
    %c0_3 = arith.constant 0 : index
    %c0_4 = arith.constant 0 : index
    %4 = vector.load %arg9[%c0_3, %c0_4] : memref<8x512xf32, #tpu.memory_space<vmem>>, vector<1x512xf32>
    %5 = vector.broadcast %4 : vector<1x512xf32> to vector<512x512xf32>
    %6 = arith.addf %3, %5 : vector<512x512xf32>
    %7 = arith.truncf %6 : vector<512x512xf32> to vector<512x512xbf16>
    %cst_5 = arith.constant 0.000000e+00 : bf16
    %8 = vector.broadcast %cst_5 : bf16 to vector<512x512xbf16>
    %9 = arith.maximumf %7, %8 : vector<512x512xbf16>
    %c0_6 = arith.constant 0 : index
    %c0_7 = arith.constant 0 : index
    %10 = vector.load %arg3[%c0_6, %c0_7] : memref<512x64xbf16, #tpu.memory_space<vmem>>, vector<512x64xbf16>
    %cst_8 = arith.constant dense<0.000000e+00> : vector<512x64xf32>
    %11 = tpu.matmul %9, %10, %cst_8 {dimension_numbers = #tpu.dot_dimension_numbers<[1], [0], [0], [1], [0, 0, 1, 1], [], []>} : vector<512x512xbf16>, vector<512x64xbf16>, vector<512x64xf32> -> vector<512x64xf32>
    %c1 = arith.constant 1 : index
    %c0_9 = arith.constant 0 : index
    %12 = vector.load %arg9[%c1, %c0_9] : memref<8x512xf32, #tpu.memory_space<vmem>>, vector<1x64xf32>
    %13 = vector.broadcast %12 : vector<1x64xf32> to vector<512x64xf32>
    %14 = arith.addf %11, %13 : vector<512x64xf32>
    %15 = arith.truncf %14 : vector<512x64xf32> to vector<512x64xbf16>
    %cst_10 = arith.constant 0.000000e+00 : bf16
    %16 = vector.broadcast %cst_10 : bf16 to vector<512x64xbf16>
    %17 = arith.maximumf %15, %16 : vector<512x64xbf16>
    %c0_11 = arith.constant 0 : index
    %c0_12 = arith.constant 0 : index
    %18 = vector.load %arg4[%c0_11, %c0_12] : memref<64x16xbf16, #tpu.memory_space<vmem>>, vector<64x16xbf16>
    %cst_13 = arith.constant dense<0.000000e+00> : vector<512x16xf32>
    %19 = tpu.matmul %17, %18, %cst_13 {dimension_numbers = #tpu.dot_dimension_numbers<[1], [0], [0], [1], [0, 0, 1, 1], [], []>} : vector<512x64xbf16>, vector<64x16xbf16>, vector<512x16xf32> -> vector<512x16xf32>
    %c2 = arith.constant 2 : index
    %c0_14 = arith.constant 0 : index
    %20 = vector.load %arg9[%c2, %c0_14] : memref<8x512xf32, #tpu.memory_space<vmem>>, vector<1x16xf32>
    %21 = vector.broadcast %20 : vector<1x16xf32> to vector<512x16xf32>
    %22 = arith.addf %19, %21 : vector<512x16xf32>
    %23 = arith.truncf %22 : vector<512x16xf32> to vector<512x16xbf16>
    %cst_15 = arith.constant 0.000000e+00 : bf16
    %24 = vector.broadcast %cst_15 : bf16 to vector<512x16xbf16>
    %25 = arith.maximumf %23, %24 : vector<512x16xbf16>
    %c0_16 = arith.constant 0 : index
    %c0_17 = arith.constant 0 : index
    %26 = vector.load %arg5[%c0_16, %c0_17] : memref<16x16xbf16, #tpu.memory_space<vmem>>, vector<16x16xbf16>
    %cst_18 = arith.constant dense<0.000000e+00> : vector<512x16xf32>
    %27 = tpu.matmul %25, %26, %cst_18 {dimension_numbers = #tpu.dot_dimension_numbers<[1], [0], [0], [1], [0, 0, 1, 1], [], []>} : vector<512x16xbf16>, vector<16x16xbf16>, vector<512x16xf32> -> vector<512x16xf32>
    %c3 = arith.constant 3 : index
    %c0_19 = arith.constant 0 : index
    %28 = vector.load %arg9[%c3, %c0_19] : memref<8x512xf32, #tpu.memory_space<vmem>>, vector<1x16xf32>
    %29 = vector.broadcast %28 : vector<1x16xf32> to vector<512x16xf32>
    %30 = arith.addf %27, %29 : vector<512x16xf32>
    %31 = arith.truncf %30 : vector<512x16xf32> to vector<512x16xbf16>
    %cst_20 = arith.constant 0.000000e+00 : bf16
    %32 = vector.broadcast %cst_20 : bf16 to vector<512x16xbf16>
    %33 = arith.maximumf %31, %32 : vector<512x16xbf16>
    %c0_21 = arith.constant 0 : index
    %c0_22 = arith.constant 0 : index
    %34 = vector.load %arg6[%c0_21, %c0_22] : memref<16x64xbf16, #tpu.memory_space<vmem>>, vector<16x64xbf16>
    %cst_23 = arith.constant dense<0.000000e+00> : vector<512x64xf32>
    %35 = tpu.matmul %33, %34, %cst_23 {dimension_numbers = #tpu.dot_dimension_numbers<[1], [0], [0], [1], [0, 0, 1, 1], [], []>} : vector<512x16xbf16>, vector<16x64xbf16>, vector<512x64xf32> -> vector<512x64xf32>
    %c4 = arith.constant 4 : index
    %c0_24 = arith.constant 0 : index
    %36 = vector.load %arg9[%c4, %c0_24] : memref<8x512xf32, #tpu.memory_space<vmem>>, vector<1x64xf32>
    %37 = vector.broadcast %36 : vector<1x64xf32> to vector<512x64xf32>
    %38 = arith.addf %35, %37 : vector<512x64xf32>
    %39 = arith.truncf %38 : vector<512x64xf32> to vector<512x64xbf16>
    %cst_25 = arith.constant 0.000000e+00 : bf16
    %40 = vector.broadcast %cst_25 : bf16 to vector<512x64xbf16>
    %41 = arith.maximumf %39, %40 : vector<512x64xbf16>
    %c0_26 = arith.constant 0 : index
    %c0_27 = arith.constant 0 : index
    %42 = vector.load %arg7[%c0_26, %c0_27] : memref<64x512xbf16, #tpu.memory_space<vmem>>, vector<64x512xbf16>
    %cst_28 = arith.constant dense<0.000000e+00> : vector<512x512xf32>
    %43 = tpu.matmul %41, %42, %cst_28 {dimension_numbers = #tpu.dot_dimension_numbers<[1], [0], [0], [1], [0, 0, 1, 1], [], []>} : vector<512x64xbf16>, vector<64x512xbf16>, vector<512x512xf32> -> vector<512x512xf32>
    %c5 = arith.constant 5 : index
    %c0_29 = arith.constant 0 : index
    %44 = vector.load %arg9[%c5, %c0_29] : memref<8x512xf32, #tpu.memory_space<vmem>>, vector<1x512xf32>
    %45 = vector.broadcast %44 : vector<1x512xf32> to vector<512x512xf32>
    %46 = arith.addf %43, %45 : vector<512x512xf32>
    %47 = arith.truncf %46 : vector<512x512xf32> to vector<512x512xbf16>
    %cst_30 = arith.constant 0.000000e+00 : bf16
    %48 = vector.broadcast %cst_30 : bf16 to vector<512x512xbf16>
    %49 = arith.maximumf %47, %48 : vector<512x512xbf16>
    %c0_31 = arith.constant 0 : index
    %c0_32 = arith.constant 0 : index
    %50 = vector.load %arg8[%c0_31, %c0_32] : memref<512x128xbf16, #tpu.memory_space<vmem>>, vector<512x128xbf16>
    %cst_33 = arith.constant dense<0.000000e+00> : vector<512x128xf32>
    %51 = tpu.matmul %49, %50, %cst_33 {dimension_numbers = #tpu.dot_dimension_numbers<[1], [0], [0], [1], [0, 0, 1, 1], [], []>} : vector<512x512xbf16>, vector<512x128xbf16>, vector<512x128xf32> -> vector<512x128xf32>
    %c6 = arith.constant 6 : index
    %c0_34 = arith.constant 0 : index
    %52 = vector.load %arg9[%c6, %c0_34] : memref<8x512xf32, #tpu.memory_space<vmem>>, vector<1x128xf32>
    %53 = vector.broadcast %52 : vector<1x128xf32> to vector<512x128xf32>
    %54 = arith.addf %51, %53 : vector<512x128xf32>
    %55 = math.tanh %54 : vector<512x128xf32>
    %c0_35 = arith.constant 0 : index
    %c0_36 = arith.constant 0 : index
    %56 = vector.load %arg10[%c0_35, %c0_36] : memref<512x128xf32, #tpu.memory_space<vmem>>, vector<512x128xf32>
    tpu.vector_store %arg10[%c0_35, %c0_36], %55 {strides = array<i32>} : memref<512x128xf32, #tpu.memory_space<vmem>>, vector<512x128xf32>,
    return
  }
  func.func @transform_0(%arg0: i32) -> (i32, i32) {
    %c0_i32 = arith.constant 0 : i32
    %c0_i32_0 = arith.constant 0 : i32
    return %arg0, %c0_i32 : i32, i32
  }
  func.func @transform_1(%arg0: i32) -> (i32, i32) {
    %c0_i32 = arith.constant 0 : i32
    %c0_i32_0 = arith.constant 0 : i32
    %c0_i32_1 = arith.constant 0 : i32
    return %c0_i32, %c0_i32_0 : i32, i32
  }
  func.func @transform_2(%arg0: i32) -> (i32, i32) {
    %c0_i32 = arith.constant 0 : i32
    %c0_i32_0 = arith.constant 0 : i32
    %c0_i32_1 = arith.constant 0 : i32
    return %c0_i32, %c0_i32_0 : i32, i32
  }
  func.func @transform_3(%arg0: i32) -> (i32, i32) {
    %c0_i32 = arith.constant 0 : i32
    %c0_i32_0 = arith.constant 0 : i32
    %c0_i32_1 = arith.constant 0 : i32
    return %c0_i32, %c0_i32_0 : i32, i32
  }
  func.func @transform_4(%arg0: i32) -> (i32, i32) {
    %c0_i32 = arith.constant 0 : i32
    %c0_i32_0 = arith.constant 0 : i32
    %c0_i32_1 = arith.constant 0 : i32
    return %c0_i32, %c0_i32_0 : i32, i32
  }
  func.func @transform_5(%arg0: i32) -> (i32, i32) {
    %c0_i32 = arith.constant 0 : i32
    %c0_i32_0 = arith.constant 0 : i32
    %c0_i32_1 = arith.constant 0 : i32
    return %c0_i32, %c0_i32_0 : i32, i32
  }
  func.func @transform_6(%arg0: i32) -> (i32, i32) {
    %c0_i32 = arith.constant 0 : i32
    %c0_i32_0 = arith.constant 0 : i32
    %c0_i32_1 = arith.constant 0 : i32
    return %c0_i32, %c0_i32_0 : i32, i32
  }
  func.func @transform_7(%arg0: i32) -> (i32, i32) {
    %c0_i32 = arith.constant 0 : i32
    %c0_i32_0 = arith.constant 0 : i32
    %c0_i32_1 = arith.constant 0 : i32
    return %c0_i32, %c0_i32_0 : i32, i32
  }
  func.func @transform_8(%arg0: i32) -> (i32, i32) {
    %c0_i32 = arith.constant 0 : i32
    %c0_i32_0 = arith.constant 0 : i32
    %c0_i32_1 = arith.constant 0 : i32
    return %c0_i32, %c0_i32_0 : i32, i32
  }
  func.func @transform_9(%arg0: i32) -> (i32, i32) {
    %c0_i32 = arith.constant 0 : i32
    %c0_i32_0 = arith.constant 0 : i32
    return %arg0, %c0_i32 : i32, i32
  }
}

</mosaic_0001>

<bundles_post_ra>
// kernel: autoencoder_forward.1
= control target key start
LH: loop header
LB: loop body
LE: loop exit
PB: predicated region body
PF: predicated region fallthrough
CT: control target
= control target key end

     0   :  { %s11537_s0 = inlined_call_operand.hbm [shape: f32[1024,128], index: 0, kind: input, shape index: {}]   ;;  %s11538_s1 = inlined_call_operand.vmem [shape: bf16[128,512], index: 1, kind: input, shape index: {}]   ;;  %s11539_s2 = inlined_call_operand.vmem [shape: bf16[512,64], index: 2, kind: input, shape index: {}]   ;;  %s11540_s3 = inlined_call_operand.vmem [shape: bf16[64,16], index: 3, kind: input, shape index: {}]   ;;  %s11541_s4 = inlined_call_operand.vmem [shape: bf16[16,16], index: 4, kind: input, shape index: {}]   ;;  %s11542_s5 = inlined_call_operand.hbm [shape: bf16[16,64], index: 5, kind: input, shape index: {}]   ;;  %s11543_s6 = inlined_call_operand.vmem [shape: bf16[64,512], index: 6, kind: input, shape index: {}]   ;;  %s11544_s7 = inlined_call_operand.hbm [shape: bf16[512,128], index: 7, kind: input, shape index: {}]   ;;  %s11545_s8 = inlined_call_operand.vmem [shape: f32[8,512], index: 8, kind: input, shape index: {}]   ;;  %s11546_s9 = inlined_call_operand.hbm [shape: f32[1024,128], index: 9, kind: output, shape index: {}]  }
   0x1   :  { %11576 = sst [smem:[#allocation31_spill]] %s11542_s5 }
   0x2   :  { %11577 = sst [smem:[#allocation32_spill]] %s11544_s7 }
   0x3   :  { %14 = vsyncpa [#allocation3], 0 }
   0x4   :  { %16 = vsyncpa [#allocation3 + $0x1], 0 }
   0x5   :  { %17 = vsyncpa [#allocation6], 0 }
   0x6   :  { %18 = vsyncpa [#allocation4], 0 }
   0x7   :  { %20 = vsyncpa [#allocation4 + $0x1], 0  ;;  %s7378_s30 = smov 0   ;;  %s7380_s10 = smov 0  }
   0x8   :  { %s7382_s11 = smov 0   ;;  %s7384_s12 = smov 0  }
   0x9 LB: > { %s7399_s13 = sadd.s32 4294967295, %s7315_s12   ;;  %s6200_s14 = sadd.s32 4294967294, %s7315_s12   ;;  %s7315_s12 = sphi %s7384_s12, %s11722_s12   ;;  %s7311_s11 = sphi %s7382_s11, %s11721_s11   ;;  %s7307_s10 = sphi %s7380_s10, %s11720_s10   ;;  %s7303_s30 = sphi %s7378_s30, %s11719_s30  }
   0xa   : > { %p46_p0 = scmp.ne.s32.totalorder %s7307_s10, %s7303_s30  ;;  %p11547_p1 = scmp.eq.s32.totalorder %s7399_s13, 0 }
   0xb   : > { %p244_p3 = scmp.eq.s32.totalorder %s6200_s14, 1  ;;  %p6201_p5 = scmp.ge.s32.totalorder %s7315_s12, 1 }
   0xc   : > { %p7408_p4 = por %p11547_p1, %p46_p0  ;;  %p251_p7 = scmp.lt.s32.totalorder %s7315_s12, 3 }
   0xd   : > { %p7413_p6 = por %p244_p3, %p46_p0  ;;  %s7317_s18 = smov [#allocation5]  }
   0xe   : > { %s11578_s15 = scalar_select %p7408_p4, 1, 0 }
   0xf   : > { %s11579_s16 = scalar_select %p7413_p6, 1, 0 }
  0x10   : > { %p7418_p8 = pnand %p6201_p5, %p251_p7  ;;  %s275_s19 = sshll.u32 %s7317_s18, 4  ;;  %s276_s19 = int_to_ptr.vmem [resolvable:$true] %s275_s19 }
  0x11   : > { %s7318_s21 = smov [#allocation7]   ;;  %s7178_s23 = scalar_lea.vmem %s276_s19, 128 }
  0x12   : > { %s11580_s17 = scalar_select %p7418_p8, 1, 0 }
  0x13   : > { %p6833_p9 = pneg %p7418_p8  ;;  %s291_s22 = sshll.u32 %s7318_s21, 4  ;;  %s292_s22 = int_to_ptr.vmem [resolvable:$true] %s291_s22 }
  0x14   : > { %p7179_p13 = scmp.ne.s32.totalorder %s276_s19, %s7178_s23  ;;  %p7186_p5 = scmp.lt.s32.totalorder %s276_s19, %s276_s19 }
  0x15   : > { %p7427_p11 = pnand %p6833_p9, %p11547_p1  ;;  %p7187_p7 = scmp.lt.s32.totalorder %s7178_s23, %s7178_s23 }
  0x17   : > { %p7169_p12 = pneg %p7427_p11  ;;  %p7188_p10 = por %p7187_p7, %p7186_p5 }
  0x19   : > { %p7181_p0 = pnand %p7179_p13, %p7169_p12 }
  0x1b   : > { %p7182_p3 = pneg %p7181_p0 }
  0x1d   : > { %p7189_p9 = pnand %p7188_p10, %p7182_p3 }
  0x1f   : > { %7192 = shalt.err (!%p7189_p9)
}
  0x20   : > { %s7319_s24 = smov 64   ;;  %s7320_s25 = smov 4  }
  0x21   : > { %s11582_s5 = sld [smem:[#allocation31_spill]]  ;;  %s7204_s28 = scalar_lea.vmem %s292_s22, 4096 }
  0x22   : > { %p7205_p1 = scmp.ne.s32.totalorder %s292_s22, %s7204_s28  ;;  %p7212_p2 = scmp.lt.s32.totalorder %s292_s22, %s292_s22 }
  0x23   : > { %p7213_p6 = scmp.lt.s32.totalorder %s7204_s28, %s7204_s28 }
  0x24   : > { %p7207_p13 = pnand %p7205_p1, %p7169_p12 }
  0x25   : > { %p7214_p5 = por %p7213_p6, %p7212_p2 }
  0x26   : > { %p7208_p0 = pneg %p7207_p13 }
  0x27   : > { %6836 = dma.hbm_to_vmem [thread:$0]  (!%p7427_p11), %s11582_s5, 128, %s276_s19, [#allocation6], %s7319_s24, %s7319_s24, %s7320_s25  }
  0x28   : > { %p7215_p10 = pnand %p7214_p5, %p7208_p0 }
  0x2a   : > { %7218 = shalt.err (!%p7215_p10)
}
  0x2b   : > { %s11583_s7 = sld [smem:[#allocation32_spill]]  ;;  %s7450_s18 = sadd.s32 1, %s7315_s12  }
  0x2c   : > { %s33_s19 = sadd.s32 1, %s7311_s11  ;;  %s30_s20 = ssub.s32 %s7315_s12, %s7450_s18 }
  0x2d   : > { %p40_p1 = scmp.ne.s32.totalorder %s7311_s11, %s7307_s10  ;;  %p31_p2 = scmp.eq.s32.totalorder %s30_s20, 0 }
  0x2e   : > { %p41_p6 = scmp.eq.s32.totalorder %s7315_s12, 0  ;;  %p11584_p12 = scmp.eq.s32.totalorder %s7399_s13, 1 }
  0x2f   : > { %p6850_p7 = scmp.lt.s32.totalorder %s7315_s12, 2  ;;  %s308_s26 = sand.u32 1, %s7311_s11  }
  0x30   : > { %p7460_p3 = por %p11584_p12, %p40_p1  ;;  %p42_p9 = por %p41_p6, %p40_p1 }
  0x31   : > { %6839 = dma.hbm_to_vmem [thread:$0]  (!%p7427_p11), %s11583_s7, 4096, %s292_s22, [#allocation6], %s7319_s24, %s7319_s24, %s7320_s25  }
  0x32   : > { %s11585_s21 = scalar_select %p7460_p3, 1, 0 }
  0x33   : > { %s7466_s23 = scalar_select %p31_p2, %s7311_s11, %s33_s19  }
  0x34   : > { %s6205_s27 = sshll.u32 %s308_s26, 9  ;;  %s6497_s22 = sshll.u32 %s7315_s12, 13 }
  0x35   : > { %11586 = sst [smem:[#allocation12_spill]] %s7466_s23  ;;  %s7473_s28 = scalar_lea.hbm %s11537_s0, %s6497_s22 }
  0x36   : > { %s312_s29 = scalar_lea.vmem [#allocation2], %s6205_s27  ;;  %p7477_p11 = pnand %p6850_p7, %p42_p9 }
  0x37   : > { %s319_s14 = sshll.u32 %s312_s29, 4  ;;  %s7481_s19 = scalar_lea.sflag [#allocation3], %s308_s26  ;;  %s7475_s14 = int_to_ptr.vmem [resolvable:$true] %s319_s14 }
  0x38   : > { %s7219_s5 = scalar_lea.hbm %s7473_s28, 8192  ;;  %p7221_p0 = pneg %p7477_p11 }
  0x39   : > { %p7220_p13 = scmp.ne.s32.totalorder %s7473_s28, %s7219_s5  ;;  %s7224_s27 = scalar_lea.hbm %s11537_s0, 16384 }
  0x3a   : > { %p7225_p1 = scmp.lt.s32.totalorder %s7473_s28, %s11537_s0  ;;  %p7226_p2 = scmp.lt.s32.totalorder %s7224_s27, %s7219_s5 }
  0x3b   : > { %p7222_p5 = pnand %p7221_p0, %p7220_p13 }
  0x3c   : > { %p7227_p6 = por %p7226_p2, %p7225_p1 }
  0x3d   : > { %p7223_p10 = pneg %p7222_p5 }
  0x3f   : > { %p7228_p12 = pnand %p7227_p6, %p7223_p10 }
  0x41   : > { %7231 = shalt.err (!%p7228_p12)
}
  0x42   : > { %s7232_s26 = scalar_lea.vmem %s7475_s14, 8192  ;;  %s7321_s7 = smov [#allocation2]  }
  0x43   : > { %p7233_p7 = scmp.ne.s32.totalorder %s7475_s14, %s7232_s26  ;;  %s7237_s23 = sshll.u32 %s7321_s7, 4  ;;  %s7238_s23 = int_to_ptr.vmem [resolvable:$false] %s7237_s23 }
  0x44   : > { %s7239_s22 = scalar_lea.vmem %s7238_s23, 16384  ;;  %p7240_p5 = scmp.lt.s32.totalorder %s7475_s14, %s7238_s23 }
  0x45   : > { %p7235_p9 = pnand %p7233_p7, %p7221_p0  ;;  %p7241_p3 = scmp.lt.s32.totalorder %s7239_s22, %s7232_s26 }
  0x47   : > { %p7236_p13 = pneg %p7235_p9  ;;  %p7242_p4 = por %p7241_p3, %p7240_p5 }
  0x49   : > { %p7243_p8 = pnand %p7242_p4, %p7236_p13 }
  0x4b   : > { %7246 = shalt.err (!%p7243_p8)
}
  0x4c   : > { %s7322_s5 = smov 128   ;;  %s7323_s24 = smov 8  }
  0x4d   : > { %6843 = dma.hbm_to_vmem [thread:$0]  (!%p7477_p11), %s7473_s28, 8192, %s7475_s14, %s7481_s19, %s7322_s5, %s7322_s5, %s7323_s24  }
  0x4e   : > { %p11588_p0 = scmp.ne.s32.totalorder %s11580_s17, 0 }
  0x50   : > { %331 = sbr.rel (%p11588_p0) target bundleno = 2048 (0x800), region = 56 }
  0x55   : > { %s7505_s7 = sand.u32 1, %s7307_s10   ;;  %p11589_p4 = scmp.ne.s32.totalorder %s11578_s15, 0 }
  0x56   : > { %s6209_s23 = sshll.u32 %s7505_s7, 9  ;;  %s334_s27 = scalar_lea.sflag [#allocation3], %s7505_s7 }
  0x57   : > { %s7511_s25 = scalar_lea.vmem [#allocation2], %s6209_s23 }
  0x58   : > { %7290 = dma.done.wait (%p11589_p4), %s334_s27, 8192  }
  0x59   : > { %7292 = vsyncadd (%p11589_p4), %s334_s27, 4294959104  ;;  %p11590_p8 = scmp.eq.s32.totalorder %s7399_s13, 0 }
  0x5b   : > { %7294 = dma.done.wait (%p11590_p8), [#allocation6], 4224   ;;  %p11591_p3 = pmov %p11590_p8 }
  0x5c   : > { %v11564_v0 = vmov 0   ;;  %v6895_v1 = vld [vmem:[%s11538_s1 + $0xe4] ss:$16 sps:$4 sm:$0xff]   ;;  %v6897_v2 = vld [vmem:[%s11538_s1 + $0xe0] ss:$16 sps:$4 sm:$0xff]   ;;  %v384_v18 = vld [vmem:[%s7511_s25 + $0x8] sm:$0xff] }
  0x5d   : > { %7296 = vsyncadd (%p11591_p3), [#allocation6], 4294963072  ;;  %725 = vmatprep.mubr.bf16.mxu0 %v11564_v0  ;;  %965 = vmatprep.mubr.bf16.mxu1 %v11564_v0  ;;  %v6898_v3 = vld [vmem:[%s11538_s1 + $0xc4] ss:$16 sps:$4 sm:$0xff]   ;;  %v6900_v4 = vld [vmem:[%s11538_s1 + $0xc0] ss:$16 sps:$4 sm:$0xff]  }
  0x5e   : > { %693 = vmatprep.subr.bf16.mxu0 %v6895_v1  ;;  %6805 = vmatprep.subr.bf16.mxu1 %v6895_v1  ;;  %v6901_v5 = vld [vmem:[%s11538_s1 + $0xa4] ss:$16 sps:$4 sm:$0xff]   ;;  %v6903_v6 = vld [vmem:[%s11538_s1 + $0xa0] ss:$16 sps:$4 sm:$0xff]   ;;  %v432_v20 = vld [vmem:[%s7511_s25 + $0x188] sm:$0xff]  ;;  %vm2587_vm0 = vcmask 523264  }
  0x5f   : > { %694 = vmatpush1.bf16.msra.mxu0 %v6897_v2  ;;  %6813 = vmatpush1.bf16.msra.mxu1 %v6897_v2  ;;  %v6904_v7 = vld [vmem:[%s11538_s1 + $0x84] ss:$16 sps:$4 sm:$0xff]   ;;  %v6906_v8 = vld [vmem:[%s11538_s1 + $0x80] ss:$16 sps:$4 sm:$0xff]   ;;  %v6921_v21 = vld [vmem:[%s11538_s1 + $0xec] ss:$16 sps:$4 sm:$0xff]  }
  0x60   : > { %695 = vmatprep.subr.bf16.mxu0 %v6898_v3  ;;  %6806 = vmatprep.subr.bf16.mxu1 %v6898_v3  ;;  %v6907_v9 = vld [vmem:[%s11538_s1 + $0x64] ss:$16 sps:$4 sm:$0xff]   ;;  %v6909_v10 = vld [vmem:[%s11538_s1 + $0x60] ss:$16 sps:$4 sm:$0xff]   ;;  %v6919_v24 = vld [vmem:[%s11538_s1 + $0xe8] ss:$16 sps:$4 sm:$0xff]  }
  0x61   : > { %v6910_v11 = vld [vmem:[%s11538_s1 + $0x44] ss:$16 sps:$4 sm:$0xff]   ;;  %v6912_v12 = vld [vmem:[%s11538_s1 + $0x40] ss:$16 sps:$4 sm:$0xff]   ;;  %v6924_v25 = vld [vmem:[%s11538_s1 + $0xcc] ss:$16 sps:$4 sm:$0xff]  }
  0x62   : > { %v6913_v13 = vld [vmem:[%s11538_s1 + $0x24] ss:$16 sps:$4 sm:$0xff]   ;;  %v6915_v14 = vld [vmem:[%s11538_s1 + $0x20] ss:$16 sps:$4 sm:$0xff]   ;;  %v386_v27 = vld [vmem:[%s7511_s25 + $0x18] sm:$0xff]  ;;  %vm3046_vm1 = vcmask 130048  }
  0x63   : > { %696 = vmatpush1.bf16.msra.mxu0 %v6900_v4  ;;  %6814 = vmatpush1.bf16.msra.mxu1 %v6900_v4  ;;  %v6916_v15 = vld [vmem:[%s11538_s1 + $0x4] ss:$16 sps:$4 sm:$0xff]   ;;  %v6918_v16 = vld [vmem:[%s11538_s1] ss:$16 sps:$4 sm:$0xff]   ;;  %v434_v29 = vld [vmem:[%s7511_s25 + $0x198] sm:$0xff]  ;;  %s11163_s28 = scalar_lea.vmem [#allocation8], %s6209_s23 }
  0x64   : > { %697 = vmatprep.subr.bf16.mxu0 %v6901_v5  ;;  %6807 = vmatprep.subr.bf16.mxu1 %v6901_v5  ;;  %v383_v17 = vld [vmem:[%s7511_s25] sm:$0xff]  ;;  %v385_v26 = vld [vmem:[%s7511_s25 + $0x10] sm:$0xff]  ;;  %v6922_v30 = vld [vmem:[%s11538_s1 + $0xc8] ss:$16 sps:$4 sm:$0xff]   ;;  %s6498_s20 = sshll.u32 %s7399_s13, 13  ;;  %s6108_s15 = sshll.u32 %s11163_s28, 4  ;;  %s11493_s15 = int_to_ptr.vmem [resolvable:$true] %s6108_s15 }
  0x65   : > { %v431_v19 = vld [vmem:[%s7511_s25 + $0x180] sm:$0xff]  ;;  %v7578_v22 = vpack.c.bf16 %v384_v18, %v383_v17  ;;  %v433_v28 = vld [vmem:[%s7511_s25 + $0x190] sm:$0xff]  ;;  %v6927_v31 = vld [vmem:[%s11538_s1 + $0xac] ss:$16 sps:$4 sm:$0xff]   ;;  %v7603_v32 = vpack.c.bf16 %v386_v27, %v385_v26  ;;  %s11491_s26 = scalar_lea.hbm %s11546_s9, %s6498_s20  ;;  %s6095_s22 = scalar_lea.sflag [#allocation4], %s7505_s7 }
  0x66   : > { %v7580_v23 = vpack.c.bf16 %v432_v20, %v431_v19  ;;  %v7605_v33 = vpack.c.bf16 %v434_v29, %v433_v28  ;;  %v6925_v34 = vld [vmem:[%s11538_s1 + $0xa8] ss:$16 sps:$4 sm:$0xff]   ;;  %v387_v35 = vld [vmem:[%s7511_s25 + $0x20] sm:$0xff]  ;;  %v6930_v36 = vld [vmem:[%s11538_s1 + $0x8c] ss:$16 sps:$4 sm:$0xff]   ;;  %p11715_p10 = scmp.ne.s32.totalorder %s11585_s21, 0 }
  0x67   : > { %698 = vmatpush1.bf16.msra.mxu0 %v6903_v6  ;;  %6815 = vmatpush1.bf16.msra.mxu1 %v6903_v6  ;;  %v388_v37 = vld [vmem:[%s7511_s25 + $0x28] sm:$0xff]  ;;  %v435_v38 = vld [vmem:[%s7511_s25 + $0x1a0] sm:$0xff]  ;;  %v6947_v39 = vld [vmem:[%s11539_s2 + $0x38] sm:$0xff]   ;;  %s7325_s13 = smov [#allocation8]  }
  0x68   : > { %699 = vmatprep.subr.bf16.mxu0 %v6904_v7  ;;  %6808 = vmatprep.subr.bf16.mxu1 %v6904_v7  ;;  %v436_v40 = vld [vmem:[%s7511_s25 + $0x1a8] sm:$0xff]  ;;  %v6949_v43 = vld [vmem:[%s11539_s2 + $0x30] sm:$0xff]   ;;  %v7634_v44 = vpack.c.bf16 %v388_v37, %v387_v35  ;;  %v390_v49 = vld [vmem:[%s7511_s25 + $0x38] sm:$0xff]  ;;  %s7251_s5 = sshll.u32 %s7325_s13, 4  ;;  %s7252_s5 = int_to_ptr.vmem [resolvable:$false] %s7251_s5 }
  0x69   : > { %v6928_v41 = vld [vmem:[%s11538_s1 + $0x88] ss:$16 sps:$4 sm:$0xff]   ;;  %v6933_v42 = vld [vmem:[%s11538_s1 + $0x6c] ss:$16 sps:$4 sm:$0xff]   ;;  %v7636_v45 = vpack.c.bf16 %v436_v40, %v435_v38  ;;  %v389_v48 = vld [vmem:[%s7511_s25 + $0x30] sm:$0xff]  ;;  %s7253_s24 = scalar_lea.vmem %s7252_s5, 16384  ;;  %p7254_p6 = scmp.lt.s32.totalorder %s11493_s15, %s7252_s5 }
  0x6a   : > { %v6931_v46 = vld [vmem:[%s11538_s1 + $0x68] ss:$16 sps:$4 sm:$0xff]   ;;  %v6936_v47 = vld [vmem:[%s11538_s1 + $0x4c] ss:$16 sps:$4 sm:$0xff]   ;;  %v437_v50 = vld [vmem:[%s7511_s25 + $0x1b0] sm:$0xff]  ;;  %v7663_v55 = vpack.c.bf16 %v390_v49, %v389_v48 }
  0x6b   : > { %700 = vmatpush1.bf16.msra.mxu0 %v6906_v8  ;;  %6816 = vmatpush1.bf16.msra.mxu1 %v6906_v8  ;;  %v438_v51 = vld [vmem:[%s7511_s25 + $0x1b8] sm:$0xff]  ;;  %v6951_v52 = vld [vmem:[%s11539_s2 + $0x28] sm:$0xff]   ;;  %v391_v59 = vld [vmem:[%s7511_s25 + $0x40] sm:$0xff] }
  0x6c   : > { %701 = vmatprep.subr.bf16.mxu0 %v6907_v9  ;;  %6809 = vmatprep.subr.bf16.mxu1 %v6907_v9  ;;  %v6934_v53 = vld [vmem:[%s11538_s1 + $0x48] ss:$16 sps:$4 sm:$0xff]   ;;  %v6939_v54 = vld [vmem:[%s11538_s1 + $0x2c] ss:$16 sps:$4 sm:$0xff]   ;;  %v7665_v56 = vpack.c.bf16 %v438_v51, %v437_v50  ;;  %v439_v61 = vld [vmem:[%s7511_s25 + $0x1c0] sm:$0xff] }
  0x6d   : > { %v6937_v57 = vld [vmem:[%s11538_s1 + $0x28] ss:$16 sps:$4 sm:$0xff]   ;;  %v6942_v58 = vld [vmem:[%s11538_s1 + $0xc] ss:$16 sps:$4 sm:$0xff]   ;;  %v6952_v62 = vld [vmem:[%s11539_s2 + $0x20] sm:$0xff]  }
  0x6e   : > { %v392_v60 = vld [vmem:[%s7511_s25 + $0x48] sm:$0xff]  ;;  %v6953_v2 = vld [vmem:[%s11539_s2 + $0x18] sm:$0xff]   ;;  %v393_v5 = vld [vmem:[%s7511_s25 + $0x50] sm:$0xff] }
  0x6f   : > { %702 = vmatpush1.bf16.msra.mxu0 %v6909_v10  ;;  %6817 = vmatpush1.bf16.msra.mxu1 %v6909_v10  ;;  %v440_v63 = vld [vmem:[%s7511_s25 + $0x1c8] sm:$0xff]  ;;  %v7691_v3 = vpack.c.bf16 %v392_v60, %v391_v59  ;;  %v394_v6 = vld [vmem:[%s7511_s25 + $0x58] sm:$0xff]  ;;  %v6955_v7 = vld [vmem:[%s11539_s2 + $0x10] sm:$0xff]  }
  0x70   : > { %703 = vmatprep.subr.bf16.mxu0 %v6910_v11  ;;  %6810 = vmatprep.subr.bf16.mxu1 %v6910_v11  ;;  %v6940_v1 = vld [vmem:[%s11538_s1 + $0x8] ss:$16 sps:$4 sm:$0xff]   ;;  %v7693_v4 = vpack.c.bf16 %v440_v63, %v439_v61  ;;  %v441_v8 = vld [vmem:[%s7511_s25 + $0x1d0] sm:$0xff]  ;;  %v7712_v11 = vpack.c.bf16 %v394_v6, %v393_v5  ;;  %v6946_v49 = vld [vmem:[%s11539_s2 + $0xa0] sm:$0xff]  }
  0x71   : > { %v442_v9 = vld [vmem:[%s7511_s25 + $0x1d8] sm:$0xff]  ;;  %v6956_v10 = vld [vmem:[%s11539_s2 + $0x8] sm:$0xff]   ;;  %v445_v26 = vld [vmem:[%s7511_s25 + $0x1f0] sm:$0xff] }
  0x72   : > { %v444_v17 = vld [vmem:[%s7511_s25 + $0x1e8] sm:$0xff]  ;;  %v6958_v18 = vld [vmem:[%s11539_s2 + $0x78] sm:$0xff]   ;;  %v6967_v50 = vld [vmem:[%s11539_s2 + $0x40] sm:$0xff]  }
  0x73   : > { %704 = vmatpush1.bf16.msra.mxu0 %v6912_v12  ;;  %6818 = vmatpush1.bf16.msra.mxu1 %v6912_v12  ;;  %v7714_v12 = vpack.c.bf16 %v442_v9, %v441_v8  ;;  %v446_v27 = vld [vmem:[%s7511_s25 + $0x1f8] sm:$0xff]  ;;  %v6961_v28 = vld [vmem:[%s11539_s2 + $0x68] sm:$0xff]   ;;  %v6959_v60 = vld [vmem:[%s11539_s2 + $0x80] sm:$0xff]  }
  0x74   : > { %705 = vmatprep.subr.bf16.mxu0 %v6913_v13  ;;  %6811 = vmatprep.subr.bf16.mxu1 %v6913_v13  ;;  %v395_v13 = vld [vmem:[%s7511_s25 + $0x60] sm:$0xff]  ;;  %v400_v35 = vld [vmem:[%s7511_s25 + $0x88] sm:$0xff]  ;;  %v6943_v38 = vld [vmem:[%s11539_s2 + $0xb8] sm:$0xff]  }
  0x75   : > { %v402_v40 = vld [vmem:[%s7511_s25 + $0x98] sm:$0xff]  ;;  %v404_v48 = vld [vmem:[%s7511_s25 + $0xa8] sm:$0xff]  ;;  %v411_v5 = vld [vmem:[%s7511_s25 + $0xe0] sm:$0xff] }
  0x76   : > { %v6948_v51 = vld [vmem:[%s11539_s2 + $0x98] sm:$0xff]   ;;  %v408_v59 = vld [vmem:[%s7511_s25 + $0xc8] sm:$0xff]  ;;  %v413_v8 = vld [vmem:[%s7511_s25 + $0xf0] sm:$0xff] }
  0x77   : > { %706 = vmatpush1.bf16.msra.mxu0 %v6915_v14  ;;  %6819 = vmatpush1.bf16.msra.mxu1 %v6915_v14  ;;  %v396_v14 = vld [vmem:[%s7511_s25 + $0x68] sm:$0xff]  ;;  %v410_v63 = vld [vmem:[%s7511_s25 + $0xd8] sm:$0xff] }
  0x78   : > { %707 = vmatprep.subr.bf16.mxu0 %v6916_v15  ;;  %6812 = vmatprep.subr.bf16.mxu1 %v6916_v15  ;;  %v6957_v15 = vld [vmem:[%s11539_s2] sm:$0xff]   ;;  %v7732_v19 = vpack.c.bf16 %v396_v14, %v395_v13  ;;  %v412_v6 = vld [vmem:[%s7511_s25 + $0xe8] sm:$0xff]  ;;  %v414_v9 = vld [vmem:[%s7511_s25 + $0xf8] sm:$0xff] }
  0x79   : > { %v415_v13 = vld [vmem:[%s7511_s25 + $0x100] sm:$0xff]  ;;  %v416_v14 = vld [vmem:[%s7511_s25 + $0x108] sm:$0xff] }
  0x7b   : > { %708 = vmatpush1.bf16.msra.mxu0 %v6918_v16  ;;  %6820 = vmatpush1.bf16.msra.mxu1 %v6918_v16  ;;  %v443_v16 = vld [vmem:[%s7511_s25 + $0x1e0] sm:$0xff] }
  0x7c   : > { %1046 = vmatprep.subr.bf16.mxu1 %v6921_v21  ;;  %1912 = vmatprep.subr.bf16.mxu0 %v11564_v0  ;;  %v7734_v20 = vpack.c.bf16 %v444_v17, %v443_v16  ;;  %v397_v21 = vld [vmem:[%s7511_s25 + $0x70] sm:$0xff]  ;;  %v418_v17 = vld [vmem:[%s7511_s25 + $0x118] sm:$0xff] }
  0x7d   : > { %v417_v16 = vld [vmem:[%s7511_s25 + $0x110] sm:$0xff] }
  0x7e   : > { %726 = vmatmul.mubr.bf16.vlgmr.msra.gmra.mxu0 %v7578_v22  ;;  %966 = vmatmul.mubr.bf16.vlgmr.msra.gmra.mxu1 %v7580_v23 }
  0x7f   : > { %1047 = vmatpush1.bf16.msra.mxu1 %v6919_v24  ;;  %735 = vmatprep.mubr.bf16.mxu0 %v11564_v0  ;;  %v398_v24 = vld [vmem:[%s7511_s25 + $0x78] sm:$0xff] }
  0x80   : > { %975 = vmatprep.mubr.bf16.mxu1 %v11564_v0  ;;  %1048 = vmatprep.subr.bf16.mxu1 %v6924_v25  ;;  %v6960_v25 = vld [vmem:[%s11539_s2 + $0x70] sm:$0xff]   ;;  %v7752_v29 = vpack.c.bf16 %v398_v24, %v397_v21  ;;  %v419_v21 = vld [vmem:[%s7511_s25 + $0x120] sm:$0xff]  ;;  %v420_v24 = vld [vmem:[%s7511_s25 + $0x128] sm:$0xff] }
  0x81   : > { %1913 = vmatpush1.bf16.msra.mxu0 %v6947_v39  ;;  %v401_v39 = vld [vmem:[%s7511_s25 + $0x90] sm:$0xff] }
  0x82   : > { %1914 = vmatprep.subr.bf16.mxu0 %v11564_v0 }
  0x83   : > { %1049 = vmatpush1.bf16.msra.mxu1 %v6922_v30  ;;  %v7754_v30 = vpack.c.bf16 %v446_v27, %v445_v26  ;;  %v421_v26 = vld [vmem:[%s7511_s25 + $0x130] sm:$0xff]  ;;  %v422_v27 = vld [vmem:[%s7511_s25 + $0x138] sm:$0xff] }
  0x84   : > { %1050 = vmatprep.subr.bf16.mxu1 %v6927_v31  ;;  %v399_v31 = vld [vmem:[%s7511_s25 + $0x80] sm:$0xff] }
  0x85   : > { %1915 = vmatpush1.bf16.msra.mxu0 %v6949_v43  ;;  %v7770_v37 = vpack.c.bf16 %v400_v35, %v399_v31  ;;  %v7789_v43 = vpack.c.bf16 %v402_v40, %v401_v39  ;;  %v423_v31 = vld [vmem:[%s7511_s25 + $0x140] sm:$0xff] }
  0x86   : > { %736 = vmatmul.mubr.bf16.gmra.mxu0 %v7603_v32  ;;  %976 = vmatmul.mubr.bf16.gmra.mxu1 %v7605_v33  ;;  %v427_v40 = vld [vmem:[%s7511_s25 + $0x160] sm:$0xff] }
  0x87   : > { %745 = vmatprep.mubr.bf16.mxu0 %v11564_v0  ;;  %985 = vmatprep.mubr.bf16.mxu1 %v11564_v0 }
  0x88   : > { %1051 = vmatpush1.bf16.msra.mxu1 %v6925_v34  ;;  %1916 = vmatprep.subr.bf16.mxu0 %v11564_v0  ;;  %v6962_v34 = vld [vmem:[%s11539_s2 + $0x60] sm:$0xff]  }
  0x89   : > { %1052 = vmatprep.subr.bf16.mxu1 %v6930_v36  ;;  %1917 = vmatpush1.bf16.msra.mxu0 %v6951_v52  ;;  %v6963_v36 = vld [vmem:[%s11539_s2 + $0x58] sm:$0xff]   ;;  %v405_v52 = vld [vmem:[%s7511_s25 + $0xb0] sm:$0xff] }
  0x8a   : > { %1918 = vmatprep.subr.bf16.mxu0 %v11564_v0 }
  0x8c   : > { %1053 = vmatpush1.bf16.msra.mxu1 %v6928_v41  ;;  %v6944_v41 = vld [vmem:[%s11539_s2 + $0xb0] sm:$0xff]  }
  0x8d   : > { %1054 = vmatprep.subr.bf16.mxu1 %v6933_v42  ;;  %1919 = vmatpush1.bf16.msra.mxu0 %v6952_v62  ;;  %v6965_v42 = vld [vmem:[%s11539_s2 + $0x50] sm:$0xff]  }
  0x8e   : > { %746 = vmatmul.mubr.bf16.gmra.mxu0 %v7634_v44  ;;  %986 = vmatmul.mubr.bf16.gmra.mxu1 %v7636_v45  ;;  %v409_v62 = vld [vmem:[%s7511_s25 + $0xd0] sm:$0xff] }
  0x8f   : > { %755 = vmatprep.mubr.bf16.mxu0 %v11564_v0  ;;  %995 = vmatprep.mubr.bf16.mxu1 %v11564_v0 }
  0x90   : > { %1055 = vmatpush1.bf16.msra.mxu1 %v6931_v46  ;;  %1920 = vmatprep.subr.bf16.mxu0 %v11564_v0  ;;  %v6945_v46 = vld [vmem:[%s11539_s2 + $0xa8] sm:$0xff]  }
  0x91   : > { %1056 = vmatprep.subr.bf16.mxu1 %v6936_v47  ;;  %1921 = vmatpush1.bf16.msra.mxu0 %v6953_v2  ;;  %v403_v47 = vld [vmem:[%s7511_s25 + $0xa0] sm:$0xff]  ;;  %v7861_v2 = vpack.c.bf16 %v410_v63, %v409_v62 }
  0x92   : > { %1922 = vmatprep.subr.bf16.mxu0 %v11564_v0 }
  0x94   : > { %1057 = vmatpush1.bf16.msra.mxu1 %v6934_v53  ;;  %v406_v53 = vld [vmem:[%s7511_s25 + $0xb8] sm:$0xff] }
  0x95   : > { %1058 = vmatprep.subr.bf16.mxu1 %v6939_v54  ;;  %1923 = vmatpush1.bf16.msra.mxu0 %v6955_v7  ;;  %v6950_v54 = vld [vmem:[%s11539_s2 + $0x90] sm:$0xff]   ;;  %v7874_v7 = vpack.c.bf16 %v412_v6, %v411_v5 }
  0x96   : > { %756 = vmatmul.mubr.bf16.gmra.mxu0 %v7663_v55  ;;  %996 = vmatmul.mubr.bf16.gmra.mxu1 %v7665_v56 }
  0x97   : > { %765 = vmatprep.mubr.bf16.mxu0 %v11564_v0  ;;  %1005 = vmatprep.mubr.bf16.mxu1 %v11564_v0 }
  0x98   : > { %1059 = vmatpush1.bf16.msra.mxu1 %v6937_v57  ;;  %1924 = vmatprep.subr.bf16.mxu0 %v11564_v0  ;;  %v7829_v57 = vpack.c.bf16 %v406_v53, %v405_v52 }
  0x99   : > { %1060 = vmatprep.subr.bf16.mxu1 %v6942_v58  ;;  %1925 = vmatpush1.bf16.msra.mxu0 %v6956_v10  ;;  %v407_v58 = vld [vmem:[%s7511_s25 + $0xc0] sm:$0xff] }
  0x9a   : > { %1926 = vmatprep.subr.bf16.mxu0 %v11564_v0  ;;  %v7845_v61 = vpack.c.bf16 %v408_v59, %v407_v58  ;;  %v6970_v10 = vld [vmem:[%s11539_s2 + $0xe0] sm:$0xff]  }
  0x9c   : > { %1061 = vmatpush1.bf16.msra.mxu1 %v6940_v1  ;;  %v6968_v1 = vld [vmem:[%s11539_s2 + $0xf0] sm:$0xff]  }
  0x9d   : > { %2201 = vmatprep.subr.bf16.mxu1 %v11564_v0  ;;  %1927 = vmatpush1.bf16.msra.mxu0 %v6957_v15  ;;  %v7894_v15 = vpack.c.bf16 %v416_v14, %v415_v13 }
  0x9e   : > { %766 = vmatmul.mubr.bf16.gmra.mxu0 %v7691_v3  ;;  %1006 = vmatmul.mubr.bf16.gmra.mxu1 %v7693_v4 }
  0x9f   : > { %775 = vmatprep.mubr.bf16.mxu0 %v11564_v0  ;;  %1015 = vmatprep.mubr.bf16.mxu1 %v11564_v0 }
  0xa0   : > { %1928 = vmatprep.subr.bf16.mxu0 %v11564_v0 }
  0xa1   : > { %1929 = vmatpush2.bf16.msra.mxu0 %v6958_v18  ;;  %v6971_v18 = vld [vmem:[%s11539_s2 + $0xd8] sm:$0xff]  }
  0xa2   : > { %1930 = vmatprep.subr.bf16.mxu0 %v11564_v0 }
  0xa5   : > { %1931 = vmatpush2.bf16.msra.mxu0 %v6960_v25  ;;  %v7914_v25 = vpack.c.bf16 %v420_v24, %v419_v21 }
  0xa6   : > { %776 = vmatmul.mubr.bf16.gmra.mxu0 %v7712_v11  ;;  %1016 = vmatmul.mubr.bf16.gmra.mxu1 %v7714_v12 }
  0xa7   : > { %785 = vmatprep.mubr.bf16.mxu0 %v11564_v0  ;;  %1025 = vmatprep.mubr.bf16.mxu1 %v11564_v0 }
  0xa8   : > { %1932 = vmatprep.subr.bf16.mxu0 %v11564_v0 }
  0xa9   : > { %1933 = vmatpush2.bf16.msra.mxu0 %v6961_v28  ;;  %v6972_v28 = vld [vmem:[%s11539_s2 + $0xd0] sm:$0xff]  }
  0xaa   : > { %1934 = vmatprep.subr.bf16.mxu0 %v11564_v0 }
  0xad   : > { %1935 = vmatpush2.bf16.msra.mxu0 %v6962_v34  ;;  %v424_v34 = vld [vmem:[%s7511_s25 + $0x148] sm:$0xff] }
  0xae   : > { %786 = vmatmul.mubr.bf16.gmra.mxu0 %v7732_v19  ;;  %1026 = vmatmul.mubr.bf16.gmra.mxu1 %v7734_v20  ;;  %v7934_v35 = vpack.c.bf16 %v424_v34, %v423_v31 }
  0xaf   : > { %795 = vmatprep.mubr.bf16.mxu0 %v11564_v0  ;;  %1035 = vmatprep.mubr.bf16.mxu1 %v11564_v0 }
  0xb0   : > { %1936 = vmatprep.subr.bf16.mxu0 %v11564_v0 }
  0xb1   : > { %1937 = vmatpush2.bf16.msra.mxu0 %v6963_v36  ;;  %v425_v36 = vld [vmem:[%s7511_s25 + $0x150] sm:$0xff] }
  0xb2   : > { %1938 = vmatprep.subr.bf16.mxu0 %v11564_v0 }
  0xb5   : > { %1939 = vmatpush2.bf16.msra.mxu0 %v6965_v42 }
  0xb6   : > { %796 = vmatmul.mubr.bf16.gmra.mxu0 %v7752_v29  ;;  %1036 = vmatmul.mubr.bf16.gmra.mxu1 %v7754_v30 }
  0xb7   : > { %805 = vmatprep.mubr.bf16.mxu0 %v11564_v0  ;;  %1078 = vmatprep.mubr.bf16.mxu1 %v11564_v0 }
  0xb8   : > { %1940 = vmatprep.subr.bf16.mxu0 %v11564_v0 }
  0xbe   : > { %806 = vmatmul.mubr.bf16.gmra.mxu0 %v7770_v37  ;;  %1079 = vmatmul.mubr.bf16.vlgmr.msra.gmra.mxu1 %v7578_v22  ;;  %v6966_v22 = vld [vmem:[%s11539_s2 + $0x48] sm:$0xff]  }
  0xbf   : > { %2202 = vmatpush1.bf16.msra.mxu1 %v6943_v38  ;;  %815 = vmatprep.mubr.bf16.mxu0 %v11564_v0  ;;  %v6973_v38 = vld [vmem:[%s11539_s2 + $0xc8] sm:$0xff]  }
  0xc0   : > { %1088 = vmatprep.mubr.bf16.mxu1 %v11564_v0  ;;  %2203 = vmatprep.subr.bf16.mxu1 %v11564_v0 }
  0xc1   : > { %1941 = vmatpush2.bf16.msra.mxu0 %v6966_v22  ;;  %v430_v22 = vld [vmem:[%s7511_s25 + $0x178] sm:$0xff] }
  0xc2   : > { %1942 = vmatprep.subr.bf16.mxu0 %v11564_v0 }
  0xc3   : > { %2204 = vmatpush1.bf16.msra.mxu1 %v6944_v41  ;;  %v428_v41 = vld [vmem:[%s7511_s25 + $0x168] sm:$0xff] }
  0xc4   : > { %2205 = vmatprep.subr.bf16.mxu1 %v11564_v0  ;;  %v7954_v42 = vpack.c.bf16 %v428_v41, %v427_v40 }
  0xc5   : > { %1943 = vmatpush2.bf16.msra.mxu0 %v6967_v50 }
  0xc6   : > { %816 = vmatmul.mubr.bf16.gmra.mxu0 %v7789_v43  ;;  %1089 = vmatmul.mubr.bf16.gmra.mxu1 %v7603_v32  ;;  %v7813_v32 = vpack.c.bf16 %v404_v48, %v403_v47  ;;  %v513_v48 = vlaneseq }
  0xc7   : > { %825 = vmatprep.mubr.bf16.mxu0 %v11564_v0  ;;  %1098 = vmatprep.mubr.bf16.mxu1 %v11564_v0 }
  0xc8   : > { %2206 = vmatpush1.bf16.msra.mxu1 %v6945_v46  ;;  %v6974_v46 = vld [vmem:[%s11539_s2 + $0xc0] sm:$0xff]  }
  0xc9   : > { %2207 = vmatprep.subr.bf16.mxu1 %v11564_v0 }
  0xcc   : > { %2208 = vmatpush1.bf16.msra.mxu1 %v6946_v49  ;;  %v7970_v49 = vshrl.u32 %v513_v48, 7 }
  0xcd   : > { %2209 = vmatprep.subr.bf16.mxu1 %v11564_v0 }
  0xce   : > { %826 = vmatmul.mubr.bf16.gmra.mxu0 %v7813_v32  ;;  %1099 = vmatmul.mubr.bf16.gmra.mxu1 %v7634_v44  ;;  %v6954_v44 = vld [vmem:[%s11539_s2 + $0x88] sm:$0xff]   ;;  %11592 = vst [vmem:[#allocation13_spill] sm:$0xff] %v7970_v49  ;;  %v11551_v50 = vsub.s32 0, %v7970_v49 }
  0xcf   : > { %835 = vmatprep.mubr.bf16.mxu0 %v11564_v0  ;;  %1108 = vmatprep.mubr.bf16.mxu1 %v11564_v0 }
  0xd0   : > { %2210 = vmatpush1.bf16.msra.mxu1 %v6948_v51  ;;  %v11552_v51 = vsub.s32 1, %v7970_v49 }
  0xd1   : > { %2211 = vmatprep.subr.bf16.mxu1 %v11564_v0 }
  0xd4   : > { %2212 = vmatpush1.bf16.msra.mxu1 %v6950_v54 }
  0xd5   : > { %2213 = vmatprep.subr.bf16.mxu1 %v11564_v0 }
  0xd6   : > { %836 = vmatmul.mubr.bf16.gmra.mxu0 %v7829_v57  ;;  %1109 = vmatmul.mubr.bf16.gmra.mxu1 %v7663_v55  ;;  %v6964_v55 = vld [vmem:[%s11539_s2 + $0xf8] sm:$0xff]  }
  0xd7   : > { %845 = vmatprep.mubr.bf16.mxu0 %v11564_v0  ;;  %1118 = vmatprep.mubr.bf16.mxu1 %v11564_v0 }
  0xd8   : > { %2214 = vmatpush1.bf16.msra.mxu1 %v6954_v44 }
  0xd9   : > { %2215 = vmatprep.subr.bf16.mxu1 %v11564_v0 }
  0xdc   : > { %2216 = vmatpush1.bf16.msra.mxu1 %v6959_v60 }
  0xdd   : > { %2217 = vmatprep.subr.bf16.mxu1 %v11564_v0 }
  0xde   : > { %846 = vmatmul.mubr.bf16.gmra.mxu0 %v7845_v61  ;;  %1119 = vmatmul.mubr.bf16.gmra.mxu1 %v7691_v3  ;;  %v6969_v3 = vld [vmem:[%s11539_s2 + $0xe8] sm:$0xff]  }
  0xdf   : > { %855 = vmatprep.mubr.bf16.mxu0 %v11564_v0  ;;  %1128 = vmatprep.mubr.bf16.mxu1 %v11564_v0 }
  0xe0   : > { %2218 = vmatpush2.bf16.msra.mxu1 %v6964_v55 }
  0xe1   : > { %2219 = vmatprep.subr.bf16.mxu1 %v11564_v0 }
  0xe4   : > { %2220 = vmatpush2.bf16.msra.mxu1 %v6968_v1 }
  0xe5   : > { %2221 = vmatprep.subr.bf16.mxu1 %v11564_v0 }
  0xe6   : > { %856 = vmatmul.mubr.bf16.gmra.mxu0 %v7861_v2  ;;  %1129 = vmatmul.mubr.bf16.gmra.mxu1 %v7712_v11  ;;  %v7885_v11 = vpack.c.bf16 %v414_v9, %v413_v8 }
  0xe7   : > { %865 = vmatprep.mubr.bf16.mxu0 %v11564_v0  ;;  %1138 = vmatprep.mubr.bf16.mxu1 %v11564_v0 }
  0xe8   : > { %2222 = vmatpush2.bf16.msra.mxu1 %v6969_v3 }
  0xe9   : > { %2223 = vmatprep.subr.bf16.mxu1 %v11564_v0 }
  0xec   : > { %2224 = vmatpush2.bf16.msra.mxu1 %v6970_v10 }
  0xed   : > { %2225 = vmatprep.subr.bf16.mxu1 %v11564_v0 }
  0xee   : > { %866 = vmatmul.mubr.bf16.gmra.mxu0 %v7874_v7  ;;  %1139 = vmatmul.mubr.bf16.gmra.mxu1 %v7732_v19  ;;  %v7905_v19 = vpack.c.bf16 %v418_v17, %v417_v16 }
  0xef   : > { %875 = vmatprep.mubr.bf16.mxu0 %v11564_v0  ;;  %1148 = vmatprep.mubr.bf16.mxu1 %v11564_v0 }
  0xf0   : > { %2226 = vmatpush2.bf16.msra.mxu1 %v6971_v18 }
  0xf1   : > { %2227 = vmatprep.subr.bf16.mxu1 %v11564_v0 }
  0xf4   : > { %2228 = vmatpush2.bf16.msra.mxu1 %v6972_v28 }
  0xf5   : > { %2229 = vmatprep.subr.bf16.mxu1 %v11564_v0 }
  0xf6   : > { %876 = vmatmul.mubr.bf16.gmra.mxu0 %v7885_v11  ;;  %1149 = vmatmul.mubr.bf16.gmra.mxu1 %v7752_v29  ;;  %v7925_v29 = vpack.c.bf16 %v422_v27, %v421_v26 }
  0xf7   : > { %885 = vmatprep.mubr.bf16.mxu0 %v11564_v0  ;;  %1158 = vmatprep.mubr.bf16.mxu1 %v11564_v0 }
  0xf8   : > { %2230 = vmatpush2.bf16.msra.mxu1 %v6973_v38 }
  0xf9   : > { %2231 = vmatprep.subr.bf16.mxu1 %v11564_v0 }
  0xfc   : > { %2232 = vmatpush2.bf16.msra.mxu1 %v6974_v46 }
  0xfe   : > { %886 = vmatmul.mubr.bf16.gmra.mxu0 %v7894_v15  ;;  %1159 = vmatmul.mubr.bf16.gmra.mxu1 %v7770_v37  ;;  %v426_v37 = vld [vmem:[%s7511_s25 + $0x158] sm:$0xff] }
  0xff   : > { %895 = vmatprep.mubr.bf16.mxu0 %v11564_v0  ;;  %1168 = vmatprep.mubr.bf16.mxu1 %v11564_v0  ;;  %v7945_v39 = vpack.c.bf16 %v426_v37, %v425_v36 }
 0x106   : > { %896 = vmatmul.mubr.bf16.gmra.mxu0 %v7905_v19  ;;  %1169 = vmatmul.mubr.bf16.gmra.mxu1 %v7789_v43  ;;  %v429_v43 = vld [vmem:[%s7511_s25 + $0x170] sm:$0xff]  ;;  %s7247_s25 = scalar_lea.vmem %s11493_s15, 8192 }
 0x107   : > { %905 = vmatprep.mubr.bf16.mxu0 %v11564_v0  ;;  %1178 = vmatprep.mubr.bf16.mxu1 %v11564_v0  ;;  %v7965_v47 = vpack.c.bf16 %v430_v22, %v429_v43  ;;  %p7248_p11 = scmp.ne.s32.totalorder %s11493_s15, %s7247_s25  ;;  %p7255_p12 = scmp.lt.s32.totalorder %s7253_s24, %s7247_s25 }
 0x109   : > { %p7249_p1 = pnand %p7248_p11, %p11715_p10  ;;  %p7256_p7 = por %p7255_p12, %p7254_p6 }
 0x10b   : > { %p7250_p2 = pneg %p7249_p1 }
 0x10d   : > { %p7257_p9 = pnand %p7256_p7, %p7250_p2 }
 0x10e   : > { %906 = vmatmul.mubr.bf16.gmra.mxu0 %v7914_v25  ;;  %1179 = vmatmul.mubr.bf16.gmra.mxu1 %v7813_v32  ;;  %v7976_v32 = vld [vmem:[%s11545_s8] ss:$8 sm:$0xf] }
 0x10f   : > { %915 = vmatprep.mubr.bf16.mxu0 %v11564_v0  ;;  %1188 = vmatprep.mubr.bf16.mxu1 %v11564_v0  ;;  %v7983_v54 = vrot.slane %v7976_v32, %v11551_v50  ;;  %v7992_v44 = vrot.slane %v7976_v32, %v11552_v51 }
 0x116   : > { %916 = vmatmul.mubr.bf16.gmra.mxu0 %v7925_v29  ;;  %1189 = vmatmul.mubr.bf16.gmra.mxu1 %v7829_v57  ;;  %v6975_v57 = vld [vmem:[%s11540_s3 + $0x18] sm:$0xff]  }
 0x117   : > { %925 = vmatprep.mubr.bf16.mxu0 %v11564_v0  ;;  %1198 = vmatprep.mubr.bf16.mxu1 %v11564_v0 }
 0x118   : > { %6601 = vmatprep.subr.bf16.mxu0 %v6975_v57 }
 0x11e   : > { %926 = vmatmul.mubr.bf16.gmra.mxu0 %v7934_v35  ;;  %1199 = vmatmul.mubr.bf16.gmra.mxu1 %v7845_v61 }
 0x11f   : > { %935 = vmatprep.mubr.bf16.mxu0 %v11564_v0  ;;  %1208 = vmatprep.mubr.bf16.mxu1 %v11564_v0 }
 0x126   : > { %936 = vmatmul.mubr.bf16.gmra.mxu0 %v7945_v39  ;;  %1209 = vmatmul.mubr.bf16.gmra.mxu1 %v7861_v2 }
 0x127   : > { %945 = vmatprep.mubr.bf16.mxu0 %v11564_v0  ;;  %1218 = vmatprep.mubr.bf16.mxu1 %v11564_v0 }
 0x12e   : > { %946 = vmatmul.mubr.bf16.gmra.mxu0 %v7954_v42  ;;  %1219 = vmatmul.mubr.bf16.gmra.mxu1 %v7874_v7 }
 0x12f   : > { %955 = vmatprep.mubr.bf16.mxu0 %v11564_v0  ;;  %1228 = vmatprep.mubr.bf16.mxu1 %v11564_v0 }
 0x136   : > { %956 = vmatmul.mubr.bf16.gmra.mxu0 %v7965_v47  ;;  %1229 = vmatmul.mubr.bf16.gmra.mxu1 %v7885_v11 }
 0x137   : > { %1238 = vmatprep.mubr.bf16.mxu1 %v11564_v0 }
 0x13e   : > { %v727_v52 = vpop.f32.mrf.mxu0  ;;  %v967_v53 = vpop.f32.mrf.mxu1  ;;  %1239 = vmatmul.mubr.bf16.gmra.mxu1 %v7894_v15 }
 0x13f   : > { %1248 = vmatprep.mubr.bf16.mxu1 %v11564_v0  ;;  %v728_v60 = vadd.f32 %v727_v52, %v7983_v54  ;;  %v7996_v62 = vadd.f32 %v967_v53, %v7983_v54 }
 0x140   : > { %v729_v58 = vpop.f32.mrf.mxu0  ;;  %v969_v59 = vpop.f32.mrf.mxu1 }
 0x141   : > { %v730_v63 = vadd.f32 %v729_v58, %v7992_v44  ;;  %v8004_v3 = vadd.f32 %v969_v59, %v7992_v44 }
 0x142   : > { %v731_v61 = vpop.f32.mrf.mxu0  ;;  %v971_v55 = vpop.f32.mrf.mxu1 }
 0x143   : > { %v732_v1 = vadd.f32 %v731_v61, %v7983_v54  ;;  %v8001_v2 = vadd.f32 %v971_v55, %v7983_v54 }
 0x144   : > { %v733_v5 = vpop.f32.mrf.mxu0  ;;  %v973_v6 = vpop.f32.mrf.mxu1 }
 0x145   : > { %v1399_v7 = vpack.c.bf16 %v732_v1, %v728_v60  ;;  %v734_v9 = vadd.f32 %v733_v5, %v7992_v44  ;;  %v8010_v10 = vadd.f32 %v973_v6, %v7992_v44 }
 0x146   : > { %v737_v11 = vpop.f32.mrf.mxu0  ;;  %v977_v13 = vpop.f32.mrf.mxu1  ;;  %1249 = vmatmul.mubr.bf16.gmra.mxu1 %v7905_v19 }
 0x147   : > { %v1400_v14 = vpack.c.bf16 %v734_v9, %v730_v63  ;;  %1258 = vmatprep.mubr.bf16.mxu1 %v11564_v0  ;;  %v1527_v16 = vmax.bf16 %v11564_v0, %v1399_v7  ;;  %v738_v21 = vadd.f32 %v737_v11, %v7983_v54  ;;  %v8020_v28 = vadd.f32 %v977_v13, %v7983_v54 }
 0x148   : > { %v739_v17 = vpop.f32.mrf.mxu0  ;;  %v979_v18 = vpop.f32.mrf.mxu1 }
 0x149   : > { %v1528_v24 = vmax.bf16 %v11564_v0, %v1400_v14  ;;  %v740_v19 = vadd.f32 %v739_v17, %v7992_v44  ;;  %v8028_v36 = vadd.f32 %v979_v18, %v7992_v44 }
 0x14a   : > { %v741_v26 = vpop.f32.mrf.mxu0  ;;  %v981_v27 = vpop.f32.mrf.mxu1 }
 0x14b   : > { %v742_v31 = vadd.f32 %v741_v26, %v7983_v54  ;;  %v8025_v34 = vadd.f32 %v981_v27, %v7983_v54  ;;  %1944 = vmatprep.mubr.bf16.mxu0 %v1528_v24 }
 0x14c   : > { %v743_v37 = vpop.f32.mrf.mxu0  ;;  %v983_v38 = vpop.f32.mrf.mxu1  ;;  %1945 = vmatmul.mubr.bf16.vlgmr.msra.gmra.mxu0 %v1527_v16 }
 0x14d   : > { %v1403_v40 = vpack.c.bf16 %v742_v31, %v738_v21  ;;  %v744_v43 = vadd.f32 %v743_v37, %v7992_v44  ;;  %v8034_v22 = vadd.f32 %v983_v38, %v7992_v44  ;;  %6602 = vmatpush3.bf16.msra.mxu0 %v6975_v57 }
 0x14e   : > { %v747_v46 = vpop.f32.mrf.mxu0  ;;  %v987_v48 = vpop.f32.mrf.mxu1  ;;  %1259 = vmatmul.mubr.bf16.gmra.mxu1 %v7914_v25 }
 0x14f   : > { %v1404_v52 = vpack.c.bf16 %v744_v43, %v740_v19  ;;  %1268 = vmatprep.mubr.bf16.mxu1 %v11564_v0  ;;  %v1531_v60 = vmax.bf16 %v11564_v0, %v1403_v40  ;;  %v748_v61 = vadd.f32 %v747_v46, %v7983_v54  ;;  %v8044_v1 = vadd.f32 %v987_v48, %v7983_v54 }
 0x150   : > { %v749_v58 = vpop.f32.mrf.mxu0  ;;  %v989_v59 = vpop.f32.mrf.mxu1 }
 0x151   : > { %v1532_v55 = vmax.bf16 %v11564_v0, %v1404_v52  ;;  %v750_v25 = vadd.f32 %v749_v58, %v7992_v44  ;;  %v8052_v7 = vadd.f32 %v989_v59, %v7992_v44 }
 0x152   : > { %v751_v63 = vpop.f32.mrf.mxu0  ;;  %v991_v57 = vpop.f32.mrf.mxu1 }
 0x153   : > { %v752_v5 = vadd.f32 %v751_v63, %v7983_v54  ;;  %v8049_v6 = vadd.f32 %v991_v57, %v7983_v54  ;;  %1952 = vmatprep.mubr.bf16.mxu0 %v1532_v55 }
 0x154   : > { %v753_v9 = vpop.f32.mrf.mxu0  ;;  %v993_v11 = vpop.f32.mrf.mxu1  ;;  %1953 = vmatmul.mubr.bf16.gmra.mxu0 %v1531_v60 }
 0x155   : > { %v1407_v13 = vpack.c.bf16 %v752_v5, %v748_v61  ;;  %v754_v16 = vadd.f32 %v753_v9, %v7992_v44  ;;  %v8058_v17 = vadd.f32 %v993_v11, %v7992_v44 }
 0x156   : > { %v757_v18 = vpop.f32.mrf.mxu0  ;;  %v997_v21 = vpop.f32.mrf.mxu1  ;;  %1269 = vmatmul.mubr.bf16.gmra.mxu1 %v7925_v29 }
 0x157   : > { %v1408_v24 = vpack.c.bf16 %v754_v16, %v750_v25  ;;  %1278 = vmatprep.mubr.bf16.mxu1 %v11564_v0  ;;  %v1535_v31 = vmax.bf16 %v11564_v0, %v1407_v13  ;;  %v758_v37 = vadd.f32 %v757_v18, %v7983_v54  ;;  %v8068_v46 = vadd.f32 %v997_v21, %v7983_v54 }
 0x158   : > { %v759_v27 = vpop.f32.mrf.mxu0  ;;  %v999_v19 = vpop.f32.mrf.mxu1 }
 0x159   : > { %v1536_v38 = vmax.bf16 %v11564_v0, %v1408_v24  ;;  %11593 = vst [vmem:[#allocation14_spill] sm:$0xff] %v8068_v46  ;;  %v760_v29 = vadd.f32 %v759_v27, %v7992_v44  ;;  %v8076_v58 = vadd.f32 %v999_v19, %v7992_v44 }
 0x15a   : > { %v761_v40 = vpop.f32.mrf.mxu0  ;;  %v1001_v43 = vpop.f32.mrf.mxu1 }
 0x15b   : > { %v762_v48 = vadd.f32 %v761_v40, %v7983_v54  ;;  %v8073_v52 = vadd.f32 %v1001_v43, %v7983_v54  ;;  %1960 = vmatprep.mubr.bf16.mxu0 %v1536_v38 }
 0x15c   : > { %v763_v59 = vpop.f32.mrf.mxu0  ;;  %v1003_v60 = vpop.f32.mrf.mxu1  ;;  %1961 = vmatmul.mubr.bf16.gmra.mxu0 %v1535_v31 }
 0x15d   : > { %v1411_v61 = vpack.c.bf16 %v762_v48, %v758_v37  ;;  %v764_v63 = vadd.f32 %v763_v59, %v7992_v44  ;;  %v8082_v57 = vadd.f32 %v1003_v60, %v7992_v44 }
 0x15e   : > { %v767_v25 = vpop.f32.mrf.mxu0  ;;  %v1007_v5 = vpop.f32.mrf.mxu1  ;;  %1279 = vmatmul.mubr.bf16.gmra.mxu1 %v7934_v35 }
 0x15f   : > { %v1412_v9 = vpack.c.bf16 %v764_v63, %v760_v29  ;;  %1288 = vmatprep.mubr.bf16.mxu1 %v11564_v0  ;;  %v1539_v18 = vmax.bf16 %v11564_v0, %v1411_v61  ;;  %v768_v21 = vadd.f32 %v767_v25, %v7983_v54  ;;  %v8092_v31 = vadd.f32 %v1007_v5, %v7983_v54 }
 0x160   : > { %v769_v13 = vpop.f32.mrf.mxu0  ;;  %v1009_v16 = vpop.f32.mrf.mxu1 }
 0x161   : > { %v1540_v24 = vmax.bf16 %v11564_v0, %v1412_v9  ;;  %11594 = vst [vmem:[#allocation15_spill] sm:$0xff] %v8092_v31  ;;  %v770_v35 = vadd.f32 %v769_v13, %v7992_v44  ;;  %v8100_v40 = vadd.f32 %v1009_v16, %v7992_v44 }
 0x162   : > { %v771_v27 = vpop.f32.mrf.mxu0  ;;  %v1011_v19 = vpop.f32.mrf.mxu1 }
 0x163   : > { %v772_v37 = vadd.f32 %v771_v27, %v7983_v54  ;;  %v8097_v38 = vadd.f32 %v1011_v19, %v7983_v54  ;;  %1968 = vmatprep.mubr.bf16.mxu0 %v1540_v24  ;;  %11596 = vst [vmem:[#allocation17_spill] sm:$0xff] %v8100_v40 }
 0x164   : > { %v773_v43 = vpop.f32.mrf.mxu0  ;;  %v1013_v29 = vpop.f32.mrf.mxu1  ;;  %1969 = vmatmul.mubr.bf16.gmra.mxu0 %v1539_v18 }
 0x165   : > { %11595 = vst [vmem:[#allocation16_spill] sm:$0xff] %v8097_v38  ;;  %v1415_v48 = vpack.c.bf16 %v772_v37, %v768_v21  ;;  %v774_v60 = vadd.f32 %v773_v43, %v7992_v44  ;;  %v8106_v61 = vadd.f32 %v1013_v29, %v7992_v44 }
 0x166   : > { %v777_v63 = vpop.f32.mrf.mxu0  ;;  %v1017_v25 = vpop.f32.mrf.mxu1  ;;  %1289 = vmatmul.mubr.bf16.gmra.mxu1 %v7945_v39 }
 0x167   : > { %11597 = vst [vmem:[#allocation18_spill] sm:$0xff] %v8106_v61  ;;  %v1416_v5 = vpack.c.bf16 %v774_v60, %v770_v35  ;;  %1298 = vmatprep.mubr.bf16.mxu1 %v11564_v0  ;;  %v1543_v13 = vmax.bf16 %v11564_v0, %v1415_v48  ;;  %v778_v21 = vadd.f32 %v777_v63, %v7983_v54 }
 0x168   : > { %v779_v16 = vpop.f32.mrf.mxu0  ;;  %v1019_v18 = vpop.f32.mrf.mxu1  ;;  %v8116_v37 = vadd.f32 %v1017_v25, %v7983_v54 }
 0x169   : > { %v1544_v24 = vmax.bf16 %v11564_v0, %v1416_v5  ;;  %v780_v39 = vadd.f32 %v779_v16, %v7992_v44  ;;  %v8124_v29 = vadd.f32 %v1019_v18, %v7992_v44 }
 0x16a   : > { %v781_v27 = vpop.f32.mrf.mxu0  ;;  %v1021_v19 = vpop.f32.mrf.mxu1  ;;  %11598 = vst [vmem:[#allocation19_spill] sm:$0xff] %v8116_v37 }
 0x16b   : > { %v782_v35 = vadd.f32 %v781_v27, %v7983_v54  ;;  %v8121_v43 = vadd.f32 %v1021_v19, %v7983_v54  ;;  %1976 = vmatprep.mubr.bf16.mxu0 %v1544_v24  ;;  %11600 = vst [vmem:[#allocation21_spill] sm:$0xff] %v8124_v29 }
 0x16c   : > { %v783_v48 = vpop.f32.mrf.mxu0  ;;  %v1023_v60 = vpop.f32.mrf.mxu1  ;;  %1977 = vmatmul.mubr.bf16.gmra.mxu0 %v1543_v13 }
 0x16d   : > { %11599 = vst [vmem:[#allocation20_spill] sm:$0xff] %v8121_v43  ;;  %v1419_v63 = vpack.c.bf16 %v782_v35, %v778_v21  ;;  %v784_v25 = vadd.f32 %v783_v48, %v7992_v44  ;;  %v8130_v16 = vadd.f32 %v1023_v60, %v7992_v44 }
 0x16e   : > { %v787_v27 = vpop.f32.mrf.mxu0  ;;  %v1027_v50 = vpop.f32.mrf.mxu1  ;;  %1299 = vmatmul.mubr.bf16.gmra.mxu1 %v7954_v42 }
 0x16f   : > { %11601 = vst [vmem:[#allocation22_spill] sm:$0xff] %v8130_v16  ;;  %v1420_v24 = vpack.c.bf16 %v784_v25, %v780_v39  ;;  %1308 = vmatprep.mubr.bf16.mxu1 %v11564_v0  ;;  %v1547_v13 = vmax.bf16 %v11564_v0, %v1419_v63  ;;  %v788_v35 = vadd.f32 %v787_v27, %v7983_v54  ;;  %v11571_v16 = vsub.s32 2, %v7970_v49 }
 0x170   : > { %v789_v21 = vpop.f32.mrf.mxu0  ;;  %v1029_v19 = vpop.f32.mrf.mxu1  ;;  %v8140_v5 = vadd.f32 %v1027_v50, %v7983_v54 }
 0x171   : > { %v1548_v48 = vmax.bf16 %v11564_v0, %v1420_v24  ;;  %v790_v42 = vadd.f32 %v789_v21, %v7992_v44  ;;  %v8148_v63 = vadd.f32 %v1029_v19, %v7992_v44 }
 0x172   : > { %v791_v60 = vpop.f32.mrf.mxu0  ;;  %v1031_v51 = vpop.f32.mrf.mxu1  ;;  %11602 = vst [vmem:[#allocation23_spill] sm:$0xff] %v8140_v5 }
 0x173   : > { %v792_v39 = vadd.f32 %v791_v60, %v7983_v54  ;;  %v8145_v25 = vadd.f32 %v1031_v51, %v7983_v54  ;;  %1984 = vmatprep.mubr.bf16.mxu0 %v1548_v48  ;;  %11604 = vst [vmem:[#allocation25_spill] sm:$0xff] %v8148_v63 }
 0x174   : > { %v793_v18 = vpop.f32.mrf.mxu0  ;;  %v1033_v27 = vpop.f32.mrf.mxu1  ;;  %1985 = vmatmul.mubr.bf16.gmra.mxu0 %v1547_v13 }
 0x175   : > { %11603 = vst [vmem:[#allocation24_spill] sm:$0xff] %v8145_v25  ;;  %v1423_v24 = vpack.c.bf16 %v792_v39, %v788_v35  ;;  %v794_v50 = vadd.f32 %v793_v18, %v7992_v44  ;;  %v8154_v21 = vadd.f32 %v1033_v27, %v7992_v44 }
 0x176   : > { %v797_v60 = vpop.f32.mrf.mxu0  ;;  %v1037_v9 = vpop.f32.mrf.mxu1  ;;  %1309 = vmatmul.mubr.bf16.gmra.mxu1 %v7965_v47 }
 0x177   : > { %11605 = vst [vmem:[#allocation26_spill] sm:$0xff] %v8154_v21  ;;  %v1424_v51 = vpack.c.bf16 %v794_v50, %v790_v42  ;;  %1318 = vmatprep.mubr.bf16.mxu1 %v11564_v0  ;;  %v1551_v13 = vmax.bf16 %v11564_v0, %v1423_v24  ;;  %v798_v39 = vadd.f32 %v797_v60, %v7983_v54 }
 0x178   : > { %v799_v35 = vpop.f32.mrf.mxu0  ;;  %v1039_v48 = vpop.f32.mrf.mxu1  ;;  %v8164_v55 = vadd.f32 %v1037_v9, %v7983_v54 }
 0x179   : > { %v1552_v18 = vmax.bf16 %v11564_v0, %v1424_v51  ;;  %v800_v47 = vadd.f32 %v799_v35, %v7992_v44  ;;  %v8172_v24 = vadd.f32 %v1039_v48, %v7992_v44 }
 0x17a   : > { %v801_v27 = vpop.f32.mrf.mxu0  ;;  %v1041_v59 = vpop.f32.mrf.mxu1  ;;  %11606 = vst [vmem:[#allocation27_spill] sm:$0xff] %v8164_v55 }
 0x17b   : > { %v802_v42 = vadd.f32 %v801_v27, %v7983_v54  ;;  %v8169_v50 = vadd.f32 %v1041_v59, %v7983_v54  ;;  %1992 = vmatprep.mubr.bf16.mxu0 %v1552_v18  ;;  %11608 = vst [vmem:[#allocation29_spill] sm:$0xff] %v8172_v24 }
 0x17c   : > { %v803_v19 = vpop.f32.mrf.mxu0  ;;  %v1043_v60 = vpop.f32.mrf.mxu1  ;;  %1993 = vmatmul.mubr.bf16.gmra.mxu0 %v1551_v13  ;;  %v6976_v13 = vld [vmem:[%s11540_s3 + $0x10] sm:$0xff]  }
 0x17d   : > { %11607 = vst [vmem:[#allocation28_spill] sm:$0xff] %v8169_v50  ;;  %v1427_v51 = vpack.c.bf16 %v802_v42, %v798_v39  ;;  %v804_v9 = vadd.f32 %v803_v19, %v7992_v44  ;;  %v8178_v35 = vadd.f32 %v1043_v60, %v7992_v44  ;;  %6603 = vmatprep.subr.bf16.mxu0 %v6976_v13 }
 0x17e   : > { %v807_v27 = vpop.f32.mrf.mxu0  ;;  %v8180_v14 = vpop.f32.mrf.mxu1  ;;  %1319 = vmatmul.mubr.bf16.gmra.mxu1 %v7580_v23  ;;  %6604 = vmatpush3.bf16.msra.mxu0 %v6976_v13 }
 0x17f   : > { %11609 = vst [vmem:[#allocation30_spill] sm:$0xff] %v8178_v35  ;;  %v1428_v59 = vpack.c.bf16 %v804_v9, %v800_v47  ;;  %1328 = vmatprep.mubr.bf16.mxu1 %v11564_v0  ;;  %v1555_v19 = vmax.bf16 %v11564_v0, %v1427_v51  ;;  %v808_v42 = vadd.f32 %v807_v27, %v7983_v54 }
 0x180   : > { %v809_v39 = vpop.f32.mrf.mxu0  ;;  %v8190_v18 = vpop.f32.mrf.mxu1 }
 0x181   : > { %v1556_v60 = vmax.bf16 %v11564_v0, %v1428_v59  ;;  %v810_v9 = vadd.f32 %v809_v39, %v7992_v44 }
 0x182   : > { %v811_v23 = vpop.f32.mrf.mxu0  ;;  %v8194_v47 = vpop.f32.mrf.mxu1 }
 0x183   : > { %v812_v11 = vadd.f32 %v811_v23, %v7983_v54  ;;  %2000 = vmatprep.mubr.bf16.mxu0 %v1556_v60 }
 0x184   : > { %v813_v48 = vpop.f32.mrf.mxu0  ;;  %v8198_v26 = vpop.f32.mrf.mxu1  ;;  %2001 = vmatmul.mubr.bf16.gmra.mxu0 %v1555_v19 }
 0x185   : > { %v1431_v51 = vpack.c.bf16 %v812_v11, %v808_v42  ;;  %v814_v41 = vadd.f32 %v813_v48, %v7992_v44 }
 0x186   : > { %v817_v27 = vpop.f32.mrf.mxu0  ;;  %v8201_v53 = vpop.f32.mrf.mxu1  ;;  %1329 = vmatmul.mubr.bf16.gmra.mxu1 %v7605_v33 }
 0x187   : > { %v1432_v59 = vpack.c.bf16 %v814_v41, %v810_v9  ;;  %1338 = vmatprep.mubr.bf16.mxu1 %v11564_v0  ;;  %v1559_v13 = vmax.bf16 %v11564_v0, %v1431_v51  ;;  %v818_v60 = vadd.f32 %v817_v27, %v7983_v54 }
 0x188   : > { %v819_v39 = vpop.f32.mrf.mxu0  ;;  %v8206_v23 = vpop.f32.mrf.mxu1 }
 0x189   : > { %v1560_v19 = vmax.bf16 %v11564_v0, %v1432_v59  ;;  %v820_v48 = vadd.f32 %v819_v39, %v7992_v44 }
 0x18a   : > { %v821_v11 = vpop.f32.mrf.mxu0  ;;  %v8210_v42 = vpop.f32.mrf.mxu1 }
 0x18b   : > { %v822_v8 = vadd.f32 %v821_v11, %v7983_v54  ;;  %2008 = vmatprep.mubr.bf16.mxu0 %v1560_v19 }
 0x18c   : > { %v823_v33 = vpop.f32.mrf.mxu0  ;;  %v8214_v41 = vpop.f32.mrf.mxu1  ;;  %2009 = vmatmul.mubr.bf16.gmra.mxu0 %v1559_v13 }
 0x18d   : > { %v1435_v9 = vpack.c.bf16 %v822_v8, %v818_v60  ;;  %v824_v51 = vadd.f32 %v823_v33, %v7992_v44 }
 0x18e   : > { %v827_v15 = vpop.f32.mrf.mxu0  ;;  %v8217_v55 = vpop.f32.mrf.mxu1  ;;  %1339 = vmatmul.mubr.bf16.gmra.mxu1 %v7636_v45 }
 0x18f   : > { %v1436_v27 = vpack.c.bf16 %v824_v51, %v820_v48  ;;  %1348 = vmatprep.mubr.bf16.mxu1 %v11564_v0  ;;  %v1563_v59 = vmax.bf16 %v11564_v0, %v1435_v9  ;;  %v828_v19 = vadd.f32 %v827_v15, %v7983_v54 }
 0x190   : > { %v829_v39 = vpop.f32.mrf.mxu0  ;;  %v8222_v11 = vpop.f32.mrf.mxu1 }
 0x191   : > { %v1564_v13 = vmax.bf16 %v11564_v0, %v1436_v27  ;;  %v830_v33 = vadd.f32 %v829_v39, %v7992_v44 }
 0x192   : > { %v831_v8 = vpop.f32.mrf.mxu0  ;;  %v8226_v60 = vpop.f32.mrf.mxu1 }
 0x193   : > { %v832_v50 = vadd.f32 %v831_v8, %v7983_v54  ;;  %2016 = vmatprep.mubr.bf16.mxu0 %v1564_v13 }
 0x194   : > { %v833_v45 = vpop.f32.mrf.mxu0  ;;  %v8230_v48 = vpop.f32.mrf.mxu1  ;;  %2017 = vmatmul.mubr.bf16.gmra.mxu0 %v1563_v59 }
 0x195   : > { %v1439_v9 = vpack.c.bf16 %v832_v50, %v828_v19  ;;  %v834_v51 = vadd.f32 %v833_v45, %v7992_v44 }
 0x196   : > { %v837_v24 = vpop.f32.mrf.mxu0  ;;  %v8233_v35 = vpop.f32.mrf.mxu1  ;;  %1349 = vmatmul.mubr.bf16.gmra.mxu1 %v7665_v56 }
 0x197   : > { %v1440_v15 = vpack.c.bf16 %v834_v51, %v830_v33  ;;  %1358 = vmatprep.mubr.bf16.mxu1 %v11564_v0  ;;  %v1567_v27 = vmax.bf16 %v11564_v0, %v1439_v9  ;;  %v838_v13 = vadd.f32 %v837_v24, %v7983_v54 }
 0x198   : > { %v839_v39 = vpop.f32.mrf.mxu0  ;;  %v8238_v8 = vpop.f32.mrf.mxu1 }
 0x199   : > { %v1568_v59 = vmax.bf16 %v11564_v0, %v1440_v15  ;;  %v840_v45 = vadd.f32 %v839_v39, %v7992_v44 }
 0x19a   : > { %v841_v50 = vpop.f32.mrf.mxu0  ;;  %v8242_v19 = vpop.f32.mrf.mxu1 }
 0x19b   : > { %v842_v5 = vadd.f32 %v841_v50, %v7983_v54  ;;  %2024 = vmatprep.mubr.bf16.mxu0 %v1568_v59 }
 0x19c   : > { %v843_v56 = vpop.f32.mrf.mxu0  ;;  %v8246_v33 = vpop.f32.mrf.mxu1  ;;  %2025 = vmatmul.mubr.bf16.gmra.mxu0 %v1567_v27 }
 0x19d   : > { %v1443_v9 = vpack.c.bf16 %v842_v5, %v838_v13  ;;  %v844_v51 = vadd.f32 %v843_v56, %v7992_v44 }
 0x19e   : > { %v847_v25 = vpop.f32.mrf.mxu0  ;;  %v8249_v63 = vpop.f32.mrf.mxu1  ;;  %1359 = vmatmul.mubr.bf16.gmra.mxu1 %v7693_v4 }
 0x19f   : > { %v1444_v24 = vpack.c.bf16 %v844_v51, %v840_v45  ;;  %1368 = vmatprep.mubr.bf16.mxu1 %v11564_v0  ;;  %v1571_v15 = vmax.bf16 %v11564_v0, %v1443_v9  ;;  %v848_v59 = vadd.f32 %v847_v25, %v7983_v54  ;;  %v11568_v25 = vsub.s32 3, %v7970_v49 }
 0x1a0   : > { %v849_v39 = vpop.f32.mrf.mxu0  ;;  %v8254_v50 = vpop.f32.mrf.mxu1 }
 0x1a1   : > { %v1572_v27 = vmax.bf16 %v11564_v0, %v1444_v24  ;;  %v850_v56 = vadd.f32 %v849_v39, %v7992_v44 }
 0x1a2   : > { %v851_v5 = vpop.f32.mrf.mxu0  ;;  %v8258_v13 = vpop.f32.mrf.mxu1 }
 0x1a3   : > { %v852_v21 = vadd.f32 %v851_v5, %v7983_v54  ;;  %2032 = vmatprep.mubr.bf16.mxu0 %v1572_v27 }
 0x1a4   : > { %v853_v4 = vpop.f32.mrf.mxu0  ;;  %v8262_v45 = vpop.f32.mrf.mxu1  ;;  %2033 = vmatmul.mubr.bf16.gmra.mxu0 %v1571_v15 }
 0x1a5   : > { %v1447_v9 = vpack.c.bf16 %v852_v21, %v848_v59  ;;  %v854_v51 = vadd.f32 %v853_v4, %v7992_v44 }
 0x1a6   : > { %v857_v37 = vpop.f32.mrf.mxu0  ;;  %v8265_v43 = vpop.f32.mrf.mxu1  ;;  %1369 = vmatmul.mubr.bf16.gmra.mxu1 %v7714_v12  ;;  %v8280_v12 = vrot.slane %v7976_v32, %v11568_v25 }
 0x1a7   : > { %v1448_v24 = vpack.c.bf16 %v854_v51, %v850_v56  ;;  %1378 = vmatprep.mubr.bf16.mxu1 %v11564_v0  ;;  %v1575_v39 = vmax.bf16 %v11564_v0, %v1447_v9  ;;  %v858_v15 = vadd.f32 %v857_v37, %v7983_v54 }
 0x1a8   : > { %v859_v27 = vpop.f32.mrf.mxu0  ;;  %v8271_v5 = vpop.f32.mrf.mxu1  ;;  %v1087_v37 = vadd.f32 %v8198_v26, %v8280_v12 }
 0x1a9   : > { %v1576_v21 = vmax.bf16 %v11564_v0, %v1448_v24  ;;  %v860_v56 = vadd.f32 %v859_v27, %v7992_v44  ;;  %v1083_v27 = vadd.f32 %v8190_v18, %v8280_v12 }
 0x1aa   : > { %v861_v59 = vpop.f32.mrf.mxu0  ;;  %v8275_v4 = vpop.f32.mrf.mxu1 }
 0x1ab   : > { %v862_v51 = vadd.f32 %v861_v59, %v7983_v54  ;;  %2040 = vmatprep.mubr.bf16.mxu0 %v1576_v21  ;;  %v11610_v59 = vmov 0  }
 0x1ac   : > { %v863_v9 = vpop.f32.mrf.mxu0  ;;  %v8284_v29 = vpop.f32.mrf.mxu1  ;;  %2041 = vmatmul.mubr.bf16.gmra.mxu0 %v1575_v39 }
 0x1ad   : > { %v1451_v24 = vpack.c.bf16 %v862_v51, %v858_v15  ;;  %v864_v0 = vadd.f32 %v863_v9, %v7992_v44  ;;  %v1402_v15 = vpack.c.bf16 %v1087_v37, %v1083_v27  ;;  %v1097_v27 = vadd.f32 %v8214_v41, %v8280_v12 }
 0x1ae   : > { %v867_v31 = vpop.f32.mrf.mxu0  ;;  %v8290_v25 = vpop.f32.mrf.mxu1  ;;  %1379 = vmatmul.mubr.bf16.gmra.mxu1 %v7734_v20  ;;  %v8304_v20 = vrot.slane %v7976_v32, %v11571_v16 }
 0x1af   : > { %v1452_v21 = vpack.c.bf16 %v864_v0, %v860_v56  ;;  %1388 = vmatprep.mubr.bf16.mxu1 %v11610_v59  ;;  %v1579_v39 = vmax.bf16 %v11610_v59, %v1451_v24  ;;  %v868_v51 = vadd.f32 %v867_v31, %v7983_v54  ;;  %v1530_v16 = vmax.bf16 %v11610_v59, %v1402_v15 }
 0x1b0   : > { %v869_v38 = vpop.f32.mrf.mxu0  ;;  %v8297_v26 = vpop.f32.mrf.mxu1  ;;  %v1085_v37 = vadd.f32 %v8194_v47, %v8304_v20  ;;  %v1093_v47 = vadd.f32 %v8206_v23, %v8280_v12 }
 0x1b1   : > { %v1580_v9 = vmax.bf16 %v11610_v59, %v1452_v21  ;;  %v870_v0 = vadd.f32 %v869_v38, %v7992_v44  ;;  %v1081_v38 = vadd.f32 %v8180_v14, %v8304_v20 }
 0x1b2   : > { %v871_v40 = vpop.f32.mrf.mxu0  ;;  %v8306_v18 = vpop.f32.mrf.mxu1  ;;  %v1406_v15 = vpack.c.bf16 %v1097_v27, %v1093_v47  ;;  %v1107_v27 = vadd.f32 %v8230_v48, %v8280_v12  ;;  %v6977_v48 = vld [vmem:[%s11540_s3 + $0x8] sm:$0xff]  }
 0x1b3   : > { %v872_v56 = vadd.f32 %v871_v40, %v7983_v54  ;;  %2048 = vmatprep.mubr.bf16.mxu0 %v1580_v9  ;;  %v1401_v49 = vpack.c.bf16 %v1085_v37, %v1081_v38  ;;  %6605 = vmatprep.subr.bf16.mxu0 %v6977_v48 }
 0x1b4   : > { %v873_v24 = vpop.f32.mrf.mxu0  ;;  %v8312_v31 = vpop.f32.mrf.mxu1  ;;  %2049 = vmatmul.mubr.bf16.gmra.mxu0 %v1579_v39 }
 0x1b5   : > { %v1455_v32 = vpack.c.bf16 %v872_v56, %v868_v51  ;;  %v874_v21 = vadd.f32 %v873_v24, %v7992_v44  ;;  %6606 = vmatpush3.bf16.msra.mxu0 %v6977_v48 }
 0x1b6   : > { %v877_v40 = vpop.f32.mrf.mxu0  ;;  %v8320_v9 = vpop.f32.mrf.mxu1  ;;  %1389 = vmatmul.mubr.bf16.gmra.mxu1 %v7754_v30 }
 0x1b7   : > { %v1456_v39 = vpack.c.bf16 %v874_v21, %v870_v0  ;;  %2233 = vmatprep.mubr.bf16.mxu1 %v1530_v16  ;;  %v1583_v41 = vmax.bf16 %v11610_v59, %v1455_v32  ;;  %v878_v24 = vadd.f32 %v877_v40, %v7983_v54  ;;  %v1529_v16 = vmax.bf16 %v11610_v59, %v1401_v49 }
 0x1b8   : > { %v879_v51 = vpop.f32.mrf.mxu0  ;;  %v8326_v56 = vpop.f32.mrf.mxu1  ;;  %v1095_v0 = vadd.f32 %v8210_v42, %v8304_v20  ;;  %v1534_v40 = vmax.bf16 %v11610_v59, %v1406_v15  ;;  %v1103_v42 = vadd.f32 %v8222_v11, %v8280_v12 }
 0x1b9   : > { %v1584_v14 = vmax.bf16 %v11610_v59, %v1456_v39  ;;  %v880_v30 = vadd.f32 %v879_v51, %v7992_v44 }
 0x1ba   : > { %v881_v61 = vpop.f32.mrf.mxu0  ;;  %v8330_v46 = vpop.f32.mrf.mxu1 }
 0x1bb   : > { %v882_v23 = vadd.f32 %v881_v61, %v7983_v54  ;;  %2056 = vmatprep.mubr.bf16.mxu0 %v1584_v14  ;;  %v1091_v61 = vadd.f32 %v8201_v53, %v8304_v20  ;;  %v1410_v53 = vpack.c.bf16 %v1107_v27, %v1103_v42 }
 0x1bc   : > { %v883_v37 = vpop.f32.mrf.mxu0  ;;  %v8337_v32 = vpop.f32.mrf.mxu1  ;;  %2057 = vmatmul.mubr.bf16.gmra.mxu0 %v1583_v41 }
 0x1bd   : > { %v1459_v21 = vpack.c.bf16 %v882_v23, %v878_v24  ;;  %v884_v38 = vadd.f32 %v883_v37, %v7992_v44  ;;  %v1405_v41 = vpack.c.bf16 %v1095_v0, %v1091_v61  ;;  %v1538_v42 = vmax.bf16 %v11610_v59, %v1410_v53 }
 0x1be   : > { %v887_v47 = vpop.f32.mrf.mxu0  ;;  %v8345_v49 = vpop.f32.mrf.mxu1  ;;  %2234 = vmatmul.mubr.bf16.vlgmr.msra.gmra.mxu1 %v1529_v16 }
 0x1bf   : > { %v1460_v39 = vpack.c.bf16 %v884_v38, %v880_v30  ;;  %2241 = vmatprep.mubr.bf16.mxu1 %v1534_v40  ;;  %v1587_v51 = vmax.bf16 %v11610_v59, %v1459_v21  ;;  %v888_v14 = vadd.f32 %v887_v47, %v7983_v54  ;;  %v1533_v0 = vmax.bf16 %v11610_v59, %v1405_v41 }
 0x1c0   : > { %v889_v15 = vpop.f32.mrf.mxu0  ;;  %v8353_v24 = vpop.f32.mrf.mxu1  ;;  %v1105_v21 = vadd.f32 %v8226_v60, %v8304_v20  ;;  %v1117_v40 = vadd.f32 %v8246_v33, %v8280_v12  ;;  %v1113_v60 = vadd.f32 %v8238_v8, %v8280_v12 }
 0x1c1   : > { %v1588_v23 = vmax.bf16 %v11610_v59, %v1460_v39  ;;  %v890_v30 = vadd.f32 %v889_v15, %v7992_v44  ;;  %v1101_v39 = vadd.f32 %v8217_v55, %v8304_v20 }
 0x1c2   : > { %v891_v16 = vpop.f32.mrf.mxu0  ;;  %v8357_v11 = vpop.f32.mrf.mxu1 }
 0x1c3   : > { %v892_v37 = vadd.f32 %v891_v16, %v7983_v54  ;;  %2064 = vmatprep.mubr.bf16.mxu0 %v1588_v23  ;;  %v1414_v16 = vpack.c.bf16 %v1117_v40, %v1113_v60  ;;  %v1127_v40 = vadd.f32 %v8262_v45, %v8280_v12  ;;  %v1111_v60 = vadd.f32 %v8233_v35, %v8304_v20 }
 0x1c4   : > { %v893_v27 = vpop.f32.mrf.mxu0  ;;  %v8364_v38 = vpop.f32.mrf.mxu1  ;;  %2065 = vmatmul.mubr.bf16.gmra.mxu0 %v1587_v51  ;;  %v1409_v51 = vpack.c.bf16 %v1105_v21, %v1101_v39  ;;  %v1115_v21 = vadd.f32 %v8242_v19, %v8304_v20  ;;  %v1123_v19 = vadd.f32 %v8254_v50, %v8280_v12 }
 0x1c5   : > { %v1463_v61 = vpack.c.bf16 %v892_v37, %v888_v14  ;;  %v894_v47 = vadd.f32 %v893_v27, %v7992_v44 }
 0x1c6   : > { %v897_v48 = vpop.f32.mrf.mxu0  ;;  %v8372_v41 = vpop.f32.mrf.mxu1  ;;  %2242 = vmatmul.mubr.bf16.gmra.mxu1 %v1533_v0 }
 0x1c7   : > { %v1464_v15 = vpack.c.bf16 %v894_v47, %v890_v30  ;;  %2249 = vmatprep.mubr.bf16.mxu1 %v1538_v42  ;;  %v1591_v33 = vmax.bf16 %v11610_v59, %v1463_v61  ;;  %v898_v53 = vadd.f32 %v897_v48, %v7983_v54  ;;  %v1537_v30 = vmax.bf16 %v11610_v59, %v1409_v51 }
 0x1c8   : > { %v899_v14 = vpop.f32.mrf.mxu0  ;;  %v8377_v23 = vpop.f32.mrf.mxu1  ;;  %v1542_v48 = vmax.bf16 %v11610_v59, %v1414_v16 }
 0x1c9   : > { %v1592_v55 = vmax.bf16 %v11610_v59, %v1464_v15  ;;  %v900_v0 = vadd.f32 %v899_v14, %v7992_v44 }
 0x1ca   : > { %v901_v37 = vpop.f32.mrf.mxu0  ;;  %v8381_v27 = vpop.f32.mrf.mxu1 }
 0x1cb   : > { %v902_v8 = vadd.f32 %v901_v37, %v7983_v54  ;;  %2072 = vmatprep.mubr.bf16.mxu0 %v1592_v55  ;;  %v1418_v37 = vpack.c.bf16 %v1127_v40, %v1123_v19  ;;  %v1137_v40 = vadd.f32 %v8284_v29, %v8280_v12  ;;  %v1121_v19 = vadd.f32 %v8249_v63, %v8304_v20 }
 0x1cc   : > { %v903_v61 = vpop.f32.mrf.mxu0  ;;  %v8388_v47 = vpop.f32.mrf.mxu1  ;;  %2073 = vmatmul.mubr.bf16.gmra.mxu0 %v1591_v33  ;;  %v1413_v33 = vpack.c.bf16 %v1115_v21, %v1111_v60  ;;  %v1125_v21 = vadd.f32 %v8258_v13, %v8304_v20  ;;  %v1133_v13 = vadd.f32 %v8271_v5, %v8280_v12 }
 0x1cd   : > { %v1467_v42 = vpack.c.bf16 %v902_v8, %v898_v53  ;;  %v904_v39 = vadd.f32 %v903_v61, %v7992_v44 }
 0x1ce   : > { %v907_v15 = vpop.f32.mrf.mxu0  ;;  %v8396_v51 = vpop.f32.mrf.mxu1  ;;  %2250 = vmatmul.mubr.bf16.gmra.mxu1 %v1537_v30 }
 0x1cf   : > { %v1468_v14 = vpack.c.bf16 %v904_v39, %v900_v0  ;;  %2257 = vmatprep.mubr.bf16.mxu1 %v1542_v48  ;;  %v1595_v45 = vmax.bf16 %v11610_v59, %v1467_v42  ;;  %v908_v16 = vadd.f32 %v907_v15, %v7983_v54  ;;  %v1541_v0 = vmax.bf16 %v11610_v59, %v1413_v33 }
 0x1d0   : > { %v909_v53 = vpop.f32.mrf.mxu0  ;;  %v8401_v55 = vpop.f32.mrf.mxu1  ;;  %v1546_v15 = vmax.bf16 %v11610_v59, %v1418_v37 }
 0x1d1   : > { %v1596_v35 = vmax.bf16 %v11610_v59, %v1468_v14  ;;  %v910_v30 = vadd.f32 %v909_v53, %v7992_v44 }
 0x1d2   : > { %v911_v8 = vpop.f32.mrf.mxu0  ;;  %v8405_v61 = vpop.f32.mrf.mxu1 }
 0x1d3   : > { %v912_v50 = vadd.f32 %v911_v8, %v7983_v54  ;;  %2080 = vmatprep.mubr.bf16.mxu0 %v1596_v35  ;;  %v1422_v8 = vpack.c.bf16 %v1137_v40, %v1133_v13  ;;  %v1147_v40 = vadd.f32 %v8312_v31, %v8280_v12  ;;  %v1131_v13 = vadd.f32 %v8265_v43, %v8304_v20 }
 0x1d4   : > { %v913_v42 = vpop.f32.mrf.mxu0  ;;  %v8412_v39 = vpop.f32.mrf.mxu1  ;;  %2081 = vmatmul.mubr.bf16.gmra.mxu0 %v1595_v45  ;;  %v1417_v45 = vpack.c.bf16 %v1125_v21, %v1121_v19  ;;  %v1135_v21 = vadd.f32 %v8275_v4, %v8304_v20  ;;  %v1143_v4 = vadd.f32 %v8297_v26, %v8280_v12 }
 0x1d5   : > { %v1471_v48 = vpack.c.bf16 %v912_v50, %v908_v16  ;;  %v914_v60 = vadd.f32 %v913_v42, %v7992_v44 }
 0x1d6   : > { %v917_v14 = vpop.f32.mrf.mxu0  ;;  %v8420_v33 = vpop.f32.mrf.mxu1  ;;  %2258 = vmatmul.mubr.bf16.gmra.mxu1 %v1541_v0 }
 0x1d7   : > { %v1472_v53 = vpack.c.bf16 %v914_v60, %v910_v30  ;;  %2265 = vmatprep.mubr.bf16.mxu1 %v1546_v15  ;;  %v1599_v29 = vmax.bf16 %v11610_v59, %v1471_v48  ;;  %v918_v37 = vadd.f32 %v917_v14, %v7983_v54  ;;  %v1545_v30 = vmax.bf16 %v11610_v59, %v1417_v45 }
 0x1d8   : > { %v919_v16 = vpop.f32.mrf.mxu0  ;;  %v8425_v35 = vpop.f32.mrf.mxu1  ;;  %v1550_v14 = vmax.bf16 %v11610_v59, %v1422_v8 }
 0x1d9   : > { %v1600_v63 = vmax.bf16 %v11610_v59, %v1472_v53  ;;  %v920_v0 = vadd.f32 %v919_v16, %v7992_v44 }
 0x1da   : > { %v921_v50 = vpop.f32.mrf.mxu0  ;;  %v8429_v42 = vpop.f32.mrf.mxu1 }
 0x1db   : > { %v922_v5 = vadd.f32 %v921_v50, %v7983_v54  ;;  %2088 = vmatprep.mubr.bf16.mxu0 %v1600_v63  ;;  %v1426_v50 = vpack.c.bf16 %v1147_v40, %v1143_v4  ;;  %v1157_v40 = vadd.f32 %v8337_v32, %v8280_v12  ;;  %v1141_v4 = vadd.f32 %v8290_v25, %v8304_v20 }
 0x1dc   : > { %v923_v48 = vpop.f32.mrf.mxu0  ;;  %v8436_v60 = vpop.f32.mrf.mxu1  ;;  %2089 = vmatmul.mubr.bf16.gmra.mxu0 %v1599_v29  ;;  %v1421_v29 = vpack.c.bf16 %v1135_v21, %v1131_v13  ;;  %v1145_v21 = vadd.f32 %v8306_v18, %v8304_v20  ;;  %v1153_v18 = vadd.f32 %v8326_v56, %v8280_v12 }
 0x1dd   : > { %v1475_v15 = vpack.c.bf16 %v922_v5, %v918_v37  ;;  %v924_v19 = vadd.f32 %v923_v48, %v7992_v44 }
 0x1de   : > { %v927_v53 = vpop.f32.mrf.mxu0  ;;  %v8444_v45 = vpop.f32.mrf.mxu1  ;;  %2266 = vmatmul.mubr.bf16.gmra.mxu1 %v1545_v30 }
 0x1df   : > { %v1476_v16 = vpack.c.bf16 %v924_v19, %v920_v0  ;;  %2273 = vmatprep.mubr.bf16.mxu1 %v1550_v14  ;;  %v1603_v31 = vmax.bf16 %v11610_v59, %v1475_v15  ;;  %v928_v8 = vadd.f32 %v927_v53, %v7983_v54  ;;  %v1549_v0 = vmax.bf16 %v11610_v59, %v1421_v29 }
 0x1e0   : > { %v929_v37 = vpop.f32.mrf.mxu0  ;;  %v8449_v63 = vpop.f32.mrf.mxu1  ;;  %v1554_v53 = vmax.bf16 %v11610_v59, %v1426_v50 }
 0x1e1   : > { %v1604_v43 = vmax.bf16 %v11610_v59, %v1476_v16  ;;  %v930_v30 = vadd.f32 %v929_v37, %v7992_v44 }
 0x1e2   : > { %v931_v5 = vpop.f32.mrf.mxu0  ;;  %v8453_v48 = vpop.f32.mrf.mxu1 }
 0x1e3   : > { %v932_v26 = vadd.f32 %v931_v5, %v7983_v54  ;;  %2096 = vmatprep.mubr.bf16.mxu0 %v1604_v43  ;;  %v1430_v5 = vpack.c.bf16 %v1157_v40, %v1153_v18  ;;  %v1167_v40 = vadd.f32 %v8364_v38, %v8280_v12  ;;  %v1151_v18 = vadd.f32 %v8320_v9, %v8304_v20 }
 0x1e4   : > { %v933_v15 = vpop.f32.mrf.mxu0  ;;  %v8460_v19 = vpop.f32.mrf.mxu1  ;;  %2097 = vmatmul.mubr.bf16.gmra.mxu0 %v1603_v31  ;;  %v1425_v31 = vpack.c.bf16 %v1145_v21, %v1141_v4  ;;  %v1155_v21 = vadd.f32 %v8330_v46, %v8304_v20  ;;  %v1163_v46 = vadd.f32 %v8353_v24, %v8280_v12 }
 0x1e5   : > { %v1479_v14 = vpack.c.bf16 %v932_v26, %v928_v8  ;;  %v934_v13 = vadd.f32 %v933_v15, %v7992_v44 }
 0x1e6   : > { %v937_v16 = vpop.f32.mrf.mxu0  ;;  %v8468_v29 = vpop.f32.mrf.mxu1  ;;  %2274 = vmatmul.mubr.bf16.gmra.mxu1 %v1549_v0 }
 0x1e7   : > { %v1480_v37 = vpack.c.bf16 %v934_v13, %v930_v30  ;;  %2281 = vmatprep.mubr.bf16.mxu1 %v1554_v53  ;;  %v1607_v32 = vmax.bf16 %v11610_v59, %v1479_v14  ;;  %v938_v50 = vadd.f32 %v937_v16, %v7983_v54  ;;  %v1553_v30 = vmax.bf16 %v11610_v59, %v1425_v31 }
 0x1e8   : > { %v939_v8 = vpop.f32.mrf.mxu0  ;;  %v8473_v43 = vpop.f32.mrf.mxu1  ;;  %v1558_v16 = vmax.bf16 %v11610_v59, %v1430_v5 }
 0x1e9   : > { %v1608_v25 = vmax.bf16 %v11610_v59, %v1480_v37  ;;  %v940_v0 = vadd.f32 %v939_v8, %v7992_v44 }
 0x1ea   : > { %v941_v26 = vpop.f32.mrf.mxu0  ;;  %v8477_v15 = vpop.f32.mrf.mxu1 }
 0x1eb   : > { %v942_v56 = vadd.f32 %v941_v26, %v7983_v54  ;;  %2104 = vmatprep.mubr.bf16.mxu0 %v1608_v25  ;;  %v1434_v26 = vpack.c.bf16 %v1167_v40, %v1163_v46  ;;  %v1177_v40 = vadd.f32 %v8388_v47, %v8280_v12  ;;  %v1161_v46 = vadd.f32 %v8345_v49, %v8304_v20 }
 0x1ec   : > { %v943_v14 = vpop.f32.mrf.mxu0  ;;  %v8484_v13 = vpop.f32.mrf.mxu1  ;;  %2105 = vmatmul.mubr.bf16.gmra.mxu0 %v1607_v32  ;;  %v1429_v32 = vpack.c.bf16 %v1155_v21, %v1151_v18  ;;  %v1165_v21 = vadd.f32 %v8357_v11, %v8304_v20  ;;  %v1173_v11 = vadd.f32 %v8377_v23, %v8280_v12 }
 0x1ed   : > { %v1483_v53 = vpack.c.bf16 %v942_v56, %v938_v50  ;;  %v944_v4 = vadd.f32 %v943_v14, %v7992_v44 }
 0x1ee   : > { %v947_v37 = vpop.f32.mrf.mxu0  ;;  %v8492_v31 = vpop.f32.mrf.mxu1  ;;  %2282 = vmatmul.mubr.bf16.gmra.mxu1 %v1553_v30 }
 0x1ef   : > { %v1484_v8 = vpack.c.bf16 %v944_v4, %v940_v0  ;;  %2289 = vmatprep.mubr.bf16.mxu1 %v1558_v16  ;;  %v1611_v38 = vmax.bf16 %v11610_v59, %v1483_v53  ;;  %v948_v5 = vadd.f32 %v947_v37, %v7983_v54  ;;  %v1557_v0 = vmax.bf16 %v11610_v59, %v1429_v32 }
 0x1f0   : > { %v949_v50 = vpop.f32.mrf.mxu0  ;;  %v8497_v25 = vpop.f32.mrf.mxu1  ;;  %v1562_v37 = vmax.bf16 %v11610_v59, %v1434_v26 }
 0x1f1   : > { %v1612_v9 = vmax.bf16 %v11610_v59, %v1484_v8  ;;  %v950_v30 = vadd.f32 %v949_v50, %v7992_v44 }
 0x1f2   : > { %v951_v56 = vpop.f32.mrf.mxu0  ;;  %v8501_v14 = vpop.f32.mrf.mxu1 }
 0x1f3   : > { %v952_v24 = vadd.f32 %v951_v56, %v7983_v54  ;;  %2112 = vmatprep.mubr.bf16.mxu0 %v1612_v9  ;;  %v1438_v56 = vpack.c.bf16 %v1177_v40, %v1173_v11  ;;  %v1187_v40 = vadd.f32 %v8412_v39, %v8280_v12  ;;  %v6978_v39 = vld [vmem:[%s11540_s3] sm:$0xff]  }
 0x1f4   : > { %v953_v53 = vpop.f32.mrf.mxu0  ;;  %v8508_v4 = vpop.f32.mrf.mxu1  ;;  %2113 = vmatmul.mubr.bf16.gmra.mxu0 %v1611_v38  ;;  %v1433_v38 = vpack.c.bf16 %v1165_v21, %v1161_v46  ;;  %v1175_v21 = vadd.f32 %v8381_v27, %v8304_v20  ;;  %v1183_v27 = vadd.f32 %v8401_v55, %v8280_v12  ;;  %6607 = vmatprep.subr.bf16.mxu0 %v6978_v39 }
 0x1f5   : > { %v1487_v16 = vpack.c.bf16 %v952_v24, %v948_v5  ;;  %v954_v18 = vadd.f32 %v953_v53, %v7992_v44  ;;  %6608 = vmatpush3.bf16.msra.mxu0 %v6978_v39  ;;  %v11611_v55 = vpack.c.bf16 %v8010_v10, %v8004_v3  ;;  %v1193_v10 = vadd.f32 %v8425_v35, %v8280_v12 }
 0x1f6   : > { %v957_v8 = vpop.f32.mrf.mxu0  ;;  %v8516_v32 = vpop.f32.mrf.mxu1  ;;  %2290 = vmatmul.mubr.bf16.gmra.mxu1 %v1557_v0 }
 0x1f7   : > { %v1488_v50 = vpack.c.bf16 %v954_v18, %v950_v30  ;;  %2297 = vmatprep.mubr.bf16.mxu1 %v1562_v37  ;;  %v1615_v47 = vmax.bf16 %v11610_v59, %v1487_v16  ;;  %v958_v26 = vadd.f32 %v957_v8, %v7983_v54  ;;  %v1561_v30 = vmax.bf16 %v11610_v59, %v1433_v38 }
 0x1f8   : > { %v959_v5 = vpop.f32.mrf.mxu0  ;;  %v8521_v9 = vpop.f32.mrf.mxu1  ;;  %v1566_v8 = vmax.bf16 %v11610_v59, %v1438_v56 }
 0x1f9   : > { %v1616_v49 = vmax.bf16 %v11610_v59, %v1488_v50  ;;  %v960_v0 = vadd.f32 %v959_v5, %v7992_v44  ;;  %v1442_v5 = vpack.c.bf16 %v1187_v40, %v1183_v27  ;;  %v1195_v27 = vadd.f32 %v8429_v42, %v8304_v20 }
 0x1fa   : > { %v961_v24 = vpop.f32.mrf.mxu0  ;;  %v8525_v53 = vpop.f32.mrf.mxu1  ;;  %v1203_v42 = vadd.f32 %v8449_v63, %v8280_v12 }
 0x1fb   : > { %v962_v23 = vadd.f32 %v961_v24, %v7983_v54  ;;  %2120 = vmatprep.mubr.bf16.mxu0 %v1616_v49  ;;  %v1171_v54 = vadd.f32 %v8372_v41, %v8304_v20  ;;  %v1185_v24 = vadd.f32 %v8405_v61, %v8304_v20 }
 0x1fc   : > { %v963_v16 = vpop.f32.mrf.mxu0  ;;  %v8532_v18 = vpop.f32.mrf.mxu1  ;;  %2121 = vmatmul.mubr.bf16.gmra.mxu0 %v1615_v47 }
 0x1fd   : > { %v1491_v37 = vpack.c.bf16 %v962_v23, %v958_v26  ;;  %v964_v46 = vadd.f32 %v963_v16, %v7992_v44  ;;  %v1437_v38 = vpack.c.bf16 %v1175_v21, %v1171_v54  ;;  %v1624_v26 = vmax.bf16 %v11610_v59, %v11611_v55 }
 0x1fe   : > { %v8540_v11 = vpop.f32.mrf.mxu1  ;;  %2298 = vmatmul.mubr.bf16.gmra.mxu1 %v1561_v30  ;;  %v1197_v23 = vadd.f32 %v8436_v60, %v8280_v12  ;;  %v1570_v30 = vmax.bf16 %v11610_v59, %v1442_v5  ;;  %v1181_v21 = vadd.f32 %v8396_v51, %v8304_v20  ;;  %v6979_v60 = vld [vmem:[%s11541_s4] sm:$0xff]   ;;  %v11614_v55 = vpack.c.bf16 %v8025_v34, %v8020_v28 }
 0x1ff   : > { %v1492_v50 = vpack.c.bf16 %v964_v46, %v960_v0  ;;  %2305 = vmatprep.mubr.bf16.mxu1 %v1566_v8  ;;  %v1619_v44 = vmax.bf16 %v11610_v59, %v1491_v37  ;;  %v1565_v49 = vmax.bf16 %v11610_v59, %v1437_v38  ;;  %v11612_v37 = vpack.c.bf16 %v8001_v2, %v7996_v62 }
 0x200   : > { %v8548_v47 = vpop.f32.mrf.mxu1  ;;  %v1441_v61 = vpack.c.bf16 %v1185_v24, %v1181_v21  ;;  %v1446_v40 = vpack.c.bf16 %v1197_v23, %v1193_v10  ;;  %v11613_v8 = vpack.c.bf16 %v8034_v22, %v8028_v36  ;;  %6673 = vmatprep.subr.bf16.mxu1 %v6979_v60  ;;  %v1207_v62 = vadd.f32 %v8460_v19, %v8280_v12 }
 0x201   : > { %v1620_v41 = vmax.bf16 %v11610_v59, %v1492_v50  ;;  %v1623_v51 = vmax.bf16 %v11610_v59, %v11612_v37  ;;  %6674 = vmatpush3.bf16.msra.mxu1 %v6979_v60  ;;  %v1191_v36 = vadd.f32 %v8420_v33, %v8304_v20  ;;  %v11615_v24 = vpack.c.bf16 %v8058_v17, %v8052_v7 }
 0x202   : > { %v8551_v56 = vpop.f32.mrf.mxu1  ;;  %v1628_v35 = vmax.bf16 %v11610_v59, %v11613_v8  ;;  %v1569_v54 = vmax.bf16 %v11610_v59, %v1441_v61  ;;  %v1574_v2 = vmax.bf16 %v11610_v59, %v1446_v40  ;;  %v1450_v19 = vpack.c.bf16 %v1207_v62, %v1203_v42 }
 0x203   : > { %2128 = vmatprep.mubr.bf16.mxu0 %v1620_v41  ;;  %v1632_v63 = vmax.bf16 %v11610_v59, %v11615_v24  ;;  %v1217_v28 = vadd.f32 %v8484_v13, %v8280_v12  ;;  %v1201_v7 = vadd.f32 %v8444_v45, %v8304_v20  ;;  %v1215_v62 = vadd.f32 %v8477_v15, %v8304_v20 }
 0x204   : > { %v8560_v0 = vpop.f32.mrf.mxu1  ;;  %2129 = vmatmul.mubr.bf16.gmra.mxu0 %v1619_v44  ;;  %v1445_v44 = vpack.c.bf16 %v1195_v27, %v1191_v36  ;;  %v1578_v34 = vmax.bf16 %v11610_v59, %v1450_v19  ;;  %v1223_v15 = vadd.f32 %v8497_v25, %v8280_v12 }
 0x205   : > { %2136 = vmatprep.mubr.bf16.mxu0 %v1624_v26  ;;  %v1627_v26 = vmax.bf16 %v11610_v59, %v11614_v55  ;;  %v11618_v55 = vld [vmem:[#allocation14_spill] sm:$0xff] }
 0x206   : > { %v8567_v3 = vpop.f32.mrf.mxu1  ;;  %2306 = vmatmul.mubr.bf16.gmra.mxu1 %v1565_v49  ;;  %v1573_v23 = vmax.bf16 %v11610_v59, %v1445_v44 }
 0x207   : > { %2313 = vmatprep.mubr.bf16.mxu1 %v1570_v30  ;;  %v1205_v30 = vadd.f32 %v8453_v48, %v8304_v20  ;;  %v1213_v48 = vadd.f32 %v8473_v43, %v8280_v12 }
 0x208   : > { %v8571_v16 = vpop.f32.mrf.mxu1 }
 0x209   : > { %v1449_v40 = vpack.c.bf16 %v1205_v30, %v1201_v7  ;;  %v1454_v13 = vpack.c.bf16 %v1217_v28, %v1213_v48 }
 0x20a   : > { %v8580_v46 = vpop.f32.mrf.mxu1 }
 0x20b   : > { %v1577_v27 = vmax.bf16 %v11610_v59, %v1449_v40  ;;  %v1221_v40 = vadd.f32 %v8492_v31, %v8304_v20 }
 0x20c   : > { %v8589_v50 = vpop.f32.mrf.mxu1  ;;  %v8591_v39 = vpop.f32.mrf.mxu0  ;;  %2137 = vmatmul.mubr.bf16.gmra.mxu0 %v1623_v51  ;;  %v11616_v51 = vpack.c.bf16 %v8049_v6, %v8044_v1  ;;  %v1227_v1 = vadd.f32 %v8508_v4, %v8280_v12  ;;  %v1582_v6 = vmax.bf16 %v11610_v59, %v1454_v13 }
 0x20d   : > { %2144 = vmatprep.mubr.bf16.mxu0 %v1628_v35 }
 0x20e   : > { %v8598_v22 = vpop.f32.mrf.mxu1  ;;  %v1948_v38 = vpop.f32.mrf.mxu0  ;;  %2314 = vmatmul.mubr.bf16.gmra.mxu1 %v1569_v54  ;;  %v1631_v8 = vmax.bf16 %v11610_v59, %v11616_v51  ;;  %v11617_v54 = vpack.c.bf16 %v8082_v57, %v8076_v58  ;;  %v1211_v58 = vadd.f32 %v8468_v29, %v8304_v20  ;;  %v1458_v4 = vpack.c.bf16 %v1227_v1, %v1223_v15 }
 0x20f   : > { %2321 = vmatprep.mubr.bf16.mxu1 %v1574_v2 }
 0x210   : > { %v8602_v5 = vpop.f32.mrf.mxu1  ;;  %v8604_v41 = vpop.f32.mrf.mxu0  ;;  %v1636_v43 = vmax.bf16 %v11610_v59, %v11617_v54  ;;  %v1453_v42 = vpack.c.bf16 %v1215_v62, %v1211_v58  ;;  %v1586_v48 = vmax.bf16 %v11610_v59, %v1458_v4  ;;  %v11626_v58 = vld [vmem:[#allocation22_spill] sm:$0xff]  ;;  %v1235_v4 = vadd.f32 %v8525_v53, %v8304_v20 }
 0x211   : > { %v1243_v53 = vadd.f32 %v8548_v47, %v8280_v12 }
 0x212   : > { %v8610_v33 = vpop.f32.mrf.mxu1  ;;  %v1951_v49 = vpop.f32.mrf.mxu0  ;;  %v1581_v28 = vmax.bf16 %v11610_v59, %v1453_v42 }
 0x214   : > { %v8619_v21 = vpop.f32.mrf.mxu1  ;;  %v8621_v10 = vpop.f32.mrf.mxu0  ;;  %2145 = vmatmul.mubr.bf16.gmra.mxu0 %v1627_v26  ;;  %v11619_v26 = vpack.c.bf16 %v8073_v52, %v11618_v55  ;;  %v1237_v52 = vadd.f32 %v8532_v18, %v8280_v12 }
 0x215   : > { %2152 = vmatprep.mubr.bf16.mxu0 %v1632_v63  ;;  %v11620_v63 = vld [vmem:[#allocation18_spill] sm:$0xff] }
 0x216   : > { %v8628_v17 = vpop.f32.mrf.mxu1  ;;  %v1956_v61 = vpop.f32.mrf.mxu0  ;;  %2322 = vmatmul.mubr.bf16.gmra.mxu1 %v1573_v23  ;;  %v1635_v49 = vmax.bf16 %v11610_v59, %v11619_v26  ;;  %v11621_v23 = vld [vmem:[#allocation17_spill] sm:$0xff] }
 0x217   : > { %2329 = vmatprep.mubr.bf16.mxu1 %v1578_v34  ;;  %v11622_v30 = vpack.c.bf16 %v11620_v63, %v11621_v23  ;;  %v1225_v34 = vadd.f32 %v8501_v14, %v8304_v20  ;;  %v1233_v14 = vadd.f32 %v8521_v9, %v8280_v12  ;;  %v1231_v63 = vadd.f32 %v8516_v32, %v8304_v20 }
 0x218   : > { %v8632_v60 = vpop.f32.mrf.mxu1  ;;  %v8634_v37 = vpop.f32.mrf.mxu0 }
 0x219   : > { %v1640_v25 = vmax.bf16 %v11610_v59, %v11622_v30  ;;  %v1462_v18 = vpack.c.bf16 %v1237_v52, %v1233_v14  ;;  %v11629_v52 = vld [vmem:[#allocation20_spill] sm:$0xff] }
 0x21a   : > { %v8640_v45 = vpop.f32.mrf.mxu1  ;;  %v1959_v35 = vpop.f32.mrf.mxu0 }
 0x21c   : > { %v8649_v2 = vpop.f32.mrf.mxu1  ;;  %v8651_v36 = vpop.f32.mrf.mxu0  ;;  %2153 = vmatmul.mubr.bf16.gmra.mxu0 %v1631_v8  ;;  %v1457_v8 = vpack.c.bf16 %v1225_v34, %v1221_v40 }
 0x21d   : > { %2160 = vmatprep.mubr.bf16.mxu0 %v1636_v43  ;;  %v11623_v43 = vld [vmem:[#allocation16_spill] sm:$0xff] }
 0x21e   : > { %v8658_v57 = vpop.f32.mrf.mxu1  ;;  %v1964_v38 = vpop.f32.mrf.mxu0  ;;  %2330 = vmatmul.mubr.bf16.gmra.mxu1 %v1577_v27  ;;  %v11624_v27 = vld [vmem:[#allocation15_spill] sm:$0xff]  ;;  %v1585_v42 = vmax.bf16 %v11610_v59, %v1457_v8  ;;  %v11632_v8 = vld [vmem:[#allocation26_spill] sm:$0xff] }
 0x21f   : > { %2337 = vmatprep.mubr.bf16.mxu1 %v1582_v6  ;;  %v11625_v62 = vpack.c.bf16 %v11623_v43, %v11624_v27  ;;  %v11627_v38 = vld [vmem:[#allocation21_spill] sm:$0xff] }
 0x220   : > { %v8662_v44 = vpop.f32.mrf.mxu1  ;;  %v8664_v19 = vpop.f32.mrf.mxu0  ;;  %v11628_v15 = vpack.c.bf16 %v11626_v58, %v11627_v38  ;;  %v1257_v58 = vadd.f32 %v8589_v50, %v8280_v12 }
 0x221   : > { %v1639_v1 = vmax.bf16 %v11610_v59, %v11625_v62  ;;  %v1245_v62 = vadd.f32 %v8551_v56, %v8304_v20  ;;  %v1253_v56 = vadd.f32 %v8571_v16, %v8280_v12 }
 0x222   : > { %v8670_v29 = vpop.f32.mrf.mxu1  ;;  %v1967_v24 = vpop.f32.mrf.mxu0  ;;  %v1644_v9 = vmax.bf16 %v11610_v59, %v11628_v15  ;;  %v1241_v15 = vadd.f32 %v8540_v11, %v8304_v20 }
 0x223   : > { %v1590_v24 = vmax.bf16 %v11610_v59, %v1462_v18  ;;  %v11633_v18 = vld [vmem:[#allocation25_spill] sm:$0xff]  ;;  %v1470_v50 = vpack.c.bf16 %v1257_v58, %v1253_v56  ;;  %v11641_v56 = vld [vmem:[#allocation28_spill] sm:$0xff] }
 0x224   : > { %v8679_v7 = vpop.f32.mrf.mxu1  ;;  %v8681_v61 = vpop.f32.mrf.mxu0  ;;  %2161 = vmatmul.mubr.bf16.gmra.mxu0 %v1635_v49  ;;  %v1247_v49 = vadd.f32 %v8560_v0, %v8280_v12  ;;  %v11634_v43 = vpack.c.bf16 %v11632_v8, %v11633_v18 }
 0x225   : > { %2168 = vmatprep.mubr.bf16.mxu0 %v1640_v25  ;;  %v1461_v25 = vpack.c.bf16 %v1235_v4, %v1231_v63  ;;  %v1465_v4 = vpack.c.bf16 %v1245_v62, %v1241_v15  ;;  %v11635_v63 = vld [vmem:[#allocation24_spill] sm:$0xff] }
 0x226   : > { %v8688_v13 = vpop.f32.mrf.mxu1  ;;  %v1972_v51 = vpop.f32.mrf.mxu0  ;;  %2338 = vmatmul.mubr.bf16.gmra.mxu1 %v1581_v28  ;;  %v1466_v0 = vpack.c.bf16 %v1247_v49, %v1243_v53  ;;  %v1648_v47 = vmax.bf16 %v11610_v59, %v11634_v43  ;;  %v1267_v43 = vadd.f32 %v8619_v21, %v8280_v12 }
 0x227   : > { %2345 = vmatprep.mubr.bf16.mxu1 %v1586_v48  ;;  %v11630_v48 = vld [vmem:[#allocation19_spill] sm:$0xff]  ;;  %v1589_v27 = vmax.bf16 %v11610_v59, %v1461_v25 }
 0x228   : > { %v8692_v35 = vpop.f32.mrf.mxu1  ;;  %v8694_v54 = vpop.f32.mrf.mxu0  ;;  %v11631_v40 = vpack.c.bf16 %v11629_v52, %v11630_v48  ;;  %v1594_v38 = vmax.bf16 %v11610_v59, %v1466_v0  ;;  %v11638_v52 = vld [vmem:[#allocation30_spill] sm:$0xff]  ;;  %v11639_v48 = vld [vmem:[#allocation29_spill] sm:$0xff] }
 0x22a   : > { %v8700_v31 = vpop.f32.mrf.mxu1  ;;  %v1975_v6 = vpop.f32.mrf.mxu0  ;;  %v1643_v51 = vmax.bf16 %v11610_v59, %v11631_v40  ;;  %v11640_v40 = vpack.c.bf16 %v11638_v52, %v11639_v48  ;;  %v1277_v52 = vadd.f32 %v8649_v2, %v8280_v12 }
 0x22c   : > { %v8709_v55 = vpop.f32.mrf.mxu1  ;;  %v8711_v26 = vpop.f32.mrf.mxu0  ;;  %2169 = vmatmul.mubr.bf16.gmra.mxu0 %v1639_v1  ;;  %v1652_v16 = vmax.bf16 %v11610_v59, %v11640_v40  ;;  %v1261_v40 = vadd.f32 %v8598_v22, %v8304_v20  ;;  %v1275_v22 = vadd.f32 %v8640_v45, %v8304_v20 }
 0x22d   : > { %2176 = vmatprep.mubr.bf16.mxu0 %v1644_v9 }
 0x22e   : > { %v8718_v23 = vpop.f32.mrf.mxu1  ;;  %v1980_v30 = vpop.f32.mrf.mxu0  ;;  %2346 = vmatmul.mubr.bf16.gmra.mxu1 %v1585_v42 }
 0x22f   : > { %2353 = vmatprep.mubr.bf16.mxu1 %v1590_v24  ;;  %v11636_v30 = vld [vmem:[#allocation23_spill] sm:$0xff] }
 0x230   : > { %v8722_v28 = vpop.f32.mrf.mxu1  ;;  %v8724_v34 = vpop.f32.mrf.mxu0  ;;  %v11637_v53 = vpack.c.bf16 %v11635_v63, %v11636_v30 }
 0x232   : > { %v8730_v32 = vpop.f32.mrf.mxu1  ;;  %v1983_v14 = vpop.f32.mrf.mxu0  ;;  %v1647_v25 = vmax.bf16 %v11610_v59, %v11637_v53 }
 0x233   : > { %v1255_v14 = vadd.f32 %v8580_v46, %v8304_v20  ;;  %v1263_v46 = vadd.f32 %v8602_v5, %v8280_v12  ;;  %v1265_v5 = vadd.f32 %v8610_v33, %v8304_v20  ;;  %v1273_v33 = vadd.f32 %v8632_v60, %v8280_v12 }
 0x234   : > { %v8739_v1 = vpop.f32.mrf.mxu1  ;;  %v8741_v6 = vpop.f32.mrf.mxu0  ;;  %2177 = vmatmul.mubr.bf16.gmra.mxu0 %v1643_v51  ;;  %v1593_v51 = vmax.bf16 %v11610_v59, %v1465_v4  ;;  %v11642_v4 = vld [vmem:[#allocation27_spill] sm:$0xff]  ;;  %v1287_v60 = vadd.f32 %v8679_v7, %v8280_v12 }
 0x235   : > { %2184 = vmatprep.mubr.bf16.mxu0 %v1648_v47  ;;  %v1598_v47 = vmax.bf16 %v11610_v59, %v1470_v50  ;;  %v1474_v21 = vpack.c.bf16 %v1267_v43, %v1263_v46  ;;  %v11643_v50 = vpack.c.bf16 %v11641_v56, %v11642_v4  ;;  %v1271_v4 = vadd.f32 %v8628_v17, %v8304_v20 }
 0x236   : > { %v8748_v9 = vpop.f32.mrf.mxu1  ;;  %v1988_v42 = vpop.f32.mrf.mxu0  ;;  %2354 = vmatmul.mubr.bf16.gmra.mxu1 %v1589_v27  ;;  %v1251_v27 = vadd.f32 %v8567_v3, %v8304_v20  ;;  %v1285_v17 = vadd.f32 %v8670_v29, %v8304_v20 }
 0x237   : > { %2361 = vmatprep.mubr.bf16.mxu1 %v1594_v38  ;;  %v1651_v63 = vmax.bf16 %v11610_v59, %v11643_v50  ;;  %v1602_v48 = vmax.bf16 %v11610_v59, %v1474_v21  ;;  %v1477_v45 = vpack.c.bf16 %v1275_v22, %v1271_v4  ;;  %v1293_v22 = vadd.f32 %v8692_v35, %v8280_v12 }
 0x238   : > { %v8752_v49 = vpop.f32.mrf.mxu1  ;;  %v8754_v24 = vpop.f32.mrf.mxu0  ;;  %v1469_v38 = vpack.c.bf16 %v1255_v14, %v1251_v27  ;;  %v1473_v14 = vpack.c.bf16 %v1265_v5, %v1261_v40  ;;  %v1478_v27 = vpack.c.bf16 %v1277_v52, %v1273_v33  ;;  %v1307_v35 = vadd.f32 %v8739_v1, %v8280_v12 }
 0x239   : > { %v1605_v40 = vmax.bf16 %v11610_v59, %v1477_v45 }
 0x23a   : > { %v8760_v11 = vpop.f32.mrf.mxu1  ;;  %v1991_v0 = vpop.f32.mrf.mxu0  ;;  %v1597_v53 = vmax.bf16 %v11610_v59, %v1469_v38  ;;  %v1601_v46 = vmax.bf16 %v11610_v59, %v1473_v14  ;;  %v1606_v56 = vmax.bf16 %v11610_v59, %v1478_v27  ;;  %v1281_v27 = vadd.f32 %v8658_v57, %v8304_v20 }
 0x23b   : > { %v1295_v57 = vadd.f32 %v8700_v31, %v8304_v20 }
 0x23c   : > { %v8769_v8 = vpop.f32.mrf.mxu1  ;;  %v8771_v18 = vpop.f32.mrf.mxu0  ;;  %2185 = vmatmul.mubr.bf16.gmra.mxu0 %v1647_v25  ;;  %v1481_v29 = vpack.c.bf16 %v1285_v17, %v1281_v27 }
 0x23d   : > { %2192 = vmatprep.mubr.bf16.mxu0 %v1652_v16 }
 0x23e   : > { %v8778_v62 = vpop.f32.mrf.mxu1  ;;  %v1996_v58 = vpop.f32.mrf.mxu0  ;;  %2362 = vmatmul.mubr.bf16.gmra.mxu1 %v1593_v51 }
 0x23f   : > { %2369 = vmatprep.mubr.bf16.mxu1 %v1598_v47 }
 0x240   : > { %v8782_v15 = vpop.f32.mrf.mxu1  ;;  %v8784_v42 = vpop.f32.mrf.mxu0 }
 0x242   : > { %v8790_v3 = vpop.f32.mrf.mxu1  ;;  %v1999_v30 = vpop.f32.mrf.mxu0 }
 0x243   : > { %v1283_v30 = vadd.f32 %v8662_v44, %v8280_v12  ;;  %v1297_v44 = vadd.f32 %v8709_v55, %v8280_v12 }
 0x244   : > { %v8795_v25 = vpop.f32.mrf.mxu1  ;;  %v8797_v0 = vpop.f32.mrf.mxu0  ;;  %2193 = vmatmul.mubr.bf16.gmra.mxu0 %v1651_v63 }
 0x245   : > { %v1482_v52 = vpack.c.bf16 %v1287_v60, %v1283_v30  ;;  %v1486_v4 = vpack.c.bf16 %v1297_v44, %v1293_v22  ;;  %v1609_v30 = vmax.bf16 %v11610_v59, %v1481_v29 }
 0x246   : > { %v8804_v16 = vpop.f32.mrf.mxu1  ;;  %v2004_v51 = vpop.f32.mrf.mxu0  ;;  %2370 = vmatmul.mubr.bf16.gmra.mxu1 %v1597_v53 }
 0x247   : > { %2377 = vmatprep.mubr.bf16.mxu1 %v1602_v48  ;;  %v1610_v14 = vmax.bf16 %v11610_v59, %v1482_v52 }
 0x248   : > { %v8808_v43 = vpop.f32.mrf.mxu1  ;;  %v8810_v47 = vpop.f32.mrf.mxu0 }
 0x24a   : > { %v8812_v2 = vpop.f32.mrf.mxu1  ;;  %v2007_v58 = vpop.f32.mrf.mxu0 }
 0x24c   : > { %v8817_v38 = vpop.f32.mrf.mxu1  ;;  %v8819_v21 = vpop.f32.mrf.mxu0 }
 0x24e   : > { %v8826_v50 = vpop.f32.mrf.mxu1  ;;  %v2012_v63 = vpop.f32.mrf.mxu0  ;;  %2378 = vmatmul.mubr.bf16.gmra.mxu1 %v1601_v46 }
 0x24f   : > { %2385 = vmatprep.mubr.bf16.mxu1 %v1606_v56 }
 0x250   : > { %v8830_v53 = vpop.f32.mrf.mxu1  ;;  %v8832_v5 = vpop.f32.mrf.mxu0 }
 0x252   : > { %v8834_v7 = vpop.f32.mrf.mxu1  ;;  %v2015_v48 = vpop.f32.mrf.mxu0 }
 0x253   : > { %v1614_v48 = vmax.bf16 %v11610_v59, %v1486_v4 }
 0x254   : > { %v8839_v51 = vpop.f32.mrf.mxu1  ;;  %v8841_v33 = vpop.f32.mrf.mxu0 }
 0x256   : > { %v8848_v58 = vpop.f32.mrf.mxu1  ;;  %v2020_v46 = vpop.f32.mrf.mxu0  ;;  %2386 = vmatmul.mubr.bf16.gmra.mxu1 %v1605_v40  ;;  %v1291_v40 = vadd.f32 %v8688_v13, %v8304_v20  ;;  %v1305_v13 = vadd.f32 %v8730_v32, %v8304_v20 }
 0x257   : > { %2393 = vmatprep.mubr.bf16.mxu1 %v1610_v14  ;;  %v1303_v14 = vadd.f32 %v8722_v28, %v8280_v12  ;;  %v1317_v28 = vadd.f32 %v8769_v8, %v8280_v12 }
 0x258   : > { %v8852_v60 = vpop.f32.mrf.mxu1  ;;  %v8854_v56 = vpop.f32.mrf.mxu0  ;;  %v1485_v31 = vpack.c.bf16 %v1295_v57, %v1291_v40 }
 0x259   : > { %v1490_v22 = vpack.c.bf16 %v1307_v35, %v1303_v14  ;;  %v1301_v35 = vadd.f32 %v8718_v23, %v8304_v20  ;;  %v1315_v23 = vadd.f32 %v8760_v11, %v8304_v20 }
 0x25a   : > { %v8856_v55 = vpop.f32.mrf.mxu1  ;;  %v2023_v63 = vpop.f32.mrf.mxu0  ;;  %v1613_v4 = vmax.bf16 %v11610_v59, %v1485_v31 }
 0x25b   : > { %v1618_v57 = vmax.bf16 %v11610_v59, %v1490_v22  ;;  %v1489_v32 = vpack.c.bf16 %v1305_v13, %v1301_v35 }
 0x25c   : > { %v8861_v45 = vpop.f32.mrf.mxu1  ;;  %v8863_v52 = vpop.f32.mrf.mxu0 }
 0x25d   : > { %11644 = vst [vmem:[#allocation14_spill] sm:$0xff] %v8863_v52 }
 0x25e   : > { %v8870_v17 = vpop.f32.mrf.mxu1  ;;  %v2028_v44 = vpop.f32.mrf.mxu0  ;;  %2394 = vmatmul.mubr.bf16.gmra.mxu1 %v1609_v30 }
 0x25f   : > { %2401 = vmatprep.mubr.bf16.mxu1 %v1614_v48  ;;  %v1313_v44 = vadd.f32 %v8752_v49, %v8280_v12  ;;  %v1327_v49 = vadd.f32 %v8795_v25, %v8280_v12 }
 0x260   : > { %v8874_v27 = vpop.f32.mrf.mxu1  ;;  %v8876_v46 = vpop.f32.mrf.mxu0 }
 0x261   : > { %11645 = vst [vmem:[#allocation18_spill] sm:$0xff] %v8876_v46 }
 0x262   : > { %v8878_v1 = vpop.f32.mrf.mxu1  ;;  %v2031_v29 = vpop.f32.mrf.mxu0 }
 0x263   : > { %v1494_v29 = vpack.c.bf16 %v1317_v28, %v1313_v44  ;;  %v1311_v28 = vadd.f32 %v8748_v9, %v8304_v20  ;;  %v1323_v44 = vadd.f32 %v8782_v15, %v8280_v12  ;;  %v1325_v9 = vadd.f32 %v8790_v3, %v8304_v20 }
 0x264   : > { %v8883_v63 = vpop.f32.mrf.mxu1  ;;  %v8885_v30 = vpop.f32.mrf.mxu0  ;;  %v1337_v15 = vadd.f32 %v8817_v38, %v8280_v12 }
 0x265   : > { %11646 = vst [vmem:[#allocation17_spill] sm:$0xff] %v8885_v30  ;;  %v1617_v30 = vmax.bf16 %v11610_v59, %v1489_v32  ;;  %v1622_v13 = vmax.bf16 %v11610_v59, %v1494_v29  ;;  %v1493_v11 = vpack.c.bf16 %v1315_v23, %v1311_v28 }
 0x266   : > { %v8892_v48 = vpop.f32.mrf.mxu1  ;;  %v2036_v40 = vpop.f32.mrf.mxu0  ;;  %2402 = vmatmul.mubr.bf16.gmra.mxu1 %v1613_v4 }
 0x267   : > { %2409 = vmatprep.mubr.bf16.mxu1 %v1618_v57 }
 0x268   : > { %v8896_v14 = vpop.f32.mrf.mxu1  ;;  %v8898_v31 = vpop.f32.mrf.mxu0 }
 0x269   : > { %11647 = vst [vmem:[#allocation16_spill] sm:$0xff] %v8898_v31  ;;  %v1621_v31 = vmax.bf16 %v11610_v59, %v1493_v11 }
 0x26a   : > { %v8900_v8 = vpop.f32.mrf.mxu1  ;;  %v2039_v22 = vpop.f32.mrf.mxu0 }
 0x26c   : > { %v8905_v40 = vpop.f32.mrf.mxu1  ;;  %v8907_v4 = vpop.f32.mrf.mxu0 }
 0x26d   : > { %11648 = vst [vmem:[#allocation15_spill] sm:$0xff] %v8907_v4  ;;  %v1498_v4 = vpack.c.bf16 %v1327_v49, %v1323_v44  ;;  %v1321_v49 = vadd.f32 %v8778_v62, %v8304_v20  ;;  %v1333_v44 = vadd.f32 %v8808_v43, %v8280_v12  ;;  %v1335_v62 = vadd.f32 %v8812_v2, %v8304_v20 }
 0x26e   : > { %v8914_v57 = vpop.f32.mrf.mxu1  ;;  %v2044_v35 = vpop.f32.mrf.mxu0  ;;  %2410 = vmatmul.mubr.bf16.gmra.mxu1 %v1617_v30  ;;  %v1347_v43 = vadd.f32 %v8839_v51, %v8280_v12  ;;  %v1343_v2 = vadd.f32 %v8830_v53, %v8280_v12  ;;  %v1345_v53 = vadd.f32 %v8834_v7, %v8304_v20 }
 0x26f   : > { %2417 = vmatprep.mubr.bf16.mxu1 %v1622_v13  ;;  %v1626_v23 = vmax.bf16 %v11610_v59, %v1498_v4  ;;  %v1497_v3 = vpack.c.bf16 %v1325_v9, %v1321_v49 }
 0x270   : > { %v8918_v32 = vpop.f32.mrf.mxu1  ;;  %v8920_v22 = vpop.f32.mrf.mxu0 }
 0x271   : > { %11649 = vst [vmem:[#allocation22_spill] sm:$0xff] %v8920_v22  ;;  %v1625_v22 = vmax.bf16 %v11610_v59, %v1497_v3 }
 0x272   : > { %v8922_v25 = vpop.f32.mrf.mxu1  ;;  %v2047_v29 = vpop.f32.mrf.mxu0 }
 0x274   : > { %v8927_v35 = vpop.f32.mrf.mxu1  ;;  %v8929_v30 = vpop.f32.mrf.mxu0 }
 0x275   : > { %11650 = vst [vmem:[#allocation21_spill] sm:$0xff] %v8929_v30  ;;  %v1502_v30 = vpack.c.bf16 %v1337_v15, %v1333_v44  ;;  %v8959_v15 = vld [vmem:[%s11545_s8 + $0x1] ss:$0 sm:$0xff] }
 0x276   : > { %v8936_v13 = vpop.f32.mrf.mxu1  ;;  %v2052_v28 = vpop.f32.mrf.mxu0  ;;  %2418 = vmatmul.mubr.bf16.gmra.mxu1 %v1621_v31 }
 0x277   : > { %2425 = vmatprep.mubr.bf16.mxu1 %v1626_v23  ;;  %v1630_v9 = vmax.bf16 %v11610_v59, %v1502_v30  ;;  %v1331_v23 = vadd.f32 %v8804_v16, %v8304_v20  ;;  %v1947_v30 = vadd.f32 %v8591_v39, %v8959_v15 }
 0x278   : > { %v8940_v11 = vpop.f32.mrf.mxu1  ;;  %v8942_v29 = vpop.f32.mrf.mxu0 }
 0x279   : > { %11651 = vst [vmem:[#allocation20_spill] sm:$0xff] %v8942_v29  ;;  %v1501_v3 = vpack.c.bf16 %v1335_v62, %v1331_v23  ;;  %v1506_v29 = vpack.c.bf16 %v1347_v43, %v1343_v2  ;;  %v1357_v23 = vadd.f32 %v8861_v45, %v8280_v12 }
 0x27a   : > { %v8944_v38 = vpop.f32.mrf.mxu1  ;;  %v2055_v4 = vpop.f32.mrf.mxu0 }
 0x27c   : > { %v8949_v28 = vpop.f32.mrf.mxu1  ;;  %v8951_v31 = vpop.f32.mrf.mxu0 }
 0x27d   : > { %11652 = vst [vmem:[#allocation19_spill] sm:$0xff] %v8951_v31  ;;  %v1950_v31 = vadd.f32 %v8604_v41, %v8959_v15  ;;  %v1341_v41 = vadd.f32 %v8826_v50, %v8304_v20  ;;  %v1958_v50 = vadd.f32 %v8634_v37, %v8959_v15 }
 0x27e   : > { %v2060_v49 = vpop.f32.mrf.mxu0  ;;  %v2235_v44 = vpop.f32.mrf.mxu1  ;;  %2426 = vmatmul.mubr.bf16.gmra.mxu1 %v1625_v22  ;;  %v1629_v22 = vmax.bf16 %v11610_v59, %v1501_v3 }
 0x27f   : > { %2433 = vmatprep.mubr.bf16.mxu1 %v1630_v9  ;;  %v2236_v49 = vadd.f32 %v2235_v44, %v1947_v30  ;;  %v1505_v44 = vpack.c.bf16 %v1345_v53, %v1341_v41 }
 0x280   : > { %v8965_v4 = vpop.f32.mrf.mxu0  ;;  %v2237_v51 = vpop.f32.mrf.mxu1 }
 0x281   : > { %v1634_v51 = vmax.bf16 %v11610_v59, %v1506_v29 }
 0x282   : > { %v2063_v46 = vpop.f32.mrf.mxu0  ;;  %v2238_v16 = vpop.f32.mrf.mxu1 }
 0x283   : > { %v2239_v52 = vadd.f32 %v2238_v16, %v1950_v31  ;;  %v1353_v31 = vadd.f32 %v8852_v60, %v8280_v12 }
 0x284   : > { %v8974_v62 = vpop.f32.mrf.mxu0  ;;  %v2240_v9 = vpop.f32.mrf.mxu1 }
 0x285   : > { %v2490_v39 = vpack.c.bf16 %v2239_v52, %v2236_v49  ;;  %v1955_v52 = vadd.f32 %v8621_v10, %v8959_v15  ;;  %v1510_v29 = vpack.c.bf16 %v1357_v23, %v1353_v31  ;;  %v1633_v49 = vmax.bf16 %v11610_v59, %v1505_v44 }
 0x286   : > { %v2068_v46 = vpop.f32.mrf.mxu0  ;;  %v2243_v43 = vpop.f32.mrf.mxu1  ;;  %2434 = vmatmul.mubr.bf16.gmra.mxu1 %v1629_v22  ;;  %v1355_v22 = vadd.f32 %v8856_v55, %v8304_v20  ;;  %v1367_v10 = vadd.f32 %v8883_v63, %v8280_v12  ;;  %v1351_v23 = vadd.f32 %v8848_v58, %v8304_v20  ;;  %v1963_v63 = vadd.f32 %v8651_v36, %v8959_v15 }
 0x287   : > { %v2522_v7 = vmax.bf16 %v11610_v59, %v2490_v39  ;;  %2441 = vmatprep.mubr.bf16.mxu1 %v1634_v51  ;;  %v2244_v16 = vadd.f32 %v2243_v43, %v1955_v52  ;;  %v1638_v37 = vmax.bf16 %v11610_v59, %v1510_v29  ;;  %v1363_v46 = vadd.f32 %v8874_v27, %v8280_v12 }
 0x288   : > { %v8984_v2 = vpop.f32.mrf.mxu0  ;;  %v2245_v45 = vpop.f32.mrf.mxu1  ;;  %v1509_v43 = vpack.c.bf16 %v1355_v22, %v1351_v23  ;;  %v1966_v44 = vadd.f32 %v8664_v19, %v8959_v15  ;;  %v1377_v36 = vadd.f32 %v8905_v40, %v8280_v12  ;;  %v1971_v40 = vadd.f32 %v8681_v61, %v8959_v15 }
 0x289   : > { %6609 = vmatprep.mubr.msk.bf16.mxu0 %vm2587_vm0, %v2522_v7  ;;  %v1514_v58 = vpack.c.bf16 %v1367_v10, %v1363_v46  ;;  %v1373_v10 = vadd.f32 %v8896_v14, %v8280_v12  ;;  %v1387_v61 = vadd.f32 %v8927_v35, %v8280_v12  ;;  %v1979_v35 = vadd.f32 %v8711_v26, %v8959_v15 }
 0x28a   : > { %v2071_v3 = vpop.f32.mrf.mxu0  ;;  %v2246_v30 = vpop.f32.mrf.mxu1  ;;  %v1637_v29 = vmax.bf16 %v11610_v59, %v1509_v43  ;;  %v1397_v26 = vadd.f32 %v8949_v28, %v8280_v12  ;;  %v1987_v28 = vadd.f32 %v8741_v6, %v8959_v15 }
 0x28b   : > { %v2247_v60 = vadd.f32 %v2246_v30, %v1958_v50  ;;  %v1365_v3 = vadd.f32 %v8878_v1, %v8304_v20  ;;  %v1642_v19 = vmax.bf16 %v11610_v59, %v1514_v58 }
 0x28c   : > { %v8994_v53 = vpop.f32.mrf.mxu0  ;;  %v2248_v9 = vpop.f32.mrf.mxu1 }
 0x28d   : > { %v2491_v39 = vpack.c.bf16 %v2247_v60, %v2244_v16 }
 0x28e   : > { %v2076_v51 = vpop.f32.mrf.mxu0  ;;  %v2251_v41 = vpop.f32.mrf.mxu1  ;;  %2442 = vmatmul.mubr.bf16.gmra.mxu1 %v1633_v49  ;;  %v1361_v49 = vadd.f32 %v8870_v17, %v8304_v20  ;;  %v1518_v17 = vpack.c.bf16 %v1377_v36, %v1373_v10  ;;  %v1982_v36 = vadd.f32 %v8724_v34, %v8959_v15 }
 0x28f   : > { %v2523_v55 = vmax.bf16 %v11610_v59, %v2491_v39  ;;  %2449 = vmatprep.mubr.bf16.mxu1 %v1638_v37  ;;  %v2252_v50 = vadd.f32 %v2251_v41, %v1963_v63  ;;  %v1974_v51 = vadd.f32 %v8694_v54, %v8959_v15 }
 0x290   : > { %v9004_v31 = vpop.f32.mrf.mxu0  ;;  %v2253_v7 = vpop.f32.mrf.mxu1  ;;  %v1513_v39 = vpack.c.bf16 %v1365_v3, %v1361_v49  ;;  %v1646_v54 = vmax.bf16 %v11610_v59, %v1518_v17  ;;  %v1393_v17 = vadd.f32 %v8940_v11, %v8280_v12 }
 0x291   : > { %6610 = vmatmul.mubr.msk.bf16.vlgmr.msra.gmra.mxu0 %vm2587_vm0, %v2523_v55  ;;  %v1375_v7 = vadd.f32 %v8900_v8, %v8304_v20 }
 0x292   : > { %v2079_v45 = vpop.f32.mrf.mxu0  ;;  %v2254_v52 = vpop.f32.mrf.mxu1  ;;  %v1641_v43 = vmax.bf16 %v11610_v59, %v1513_v39 }
 0x293   : > { %v2255_v27 = vadd.f32 %v2254_v52, %v1966_v44  ;;  %v1371_v45 = vadd.f32 %v8892_v48, %v8304_v20 }
 0x294   : > { %v9014_v30 = vpop.f32.mrf.mxu0  ;;  %v2256_v16 = vpop.f32.mrf.mxu1 }
 0x295   : > { %v2492_v60 = vpack.c.bf16 %v2255_v27, %v2252_v50  ;;  %v1383_v27 = vadd.f32 %v8918_v32, %v8280_v12 }
 0x296   : > { %v2084_v22 = vpop.f32.mrf.mxu0  ;;  %v2259_v9 = vpop.f32.mrf.mxu1  ;;  %2450 = vmatmul.mubr.bf16.gmra.mxu1 %v1637_v29  ;;  %v1517_v29 = vpack.c.bf16 %v1375_v7, %v1371_v45 }
 0x297   : > { %v2524_v1 = vmax.bf16 %v11610_v59, %v2492_v60  ;;  %2457 = vmatprep.mubr.bf16.mxu1 %v1642_v19  ;;  %v2260_v55 = vadd.f32 %v2259_v9, %v1971_v40  ;;  %v1522_v48 = vpack.c.bf16 %v1387_v61, %v1383_v27  ;;  %v1385_v9 = vadd.f32 %v8922_v25, %v8304_v20 }
 0x298   : > { %v9024_v37 = vpop.f32.mrf.mxu0  ;;  %v2261_v23 = vpop.f32.mrf.mxu1  ;;  %v1645_v22 = vmax.bf16 %v11610_v59, %v1517_v29  ;;  %v1395_v61 = vadd.f32 %v8944_v38, %v8304_v20  ;;  %v1995_v38 = vadd.f32 %v8771_v18, %v8959_v15 }
 0x299   : > { %6613 = vmatprep.mubr.msk.bf16.mxu0 %vm2587_vm0, %v2524_v1  ;;  %v1650_v34 = vmax.bf16 %v11610_v59, %v1522_v48  ;;  %v1381_v23 = vadd.f32 %v8914_v57, %v8304_v20  ;;  %v1526_v57 = vpack.c.bf16 %v1397_v26, %v1393_v17  ;;  %v2003_v26 = vadd.f32 %v8797_v0, %v8959_v15 }
 0x29a   : > { %v2087_v41 = vpop.f32.mrf.mxu0  ;;  %v2262_v46 = vpop.f32.mrf.mxu1 }
 0x29b   : > { %v2263_v14 = vadd.f32 %v2262_v46, %v1974_v51  ;;  %v1521_v41 = vpack.c.bf16 %v1385_v9, %v1381_v23  ;;  %v1654_v6 = vmax.bf16 %v11610_v59, %v1526_v57 }
 0x29c   : > { %v9034_v63 = vpop.f32.mrf.mxu0  ;;  %v2264_v44 = vpop.f32.mrf.mxu1 }
 0x29d   : > { %v2493_v58 = vpack.c.bf16 %v2263_v14, %v2260_v55  ;;  %v1990_v14 = vadd.f32 %v8754_v24, %v8959_v15  ;;  %v1649_v11 = vmax.bf16 %v11610_v59, %v1521_v41  ;;  %v1391_v24 = vadd.f32 %v8936_v13, %v8304_v20 }
 0x29e   : > { %v2092_v52 = vpop.f32.mrf.mxu0  ;;  %v2267_v50 = vpop.f32.mrf.mxu1  ;;  %2458 = vmatmul.mubr.bf16.gmra.mxu1 %v1641_v43 }
 0x29f   : > { %v2525_v8 = vmax.bf16 %v11610_v59, %v2493_v58  ;;  %2465 = vmatprep.mubr.bf16.mxu1 %v1646_v54  ;;  %v2268_v49 = vadd.f32 %v2267_v50, %v1979_v35  ;;  %v1998_v35 = vadd.f32 %v8784_v42, %v8959_v15 }
 0x2a0   : > { %v9044_v3 = vpop.f32.mrf.mxu0  ;;  %v2269_v16 = vpop.f32.mrf.mxu1 }
 0x2a1   : > { %6614 = vmatmul.mubr.msk.bf16.gmra.mxu0 %vm2587_vm0, %v2525_v8  ;;  %v1525_v8 = vpack.c.bf16 %v1395_v61, %v1391_v24 }
 0x2a2   : > { %v2095_v60 = vpop.f32.mrf.mxu0  ;;  %v2270_v19 = vpop.f32.mrf.mxu1 }
 0x2a3   : > { %v2271_v32 = vadd.f32 %v2270_v19, %v1982_v36  ;;  %v1653_v60 = vmax.bf16 %v11610_v59, %v1525_v8 }
 0x2a4   : > { %v9054_v10 = vpop.f32.mrf.mxu0  ;;  %v2272_v1 = vpop.f32.mrf.mxu1 }
 0x2a5   : > { %v2494_v39 = vpack.c.bf16 %v2271_v32, %v2268_v49 }
 0x2a6   : > { %v2100_v40 = vpop.f32.mrf.mxu0  ;;  %v2275_v51 = vpop.f32.mrf.mxu1  ;;  %2466 = vmatmul.mubr.bf16.gmra.mxu1 %v1645_v22 }
 0x2a7   : > { %v2526_v25 = vmax.bf16 %v11610_v59, %v2494_v39  ;;  %2473 = vmatprep.mubr.bf16.mxu1 %v1650_v34  ;;  %v2276_v44 = vadd.f32 %v2275_v51, %v1987_v28  ;;  %v2006_v39 = vadd.f32 %v8810_v47, %v8959_v15  ;;  %v2011_v47 = vadd.f32 %v8819_v21, %v8959_v15 }
 0x2a8   : > { %v9064_v46 = vpop.f32.mrf.mxu0  ;;  %v2277_v55 = vpop.f32.mrf.mxu1 }
 0x2a9   : > { %6617 = vmatprep.mubr.msk.bf16.mxu0 %vm2587_vm0, %v2526_v25 }
 0x2aa   : > { %v2103_v43 = vpop.f32.mrf.mxu0  ;;  %v2278_v7 = vpop.f32.mrf.mxu1 }
 0x2ab   : > { %v2279_v12 = vadd.f32 %v2278_v7, %v1990_v14  ;;  %v2014_v43 = vadd.f32 %v8832_v5, %v8959_v15  ;;  %v2019_v5 = vadd.f32 %v8841_v33, %v8959_v15 }
 0x2ac   : > { %v9074_v58 = vpop.f32.mrf.mxu0  ;;  %v2280_v54 = vpop.f32.mrf.mxu1 }
 0x2ad   : > { %v2495_v45 = vpack.c.bf16 %v2279_v12, %v2276_v44 }
 0x2ae   : > { %v2108_v52 = vpop.f32.mrf.mxu0  ;;  %v2283_v50 = vpop.f32.mrf.mxu1  ;;  %2474 = vmatmul.mubr.bf16.gmra.mxu1 %v1649_v11 }
 0x2af   : > { %v2527_v27 = vmax.bf16 %v11610_v59, %v2495_v45  ;;  %2481 = vmatprep.mubr.bf16.mxu1 %v1654_v6  ;;  %v2284_v13 = vadd.f32 %v2283_v50, %v1995_v38 }
 0x2b0   : > { %v9080_v29 = vpop.f32.mrf.mxu0  ;;  %v2285_v16 = vpop.f32.mrf.mxu1 }
 0x2b1   : > { %6618 = vmatmul.mubr.msk.bf16.gmra.mxu0 %vm2587_vm0, %v2527_v27  ;;  %v2022_v27 = vadd.f32 %v8854_v56, %v8959_v15 }
 0x2b2   : > { %v2111_v36 = vpop.f32.mrf.mxu0  ;;  %v2286_v20 = vpop.f32.mrf.mxu1 }
 0x2b3   : > { %v2287_v48 = vadd.f32 %v2286_v20, %v1998_v35 }
 0x2b4   : > { %v9088_v19 = vpop.f32.mrf.mxu0  ;;  %v2288_v49 = vpop.f32.mrf.mxu1 }
 0x2b5   : > { %v2496_v32 = vpack.c.bf16 %v2287_v48, %v2284_v13 }
 0x2b6   : > { %v2116_v22 = vpop.f32.mrf.mxu0  ;;  %v2291_v9 = vpop.f32.mrf.mxu1  ;;  %2482 = vmatmul.mubr.bf16.gmra.mxu1 %v1653_v60 }
 0x2b7   : > { %v2528_v18 = vmax.bf16 %v11610_v59, %v2496_v32  ;;  %v2292_v40 = vadd.f32 %v2291_v9, %v2003_v26  ;;  %v11653_v22 = vld [vmem:[#allocation14_spill] sm:$0xff] }
 0x2b8   : > { %v9091_v1 = vpop.f32.mrf.mxu0  ;;  %v2293_v42 = vpop.f32.mrf.mxu1  ;;  %v2027_v56 = vadd.f32 %v11653_v22, %v8959_v15  ;;  %v11654_v9 = vld [vmem:[#allocation18_spill] sm:$0xff] }
 0x2b9   : > { %6621 = vmatprep.mubr.msk.bf16.mxu0 %vm2587_vm0, %v2528_v18  ;;  %v2030_v18 = vadd.f32 %v11654_v9, %v8959_v15 }
 0x2ba   : > { %v2119_v34 = vpop.f32.mrf.mxu0  ;;  %v2294_v23 = vpop.f32.mrf.mxu1 }
 0x2bb   : > { %v2295_v51 = vadd.f32 %v2294_v23, %v2006_v39 }
 0x2bc   : > { %v9098_v17 = vpop.f32.mrf.mxu0  ;;  %v2296_v25 = vpop.f32.mrf.mxu1 }
 0x2bd   : > { %v2497_v41 = vpack.c.bf16 %v2295_v51, %v2292_v40 }
 0x2be   : > { %v2124_v55 = vpop.f32.mrf.mxu0  ;;  %v2299_v28 = vpop.f32.mrf.mxu1 }
 0x2bf   : > { %v2529_v14 = vmax.bf16 %v11610_v59, %v2497_v41  ;;  %v2300_v12 = vadd.f32 %v2299_v28, %v2011_v47 }
 0x2c0   : > { %v9101_v57 = vpop.f32.mrf.mxu0  ;;  %v2301_v0 = vpop.f32.mrf.mxu1 }
 0x2c1   : > { %6622 = vmatmul.mubr.msk.bf16.gmra.mxu0 %vm2587_vm0, %v2529_v14  ;;  %v11655_v0 = vld [vmem:[#allocation17_spill] sm:$0xff] }
 0x2c2   : > { %v2127_v7 = vpop.f32.mrf.mxu0  ;;  %v2302_v44 = vpop.f32.mrf.mxu1  ;;  %v2035_v47 = vadd.f32 %v11655_v0, %v8959_v15 }
 0x2c3   : > { %v2303_v11 = vadd.f32 %v2302_v44, %v2014_v43  ;;  %v11656_v43 = vld [vmem:[#allocation16_spill] sm:$0xff] }
 0x2c4   : > { %v9108_v61 = vpop.f32.mrf.mxu0  ;;  %v2304_v54 = vpop.f32.mrf.mxu1  ;;  %v2038_v7 = vadd.f32 %v11656_v43, %v8959_v15 }
 0x2c5   : > { %v2498_v45 = vpack.c.bf16 %v2303_v11, %v2300_v12 }
 0x2c6   : > { %v2132_v6 = vpop.f32.mrf.mxu0  ;;  %v2307_v24 = vpop.f32.mrf.mxu1 }
 0x2c7   : > { %v2530_v52 = vmax.bf16 %v11610_v59, %v2498_v45  ;;  %v2308_v38 = vadd.f32 %v2307_v24, %v2019_v5 }
 0x2c8   : > { %v9111_v50 = vpop.f32.mrf.mxu0  ;;  %v2309_v21 = vpop.f32.mrf.mxu1 }
 0x2c9   : > { %6625 = vmatprep.mubr.msk.bf16.mxu0 %vm2587_vm0, %v2530_v52 }
 0x2ca   : > { %v2135_v8 = vpop.f32.mrf.mxu0  ;;  %v2310_v16 = vpop.f32.mrf.mxu1 }
 0x2cb   : > { %v2311_v35 = vadd.f32 %v2310_v16, %v2022_v27  ;;  %v11657_v16 = vld [vmem:[#allocation15_spill] sm:$0xff] }
 0x2cc   : > { %v9118_v36 = vpop.f32.mrf.mxu0  ;;  %v2312_v20 = vpop.f32.mrf.mxu1 }
 0x2cd   : > { %v2499_v13 = vpack.c.bf16 %v2311_v35, %v2308_v38  ;;  %v2043_v38 = vadd.f32 %v11657_v16, %v8959_v15  ;;  %v11658_v35 = vld [vmem:[#allocation22_spill] sm:$0xff] }
 0x2ce   : > { %v2140_v48 = vpop.f32.mrf.mxu0  ;;  %v2315_v60 = vpop.f32.mrf.mxu1  ;;  %v2046_v20 = vadd.f32 %v11658_v35, %v8959_v15 }
 0x2cf   : > { %v2531_v49 = vmax.bf16 %v11610_v59, %v2499_v13  ;;  %v2316_v39 = vadd.f32 %v2315_v60, %v2027_v56 }
 0x2d0   : > { %v9121_v32 = vpop.f32.mrf.mxu0  ;;  %v2317_v33 = vpop.f32.mrf.mxu1 }
 0x2d1   : > { %6626 = vmatmul.mubr.msk.bf16.gmra.mxu0 %vm2587_vm0, %v2531_v49 }
 0x2d2   : > { %v2143_v42 = vpop.f32.mrf.mxu0  ;;  %v2318_v26 = vpop.f32.mrf.mxu1 }
 0x2d3   : > { %v2319_v34 = vadd.f32 %v2318_v26, %v2030_v18 }
 0x2d4   : > { %v9128_v23 = vpop.f32.mrf.mxu0  ;;  %v2320_v40 = vpop.f32.mrf.mxu1 }
 0x2d5   : > { %v2500_v51 = vpack.c.bf16 %v2319_v34, %v2316_v39  ;;  %v11659_v34 = vld [vmem:[#allocation21_spill] sm:$0xff] }
 0x2d6   : > { %v2148_v25 = vpop.f32.mrf.mxu0  ;;  %v2323_v41 = vpop.f32.mrf.mxu1  ;;  %v2051_v40 = vadd.f32 %v11659_v34, %v8959_v15 }
 0x2d7   : > { %v2532_v55 = vmax.bf16 %v11610_v59, %v2500_v51  ;;  %v2324_v11 = vadd.f32 %v2323_v41, %v2035_v47  ;;  %v11660_v51 = vld [vmem:[#allocation20_spill] sm:$0xff] }
 0x2d8   : > { %v9131_v28 = vpop.f32.mrf.mxu0  ;;  %v2325_v14 = vpop.f32.mrf.mxu1  ;;  %v2054_v25 = vadd.f32 %v11660_v51, %v8959_v15 }
 0x2d9   : > { %6629 = vmatprep.mubr.msk.bf16.mxu0 %vm2587_vm0, %v2532_v55 }
 0x2da   : > { %v2151_v44 = vpop.f32.mrf.mxu0  ;;  %v2326_v12 = vpop.f32.mrf.mxu1 }
 0x2db   : > { %v2327_v54 = vadd.f32 %v2326_v12, %v2038_v7 }
 0x2dc   : > { %v9138_v45 = vpop.f32.mrf.mxu0  ;;  %v2328_v6 = vpop.f32.mrf.mxu1 }
 0x2dd   : > { %v2501_v24 = vpack.c.bf16 %v2327_v54, %v2324_v11 }
 0x2de   : > { %v2156_v52 = vpop.f32.mrf.mxu0  ;;  %v2331_v21 = vpop.f32.mrf.mxu1 }
 0x2df   : > { %v2533_v5 = vmax.bf16 %v11610_v59, %v2501_v24  ;;  %v2332_v60 = vadd.f32 %v2331_v21, %v2043_v38  ;;  %v11661_v24 = vld [vmem:[#allocation19_spill] sm:$0xff]  ;;  %v2062_v21 = vadd.f32 %v8965_v4, %v8959_v15  ;;  %v2067_v4 = vadd.f32 %v8974_v62, %v8959_v15 }
 0x2e0   : > { %v9141_v27 = vpop.f32.mrf.mxu0  ;;  %v2333_v8 = vpop.f32.mrf.mxu1  ;;  %v2059_v52 = vadd.f32 %v11661_v24, %v8959_v15 }
 0x2e1   : > { %6630 = vmatmul.mubr.msk.bf16.gmra.mxu0 %vm2587_vm0, %v2533_v5 }
 0x2e2   : > { %v2159_v13 = vpop.f32.mrf.mxu0  ;;  %v2334_v48 = vpop.f32.mrf.mxu1 }
 0x2e3   : > { %v2335_v49 = vadd.f32 %v2334_v48, %v2046_v20 }
 0x2e4   : > { %v9148_v33 = vpop.f32.mrf.mxu0  ;;  %v2336_v22 = vpop.f32.mrf.mxu1 }
 0x2e5   : > { %v2502_v56 = vpack.c.bf16 %v2335_v49, %v2332_v60 }
 0x2e6   : > { %v2164_v9 = vpop.f32.mrf.mxu0  ;;  %v2339_v18 = vpop.f32.mrf.mxu1 }
 0x2e7   : > { %v2534_v42 = vmax.bf16 %v11610_v59, %v2502_v56  ;;  %v2340_v14 = vadd.f32 %v2339_v18, %v2051_v40  ;;  %v2070_v9 = vadd.f32 %v8984_v2, %v8959_v15  ;;  %v2075_v2 = vadd.f32 %v8994_v53, %v8959_v15 }
 0x2e8   : > { %v9151_v26 = vpop.f32.mrf.mxu0  ;;  %v2341_v39 = vpop.f32.mrf.mxu1 }
 0x2e9   : > { %6633 = vmatprep.mubr.msk.bf16.mxu0 %vm2587_vm0, %v2534_v42 }
 0x2ea   : > { %v2167_v41 = vpop.f32.mrf.mxu0  ;;  %v2342_v55 = vpop.f32.mrf.mxu1 }
 0x2eb   : > { %v2343_v0 = vadd.f32 %v2342_v55, %v2054_v25 }
 0x2ec   : > { %v9158_v47 = vpop.f32.mrf.mxu0  ;;  %v2344_v43 = vpop.f32.mrf.mxu1 }
 0x2ed   : > { %v2503_v7 = vpack.c.bf16 %v2343_v0, %v2340_v14  ;;  %v2078_v43 = vadd.f32 %v9004_v31, %v8959_v15  ;;  %v2083_v31 = vadd.f32 %v9014_v30, %v8959_v15  ;;  %v2094_v30 = vadd.f32 %v9044_v3, %v8959_v15 }
 0x2ee   : > { %v2172_v44 = vpop.f32.mrf.mxu0  ;;  %v2347_v12 = vpop.f32.mrf.mxu1 }
 0x2ef   : > { %v2535_v11 = vmax.bf16 %v11610_v59, %v2503_v7  ;;  %v2348_v16 = vadd.f32 %v2347_v12, %v2059_v52 }
 0x2f0   : > { %v9161_v54 = vpop.f32.mrf.mxu0  ;;  %v2349_v6 = vpop.f32.mrf.mxu1 }
 0x2f1   : > { %6634 = vmatmul.mubr.msk.bf16.gmra.mxu0 %vm2587_vm0, %v2535_v11 }
 0x2f2   : > { %v2175_v5 = vpop.f32.mrf.mxu0  ;;  %v2350_v8 = vpop.f32.mrf.mxu1 }
 0x2f3   : > { %v2351_v38 = vadd.f32 %v2350_v8, %v2062_v21 }
 0x2f4   : > { %v9168_v35 = vpop.f32.mrf.mxu0  ;;  %v2352_v20 = vpop.f32.mrf.mxu1 }
 0x2f5   : > { %v2504_v13 = vpack.c.bf16 %v2351_v38, %v2348_v16  ;;  %v2086_v38 = vadd.f32 %v9024_v37, %v8959_v15 }
 0x2f6   : > { %v2180_v48 = vpop.f32.mrf.mxu0  ;;  %v2355_v60 = vpop.f32.mrf.mxu1 }
 0x2f7   : > { %v2536_v49 = vmax.bf16 %v11610_v59, %v2504_v13  ;;  %v2356_v39 = vadd.f32 %v2355_v60, %v2067_v4 }
 0x2f8   : > { %v9171_v22 = vpop.f32.mrf.mxu0  ;;  %v2357_v56 = vpop.f32.mrf.mxu1 }
 0x2f9   : > { %6637 = vmatprep.mubr.msk.bf16.mxu0 %vm2587_vm0, %v2536_v49 }
 0x2fa   : > { %v2183_v18 = vpop.f32.mrf.mxu0  ;;  %v2358_v42 = vpop.f32.mrf.mxu1 }
 0x2fb   : > { %v2359_v34 = vadd.f32 %v2358_v42, %v2070_v9  ;;  %v2091_v42 = vadd.f32 %v9034_v63, %v8959_v15  ;;  %v2102_v63 = vadd.f32 %v9064_v46, %v8959_v15 }
 0x2fc   : > { %v9178_v40 = vpop.f32.mrf.mxu0  ;;  %v2360_v51 = vpop.f32.mrf.mxu1 }
 0x2fd   : > { %v2505_v25 = vpack.c.bf16 %v2359_v34, %v2356_v39 }
 0x2fe   : > { %v2188_v41 = vpop.f32.mrf.mxu0  ;;  %v2363_v55 = vpop.f32.mrf.mxu1 }
 0x2ff   : > { %v2537_v14 = vmax.bf16 %v11610_v59, %v2505_v25  ;;  %v2364_v12 = vadd.f32 %v2363_v55, %v2075_v2 }
 0x300   : > { %v9181_v0 = vpop.f32.mrf.mxu0  ;;  %v2365_v62 = vpop.f32.mrf.mxu1 }
 0x301   : > { %6638 = vmatmul.mubr.msk.bf16.gmra.mxu0 %vm2587_vm0, %v2537_v14  ;;  %v2099_v62 = vadd.f32 %v9054_v10, %v8959_v15  ;;  %v2110_v10 = vadd.f32 %v9080_v29, %v8959_v15 }
 0x302   : > { %v2191_v7 = vpop.f32.mrf.mxu0  ;;  %v2366_v44 = vpop.f32.mrf.mxu1 }
 0x303   : > { %v2367_v11 = vadd.f32 %v2366_v44, %v2078_v43 }
 0x304   : > { %v9188_v6 = vpop.f32.mrf.mxu0  ;;  %v2368_v24 = vpop.f32.mrf.mxu1 }
 0x305   : > { %v2506_v52 = vpack.c.bf16 %v2367_v11, %v2364_v12 }
 0x306   : > { %v2196_v21 = vpop.f32.mrf.mxu0  ;;  %v2371_v5 = vpop.f32.mrf.mxu1 }
 0x307   : > { %v2538_v8 = vmax.bf16 %v11610_v59, %v2506_v52  ;;  %v2372_v48 = vadd.f32 %v2371_v5, %v2083_v31  ;;  %v2107_v52 = vadd.f32 %v9074_v58, %v8959_v15  ;;  %v2118_v58 = vadd.f32 %v9091_v1, %v8959_v15 }
 0x308   : > { %v9191_v16 = vpop.f32.mrf.mxu0  ;;  %v2373_v53 = vpop.f32.mrf.mxu1 }
 0x309   : > { %6641 = vmatprep.mubr.msk.bf16.mxu0 %vm2587_vm0, %v2538_v8 }
 0x30a   : > { %v2199_v20 = vpop.f32.mrf.mxu0  ;;  %v2374_v13 = vpop.f32.mrf.mxu1 }
 0x30b   : > { %v2375_v60 = vadd.f32 %v2374_v13, %v2086_v38  ;;  %v2115_v13 = vadd.f32 %v9088_v19, %v8959_v15  ;;  %v2126_v19 = vadd.f32 %v9101_v57, %v8959_v15 }
 0x30c   : > { %v2376_v49 = vpop.f32.mrf.mxu1 }
 0x30d   : > { %v2507_v56 = vpack.c.bf16 %v2375_v60, %v2372_v48 }
 0x30e   : > { %v2379_v4 = vpop.f32.mrf.mxu1 }
 0x30f   : > { %v2539_v9 = vmax.bf16 %v11610_v59, %v2507_v56  ;;  %v2380_v39 = vadd.f32 %v2379_v4, %v2091_v42  ;;  %v2123_v42 = vadd.f32 %v9098_v17, %v8959_v15  ;;  %v2134_v17 = vadd.f32 %v9111_v50, %v8959_v15 }
 0x310   : > { %v2381_v18 = vpop.f32.mrf.mxu1 }
 0x311   : > { %6642 = vmatmul.mubr.msk.bf16.gmra.mxu0 %vm2587_vm0, %v2539_v9 }
 0x312   : > { %v2382_v37 = vpop.f32.mrf.mxu1 }
 0x313   : > { %v2383_v34 = vadd.f32 %v2382_v37, %v2094_v30 }
 0x314   : > { %v2384_v51 = vpop.f32.mrf.mxu1 }
 0x315   : > { %v2508_v25 = vpack.c.bf16 %v2383_v34, %v2380_v39 }
 0x316   : > { %v2387_v41 = vpop.f32.mrf.mxu1 }
 0x317   : > { %v2540_v55 = vmax.bf16 %v11610_v59, %v2508_v25  ;;  %v2388_v2 = vadd.f32 %v2387_v41, %v2099_v62 }
 0x318   : > { %v2389_v14 = vpop.f32.mrf.mxu1 }
 0x319   : > { %6645 = vmatprep.mubr.msk.bf16.mxu0 %vm2587_vm0, %v2540_v55  ;;  %v2131_v55 = vadd.f32 %v9108_v61, %v8959_v15  ;;  %v2142_v61 = vadd.f32 %v9121_v32, %v8959_v15 }
 0x31a   : > { %v2390_v3 = vpop.f32.mrf.mxu1 }
 0x31b   : > { %v2391_v43 = vadd.f32 %v2390_v3, %v2102_v63 }
 0x31c   : > { %v2392_v7 = vpop.f32.mrf.mxu1 }
 0x31d   : > { %v2509_v44 = vpack.c.bf16 %v2391_v43, %v2388_v2 }
 0x31e   : > { %v2395_v12 = vpop.f32.mrf.mxu1 }
 0x31f   : > { %v2541_v11 = vmax.bf16 %v11610_v59, %v2509_v44  ;;  %v2396_v21 = vadd.f32 %v2395_v12, %v2107_v52  ;;  %v2139_v44 = vadd.f32 %v9118_v36, %v8959_v15  ;;  %v2150_v36 = vadd.f32 %v9131_v28, %v8959_v15 }
 0x320   : > { %v2397_v24 = vpop.f32.mrf.mxu1 }
 0x321   : > { %6646 = vmatmul.mubr.msk.bf16.gmra.mxu0 %vm2587_vm0, %v2541_v11 }
 0x322   : > { %v2398_v46 = vpop.f32.mrf.mxu1 }
 0x323   : > { %v2399_v5 = vadd.f32 %v2398_v46, %v2110_v10 }
 0x324   : > { %v2400_v8 = vpop.f32.mrf.mxu1 }
 0x325   : > { %v2510_v53 = vpack.c.bf16 %v2399_v5, %v2396_v21  ;;  %v2147_v5 = vadd.f32 %v9128_v23, %v8959_v15  ;;  %v2158_v23 = vadd.f32 %v9141_v27, %v8959_v15 }
 0x326   : > { %v2403_v31 = vpop.f32.mrf.mxu1 }
 0x327   : > { %v2542_v38 = vmax.bf16 %v11610_v59, %v2510_v53  ;;  %v2404_v48 = vadd.f32 %v2403_v31, %v2115_v13 }
 0x328   : > { %v2405_v20 = vpop.f32.mrf.mxu1 }
 0x329   : > { %6649 = vmatprep.mubr.msk.bf16.mxu0 %vm2587_vm0, %v2542_v38 }
 0x32a   : > { %v2406_v29 = vpop.f32.mrf.mxu1 }
 0x32b   : > { %v2407_v60 = vadd.f32 %v2406_v29, %v2118_v58  ;;  %v2155_v29 = vadd.f32 %v9138_v45, %v8959_v15 }
 0x32c   : > { %v2408_v49 = vpop.f32.mrf.mxu1 }
 0x32d   : > { %v2511_v56 = vpack.c.bf16 %v2407_v60, %v2404_v48 }
 0x32e   : > { %v2411_v4 = vpop.f32.mrf.mxu1 }
 0x32f   : > { %v2543_v9 = vmax.bf16 %v11610_v59, %v2511_v56  ;;  %v2412_v30 = vadd.f32 %v2411_v4, %v2123_v42  ;;  %v9255_v4 = vld [vmem:[%s11545_s8 + $0x2] ss:$0 sm:$0xff] }
 0x330   : > { %v2413_v18 = vpop.f32.mrf.mxu1 }
 0x331   : > { %6650 = vmatmul.mubr.msk.bf16.gmra.mxu0 %vm2587_vm0, %v2543_v9 }
 0x332   : > { %v2414_v1 = vpop.f32.mrf.mxu1 }
 0x333   : > { %v2415_v37 = vadd.f32 %v2414_v1, %v2126_v19 }
 0x334   : > { %v2416_v39 = vpop.f32.mrf.mxu1 }
 0x335   : > { %v2512_v34 = vpack.c.bf16 %v2415_v37, %v2412_v30 }
 0x336   : > { %v2419_v51 = vpop.f32.mrf.mxu1 }
 0x337   : > { %v2544_v25 = vmax.bf16 %v11610_v59, %v2512_v34  ;;  %v2420_v14 = vadd.f32 %v2419_v51, %v2131_v55  ;;  %v2163_v51 = vadd.f32 %v9148_v33, %v8959_v15 }
 0x338   : > { %v2421_v41 = vpop.f32.mrf.mxu1 }
 0x339   : > { %6653 = vmatprep.mubr.msk.bf16.mxu0 %vm2587_vm0, %v2544_v25  ;;  %v2166_v25 = vadd.f32 %v9151_v26, %v8959_v15 }
 0x33a   : > { %v2422_v57 = vpop.f32.mrf.mxu1 }
 0x33b   : > { %v2423_v62 = vadd.f32 %v2422_v57, %v2134_v17  ;;  %v6980_v57 = vld [vmem:[#allocation5] sm:$0xff]  }
 0x33c   : > { %v2424_v63 = vpop.f32.mrf.mxu1  ;;  %6739 = vmatprep.subr.bf16.mxu0 %v6980_v57 }
 0x33d   : > { %v2513_v3 = vpack.c.bf16 %v2423_v62, %v2420_v14  ;;  %6740 = vmatpush3.bf16.msra.mxu0 %v6980_v57  ;;  %v7165_v57 = vld [vmem:[%s11545_s8 + $0x1] ss:$0 sm:$0xff] }
 0x33e   : > { %v2427_v2 = vpop.f32.mrf.mxu1 }
 0x33f   : > { %v2545_v43 = vmax.bf16 %v11610_v59, %v2513_v3  ;;  %v2428_v12 = vadd.f32 %v2427_v2, %v2139_v44  ;;  %v2171_v44 = vadd.f32 %v9158_v47, %v8959_v15 }
 0x340   : > { %v2429_v7 = vpop.f32.mrf.mxu1 }
 0x341   : > { %6654 = vmatmul.mubr.msk.bf16.gmra.mxu0 %vm2587_vm0, %v2545_v43 }
 0x342   : > { %v2430_v50 = vpop.f32.mrf.mxu1 }
 0x343   : > { %v2431_v11 = vadd.f32 %v2430_v50, %v2142_v61  ;;  %v2174_v61 = vadd.f32 %v9161_v54, %v8959_v15 }
 0x344   : > { %v2432_v24 = vpop.f32.mrf.mxu1 }
 0x345   : > { %v2514_v52 = vpack.c.bf16 %v2431_v11, %v2428_v12 }
 0x346   : > { %v2435_v10 = vpop.f32.mrf.mxu1 }
 0x347   : > { %v2546_v46 = vmax.bf16 %v11610_v59, %v2514_v52  ;;  %v2436_v8 = vadd.f32 %v2435_v10, %v2147_v5 }
 0x348   : > { %v2437_v21 = vpop.f32.mrf.mxu1 }
 0x349   : > { %6657 = vmatprep.mubr.msk.bf16.mxu0 %vm2587_vm0, %v2546_v46 }
 0x34a   : > { %v2438_v32 = vpop.f32.mrf.mxu1 }
 0x34b   : > { %v2439_v53 = vadd.f32 %v2438_v32, %v2150_v36 }
 0x34c   : > { %v2440_v31 = vpop.f32.mrf.mxu1 }
 0x34d   : > { %v2515_v38 = vpack.c.bf16 %v2439_v53, %v2436_v8 }
 0x34e   : > { %v2443_v20 = vpop.f32.mrf.mxu1 }
 0x34f   : > { %v2547_v13 = vmax.bf16 %v11610_v59, %v2515_v38  ;;  %v2444_v60 = vadd.f32 %v2443_v20, %v2155_v29  ;;  %v2179_v38 = vadd.f32 %v9168_v35, %v8959_v15  ;;  %v2182_v20 = vadd.f32 %v9171_v22, %v8959_v15 }
 0x350   : > { %v2445_v58 = vpop.f32.mrf.mxu1 }
 0x351   : > { %v6611_v48 = vpop.f32.mrf.mxu0  ;;  %6658 = vmatmul.mubr.msk.bf16.gmra.mxu0 %vm2587_vm0, %v2547_v13 }
 0x352   : > { %v2446_v28 = vpop.f32.mrf.mxu1  ;;  %v2727_v27 = vadd.f32 %v6611_v48, %v9255_v4 }
 0x353   : > { %v2447_v49 = vadd.f32 %v2446_v28, %v2158_v23  ;;  %v2718_v56 = vpop.f32.mrf.mxu0 }
 0x354   : > { %v2448_v9 = vpop.f32.mrf.mxu1  ;;  %v2719_v37 = vadd.f32 %v2718_v56, %v9255_v4 }
 0x355   : > { %v2516_v18 = vpack.c.bf16 %v2447_v49, %v2444_v60  ;;  %v6612_v42 = vpop.f32.mrf.mxu0 }
 0x356   : > { %v2730_v45 = vadd.f32 %v6612_v42, %v9255_v4  ;;  %v2451_v19 = vpop.f32.mrf.mxu1  ;;  %v2190_v42 = vadd.f32 %v9181_v0, %v8959_v15 }
 0x357   : > { %v2548_v1 = vmax.bf16 %v11610_v59, %v2516_v18  ;;  %v2721_v30 = vpop.f32.mrf.mxu0  ;;  %v2452_v14 = vadd.f32 %v2451_v19, %v2163_v51  ;;  %v2187_v18 = vadd.f32 %v9178_v40, %v8959_v15 }
 0x358   : > { %v2722_v39 = vadd.f32 %v2721_v30, %v9255_v4  ;;  %v2453_v34 = vpop.f32.mrf.mxu1  ;;  %v2974_v41 = vpack.c.bf16 %v2730_v45, %v2727_v27 }
 0x359   : > { %6661 = vmatprep.mubr.msk.bf16.mxu0 %vm2587_vm0, %v2548_v1 }
 0x35a   : > { %v2973_v55 = vpack.c.bf16 %v2722_v39, %v2719_v37  ;;  %v2454_v17 = vpop.f32.mrf.mxu1  ;;  %v3006_v2 = vmax.bf16 %v11610_v59, %v2974_v41 }
 0x35b   : > { %v2455_v62 = vadd.f32 %v2454_v17, %v2166_v25 }
 0x35c   : > { %v3005_v63 = vmax.bf16 %v11610_v59, %v2973_v55  ;;  %v2456_v3 = vpop.f32.mrf.mxu1 }
 0x35d   : > { %v2517_v43 = vpack.c.bf16 %v2455_v62, %v2452_v14  ;;  %v2195_v14 = vadd.f32 %v7165_v57, %v9188_v6  ;;  %v2198_v62 = vadd.f32 %v7165_v57, %v9191_v16 }
 0x35e   : > { %v2459_v33 = vpop.f32.mrf.mxu1  ;;  %6675 = vmatprep.mubr.msk.bf16.mxu1 %vm3046_vm1, %v3005_v63 }
 0x35f   : > { %v2549_v26 = vmax.bf16 %v11610_v59, %v2517_v43  ;;  %6676 = vmatmul.mubr.msk.bf16.vlgmr.msra.gmra.mxu1 %vm3046_vm1, %v3006_v2  ;;  %v2460_v11 = vadd.f32 %v2459_v33, %v2171_v44 }
 0x360   : > { %v2461_v7 = vpop.f32.mrf.mxu1 }
 0x361   : > { %v6615_v50 = vpop.f32.mrf.mxu0  ;;  %6662 = vmatmul.mubr.msk.bf16.gmra.mxu0 %vm2587_vm0, %v2549_v26 }
 0x362   : > { %v2462_v12 = vpop.f32.mrf.mxu1  ;;  %v2743_v32 = vadd.f32 %v6615_v50, %v9255_v4 }
 0x363   : > { %v2463_v24 = vadd.f32 %v2462_v12, %v2174_v61  ;;  %v2734_v52 = vpop.f32.mrf.mxu0 }
 0x364   : > { %v2464_v10 = vpop.f32.mrf.mxu1  ;;  %v2735_v54 = vadd.f32 %v2734_v52, %v9255_v4 }
 0x365   : > { %v2518_v46 = vpack.c.bf16 %v2463_v24, %v2460_v11  ;;  %v6616_v21 = vpop.f32.mrf.mxu0 }
 0x366   : > { %v2746_v5 = vadd.f32 %v6616_v21, %v9255_v4  ;;  %v2467_v36 = vpop.f32.mrf.mxu1 }
 0x367   : > { %v2550_v47 = vmax.bf16 %v11610_v59, %v2518_v46  ;;  %v2737_v8 = vpop.f32.mrf.mxu0  ;;  %v2468_v23 = vadd.f32 %v2467_v36, %v2179_v38 }
 0x368   : > { %v2738_v53 = vadd.f32 %v2737_v8, %v9255_v4  ;;  %v2469_v31 = vpop.f32.mrf.mxu1  ;;  %v2976_v13 = vpack.c.bf16 %v2746_v5, %v2743_v32 }
 0x369   : > { %6665 = vmatprep.mubr.msk.bf16.mxu0 %vm2587_vm0, %v2550_v47 }
 0x36a   : > { %v2975_v58 = vpack.c.bf16 %v2738_v53, %v2735_v54  ;;  %v2470_v29 = vpop.f32.mrf.mxu1  ;;  %v3008_v49 = vmax.bf16 %v11610_v59, %v2976_v13 }
 0x36b   : > { %v2471_v48 = vadd.f32 %v2470_v29, %v2182_v20 }
 0x36c   : > { %v3007_v28 = vmax.bf16 %v11610_v59, %v2975_v58  ;;  %v2472_v60 = vpop.f32.mrf.mxu1 }
 0x36d   : > { %v2519_v56 = vpack.c.bf16 %v2471_v48, %v2468_v23 }
 0x36e   : > { %v2475_v9 = vpop.f32.mrf.mxu1  ;;  %6679 = vmatprep.mubr.msk.bf16.mxu1 %vm3046_vm1, %v3007_v28 }
 0x36f   : > { %v2551_v35 = vmax.bf16 %v11610_v59, %v2519_v56  ;;  %6680 = vmatmul.mubr.msk.bf16.gmra.mxu1 %vm3046_vm1, %v3008_v49  ;;  %v2476_v27 = vadd.f32 %v2475_v9, %v2187_v18 }
 0x370   : > { %v2477_v22 = vpop.f32.mrf.mxu1 }
 0x371   : > { %v6619_v45 = vpop.f32.mrf.mxu0  ;;  %6666 = vmatmul.mubr.msk.bf16.gmra.mxu0 %vm2587_vm0, %v2551_v35 }
 0x372   : > { %v2478_v19 = vpop.f32.mrf.mxu1  ;;  %v2759_v41 = vadd.f32 %v6619_v45, %v9255_v4 }
 0x373   : > { %v2479_v1 = vadd.f32 %v2478_v19, %v2190_v42  ;;  %v2750_v30 = vpop.f32.mrf.mxu0 }
 0x374   : > { %v2480_v37 = vpop.f32.mrf.mxu1  ;;  %v2751_v15 = vadd.f32 %v2750_v30, %v9255_v4 }
 0x375   : > { %v2520_v39 = vpack.c.bf16 %v2479_v1, %v2476_v27  ;;  %v6620_v34 = vpop.f32.mrf.mxu0 }
 0x376   : > { %v2762_v51 = vadd.f32 %v6620_v34, %v9255_v4  ;;  %v2483_v25 = vpop.f32.mrf.mxu1 }
 0x377   : > { %v2552_v40 = vmax.bf16 %v11610_v59, %v2520_v39  ;;  %v2753_v55 = vpop.f32.mrf.mxu0  ;;  %v2484_v43 = vadd.f32 %v2483_v25, %v2195_v14 }
 0x378   : > { %v2754_v0 = vadd.f32 %v2753_v55, %v9255_v4  ;;  %v2485_v17 = vpop.f32.mrf.mxu1  ;;  %v2978_v63 = vpack.c.bf16 %v2762_v51, %v2759_v41 }
 0x379   : > { %6669 = vmatprep.mubr.msk.bf16.mxu0 %vm2587_vm0, %v2552_v40 }
 0x37a   : > { %v2977_v3 = vpack.c.bf16 %v2754_v0, %v2751_v15  ;;  %v2486_v2 = vpop.f32.mrf.mxu1  ;;  %v3010_v44 = vmax.bf16 %v11610_v59, %v2978_v63 }
 0x37b   : > { %v2487_v33 = vadd.f32 %v2486_v2, %v2198_v62 }
 0x37c   : > { %v3009_v26 = vmax.bf16 %v11610_v59, %v2977_v3  ;;  %v2488_v7 = vpop.f32.mrf.mxu1 }
 0x37d   : > { %v2521_v61 = vpack.c.bf16 %v2487_v33, %v2484_v43 }
 0x37e   : > { %6683 = vmatprep.mubr.msk.bf16.mxu1 %vm3046_vm1, %v3009_v26 }
 0x37f   : > { %v2553_v50 = vmax.bf16 %v11610_v59, %v2521_v61  ;;  %6684 = vmatmul.mubr.msk.bf16.gmra.mxu1 %vm3046_vm1, %v3010_v44 }
 0x381   : > { %v6623_v6 = vpop.f32.mrf.mxu0  ;;  %6670 = vmatmul.mubr.msk.bf16.gmra.mxu0 %vm2587_vm0, %v2553_v50 }
 0x382   : > { %v2775_v24 = vadd.f32 %v6623_v6, %v9255_v4 }
 0x383   : > { %v2766_v16 = vpop.f32.mrf.mxu0 }
 0x384   : > { %v2767_v10 = vadd.f32 %v2766_v16, %v9255_v4 }
 0x385   : > { %v6624_v12 = vpop.f32.mrf.mxu0 }
 0x386   : > { %v2778_v11 = vadd.f32 %v6624_v12, %v9255_v4 }
 0x387   : > { %v2769_v52 = vpop.f32.mrf.mxu0 }
 0x388   : > { %v2770_v46 = vadd.f32 %v2769_v52, %v9255_v4  ;;  %v2980_v21 = vpack.c.bf16 %v2778_v11, %v2775_v24 }
 0x38a   : > { %v2979_v5 = vpack.c.bf16 %v2770_v46, %v2767_v10  ;;  %v3012_v32 = vmax.bf16 %v11610_v59, %v2980_v21 }
 0x38c   : > { %v3011_v36 = vmax.bf16 %v11610_v59, %v2979_v5 }
 0x38e   : > { %6687 = vmatprep.mubr.msk.bf16.mxu1 %vm3046_vm1, %v3011_v36 }
 0x38f   : > { %6688 = vmatmul.mubr.msk.bf16.gmra.mxu1 %vm3046_vm1, %v3012_v32 }
 0x391   : > { %v6627_v47 = vpop.f32.mrf.mxu0 }
 0x392   : > { %v2791_v31 = vadd.f32 %v6627_v47, %v9255_v4 }
 0x393   : > { %v2782_v8 = vpop.f32.mrf.mxu0 }
 0x394   : > { %v2783_v20 = vadd.f32 %v2782_v8, %v9255_v4 }
 0x395   : > { %v6628_v54 = vpop.f32.mrf.mxu0 }
 0x396   : > { %v2794_v53 = vadd.f32 %v6628_v54, %v9255_v4 }
 0x397   : > { %v2785_v38 = vpop.f32.mrf.mxu0 }
 0x398   : > { %v2786_v13 = vadd.f32 %v2785_v38, %v9255_v4  ;;  %v2982_v58 = vpack.c.bf16 %v2794_v53, %v2791_v31 }
 0x39a   : > { %v2981_v29 = vpack.c.bf16 %v2786_v13, %v2783_v20  ;;  %v3014_v48 = vmax.bf16 %v11610_v59, %v2982_v58 }
 0x39c   : > { %v3013_v23 = vmax.bf16 %v11610_v59, %v2981_v29 }
 0x39e   : > { %6691 = vmatprep.mubr.msk.bf16.mxu1 %vm3046_vm1, %v3013_v23 }
 0x39f   : > { %6692 = vmatmul.mubr.msk.bf16.gmra.mxu1 %vm3046_vm1, %v3014_v48 }
 0x3a1   : > { %v6631_v28 = vpop.f32.mrf.mxu0 }
 0x3a2   : > { %v2807_v9 = vadd.f32 %v6631_v28, %v9255_v4 }
 0x3a3   : > { %v2798_v60 = vpop.f32.mrf.mxu0 }
 0x3a4   : > { %v2799_v22 = vadd.f32 %v2798_v60, %v9255_v4 }
 0x3a5   : > { %v6632_v49 = vpop.f32.mrf.mxu0 }
 0x3a6   : > { %v2810_v56 = vadd.f32 %v6632_v49, %v9255_v4 }
 0x3a7   : > { %v2801_v35 = vpop.f32.mrf.mxu0 }
 0x3a8   : > { %v2802_v18 = vadd.f32 %v2801_v35, %v9255_v4  ;;  %v2984_v42 = vpack.c.bf16 %v2810_v56, %v2807_v9 }
 0x3aa   : > { %v2983_v45 = vpack.c.bf16 %v2802_v18, %v2799_v22  ;;  %v3016_v27 = vmax.bf16 %v11610_v59, %v2984_v42 }
 0x3ac   : > { %v3015_v19 = vmax.bf16 %v11610_v59, %v2983_v45 }
 0x3ae   : > { %6695 = vmatprep.mubr.msk.bf16.mxu1 %vm3046_vm1, %v3015_v19 }
 0x3af   : > { %6696 = vmatmul.mubr.msk.bf16.gmra.mxu1 %vm3046_vm1, %v3016_v27 }
 0x3b1   : > { %v6635_v1 = vpop.f32.mrf.mxu0 }
 0x3b2   : > { %v2823_v34 = vadd.f32 %v6635_v1, %v9255_v4 }
 0x3b3   : > { %v2814_v30 = vpop.f32.mrf.mxu0 }
 0x3b4   : > { %v2815_v25 = vadd.f32 %v2814_v30, %v9255_v4 }
 0x3b5   : > { %v6636_v37 = vpop.f32.mrf.mxu0 }
 0x3b6   : > { %v2826_v39 = vadd.f32 %v6636_v37, %v9255_v4 }
 0x3b7   : > { %v2817_v51 = vpop.f32.mrf.mxu0 }
 0x3b8   : > { %v2818_v41 = vadd.f32 %v2817_v51, %v9255_v4  ;;  %v2986_v40 = vpack.c.bf16 %v2826_v39, %v2823_v34 }
 0x3ba   : > { %v2985_v55 = vpack.c.bf16 %v2818_v41, %v2815_v25  ;;  %v3018_v0 = vmax.bf16 %v11610_v59, %v2986_v40 }
 0x3bc   : > { %v3017_v15 = vmax.bf16 %v11610_v59, %v2985_v55 }
 0x3be   : > { %6699 = vmatprep.mubr.msk.bf16.mxu1 %vm3046_vm1, %v3017_v15 }
 0x3bf   : > { %6700 = vmatmul.mubr.msk.bf16.gmra.mxu1 %vm3046_vm1, %v3018_v0 }
 0x3c1   : > { %v6639_v17 = vpop.f32.mrf.mxu0 }
 0x3c2   : > { %v2839_v63 = vadd.f32 %v6639_v17, %v9255_v4 }
 0x3c3   : > { %v2830_v57 = vpop.f32.mrf.mxu0 }
 0x3c4   : > { %v2831_v2 = vadd.f32 %v2830_v57, %v9255_v4 }
 0x3c5   : > { %v6640_v14 = vpop.f32.mrf.mxu0 }
 0x3c6   : > { %v2842_v62 = vadd.f32 %v6640_v14, %v9255_v4 }
 0x3c7   : > { %v2833_v3 = vpop.f32.mrf.mxu0 }
 0x3c8   : > { %v2834_v43 = vadd.f32 %v2833_v3, %v9255_v4  ;;  %v2988_v33 = vpack.c.bf16 %v2842_v62, %v2839_v63 }
 0x3ca   : > { %v2987_v26 = vpack.c.bf16 %v2834_v43, %v2831_v2  ;;  %v3020_v44 = vmax.bf16 %v11610_v59, %v2988_v33 }
 0x3cc   : > { %v3019_v7 = vmax.bf16 %v11610_v59, %v2987_v26 }
 0x3ce   : > { %6703 = vmatprep.mubr.msk.bf16.mxu1 %vm3046_vm1, %v3019_v7 }
 0x3cf   : > { %6704 = vmatmul.mubr.msk.bf16.gmra.mxu1 %vm3046_vm1, %v3020_v44 }
 0x3d1   : > { %v6643_v61 = vpop.f32.mrf.mxu0 }
 0x3d2   : > { %v2855_v12 = vadd.f32 %v6643_v61, %v9255_v4 }
 0x3d3   : > { %v2846_v50 = vpop.f32.mrf.mxu0 }
 0x3d4   : > { %v2847_v24 = vadd.f32 %v2846_v50, %v9255_v4  ;;  %v9397_v50 = vld [vmem:[%s11545_s8 + $0x3] ss:$0 sm:$0xff] }
 0x3d5   : > { %v6644_v6 = vpop.f32.mrf.mxu0 }
 0x3d6   : > { %v2858_v16 = vadd.f32 %v6644_v6, %v9255_v4 }
 0x3d7   : > { %v2849_v11 = vpop.f32.mrf.mxu0 }
 0x3d8   : > { %v2850_v52 = vadd.f32 %v2849_v11, %v9255_v4  ;;  %v2990_v10 = vpack.c.bf16 %v2858_v16, %v2855_v12 }
 0x3da   : > { %v2989_v46 = vpack.c.bf16 %v2850_v52, %v2847_v24  ;;  %v3022_v5 = vmax.bf16 %v11610_v59, %v2990_v10 }
 0x3dc   : > { %v3021_v21 = vmax.bf16 %v11610_v59, %v2989_v46 }
 0x3de   : > { %6707 = vmatprep.mubr.msk.bf16.mxu1 %vm3046_vm1, %v3021_v21 }
 0x3df   : > { %6708 = vmatmul.mubr.msk.bf16.gmra.mxu1 %vm3046_vm1, %v3022_v5 }
 0x3e1   : > { %v6647_v36 = vpop.f32.mrf.mxu0 }
 0x3e2   : > { %v2871_v54 = vadd.f32 %v6647_v36, %v9255_v4 }
 0x3e3   : > { %v2862_v32 = vpop.f32.mrf.mxu0 }
 0x3e4   : > { %v2863_v31 = vadd.f32 %v2862_v32, %v9255_v4 }
 0x3e5   : > { %v6648_v47 = vpop.f32.mrf.mxu0 }
 0x3e6   : > { %v2874_v8 = vadd.f32 %v6648_v47, %v9255_v4 }
 0x3e7   : > { %v2865_v53 = vpop.f32.mrf.mxu0 }
 0x3e8   : > { %v2866_v38 = vadd.f32 %v2865_v53, %v9255_v4  ;;  %v2992_v20 = vpack.c.bf16 %v2874_v8, %v2871_v54  ;;  %v6981_v53 = vld [vmem:[%s11543_s6 + $0x60] ss:$16 sps:$4 sm:$0xff]  }
 0x3ea   : > { %v2991_v13 = vpack.c.bf16 %v2866_v38, %v2863_v31  ;;  %v3024_v29 = vmax.bf16 %v11610_v59, %v2992_v20  ;;  %v6983_v31 = vld [vmem:[%s11543_s6 + $0x64] ss:$16 sps:$4 sm:$0xff]  }
 0x3eb   : > { %4177 = vmatprep.subr.bf16.mxu1 %v6983_v31 }
 0x3ec   : > { %v3023_v58 = vmax.bf16 %v11610_v59, %v2991_v13  ;;  %4178 = vmatpush1.bf16.msra.mxu1 %v6981_v53 }
 0x3ee   : > { %6711 = vmatprep.mubr.msk.bf16.mxu1 %vm3046_vm1, %v3023_v58  ;;  %v6984_v58 = vld [vmem:[%s11543_s6 + $0x68] ss:$16 sps:$4 sm:$0xff]  }
 0x3ef   : > { %6712 = vmatmul.mubr.msk.bf16.gmra.mxu1 %vm3046_vm1, %v3024_v29  ;;  %v6986_v29 = vld [vmem:[%s11543_s6 + $0x6c] ss:$16 sps:$4 sm:$0xff]  }
 0x3f0   : > { %4530 = vmatprep.subr.bf16.mxu0 %v6986_v29 }
 0x3f1   : > { %v6651_v23 = vpop.f32.mrf.mxu0 }
 0x3f2   : > { %v2887_v49 = vadd.f32 %v6651_v23, %v9255_v4 }
 0x3f3   : > { %v2878_v48 = vpop.f32.mrf.mxu0 }
 0x3f4   : > { %v2879_v9 = vadd.f32 %v2878_v48, %v9255_v4 }
 0x3f5   : > { %v6652_v28 = vpop.f32.mrf.mxu0 }
 0x3f6   : > { %v2890_v60 = vadd.f32 %v6652_v28, %v9255_v4 }
 0x3f7   : > { %v2881_v56 = vpop.f32.mrf.mxu0 }
 0x3f8   : > { %v2882_v35 = vadd.f32 %v2881_v56, %v9255_v4  ;;  %v2994_v22 = vpack.c.bf16 %v2890_v60, %v2887_v49 }
 0x3fa   : > { %v2993_v18 = vpack.c.bf16 %v2882_v35, %v2879_v9  ;;  %v3026_v45 = vmax.bf16 %v11610_v59, %v2994_v22 }
 0x3fc   : > { %v3025_v42 = vmax.bf16 %v11610_v59, %v2993_v18 }
 0x3fe   : > { %6715 = vmatprep.mubr.msk.bf16.mxu1 %vm3046_vm1, %v3025_v42 }
 0x3ff   : > { %6716 = vmatmul.mubr.msk.bf16.gmra.mxu1 %vm3046_vm1, %v3026_v45 }
 0x401   : > { %v6655_v19 = vpop.f32.mrf.mxu0 }
 0x402   : > { %v2903_v37 = vadd.f32 %v6655_v19, %v9255_v4 }
 0x403   : > { %v2894_v27 = vpop.f32.mrf.mxu0 }
 0x404   : > { %v2895_v34 = vadd.f32 %v2894_v27, %v9255_v4 }
 0x405   : > { %v6656_v1 = vpop.f32.mrf.mxu0 }
 0x406   : > { %v2906_v30 = vadd.f32 %v6656_v1, %v9255_v4 }
 0x407   : > { %v2897_v39 = vpop.f32.mrf.mxu0 }
 0x408   : > { %v2898_v51 = vadd.f32 %v2897_v39, %v9255_v4  ;;  %v2996_v25 = vpack.c.bf16 %v2906_v30, %v2903_v37 }
 0x40a   : > { %v2995_v41 = vpack.c.bf16 %v2898_v51, %v2895_v34  ;;  %v3028_v55 = vmax.bf16 %v11610_v59, %v2996_v25 }
 0x40c   : > { %v3027_v40 = vmax.bf16 %v11610_v59, %v2995_v41 }
 0x40e   : > { %6719 = vmatprep.mubr.msk.bf16.mxu1 %vm3046_vm1, %v3027_v40 }
 0x40f   : > { %6720 = vmatmul.mubr.msk.bf16.gmra.mxu1 %vm3046_vm1, %v3028_v55 }
 0x411   : > { %v6659_v15 = vpop.f32.mrf.mxu0 }
 0x412   : > { %v2919_v14 = vadd.f32 %v6659_v15, %v9255_v4 }
 0x413   : > { %v2910_v0 = vpop.f32.mrf.mxu0 }
 0x414   : > { %v2911_v63 = vadd.f32 %v2910_v0, %v9255_v4 }
 0x415   : > { %v6660_v17 = vpop.f32.mrf.mxu0 }
 0x416   : > { %v2922_v57 = vadd.f32 %v6660_v17, %v9255_v4 }
 0x417   : > { %v2913_v62 = vpop.f32.mrf.mxu0 }
 0x418   : > { %v2914_v3 = vadd.f32 %v2913_v62, %v9255_v4  ;;  %v2998_v2 = vpack.c.bf16 %v2922_v57, %v2919_v14 }
 0x41a   : > { %v2997_v43 = vpack.c.bf16 %v2914_v3, %v2911_v63  ;;  %v3030_v26 = vmax.bf16 %v11610_v59, %v2998_v2 }
 0x41c   : > { %v3029_v33 = vmax.bf16 %v11610_v59, %v2997_v43 }
 0x41e   : > { %6723 = vmatprep.mubr.msk.bf16.mxu1 %vm3046_vm1, %v3029_v33 }
 0x41f   : > { %v6677_v7 = vpop.f32.mrf.mxu1  ;;  %6724 = vmatmul.mubr.msk.bf16.gmra.mxu1 %vm3046_vm1, %v3030_v26 }
 0x420   : > { %v3186_v11 = vadd.f32 %v6677_v7, %v9397_v50 }
 0x421   : > { %v6663_v44 = vpop.f32.mrf.mxu0  ;;  %v3177_v61 = vpop.f32.mrf.mxu1 }
 0x422   : > { %v3178_v10 = vadd.f32 %v3177_v61, %v9397_v50  ;;  %v2935_v5 = vadd.f32 %v6663_v44, %v9255_v4 }
 0x423   : > { %v2926_v6 = vpop.f32.mrf.mxu0  ;;  %v6678_v16 = vpop.f32.mrf.mxu1 }
 0x424   : > { %v3189_v12 = vadd.f32 %v6678_v16, %v9397_v50  ;;  %v2927_v47 = vadd.f32 %v2926_v6, %v9255_v4 }
 0x425   : > { %v6664_v24 = vpop.f32.mrf.mxu0  ;;  %v3180_v52 = vpop.f32.mrf.mxu1 }
 0x426   : > { %v2938_v46 = vadd.f32 %v6664_v24, %v9255_v4  ;;  %v3181_v21 = vadd.f32 %v3180_v52, %v9397_v50  ;;  %v3433_v36 = vpack.c.bf16 %v3189_v12, %v3186_v11 }
 0x427   : > { %v2929_v32 = vpop.f32.mrf.mxu0 }
 0x428   : > { %v3432_v8 = vpack.c.bf16 %v3181_v21, %v3178_v10  ;;  %v2930_v54 = vadd.f32 %v2929_v32, %v9255_v4  ;;  %v3000_v38 = vpack.c.bf16 %v2938_v46, %v2935_v5  ;;  %v3465_v23 = vmax.bf16 %v11610_v59, %v3433_v36  ;;  %v6987_v10 = vld [vmem:[%s11543_s6 + $0x40] ss:$16 sps:$4 sm:$0xff]   ;;  %v6989_v46 = vld [vmem:[%s11543_s6 + $0x44] ss:$16 sps:$4 sm:$0xff]   ;;  %v6990_v32 = vld [vmem:[%s11543_s6 + $0x48] ss:$16 sps:$4 sm:$0xff]  }
 0x429   : > { %4179 = vmatprep.subr.bf16.mxu1 %v6989_v46  ;;  %v7002_v46 = vld [vmem:[%s11543_s6 + $0x8] ss:$16 sps:$4 sm:$0xff]  }
 0x42a   : > { %v3464_v20 = vmax.bf16 %v11610_v59, %v3432_v8  ;;  %v2999_v13 = vpack.c.bf16 %v2930_v54, %v2927_v47  ;;  %v3032_v28 = vmax.bf16 %v11610_v59, %v3000_v38  ;;  %4180 = vmatpush1.bf16.msra.mxu1 %v6987_v10 }
 0x42c   : > { %v3031_v48 = vmax.bf16 %v11610_v59, %v2999_v13  ;;  %6741 = vmatprep.mubr.msk.bf16.mxu0 %vm3046_vm1, %v3464_v20 }
 0x42d   : > { %6742 = vmatmul.mubr.msk.bf16.vlgmr.msra.gmra.mxu0 %vm3046_vm1, %v3465_v23 }
 0x42e   : > { %6727 = vmatprep.mubr.msk.bf16.mxu1 %vm3046_vm1, %v3031_v48  ;;  %4531 = vmatpush1.bf16.msra.mxu0 %v6984_v58 }
 0x42f   : > { %v6681_v60 = vpop.f32.mrf.mxu1  ;;  %6728 = vmatmul.mubr.msk.bf16.gmra.mxu1 %vm3046_vm1, %v3032_v28 }
 0x430   : > { %v3202_v18 = vadd.f32 %v6681_v60, %v9397_v50 }
 0x431   : > { %v6667_v49 = vpop.f32.mrf.mxu0  ;;  %v3193_v56 = vpop.f32.mrf.mxu1 }
 0x432   : > { %v3194_v19 = vadd.f32 %v3193_v56, %v9397_v50  ;;  %v2951_v30 = vadd.f32 %v6667_v49, %v9255_v4 }
 0x433   : > { %v2942_v9 = vpop.f32.mrf.mxu0  ;;  %v6682_v35 = vpop.f32.mrf.mxu1 }
 0x434   : > { %v3205_v22 = vadd.f32 %v6682_v35, %v9397_v50  ;;  %v2943_v34 = vadd.f32 %v2942_v9, %v9255_v4 }
 0x435   : > { %v6668_v42 = vpop.f32.mrf.mxu0  ;;  %v3196_v45 = vpop.f32.mrf.mxu1 }
 0x436   : > { %v2954_v27 = vadd.f32 %v6668_v42, %v9255_v4  ;;  %v3197_v1 = vadd.f32 %v3196_v45, %v9397_v50  ;;  %v3435_v37 = vpack.c.bf16 %v3205_v22, %v3202_v18 }
 0x437   : > { %v2945_v39 = vpop.f32.mrf.mxu0 }
 0x438   : > { %v3434_v51 = vpack.c.bf16 %v3197_v1, %v3194_v19  ;;  %v2946_v25 = vadd.f32 %v2945_v39, %v9255_v4  ;;  %v3002_v41 = vpack.c.bf16 %v2954_v27, %v2951_v30  ;;  %v3467_v15 = vmax.bf16 %v11610_v59, %v3435_v37  ;;  %v6993_v30 = vld [vmem:[%s11543_s6 + $0x20] ss:$16 sps:$4 sm:$0xff]   ;;  %v6995_v37 = vld [vmem:[%s11543_s6 + $0x24] ss:$16 sps:$4 sm:$0xff]  }
 0x439   : > { %4181 = vmatprep.subr.bf16.mxu1 %v6995_v37 }
 0x43a   : > { %v3466_v40 = vmax.bf16 %v11610_v59, %v3434_v51  ;;  %v3001_v55 = vpack.c.bf16 %v2946_v25, %v2943_v34  ;;  %v3034_v17 = vmax.bf16 %v11610_v59, %v3002_v41  ;;  %v6996_v34 = vld [vmem:[%s11543_s6 + $0x28] ss:$16 sps:$4 sm:$0xff]   ;;  %v6998_v51 = vld [vmem:[%s11543_s6 + $0x2c] ss:$16 sps:$4 sm:$0xff]   ;;  %4182 = vmatpush1.bf16.msra.mxu1 %v6993_v30 }
 0x43c   : > { %v3033_v0 = vmax.bf16 %v11610_v59, %v3001_v55  ;;  %6745 = vmatprep.mubr.msk.bf16.mxu0 %vm3046_vm1, %v3466_v40 }
 0x43d   : > { %6746 = vmatmul.mubr.msk.bf16.gmra.mxu0 %vm3046_vm1, %v3467_v15 }
 0x43e   : > { %6731 = vmatprep.mubr.msk.bf16.mxu1 %vm3046_vm1, %v3033_v0 }
 0x43f   : > { %v6685_v57 = vpop.f32.mrf.mxu1  ;;  %6732 = vmatmul.mubr.msk.bf16.gmra.mxu1 %vm3046_vm1, %v3034_v17 }
 0x440   : > { %v3218_v43 = vadd.f32 %v6685_v57, %v9397_v50  ;;  %v7001_v57 = vld [vmem:[%s11543_s6 + $0x4] ss:$16 sps:$4 sm:$0xff]  }
 0x441   : > { %v6671_v14 = vpop.f32.mrf.mxu0  ;;  %v3209_v62 = vpop.f32.mrf.mxu1  ;;  %4183 = vmatprep.subr.bf16.mxu1 %v7001_v57 }
 0x442   : > { %v3210_v7 = vadd.f32 %v3209_v62, %v9397_v50  ;;  %v2967_v6 = vadd.f32 %v6671_v14, %v9255_v4 }
 0x443   : > { %v2958_v63 = vpop.f32.mrf.mxu0  ;;  %v6686_v3 = vpop.f32.mrf.mxu1 }
 0x444   : > { %v3221_v2 = vadd.f32 %v6686_v3, %v9397_v50  ;;  %v2959_v11 = vadd.f32 %v2958_v63, %v9255_v4  ;;  %v6999_v63 = vld [vmem:[%s11543_s6] ss:$16 sps:$4 sm:$0xff]  }
 0x445   : > { %v6672_v33 = vpop.f32.mrf.mxu0  ;;  %v3212_v26 = vpop.f32.mrf.mxu1  ;;  %4184 = vmatpush1.bf16.msra.mxu1 %v6999_v63 }
 0x446   : > { %v2970_v44 = vadd.f32 %v6672_v33, %v9255_v4  ;;  %v3213_v61 = vadd.f32 %v3212_v26, %v9397_v50  ;;  %v3437_v16 = vpack.c.bf16 %v3221_v2, %v3218_v43  ;;  %5388 = vmatprep.subr.bf16.mxu1 %v11610_v59 }
 0x447   : > { %v2961_v12 = vpop.f32.mrf.mxu0 }
 0x448   : > { %v3436_v24 = vpack.c.bf16 %v3213_v61, %v3210_v7  ;;  %v2962_v52 = vadd.f32 %v2961_v12, %v9255_v4  ;;  %v3004_v21 = vpack.c.bf16 %v2970_v44, %v2967_v6  ;;  %v6992_v4 = vld [vmem:[%s11543_s6 + $0x4c] ss:$16 sps:$4 sm:$0xff]   ;;  %v3469_v47 = vmax.bf16 %v11610_v59, %v3437_v16 }
 0x449   : > { %4532 = vmatprep.subr.bf16.mxu0 %v6992_v4 }
 0x44a   : > { %v3468_v5 = vmax.bf16 %v11610_v59, %v3436_v24  ;;  %v3003_v36 = vpack.c.bf16 %v2962_v52, %v2959_v11  ;;  %v3036_v54 = vmax.bf16 %v11610_v59, %v3004_v21  ;;  %4533 = vmatpush1.bf16.msra.mxu0 %v6990_v32  ;;  %v7004_v21 = vld [vmem:[%s11543_s6 + $0xc] ss:$16 sps:$4 sm:$0xff]  }
 0x44b   : > { %4534 = vmatprep.subr.bf16.mxu0 %v6998_v51 }
 0x44c   : > { %v3035_v8 = vmax.bf16 %v11610_v59, %v3003_v36  ;;  %6749 = vmatprep.mubr.msk.bf16.mxu0 %vm3046_vm1, %v3468_v5 }
 0x44d   : > { %6750 = vmatmul.mubr.msk.bf16.gmra.mxu0 %vm3046_vm1, %v3469_v47 }
 0x44e   : > { %6735 = vmatprep.mubr.msk.bf16.mxu1 %vm3046_vm1, %v3035_v8  ;;  %4535 = vmatpush1.bf16.msra.mxu0 %v6996_v34 }
 0x44f   : > { %v6689_v53 = vpop.f32.mrf.mxu1  ;;  %6736 = vmatmul.mubr.msk.bf16.gmra.mxu1 %vm3046_vm1, %v3036_v54  ;;  %4536 = vmatprep.subr.bf16.mxu0 %v7004_v21 }
 0x450   : > { %4201 = vmatprep.mubr.bf16.mxu1 %v11610_v59  ;;  %v3234_v13 = vadd.f32 %v6689_v53, %v9397_v50 }
 0x451   : > { %v3225_v31 = vpop.f32.mrf.mxu1 }
 0x452   : > { %v3226_v29 = vadd.f32 %v3225_v31, %v9397_v50  ;;  %4537 = vmatpush1.bf16.msra.mxu0 %v7002_v46 }
 0x453   : > { %v6690_v38 = vpop.f32.mrf.mxu1  ;;  %5677 = vmatprep.subr.bf16.mxu0 %v11610_v59 }
 0x454   : > { %v3237_v20 = vadd.f32 %v6690_v38, %v9397_v50 }
 0x455   : > { %v3228_v58 = vpop.f32.mrf.mxu1 }
 0x456   : > { %v3229_v23 = vadd.f32 %v3228_v58, %v9397_v50  ;;  %v3439_v48 = vpack.c.bf16 %v3237_v20, %v3234_v13 }
 0x458   : > { %v3438_v28 = vpack.c.bf16 %v3229_v23, %v3226_v29  ;;  %v3471_v49 = vmax.bf16 %v11610_v59, %v3439_v48 }
 0x45a   : > { %v3470_v60 = vmax.bf16 %v11610_v59, %v3438_v28 }
 0x45c   : > { %6753 = vmatprep.mubr.msk.bf16.mxu0 %vm3046_vm1, %v3470_v60 }
 0x45d   : > { %6754 = vmatmul.mubr.msk.bf16.gmra.mxu0 %vm3046_vm1, %v3471_v49 }
 0x45f   : > { %v6693_v56 = vpop.f32.mrf.mxu1 }
 0x460   : > { %v3250_v18 = vadd.f32 %v6693_v56, %v9397_v50 }
 0x461   : > { %v3241_v9 = vpop.f32.mrf.mxu1 }
 0x462   : > { %v3242_v45 = vadd.f32 %v3241_v9, %v9397_v50 }
 0x463   : > { %v6694_v35 = vpop.f32.mrf.mxu1 }
 0x464   : > { %v3253_v22 = vadd.f32 %v6694_v35, %v9397_v50 }
 0x465   : > { %v3244_v42 = vpop.f32.mrf.mxu1 }
 0x466   : > { %v3245_v19 = vadd.f32 %v3244_v42, %v9397_v50  ;;  %v3441_v27 = vpack.c.bf16 %v3253_v22, %v3250_v18 }
 0x468   : > { %v3440_v1 = vpack.c.bf16 %v3245_v19, %v3242_v45  ;;  %v3473_v25 = vmax.bf16 %v11610_v59, %v3441_v27 }
 0x46a   : > { %v3472_v39 = vmax.bf16 %v11610_v59, %v3440_v1 }
 0x46c   : > { %6757 = vmatprep.mubr.msk.bf16.mxu0 %vm3046_vm1, %v3472_v39 }
 0x46d   : > { %6758 = vmatmul.mubr.msk.bf16.gmra.mxu0 %vm3046_vm1, %v3473_v25 }
 0x46f   : > { %v6697_v41 = vpop.f32.mrf.mxu1 }
 0x470   : > { %v3266_v0 = vadd.f32 %v6697_v41, %v9397_v50 }
 0x471   : > { %v3257_v40 = vpop.f32.mrf.mxu1 }
 0x472   : > { %v3258_v14 = vadd.f32 %v3257_v40, %v9397_v50 }
 0x473   : > { %v6698_v55 = vpop.f32.mrf.mxu1 }
 0x474   : > { %v3269_v15 = vadd.f32 %v6698_v55, %v9397_v50 }
 0x475   : > { %v3260_v17 = vpop.f32.mrf.mxu1 }
 0x476   : > { %v3261_v62 = vadd.f32 %v3260_v17, %v9397_v50  ;;  %v3443_v3 = vpack.c.bf16 %v3269_v15, %v3266_v0 }
 0x478   : > { %v3442_v2 = vpack.c.bf16 %v3261_v62, %v3258_v14  ;;  %v3475_v33 = vmax.bf16 %v11610_v59, %v3443_v3 }
 0x47a   : > { %v3474_v43 = vmax.bf16 %v11610_v59, %v3442_v2 }
 0x47c   : > { %6761 = vmatprep.mubr.msk.bf16.mxu0 %vm3046_vm1, %v3474_v43 }
 0x47d   : > { %6762 = vmatmul.mubr.msk.bf16.gmra.mxu0 %vm3046_vm1, %v3475_v33 }
 0x47f   : > { %v6701_v26 = vpop.f32.mrf.mxu1 }
 0x480   : > { %v3282_v6 = vadd.f32 %v6701_v26, %v9397_v50 }
 0x481   : > { %v3273_v7 = vpop.f32.mrf.mxu1 }
 0x482   : > { %v3274_v12 = vadd.f32 %v3273_v7, %v9397_v50 }
 0x483   : > { %v6702_v44 = vpop.f32.mrf.mxu1 }
 0x484   : > { %v3285_v61 = vadd.f32 %v6702_v44, %v9397_v50 }
 0x485   : > { %v3276_v16 = vpop.f32.mrf.mxu1 }
 0x486   : > { %v3277_v11 = vadd.f32 %v3276_v16, %v9397_v50  ;;  %v3445_v24 = vpack.c.bf16 %v3285_v61, %v3282_v6 }
 0x488   : > { %v3444_v52 = vpack.c.bf16 %v3277_v11, %v3274_v12  ;;  %v3477_v5 = vmax.bf16 %v11610_v59, %v3445_v24 }
 0x48a   : > { %v3476_v10 = vmax.bf16 %v11610_v59, %v3444_v52 }
 0x48c   : > { %6765 = vmatprep.mubr.msk.bf16.mxu0 %vm3046_vm1, %v3476_v10 }
 0x48d   : > { %6766 = vmatmul.mubr.msk.bf16.gmra.mxu0 %vm3046_vm1, %v3477_v5 }
 0x48f   : > { %v6705_v36 = vpop.f32.mrf.mxu1 }
 0x490   : > { %v3298_v8 = vadd.f32 %v6705_v36, %v9397_v50 }
 0x491   : > { %v3289_v32 = vpop.f32.mrf.mxu1 }
 0x492   : > { %v3290_v53 = vadd.f32 %v3289_v32, %v9397_v50 }
 0x493   : > { %v6706_v4 = vpop.f32.mrf.mxu1 }
 0x494   : > { %v3301_v47 = vadd.f32 %v6706_v4, %v9397_v50 }
 0x495   : > { %v3292_v54 = vpop.f32.mrf.mxu1 }
 0x496   : > { %v3293_v31 = vadd.f32 %v3292_v54, %v9397_v50  ;;  %v3447_v38 = vpack.c.bf16 %v3301_v47, %v3298_v8 }
 0x498   : > { %v3446_v20 = vpack.c.bf16 %v3293_v31, %v3290_v53  ;;  %v3479_v58 = vmax.bf16 %v11610_v59, %v3447_v38 }
 0x49a   : > { %v3478_v13 = vmax.bf16 %v11610_v59, %v3446_v20 }
 0x49c   : > { %6769 = vmatprep.mubr.msk.bf16.mxu0 %vm3046_vm1, %v3478_v13 }
 0x49d   : > { %6770 = vmatmul.mubr.msk.bf16.gmra.mxu0 %vm3046_vm1, %v3479_v58 }
 0x49f   : > { %v6709_v29 = vpop.f32.mrf.mxu1 }
 0x4a0   : > { %v3314_v60 = vadd.f32 %v6709_v29, %v9397_v50 }
 0x4a1   : > { %v3305_v23 = vpop.f32.mrf.mxu1 }
 0x4a2   : > { %v3306_v56 = vadd.f32 %v3305_v23, %v9397_v50 }
 0x4a3   : > { %v6710_v48 = vpop.f32.mrf.mxu1 }
 0x4a4   : > { %v3317_v28 = vadd.f32 %v6710_v48, %v9397_v50 }
 0x4a5   : > { %v3308_v49 = vpop.f32.mrf.mxu1 }
 0x4a6   : > { %v3309_v9 = vadd.f32 %v3308_v49, %v9397_v50  ;;  %v3449_v35 = vpack.c.bf16 %v3317_v28, %v3314_v60  ;;  %v9581_v28 = vld [vmem:[%s11545_s8 + $0x4] ss:$0 sm:$0xff] }
 0x4a8   : > { %v3448_v22 = vpack.c.bf16 %v3309_v9, %v3306_v56  ;;  %v3481_v42 = vmax.bf16 %v11610_v59, %v3449_v35 }
 0x4aa   : > { %v3480_v18 = vmax.bf16 %v11610_v59, %v3448_v22 }
 0x4ac   : > { %6773 = vmatprep.mubr.msk.bf16.mxu0 %vm3046_vm1, %v3480_v18 }
 0x4ad   : > { %6774 = vmatmul.mubr.msk.bf16.gmra.mxu0 %vm3046_vm1, %v3481_v42 }
 0x4af   : > { %v6713_v45 = vpop.f32.mrf.mxu1 }
 0x4b0   : > { %v3330_v30 = vadd.f32 %v6713_v45, %v9397_v50 }
 0x4b1   : > { %v3321_v19 = vpop.f32.mrf.mxu1 }
 0x4b2   : > { %v3322_v39 = vadd.f32 %v3321_v19, %v9397_v50 }
 0x4b3   : > { %v6714_v27 = vpop.f32.mrf.mxu1 }
 0x4b4   : > { %v3333_v1 = vadd.f32 %v6714_v27, %v9397_v50 }
 0x4b5   : > { %v3324_v37 = vpop.f32.mrf.mxu1 }
 0x4b6   : > { %v3325_v34 = vadd.f32 %v3324_v37, %v9397_v50  ;;  %v3451_v51 = vpack.c.bf16 %v3333_v1, %v3330_v30  ;;  %v7005_v1 = vld [vmem:[#allocation7 + $0x38] sm:$0xff]  }
 0x4b8   : > { %v3450_v25 = vpack.c.bf16 %v3325_v34, %v3322_v39  ;;  %v3483_v40 = vmax.bf16 %v11610_v59, %v3451_v51 }
 0x4ba   : > { %v3482_v41 = vmax.bf16 %v11610_v59, %v3450_v25 }
 0x4bc   : > { %6777 = vmatprep.mubr.msk.bf16.mxu0 %vm3046_vm1, %v3482_v41  ;;  %v7007_v41 = vld [vmem:[#allocation7 + $0x30] sm:$0xff]  }
 0x4bd   : > { %6778 = vmatmul.mubr.msk.bf16.gmra.mxu0 %vm3046_vm1, %v3483_v40 }
 0x4bf   : > { %v6717_v55 = vpop.f32.mrf.mxu1 }
 0x4c0   : > { %v3346_v57 = vadd.f32 %v6717_v55, %v9397_v50 }
 0x4c1   : > { %v3337_v15 = vpop.f32.mrf.mxu1 }
 0x4c2   : > { %v3338_v62 = vadd.f32 %v3337_v15, %v9397_v50 }
 0x4c3   : > { %v6718_v0 = vpop.f32.mrf.mxu1 }
 0x4c4   : > { %v3349_v17 = vadd.f32 %v6718_v0, %v9397_v50 }
 0x4c5   : > { %v3340_v14 = vpop.f32.mrf.mxu1 }
 0x4c6   : > { %v3341_v63 = vadd.f32 %v3340_v14, %v9397_v50  ;;  %v3453_v3 = vpack.c.bf16 %v3349_v17, %v3346_v57  ;;  %v7009_v17 = vld [vmem:[#allocation7 + $0x28] sm:$0xff]  }
 0x4c8   : > { %v3452_v2 = vpack.c.bf16 %v3341_v63, %v3338_v62  ;;  %v3485_v33 = vmax.bf16 %v11610_v59, %v3453_v3 }
 0x4ca   : > { %v3484_v43 = vmax.bf16 %v11610_v59, %v3452_v2  ;;  %v7011_v2 = vld [vmem:[#allocation7 + $0x20] sm:$0xff]  }
 0x4cc   : > { %6781 = vmatprep.mubr.msk.bf16.mxu0 %vm3046_vm1, %v3484_v43 }
 0x4cd   : > { %6782 = vmatmul.mubr.msk.bf16.gmra.mxu0 %vm3046_vm1, %v3485_v33 }
 0x4cf   : > { %v6721_v26 = vpop.f32.mrf.mxu1 }
 0x4d0   : > { %v3362_v6 = vadd.f32 %v6721_v26, %v9397_v50 }
 0x4d1   : > { %v3353_v7 = vpop.f32.mrf.mxu1 }
 0x4d2   : > { %v3354_v12 = vadd.f32 %v3353_v7, %v9397_v50 }
 0x4d3   : > { %v6722_v44 = vpop.f32.mrf.mxu1 }
 0x4d4   : > { %v3365_v61 = vadd.f32 %v6722_v44, %v9397_v50 }
 0x4d5   : > { %v3356_v16 = vpop.f32.mrf.mxu1 }
 0x4d6   : > { %v3357_v11 = vadd.f32 %v3356_v16, %v9397_v50  ;;  %v3455_v24 = vpack.c.bf16 %v3365_v61, %v3362_v6 }
 0x4d8   : > { %v3454_v52 = vpack.c.bf16 %v3357_v11, %v3354_v12  ;;  %v3487_v46 = vmax.bf16 %v11610_v59, %v3455_v24  ;;  %v7013_v11 = vld [vmem:[#allocation7 + $0x18] sm:$0xff]  }
 0x4da   : > { %v3486_v10 = vmax.bf16 %v11610_v59, %v3454_v52 }
 0x4dc   : > { %6785 = vmatprep.mubr.msk.bf16.mxu0 %vm3046_vm1, %v3486_v10 }
 0x4dd   : > { %6786 = vmatmul.mubr.msk.bf16.gmra.mxu0 %vm3046_vm1, %v3487_v46 }
 0x4df   : > { %v6725_v21 = vpop.f32.mrf.mxu1 }
 0x4e0   : > { %v3378_v4 = vadd.f32 %v6725_v21, %v9397_v50 }
 0x4e1   : > { %v3369_v5 = vpop.f32.mrf.mxu1 }
 0x4e2   : > { %v3370_v8 = vadd.f32 %v3369_v5, %v9397_v50 }
 0x4e3   : > { %v6726_v36 = vpop.f32.mrf.mxu1 }
 0x4e4   : > { %v3381_v32 = vadd.f32 %v6726_v36, %v9397_v50  ;;  %v7015_v36 = vld [vmem:[#allocation7 + $0x10] sm:$0xff]  }
 0x4e5   : > { %v3372_v47 = vpop.f32.mrf.mxu1 }
 0x4e6   : > { %v3373_v54 = vadd.f32 %v3372_v47, %v9397_v50  ;;  %v3457_v53 = vpack.c.bf16 %v3381_v32, %v3378_v4 }
 0x4e8   : > { %v3456_v31 = vpack.c.bf16 %v3373_v54, %v3370_v8  ;;  %v3489_v20 = vmax.bf16 %v11610_v59, %v3457_v53  ;;  %v7017_v54 = vld [vmem:[#allocation7 + $0x8] sm:$0xff]  }
 0x4ea   : > { %v3488_v38 = vmax.bf16 %v11610_v59, %v3456_v31 }
 0x4ec   : > { %6789 = vmatprep.mubr.msk.bf16.mxu0 %vm3046_vm1, %v3488_v38 }
 0x4ed   : > { %v6743_v13 = vpop.f32.mrf.mxu0  ;;  %6790 = vmatmul.mubr.msk.bf16.gmra.mxu0 %vm3046_vm1, %v3489_v20 }
 0x4ee   : > { %v3644_v34 = vadd.f32 %v6743_v13, %v9581_v28 }
 0x4ef   : > { %v6729_v58 = vpop.f32.mrf.mxu1  ;;  %v3635_v29 = vpop.f32.mrf.mxu0 }
 0x4f0   : > { %v3636_v56 = vadd.f32 %v3635_v29, %v9581_v28  ;;  %v3394_v22 = vadd.f32 %v6729_v58, %v9397_v50 }
 0x4f1   : > { %v3385_v23 = vpop.f32.mrf.mxu1  ;;  %v6744_v48 = vpop.f32.mrf.mxu0 }
 0x4f2   : > { %v3386_v42 = vadd.f32 %v3385_v23, %v9397_v50  ;;  %v3647_v30 = vadd.f32 %v6744_v48, %v9581_v28 }
 0x4f3   : > { %v6730_v60 = vpop.f32.mrf.mxu1  ;;  %v3638_v49 = vpop.f32.mrf.mxu0 }
 0x4f4   : > { %v3397_v9 = vadd.f32 %v6730_v60, %v9397_v50  ;;  %v3639_v35 = vadd.f32 %v3638_v49, %v9581_v28  ;;  %v3891_v40 = vpack.c.bf16 %v3647_v30, %v3644_v34 }
 0x4f5   : > { %v3388_v18 = vpop.f32.mrf.mxu1 }
 0x4f6   : > { %v3890_v45 = vpack.c.bf16 %v3639_v35, %v3636_v56  ;;  %v3389_v19 = vadd.f32 %v3388_v18, %v9397_v50  ;;  %v3459_v27 = vpack.c.bf16 %v3397_v9, %v3394_v22  ;;  %v9603_v57 = vmax.bf16 %v11610_v59, %v3891_v40 }
 0x4f8   : > { %v9591_v37 = vmax.bf16 %v11610_v59, %v3890_v45  ;;  %v3458_v39 = vpack.c.bf16 %v3389_v19, %v3386_v42  ;;  %v3491_v25 = vmax.bf16 %v11610_v59, %v3459_v27  ;;  %v7019_v45 = vld [vmem:[#allocation7] sm:$0xff]  }
 0x4fa   : > { %v3490_v51 = vmax.bf16 %v11610_v59, %v3458_v39  ;;  %6396 = vmatmul.mubr.msk.bf16.vlgmr.msra.gmra.mxu1 %vm2587_vm0, %v9591_v37 }
 0x4fb   : > { %4211 = vmatprep.mubr.bf16.mxu1 %v11610_v59  ;;  %5389 = vmatpush1.bf16.msra.mxu1 %v7005_v1 }
 0x4fc   : > { %6793 = vmatprep.mubr.msk.bf16.mxu0 %vm3046_vm1, %v3490_v51  ;;  %5390 = vmatprep.subr.bf16.mxu1 %v11610_v59 }
 0x4fd   : > { %v6747_v55 = vpop.f32.mrf.mxu0  ;;  %6794 = vmatmul.mubr.msk.bf16.gmra.mxu0 %vm3046_vm1, %v3491_v25  ;;  %v7006_v25 = vld [vmem:[#allocation7 + $0xb8] sm:$0xff]  }
 0x4fe   : > { %v3660_v46 = vadd.f32 %v6747_v55, %v9581_v28 }
 0x4ff   : > { %v6733_v15 = vpop.f32.mrf.mxu1  ;;  %v3651_v0 = vpop.f32.mrf.mxu0  ;;  %5391 = vmatpush1.bf16.msra.mxu1 %v7007_v41 }
 0x500   : > { %5392 = vmatprep.subr.bf16.mxu1 %v11610_v59  ;;  %v3652_v43 = vadd.f32 %v3651_v0, %v9581_v28  ;;  %v3410_v7 = vadd.f32 %v6733_v15, %v9397_v50  ;;  %v7008_v0 = vld [vmem:[#allocation7 + $0xb0] sm:$0xff]  }
 0x501   : > { %v3401_v14 = vpop.f32.mrf.mxu1  ;;  %v6748_v62 = vpop.f32.mrf.mxu0 }
 0x502   : > { %6397 = vmatmul.mubr.msk.bf16.gmra.mxu1 %vm2587_vm0, %v9603_v57  ;;  %v3402_v61 = vadd.f32 %v3401_v14, %v9397_v50  ;;  %v3663_v24 = vadd.f32 %v6748_v62, %v9581_v28  ;;  %v7021_v62 = vld [vmem:[#allocation7 + $0x78] sm:$0xff]  }
 0x503   : > { %v6734_v63 = vpop.f32.mrf.mxu1  ;;  %v3654_v3 = vpop.f32.mrf.mxu0  ;;  %4221 = vmatprep.mubr.bf16.mxu1 %v11610_v59  ;;  %5393 = vmatpush1.bf16.msra.mxu1 %v7009_v17 }
 0x504   : > { %v3413_v33 = vadd.f32 %v6734_v63, %v9397_v50  ;;  %v3655_v26 = vadd.f32 %v3654_v3, %v9581_v28  ;;  %5394 = vmatprep.subr.bf16.mxu1 %v11610_v59  ;;  %v3893_v32 = vpack.c.bf16 %v3663_v24, %v3660_v46 }
 0x505   : > { %v3404_v44 = vpop.f32.mrf.mxu1 }
 0x506   : > { %v3892_v6 = vpack.c.bf16 %v3655_v26, %v3652_v43  ;;  %v3405_v16 = vadd.f32 %v3404_v44, %v9397_v50  ;;  %v3461_v12 = vpack.c.bf16 %v3413_v33, %v3410_v7  ;;  %v9631_v53 = vmax.bf16 %v11610_v59, %v3893_v32  ;;  %v7012_v43 = vld [vmem:[#allocation7 + $0xa0] sm:$0xff]   ;;  %v7014_v44 = vld [vmem:[#allocation7 + $0x98] sm:$0xff]  }
 0x507   : > { %5395 = vmatpush1.bf16.msra.mxu1 %v7011_v2 }
 0x508   : > { %v9618_v52 = vmax.bf16 %v11610_v59, %v3892_v6  ;;  %v3460_v10 = vpack.c.bf16 %v3405_v16, %v3402_v61  ;;  %5396 = vmatprep.subr.bf16.mxu1 %v11610_v59  ;;  %v3493_v5 = vmax.bf16 %v11610_v59, %v3461_v12  ;;  %v7016_v12 = vld [vmem:[#allocation7 + $0x90] sm:$0xff]  }
 0x50a   : > { %v3492_v21 = vmax.bf16 %v11610_v59, %v3460_v10  ;;  %6398 = vmatmul.mubr.msk.bf16.gmra.mxu1 %vm2587_vm0, %v9618_v52  ;;  %v7023_v10 = vld [vmem:[#allocation7 + $0x70] sm:$0xff]  }
 0x50b   : > { %4231 = vmatprep.mubr.bf16.mxu1 %v11610_v59  ;;  %5397 = vmatpush1.bf16.msra.mxu1 %v7013_v11 }
 0x50c   : > { %6797 = vmatprep.mubr.msk.bf16.mxu0 %vm3046_vm1, %v3492_v21  ;;  %5398 = vmatprep.subr.bf16.mxu1 %v11610_v59 }
 0x50d   : > { %v6751_v4 = vpop.f32.mrf.mxu0  ;;  %6798 = vmatmul.mubr.msk.bf16.gmra.mxu0 %vm3046_vm1, %v3493_v5 }
 0x50e   : > { %v3676_v19 = vadd.f32 %v6751_v4, %v9581_v28 }
 0x50f   : > { %v6737_v47 = vpop.f32.mrf.mxu1  ;;  %v3667_v8 = vpop.f32.mrf.mxu0  ;;  %5399 = vmatpush1.bf16.msra.mxu1 %v7015_v36  ;;  %v7020_v36 = vld [vmem:[#allocation7 + $0x80] sm:$0xff]  }
 0x510   : > { %5400 = vmatprep.subr.bf16.mxu1 %v11610_v59  ;;  %v3668_v58 = vadd.f32 %v3667_v8, %v9581_v28  ;;  %v3426_v48 = vadd.f32 %v6737_v47, %v9397_v50  ;;  %v7022_v8 = vld [vmem:[#allocation7 + $0xf8] sm:$0xff]  }
 0x511   : > { %v3417_v31 = vpop.f32.mrf.mxu1  ;;  %v6752_v38 = vpop.f32.mrf.mxu0 }
 0x512   : > { %6399 = vmatmul.mubr.msk.bf16.gmra.mxu1 %vm2587_vm0, %v9631_v53  ;;  %v3418_v49 = vadd.f32 %v3417_v31, %v9397_v50  ;;  %v3679_v22 = vadd.f32 %v6752_v38, %v9581_v28 }
 0x513   : > { %v6738_v20 = vpop.f32.mrf.mxu1  ;;  %v3670_v13 = vpop.f32.mrf.mxu0  ;;  %4241 = vmatprep.mubr.bf16.mxu1 %v11610_v59  ;;  %5401 = vmatpush1.bf16.msra.mxu1 %v7017_v54 }
 0x514   : > { %v3429_v29 = vadd.f32 %v6738_v20, %v9397_v50  ;;  %v3671_v23 = vadd.f32 %v3670_v13, %v9581_v28  ;;  %5402 = vmatprep.subr.bf16.mxu1 %v11610_v59  ;;  %v7024_v20 = vld [vmem:[#allocation7 + $0xf0] sm:$0xff]  }
 0x515   : > { %v3420_v60 = vpop.f32.mrf.mxu1 }
 0x516   : > { %v3894_v56 = vpack.c.bf16 %v3671_v23, %v3668_v58  ;;  %v3421_v9 = vadd.f32 %v3420_v60, %v9397_v50  ;;  %v3463_v35 = vpack.c.bf16 %v3429_v29, %v3426_v48  ;;  %v3895_v50 = vpack.c.bf16 %v3679_v22, %v3676_v19  ;;  %v7025_v29 = vld [vmem:[#allocation7 + $0x68] sm:$0xff]  }
 0x517   : > { %5403 = vmatpush1.bf16.msra.mxu1 %v7019_v45  ;;  %v7026_v48 = vld [vmem:[#allocation7 + $0xe8] sm:$0xff]  }
 0x518   : > { %v9646_v18 = vmax.bf16 %v11610_v59, %v3894_v56  ;;  %v3462_v42 = vpack.c.bf16 %v3421_v9, %v3418_v49  ;;  %v3495_v1 = vmax.bf16 %v11610_v59, %v3463_v35  ;;  %5404 = vmatprep.subr.bf16.mxu1 %v11610_v59  ;;  %v9659_v34 = vmax.bf16 %v11610_v59, %v3895_v50 }
 0x51a   : > { %v3494_v27 = vmax.bf16 %v11610_v59, %v3462_v42  ;;  %6400 = vmatmul.mubr.msk.bf16.gmra.mxu1 %vm2587_vm0, %v9646_v18 }
 0x51b   : > { %4251 = vmatprep.mubr.bf16.mxu1 %v11610_v59  ;;  %5405 = vmatpush2.bf16.msra.mxu1 %v7021_v62  ;;  %v7029_v62 = vld [vmem:[#allocation7 + $0x58] sm:$0xff]  }
 0x51c   : > { %6801 = vmatprep.mubr.msk.bf16.mxu0 %vm3046_vm1, %v3494_v27  ;;  %5406 = vmatprep.subr.bf16.mxu1 %v11610_v59 }
 0x51d   : > { %v6755_v30 = vpop.f32.mrf.mxu0  ;;  %6802 = vmatmul.mubr.msk.bf16.gmra.mxu0 %vm3046_vm1, %v3495_v1  ;;  %v7027_v1 = vld [vmem:[#allocation7 + $0x60] sm:$0xff]  }
 0x51e   : > { %4554 = vmatprep.mubr.bf16.mxu0 %v11610_v59  ;;  %v3692_v63 = vadd.f32 %v6755_v30, %v9581_v28  ;;  %v7028_v30 = vld [vmem:[#allocation7 + $0xe0] sm:$0xff]  }
 0x51f   : > { %v3683_v39 = vpop.f32.mrf.mxu0  ;;  %5407 = vmatpush2.bf16.msra.mxu1 %v7023_v10 }
 0x520   : > { %v3684_v40 = vadd.f32 %v3683_v39, %v9581_v28  ;;  %5408 = vmatprep.subr.bf16.mxu1 %v11610_v59 }
 0x521   : > { %v6756_v51 = vpop.f32.mrf.mxu0 }
 0x522   : > { %6401 = vmatmul.mubr.msk.bf16.gmra.mxu1 %vm2587_vm0, %v9659_v34  ;;  %v3695_v17 = vadd.f32 %v6756_v51, %v9581_v28 }
 0x523   : > { %v3686_v41 = vpop.f32.mrf.mxu0  ;;  %4261 = vmatprep.mubr.bf16.mxu1 %v11610_v59  ;;  %5409 = vmatpush2.bf16.msra.mxu1 %v7025_v29 }
 0x524   : > { %v3687_v55 = vadd.f32 %v3686_v41, %v9581_v28  ;;  %v3897_v3 = vpack.c.bf16 %v3695_v17, %v3692_v63  ;;  %5410 = vmatprep.subr.bf16.mxu1 %v11610_v59 }
 0x525   : > { %6428 = vmatmul.mubr.msk.bf16.vlgmr.msra.gmra.mxu0 %vm2587_vm0, %v9591_v37  ;;  %v7010_v37 = vld [vmem:[#allocation7 + $0xa8] sm:$0xff]  }
 0x526   : > { %v3896_v15 = vpack.c.bf16 %v3687_v55, %v3684_v40  ;;  %5678 = vmatpush1.bf16.msra.mxu0 %v7006_v25  ;;  %4564 = vmatprep.mubr.bf16.mxu0 %v11610_v59  ;;  %v9685_v26 = vmax.bf16 %v11610_v59, %v3897_v3 }
 0x527   : > { %5679 = vmatprep.subr.bf16.mxu0 %v11610_v59  ;;  %5411 = vmatpush2.bf16.msra.mxu1 %v7027_v1 }
 0x528   : > { %v9672_v14 = vmax.bf16 %v11610_v59, %v3896_v15  ;;  %5412 = vmatprep.subr.bf16.mxu1 %v11610_v59 }
 0x52a   : > { %6402 = vmatmul.mubr.msk.bf16.gmra.mxu1 %vm2587_vm0, %v9672_v14  ;;  %5680 = vmatpush1.bf16.msra.mxu0 %v7008_v0 }
 0x52b   : > { %4271 = vmatprep.mubr.bf16.mxu1 %v11610_v59  ;;  %5681 = vmatprep.subr.bf16.mxu0 %v11610_v59 }
 0x52c   : > { %5413 = vmatpush2.bf16.msra.mxu1 %v7029_v62 }
 0x52d   : > { %v6759_v2 = vpop.f32.mrf.mxu0  ;;  %6429 = vmatmul.mubr.msk.bf16.gmra.mxu0 %vm2587_vm0, %v9603_v57  ;;  %5414 = vmatprep.subr.bf16.mxu1 %v11610_v59 }
 0x52e   : > { %4574 = vmatprep.mubr.bf16.mxu0 %v11610_v59  ;;  %5682 = vmatpush1.bf16.msra.mxu0 %v7010_v37  ;;  %v3708_v46 = vadd.f32 %v6759_v2, %v9581_v28  ;;  %v7030_v37 = vld [vmem:[#allocation7 + $0xd8] sm:$0xff]  }
 0x52f   : > { %v3699_v33 = vpop.f32.mrf.mxu0  ;;  %5683 = vmatprep.subr.bf16.mxu0 %v11610_v59 }
 0x530   : > { %v3700_v57 = vadd.f32 %v3699_v33, %v9581_v28 }
 0x531   : > { %v6760_v7 = vpop.f32.mrf.mxu0 }
 0x532   : > { %6403 = vmatmul.mubr.msk.bf16.gmra.mxu1 %vm2587_vm0, %v9685_v26  ;;  %5684 = vmatpush1.bf16.msra.mxu0 %v7012_v43  ;;  %v3711_v11 = vadd.f32 %v6760_v7, %v9581_v28  ;;  %v7031_v43 = vld [vmem:[#allocation7 + $0x50] sm:$0xff]  }
 0x533   : > { %v3702_v61 = vpop.f32.mrf.mxu0  ;;  %4281 = vmatprep.mubr.bf16.mxu1 %v11610_v59  ;;  %5685 = vmatprep.subr.bf16.mxu0 %v11610_v59 }
 0x534   : > { %v3703_v6 = vadd.f32 %v3702_v61, %v9581_v28  ;;  %v3899_v21 = vpack.c.bf16 %v3711_v11, %v3708_v46  ;;  %5415 = vmatpush2.bf16.msra.mxu1 %v7031_v43  ;;  %v7033_v46 = vld [vmem:[#allocation7 + $0xd0] sm:$0xff]  }
 0x535   : > { %6430 = vmatmul.mubr.msk.bf16.gmra.mxu0 %vm2587_vm0, %v9618_v52  ;;  %v7018_v52 = vld [vmem:[#allocation7 + $0x88] sm:$0xff]   ;;  %5416 = vmatprep.subr.bf16.mxu1 %v11610_v59 }
 0x536   : > { %v3898_v16 = vpack.c.bf16 %v3703_v6, %v3700_v57  ;;  %4584 = vmatprep.mubr.bf16.mxu0 %v11610_v59  ;;  %5686 = vmatpush1.bf16.msra.mxu0 %v7014_v44  ;;  %v9712_v4 = vmax.bf16 %v11610_v59, %v3899_v21  ;;  %v7032_v44 = vld [vmem:[#allocation7 + $0x48] sm:$0xff]  }
 0x537   : > { %5687 = vmatprep.subr.bf16.mxu0 %v11610_v59 }
 0x538   : > { %v9699_v24 = vmax.bf16 %v11610_v59, %v3898_v16  ;;  %5417 = vmatpush2.bf16.msra.mxu1 %v7032_v44 }
 0x539   : > { %5418 = vmatprep.subr.bf16.mxu1 %v11610_v59 }
 0x53a   : > { %6404 = vmatmul.mubr.msk.bf16.gmra.mxu1 %vm2587_vm0, %v9699_v24  ;;  %5688 = vmatpush1.bf16.msra.mxu0 %v7016_v12  ;;  %v7034_v12 = vld [vmem:[#allocation7 + $0x40] sm:$0xff]  }
 0x53b   : > { %4291 = vmatprep.mubr.bf16.mxu1 %v11610_v59  ;;  %5689 = vmatprep.subr.bf16.mxu0 %v11610_v59 }
 0x53c   : > { %5419 = vmatpush2.bf16.msra.mxu1 %v7034_v12 }
 0x53d   : > { %v6763_v5 = vpop.f32.mrf.mxu0  ;;  %6431 = vmatmul.mubr.msk.bf16.gmra.mxu0 %vm2587_vm0, %v9631_v53 }
 0x53e   : > { %4594 = vmatprep.mubr.bf16.mxu0 %v11610_v59  ;;  %5690 = vmatpush1.bf16.msra.mxu0 %v7018_v52  ;;  %v3724_v23 = vadd.f32 %v6763_v5, %v9581_v28 }
 0x53f   : > { %v3715_v32 = vpop.f32.mrf.mxu0  ;;  %5691 = vmatprep.subr.bf16.mxu0 %v11610_v59 }
 0x540   : > { %v3716_v53 = vadd.f32 %v3715_v32, %v9581_v28 }
 0x541   : > { %v6764_v47 = vpop.f32.mrf.mxu0 }
 0x542   : > { %6405 = vmatmul.mubr.msk.bf16.gmra.mxu1 %vm2587_vm0, %v9712_v4  ;;  %5692 = vmatpush1.bf16.msra.mxu0 %v7020_v36  ;;  %v3727_v13 = vadd.f32 %v6764_v47, %v9581_v28 }
 0x543   : > { %v3718_v54 = vpop.f32.mrf.mxu0  ;;  %4301 = vmatprep.mubr.bf16.mxu1 %v11610_v59  ;;  %5693 = vmatprep.subr.bf16.mxu0 %v11610_v59 }
 0x544   : > { %v3719_v31 = vadd.f32 %v3718_v54, %v9581_v28  ;;  %v3901_v60 = vpack.c.bf16 %v3727_v13, %v3724_v23 }
 0x545   : > { %6432 = vmatmul.mubr.msk.bf16.gmra.mxu0 %vm2587_vm0, %v9646_v18 }
 0x546   : > { %v3900_v38 = vpack.c.bf16 %v3719_v31, %v3716_v53  ;;  %4604 = vmatprep.mubr.bf16.mxu0 %v11610_v59  ;;  %5694 = vmatpush2.bf16.msra.mxu0 %v7022_v8  ;;  %v9739_v9 = vmax.bf16 %v11610_v59, %v3901_v60 }
 0x547   : > { %5695 = vmatprep.subr.bf16.mxu0 %v11610_v59 }
 0x548   : > { %v9726_v58 = vmax.bf16 %v11610_v59, %v3900_v38 }
 0x54a   : > { %6406 = vmatmul.mubr.msk.bf16.gmra.mxu1 %vm2587_vm0, %v9726_v58  ;;  %5696 = vmatpush2.bf16.msra.mxu0 %v7024_v20  ;;  %v7035_v20 = vld [vmem:[#allocation7 + $0xc8] sm:$0xff]  }
 0x54b   : > { %4311 = vmatprep.mubr.bf16.mxu1 %v11610_v59  ;;  %5697 = vmatprep.subr.bf16.mxu0 %v11610_v59 }
 0x54d   : > { %v6767_v49 = vpop.f32.mrf.mxu0  ;;  %6433 = vmatmul.mubr.msk.bf16.gmra.mxu0 %vm2587_vm0, %v9659_v34 }
 0x54e   : > { %4614 = vmatprep.mubr.bf16.mxu0 %v11610_v59  ;;  %5698 = vmatpush2.bf16.msra.mxu0 %v7026_v48  ;;  %v3740_v50 = vadd.f32 %v6767_v49, %v9581_v28 }
 0x54f   : > { %v3731_v56 = vpop.f32.mrf.mxu0  ;;  %5699 = vmatprep.subr.bf16.mxu0 %v11610_v59 }
 0x550   : > { %v3732_v18 = vadd.f32 %v3731_v56, %v9581_v28 }
 0x551   : > { %v6768_v35 = vpop.f32.mrf.mxu0 }
 0x552   : > { %6407 = vmatmul.mubr.msk.bf16.gmra.mxu1 %vm2587_vm0, %v9739_v9  ;;  %v3743_v19 = vadd.f32 %v6768_v35, %v9581_v28  ;;  %5700 = vmatpush2.bf16.msra.mxu0 %v7028_v30 }
 0x553   : > { %v3734_v22 = vpop.f32.mrf.mxu0  ;;  %4321 = vmatprep.mubr.bf16.mxu1 %v11610_v59  ;;  %5701 = vmatprep.subr.bf16.mxu0 %v11610_v59 }
 0x554   : > { %v3735_v42 = vadd.f32 %v3734_v22, %v9581_v28  ;;  %v3903_v39 = vpack.c.bf16 %v3743_v19, %v3740_v50 }
 0x555   : > { %6434 = vmatmul.mubr.msk.bf16.gmra.mxu0 %vm2587_vm0, %v9672_v14 }
 0x556   : > { %v3902_v45 = vpack.c.bf16 %v3735_v42, %v3732_v18  ;;  %4624 = vmatprep.mubr.bf16.mxu0 %v11610_v59  ;;  %v9763_v25 = vmax.bf16 %v11610_v59, %v3903_v39  ;;  %5702 = vmatpush2.bf16.msra.mxu0 %v7030_v37  ;;  %v7036_v42 = vld [vmem:[#allocation7 + $0xc0] sm:$0xff]  }
 0x557   : > { %5703 = vmatprep.subr.bf16.mxu0 %v11610_v59 }
 0x558   : > { %v9751_v27 = vmax.bf16 %v11610_v59, %v3902_v45 }
 0x55a   : > { %6408 = vmatmul.mubr.msk.bf16.gmra.mxu1 %vm2587_vm0, %v9751_v27  ;;  %5704 = vmatpush2.bf16.msra.mxu0 %v7033_v46 }
 0x55b   : > { %4331 = vmatprep.mubr.bf16.mxu1 %v11610_v59  ;;  %5705 = vmatprep.subr.bf16.mxu0 %v11610_v59 }
 0x55d   : > { %v6771_v34 = vpop.f32.mrf.mxu0  ;;  %6435 = vmatmul.mubr.msk.bf16.gmra.mxu0 %vm2587_vm0, %v9685_v26 }
 0x55e   : > { %4634 = vmatprep.mubr.bf16.mxu0 %v11610_v59  ;;  %v3756_v63 = vadd.f32 %v6771_v34, %v9581_v28  ;;  %5706 = vmatpush2.bf16.msra.mxu0 %v7035_v20 }
 0x55f   : > { %v3747_v51 = vpop.f32.mrf.mxu0  ;;  %5707 = vmatprep.subr.bf16.mxu0 %v11610_v59 }
 0x560   : > { %v3748_v55 = vadd.f32 %v3747_v51, %v9581_v28 }
 0x561   : > { %v6772_v41 = vpop.f32.mrf.mxu0 }
 0x562   : > { %6409 = vmatmul.mubr.msk.bf16.gmra.mxu1 %vm2587_vm0, %v9763_v25  ;;  %v3759_v17 = vadd.f32 %v6772_v41, %v9581_v28  ;;  %5708 = vmatpush2.bf16.msra.mxu0 %v7036_v42 }
 0x563   : > { %v3750_v40 = vpop.f32.mrf.mxu0  ;;  %4341 = vmatprep.mubr.bf16.mxu1 %v11610_v59 }
 0x564   : > { %v3751_v15 = vadd.f32 %v3750_v40, %v9581_v28  ;;  %v3905_v3 = vpack.c.bf16 %v3759_v17, %v3756_v63 }
 0x565   : > { %6436 = vmatmul.mubr.msk.bf16.gmra.mxu0 %vm2587_vm0, %v9699_v24 }
 0x566   : > { %v3904_v0 = vpack.c.bf16 %v3751_v15, %v3748_v55  ;;  %4644 = vmatprep.mubr.bf16.mxu0 %v11610_v59  ;;  %v9787_v26 = vmax.bf16 %v11610_v59, %v3905_v3 }
 0x568   : > { %v9775_v14 = vmax.bf16 %v11610_v59, %v3904_v0 }
 0x56a   : > { %6410 = vmatmul.mubr.msk.bf16.gmra.mxu1 %vm2587_vm0, %v9775_v14 }
 0x56b   : > { %4351 = vmatprep.mubr.bf16.mxu1 %v11610_v59 }
 0x56d   : > { %v6775_v2 = vpop.f32.mrf.mxu0  ;;  %6437 = vmatmul.mubr.msk.bf16.gmra.mxu0 %vm2587_vm0, %v9712_v4 }
 0x56e   : > { %4654 = vmatprep.mubr.bf16.mxu0 %v11610_v59  ;;  %v3772_v10 = vadd.f32 %v6775_v2, %v9581_v28 }
 0x56f   : > { %v3763_v33 = vpop.f32.mrf.mxu0 }
 0x570   : > { %v3764_v57 = vadd.f32 %v3763_v33, %v9581_v28 }
 0x571   : > { %v6776_v7 = vpop.f32.mrf.mxu0 }
 0x572   : > { %6411 = vmatmul.mubr.msk.bf16.gmra.mxu1 %vm2587_vm0, %v9787_v26  ;;  %v3775_v11 = vadd.f32 %v6776_v7, %v9581_v28 }
 0x573   : > { %v3766_v61 = vpop.f32.mrf.mxu0  ;;  %4361 = vmatprep.mubr.bf16.mxu1 %v11610_v59 }
 0x574   : > { %v3767_v6 = vadd.f32 %v3766_v61, %v9581_v28  ;;  %v3907_v52 = vpack.c.bf16 %v3775_v11, %v3772_v10 }
 0x575   : > { %6438 = vmatmul.mubr.msk.bf16.gmra.mxu0 %vm2587_vm0, %v9726_v58 }
 0x576   : > { %v3906_v16 = vpack.c.bf16 %v3767_v6, %v3764_v57  ;;  %4664 = vmatprep.mubr.bf16.mxu0 %v11610_v59  ;;  %v3939_v36 = vmax.bf16 %v11610_v59, %v3907_v52 }
 0x578   : > { %v9801_v24 = vmax.bf16 %v11610_v59, %v3906_v16 }
 0x57a   : > { %6412 = vmatmul.mubr.msk.bf16.gmra.mxu1 %vm2587_vm0, %v9801_v24 }
 0x57b   : > { %4371 = vmatprep.mubr.bf16.mxu1 %v11610_v59 }
 0x57d   : > { %v6779_v21 = vpop.f32.mrf.mxu0  ;;  %6439 = vmatmul.mubr.msk.bf16.gmra.mxu0 %vm2587_vm0, %v9739_v9 }
 0x57e   : > { %4674 = vmatprep.mubr.bf16.mxu0 %v11610_v59  ;;  %v3788_v38 = vadd.f32 %v6779_v21, %v9581_v28 }
 0x57f   : > { %v3779_v5 = vpop.f32.mrf.mxu0 }
 0x580   : > { %v3780_v47 = vadd.f32 %v3779_v5, %v9581_v28 }
 0x581   : > { %v6780_v32 = vpop.f32.mrf.mxu0 }
 0x582   : > { %6413 = vmatmul.mubr.msk.bf16.gmra.mxu1 %vm2587_vm0, %v3939_v36  ;;  %v3791_v53 = vadd.f32 %v6780_v32, %v9581_v28 }
 0x583   : > { %v3782_v4 = vpop.f32.mrf.mxu0  ;;  %4381 = vmatprep.mubr.bf16.mxu1 %v11610_v59 }
 0x584   : > { %v3783_v8 = vadd.f32 %v3782_v4, %v9581_v28  ;;  %v3909_v13 = vpack.c.bf16 %v3791_v53, %v3788_v38 }
 0x585   : > { %6440 = vmatmul.mubr.msk.bf16.gmra.mxu0 %vm2587_vm0, %v9751_v27 }
 0x586   : > { %v3908_v54 = vpack.c.bf16 %v3783_v8, %v3780_v47  ;;  %4684 = vmatprep.mubr.bf16.mxu0 %v11610_v59  ;;  %v3941_v23 = vmax.bf16 %v11610_v59, %v3909_v13 }
 0x588   : > { %v3940_v31 = vmax.bf16 %v11610_v59, %v3908_v54 }
 0x58a   : > { %6414 = vmatmul.mubr.msk.bf16.gmra.mxu1 %vm2587_vm0, %v3940_v31 }
 0x58b   : > { %4391 = vmatprep.mubr.bf16.mxu1 %v11610_v59 }
 0x58d   : > { %v6783_v58 = vpop.f32.mrf.mxu0  ;;  %6441 = vmatmul.mubr.msk.bf16.gmra.mxu0 %vm2587_vm0, %v9763_v25 }
 0x58e   : > { %4694 = vmatprep.mubr.bf16.mxu0 %v11610_v59  ;;  %v3804_v18 = vadd.f32 %v6783_v58, %v9581_v28 }
 0x58f   : > { %v3795_v29 = vpop.f32.mrf.mxu0 }
 0x590   : > { %v3796_v49 = vadd.f32 %v3795_v29, %v9581_v28 }
 0x591   : > { %v6784_v48 = vpop.f32.mrf.mxu0 }
 0x592   : > { %6415 = vmatmul.mubr.msk.bf16.gmra.mxu1 %vm2587_vm0, %v3941_v23  ;;  %v3807_v35 = vadd.f32 %v6784_v48, %v9581_v28 }
 0x593   : > { %v3798_v60 = vpop.f32.mrf.mxu0  ;;  %4401 = vmatprep.mubr.bf16.mxu1 %v11610_v59 }
 0x594   : > { %v3799_v56 = vadd.f32 %v3798_v60, %v9581_v28  ;;  %v3911_v45 = vpack.c.bf16 %v3807_v35, %v3804_v18 }
 0x595   : > { %6442 = vmatmul.mubr.msk.bf16.gmra.mxu0 %vm2587_vm0, %v9775_v14 }
 0x596   : > { %v3910_v9 = vpack.c.bf16 %v3799_v56, %v3796_v49  ;;  %4704 = vmatprep.mubr.bf16.mxu0 %v11610_v59  ;;  %v9848_v1 = vmax.bf16 %v11610_v59, %v3911_v45 }
 0x598   : > { %v9838_v22 = vmax.bf16 %v11610_v59, %v3910_v9 }
 0x59a   : > { %6416 = vmatmul.mubr.msk.bf16.gmra.mxu1 %vm2587_vm0, %v9838_v22 }
 0x59b   : > { %4411 = vmatprep.mubr.bf16.mxu1 %v11610_v59 }
 0x59d   : > { %v6787_v19 = vpop.f32.mrf.mxu0  ;;  %6443 = vmatmul.mubr.msk.bf16.gmra.mxu0 %vm2587_vm0, %v9787_v26 }
 0x59e   : > { %4714 = vmatprep.mubr.bf16.mxu0 %v11610_v59  ;;  %v3820_v40 = vadd.f32 %v6787_v19, %v9581_v28 }
 0x59f   : > { %v3811_v27 = vpop.f32.mrf.mxu0 }
 0x5a0   : > { %v3812_v39 = vadd.f32 %v3811_v27, %v9581_v28 }
 0x5a1   : > { %v6788_v50 = vpop.f32.mrf.mxu0 }
 0x5a2   : > { %6417 = vmatmul.mubr.msk.bf16.gmra.mxu1 %vm2587_vm0, %v9848_v1  ;;  %v3823_v25 = vadd.f32 %v6788_v50, %v9581_v28 }
 0x5a3   : > { %v3814_v30 = vpop.f32.mrf.mxu0  ;;  %4421 = vmatprep.mubr.bf16.mxu1 %v11610_v59 }
 0x5a4   : > { %v3815_v34 = vadd.f32 %v3814_v30, %v9581_v28  ;;  %v3913_v55 = vpack.c.bf16 %v3823_v25, %v3820_v40 }
 0x5a5   : > { %6444 = vmatmul.mubr.msk.bf16.gmra.mxu0 %vm2587_vm0, %v9801_v24 }
 0x5a6   : > { %v3912_v51 = vpack.c.bf16 %v3815_v34, %v3812_v39  ;;  %4724 = vmatprep.mubr.bf16.mxu0 %v11610_v59  ;;  %v9869_v17 = vmax.bf16 %v11610_v59, %v3913_v55 }
 0x5a8   : > { %v9860_v41 = vmax.bf16 %v11610_v59, %v3912_v51 }
 0x5aa   : > { %6418 = vmatmul.mubr.msk.bf16.gmra.mxu1 %vm2587_vm0, %v9860_v41 }
 0x5ab   : > { %4431 = vmatprep.mubr.bf16.mxu1 %v11610_v59 }
 0x5ad   : > { %v6791_v15 = vpop.f32.mrf.mxu0  ;;  %6445 = vmatmul.mubr.msk.bf16.gmra.mxu0 %vm2587_vm0, %v3939_v36 }
 0x5ae   : > { %4734 = vmatprep.mubr.bf16.mxu0 %v11610_v59  ;;  %v3836_v33 = vadd.f32 %v6791_v15, %v9581_v28 }
 0x5af   : > { %v3827_v0 = vpop.f32.mrf.mxu0 }
 0x5b0   : > { %v3828_v63 = vadd.f32 %v3827_v0, %v9581_v28 }
 0x5b1   : > { %v6792_v14 = vpop.f32.mrf.mxu0 }
 0x5b2   : > { %6419 = vmatmul.mubr.msk.bf16.gmra.mxu1 %vm2587_vm0, %v9869_v17  ;;  %v3839_v2 = vadd.f32 %v6792_v14, %v9581_v28 }
 0x5b3   : > { %v3830_v62 = vpop.f32.mrf.mxu0  ;;  %4441 = vmatprep.mubr.bf16.mxu1 %v11610_v59 }
 0x5b4   : > { %v3831_v37 = vadd.f32 %v3830_v62, %v9581_v28  ;;  %v3915_v7 = vpack.c.bf16 %v3839_v2, %v3836_v33  ;;  %v9991_v62 = vld [vmem:[%s11545_s8 + $0x5] ss:$8 sm:$0xf] }
 0x5b5   : > { %6446 = vmatmul.mubr.msk.bf16.gmra.mxu0 %vm2587_vm0, %v3940_v31 }
 0x5b6   : > { %v3914_v3 = vpack.c.bf16 %v3831_v37, %v3828_v63  ;;  %4744 = vmatprep.mubr.bf16.mxu0 %v11610_v59  ;;  %v9895_v16 = vmax.bf16 %v11610_v59, %v3915_v7 }
 0x5b8   : > { %v9880_v43 = vmax.bf16 %v11610_v59, %v3914_v3  ;;  %v11662_v3 = vld [vmem:[#allocation13_spill] sm:$0xff] }
 0x5b9   : > { %v11663_v2 = vsub.s32 1, %v11662_v3 }
 0x5ba   : > { %v9883_v26 = vpop.f32.mrf.mxu1  ;;  %6420 = vmatmul.mubr.msk.bf16.gmra.mxu1 %vm2587_vm0, %v9880_v43 }
 0x5bb   : > { %4451 = vmatprep.mubr.bf16.mxu1 %v11610_v59  ;;  %v9999_v33 = vrot.slane %v9991_v62, %v11663_v2 }
 0x5bc   : > { %v9888_v44 = vpop.f32.mrf.mxu1 }
 0x5bd   : > { %v6795_v61 = vpop.f32.mrf.mxu0  ;;  %6447 = vmatmul.mubr.msk.bf16.gmra.mxu0 %vm2587_vm0, %v3941_v23 }
 0x5be   : > { %v9891_v57 = vpop.f32.mrf.mxu1  ;;  %4754 = vmatprep.mubr.bf16.mxu0 %v11610_v59  ;;  %v3852_v8 = vadd.f32 %v6795_v61, %v9581_v28 }
 0x5bf   : > { %v3843_v6 = vpop.f32.mrf.mxu0 }
 0x5c0   : > { %v9897_v12 = vpop.f32.mrf.mxu1  ;;  %v3844_v46 = vadd.f32 %v3843_v6, %v9581_v28 }
 0x5c1   : > { %v6796_v11 = vpop.f32.mrf.mxu0 }
 0x5c2   : > { %v9899_v24 = vpop.f32.mrf.mxu1  ;;  %6421 = vmatmul.mubr.msk.bf16.gmra.mxu1 %vm2587_vm0, %v9895_v16  ;;  %v3855_v32 = vadd.f32 %v6796_v11, %v9581_v28  ;;  %v4210_v11 = vadd.f32 %v9897_v12, %v9999_v33 }
 0x5c3   : > { %v3846_v10 = vpop.f32.mrf.mxu0  ;;  %4461 = vmatprep.mubr.bf16.mxu1 %v11610_v59 }
 0x5c4   : > { %v3847_v52 = vadd.f32 %v3846_v10, %v9581_v28  ;;  %v9906_v21 = vpop.f32.mrf.mxu1  ;;  %v3917_v53 = vpack.c.bf16 %v3855_v32, %v3852_v8 }
 0x5c5   : > { %6448 = vmatmul.mubr.msk.bf16.gmra.mxu0 %vm2587_vm0, %v9838_v22 }
 0x5c6   : > { %v3916_v5 = vpack.c.bf16 %v3847_v52, %v3844_v46  ;;  %v9910_v36 = vpop.f32.mrf.mxu1  ;;  %4764 = vmatprep.mubr.bf16.mxu0 %v11610_v59  ;;  %v9933_v58 = vmax.bf16 %v11610_v59, %v3917_v53 }
 0x5c8   : > { %v9915_v4 = vmax.bf16 %v11610_v59, %v3916_v5  ;;  %v9917_v47 = vpop.f32.mrf.mxu1  ;;  %v4206_v5 = vadd.f32 %v9888_v44, %v9999_v33 }
 0x5ca   : > { %v9920_v54 = vpop.f32.mrf.mxu1  ;;  %6422 = vmatmul.mubr.msk.bf16.gmra.mxu1 %vm2587_vm0, %v9915_v4  ;;  %v4876_v12 = vpack.c.bf16 %v4210_v11, %v4206_v5 }
 0x5cb   : > { %4471 = vmatprep.mubr.bf16.mxu1 %v11610_v59 }
 0x5cc   : > { %v9925_v31 = vpop.f32.mrf.mxu1 }
 0x5cd   : > { %v6799_v38 = vpop.f32.mrf.mxu0  ;;  %6449 = vmatmul.mubr.msk.bf16.gmra.mxu0 %vm2587_vm0, %v9848_v1  ;;  %v4226_v5 = vadd.f32 %v9925_v31, %v9999_v33 }
 0x5ce   : > { %v9929_v20 = vpop.f32.mrf.mxu1  ;;  %4774 = vmatprep.mubr.bf16.mxu0 %v11610_v59  ;;  %v3868_v19 = vadd.f32 %v6799_v38, %v9581_v28 }
 0x5cf   : > { %v3859_v13 = vpop.f32.mrf.mxu0 }
 0x5d0   : > { %v9935_v29 = vpop.f32.mrf.mxu1  ;;  %v3860_v49 = vadd.f32 %v3859_v13, %v9581_v28 }
 0x5d1   : > { %v6800_v23 = vpop.f32.mrf.mxu0  ;;  %v4230_v2 = vadd.f32 %v9935_v29, %v9999_v33 }
 0x5d2   : > { %v9937_v48 = vpop.f32.mrf.mxu1  ;;  %6423 = vmatmul.mubr.msk.bf16.gmra.mxu1 %vm2587_vm0, %v9933_v58  ;;  %v3871_v18 = vadd.f32 %v6800_v23, %v9581_v28 }
 0x5d3   : > { %v3862_v60 = vpop.f32.mrf.mxu0  ;;  %4481 = vmatprep.mubr.bf16.mxu1 %v11610_v59  ;;  %v4884_v29 = vpack.c.bf16 %v4230_v2, %v4226_v5 }
 0x5d4   : > { %v3863_v56 = vadd.f32 %v3862_v60, %v9581_v28  ;;  %v9944_v9 = vpop.f32.mrf.mxu1  ;;  %v3919_v1 = vpack.c.bf16 %v3871_v18, %v3868_v19  ;;  %v5004_v18 = vmax.bf16 %v11610_v59, %v4876_v12 }
 0x5d5   : > { %6450 = vmatmul.mubr.msk.bf16.gmra.mxu0 %vm2587_vm0, %v9860_v41 }
 0x5d6   : > { %v3918_v35 = vpack.c.bf16 %v3863_v56, %v3860_v49  ;;  %v9948_v22 = vpop.f32.mrf.mxu1  ;;  %4784 = vmatprep.mubr.bf16.mxu0 %v11610_v59  ;;  %v9971_v51 = vmax.bf16 %v11610_v59, %v3919_v1 }
 0x5d8   : > { %v9953_v42 = vmax.bf16 %v11610_v59, %v3918_v35  ;;  %v9955_v45 = vpop.f32.mrf.mxu1 }
 0x5da   : > { %v9958_v27 = vpop.f32.mrf.mxu1  ;;  %6424 = vmatmul.mubr.msk.bf16.gmra.mxu1 %vm2587_vm0, %v9953_v42 }
 0x5db   : > { %4491 = vmatprep.mubr.bf16.mxu1 %v11610_v59 }
 0x5dc   : > { %v9963_v50 = vpop.f32.mrf.mxu1 }
 0x5dd   : > { %v6803_v30 = vpop.f32.mrf.mxu0  ;;  %6451 = vmatmul.mubr.msk.bf16.gmra.mxu0 %vm2587_vm0, %v9869_v17 }
 0x5de   : > { %v9967_v39 = vpop.f32.mrf.mxu1  ;;  %4794 = vmatprep.mubr.bf16.mxu0 %v11610_v59  ;;  %v3884_v46 = vadd.f32 %v6803_v30, %v9581_v28 }
 0x5df   : > { %v3875_v34 = vpop.f32.mrf.mxu0 }
 0x5e0   : > { %v9973_v25 = vpop.f32.mrf.mxu1  ;;  %v3876_v15 = vadd.f32 %v3875_v34, %v9581_v28 }
 0x5e1   : > { %v6804_v41 = vpop.f32.mrf.mxu0 }
 0x5e2   : > { %v9975_v40 = vpop.f32.mrf.mxu1  ;;  %6425 = vmatmul.mubr.msk.bf16.gmra.mxu1 %vm2587_vm0, %v9971_v51  ;;  %v3887_v61 = vadd.f32 %v6804_v41, %v9581_v28 }
 0x5e3   : > { %v3878_v55 = vpop.f32.mrf.mxu0  ;;  %4501 = vmatprep.mubr.bf16.mxu1 %v11610_v59 }
 0x5e4   : > { %v3879_v0 = vadd.f32 %v3878_v55, %v9581_v28  ;;  %v9982_v17 = vpop.f32.mrf.mxu1  ;;  %v3921_v8 = vpack.c.bf16 %v3887_v61, %v3884_v46  ;;  %v11664_v28 = vsub.s32 0, %v11662_v3 }
 0x5e5   : > { %v9984_v14 = vpop.f32.mrf.mxu0  ;;  %6452 = vmatmul.mubr.msk.bf16.gmra.mxu0 %vm2587_vm0, %v9880_v43 }
 0x5e6   : > { %v3920_v63 = vpack.c.bf16 %v3879_v0, %v3876_v15  ;;  %v9993_v37 = vpop.f32.mrf.mxu1  ;;  %4804 = vmatprep.mubr.bf16.mxu0 %v11610_v59  ;;  %v10032_v13 = vrot.slane %v9991_v62, %v11664_v28  ;;  %v10042_v49 = vmax.bf16 %v11610_v59, %v3921_v8 }
 0x5e7   : > { %v10001_v7 = vpop.f32.mrf.mxu0 }
 0x5e8   : > { %v10005_v43 = vmax.bf16 %v11610_v59, %v3920_v63  ;;  %v10007_v6 = vpop.f32.mrf.mxu1  ;;  %v4208_v60 = vadd.f32 %v9891_v57, %v10032_v13  ;;  %v4204_v19 = vadd.f32 %v9883_v26, %v10032_v13  ;;  %v4216_v57 = vadd.f32 %v9906_v21, %v9999_v33 }
 0x5e9   : > { %v10011_v10 = vpop.f32.mrf.mxu0  ;;  %v4218_v0 = vadd.f32 %v9910_v36, %v10032_v13  ;;  %v4214_v11 = vadd.f32 %v9899_v24, %v10032_v13  ;;  %v4238_v5 = vadd.f32 %v9948_v22, %v10032_v13 }
 0x5ea   : > { %v10014_v52 = vpop.f32.mrf.mxu1  ;;  %6426 = vmatmul.mubr.msk.bf16.gmra.mxu1 %vm2587_vm0, %v10005_v43  ;;  %v4875_v34 = vpack.c.bf16 %v4208_v60, %v4204_v19  ;;  %v4240_v19 = vadd.f32 %v9955_v45, %v9999_v33 }
 0x5eb   : > { %v10020_v32 = vpop.f32.mrf.mxu0  ;;  %4511 = vmatprep.mubr.bf16.mxu1 %v11610_v59  ;;  %v4879_v36 = vpack.c.bf16 %v4218_v0, %v4214_v11 }
 0x5ec   : > { %v10023_v53 = vpop.f32.mrf.mxu1  ;;  %v5003_v21 = vmax.bf16 %v11610_v59, %v4875_v34  ;;  %v4224_v34 = vadd.f32 %v9920_v54, %v10032_v13 }
 0x5ed   : > { %v10025_v38 = vpop.f32.mrf.mxu0  ;;  %6453 = vmatmul.mubr.msk.bf16.gmra.mxu0 %vm2587_vm0, %v9895_v16  ;;  %v4220_v16 = vadd.f32 %v9917_v47, %v9999_v33  ;;  %v5007_v31 = vmax.bf16 %v11610_v59, %v4879_v36 }
 0x5ee   : > { %v10034_v23 = vpop.f32.mrf.mxu1  ;;  %4814 = vmatprep.mubr.bf16.mxu0 %v11610_v59 }
 0x5ef   : > { %v10037_v44 = vpop.f32.mrf.mxu0  ;;  %v4880_v41 = vpack.c.bf16 %v4220_v16, %v4216_v57  ;;  %v4228_v16 = vadd.f32 %v9929_v20, %v10032_v13 }
 0x5f0   : > { %v10044_v56 = vpop.f32.mrf.mxu1 }
 0x5f1   : > { %v10048_v35 = vpop.f32.mrf.mxu0  ;;  %v4883_v20 = vpack.c.bf16 %v4228_v16, %v4224_v34  ;;  %v4234_v16 = vadd.f32 %v9937_v48, %v10032_v13 }
 0x5f2   : > { %v10053_v1 = vpop.f32.mrf.mxu1  ;;  %6427 = vmatmul.mubr.msk.bf16.gmra.mxu1 %vm2587_vm0, %v10042_v49 }
 0x5f3   : > { %v10059_v30 = vpop.f32.mrf.mxu0  ;;  %5420 = vmatprep.mubr.bf16.mxu1 %v5004_v18  ;;  %v4887_v22 = vpack.c.bf16 %v4238_v5, %v4234_v16  ;;  %v4244_v16 = vadd.f32 %v9958_v27, %v10032_v13 }
 0x5f4   : > { %v10061_v47 = vpop.f32.mrf.mxu1 }
 0x5f5   : > { %v10063_v55 = vpop.f32.mrf.mxu0  ;;  %6454 = vmatmul.mubr.msk.bf16.gmra.mxu0 %vm2587_vm0, %v9915_v4  ;;  %v5008_v4 = vmax.bf16 %v11610_v59, %v4880_v41 }
 0x5f6   : > { %v10067_v26 = vpop.f32.mrf.mxu1  ;;  %4824 = vmatprep.mubr.bf16.mxu0 %v11610_v59 }
 0x5f7   : > { %v10070_v15 = vpop.f32.mrf.mxu0 }
 0x5f8   : > { %v10075_v63 = vpop.f32.mrf.mxu1 }
 0x5f9   : > { %v10079_v61 = vpop.f32.mrf.mxu0 }
 0x5fa   : > { %v10084_v46 = vpop.f32.mrf.mxu1  ;;  %5421 = vmatmul.mubr.bf16.vlgmr.msra.gmra.mxu1 %v5003_v21  ;;  %v4236_v21 = vadd.f32 %v9944_v9, %v9999_v33  ;;  %v5011_v9 = vmax.bf16 %v11610_v59, %v4883_v20 }
 0x5fb   : > { %v10088_v8 = vpop.f32.mrf.mxu0  ;;  %5428 = vmatprep.mubr.bf16.mxu1 %v5008_v4 }
 0x5fc   : > { %v10090_v12 = vpop.f32.mrf.mxu1  ;;  %v4888_v45 = vpack.c.bf16 %v4240_v19, %v4236_v21 }
 0x5fd   : > { %v10092_v28 = vpop.f32.mrf.mxu0  ;;  %6455 = vmatmul.mubr.msk.bf16.gmra.mxu0 %vm2587_vm0, %v9933_v58  ;;  %v5012_v58 = vmax.bf16 %v11610_v59, %v4884_v29  ;;  %v4250_v29 = vadd.f32 %v9973_v25, %v9999_v33 }
 0x5fe   : > { %v10096_v60 = vpop.f32.mrf.mxu1  ;;  %4834 = vmatprep.mubr.bf16.mxu0 %v11610_v59 }
 0x5ff   : > { %v10099_v24 = vpop.f32.mrf.mxu0 }
 0x600   : > { %v10104_v18 = vpop.f32.mrf.mxu1 }
 0x601   : > { %v10108_v57 = vpop.f32.mrf.mxu0 }
 0x602   : > { %v10113_v41 = vpop.f32.mrf.mxu1  ;;  %5429 = vmatmul.mubr.bf16.gmra.mxu1 %v5007_v31 }
 0x603   : > { %v10117_v0 = vpop.f32.mrf.mxu0  ;;  %5436 = vmatprep.mubr.bf16.mxu1 %v5012_v58  ;;  %v4246_v58 = vadd.f32 %v9963_v50, %v9999_v33  ;;  %v5015_v50 = vmax.bf16 %v11610_v59, %v4887_v22 }
 0x604   : > { %v10119_v2 = vpop.f32.mrf.mxu1 }
 0x605   : > { %v10121_v4 = vpop.f32.mrf.mxu0  ;;  %6456 = vmatmul.mubr.msk.bf16.gmra.mxu0 %vm2587_vm0, %v9953_v42  ;;  %v5016_v42 = vmax.bf16 %v11610_v59, %v4888_v45  ;;  %v4892_v25 = vpack.c.bf16 %v4250_v29, %v4246_v58  ;;  %v4260_v29 = vadd.f32 %v10007_v6, %v9999_v33  ;;  %v11669_v58 = vsub.s32 3, %v11662_v3 }
 0x606   : > { %v10125_v11 = vpop.f32.mrf.mxu1  ;;  %4844 = vmatprep.mubr.bf16.mxu0 %v11610_v59 }
 0x607   : > { %v10128_v54 = vpop.f32.mrf.mxu0 }
 0x608   : > { %v10133_v36 = vpop.f32.mrf.mxu1 }
 0x609   : > { %v10137_v31 = vpop.f32.mrf.mxu0 }
 0x60a   : > { %v10142_v19 = vpop.f32.mrf.mxu1  ;;  %5437 = vmatmul.mubr.bf16.gmra.mxu1 %v5011_v9  ;;  %v4248_v9 = vadd.f32 %v9967_v39, %v10032_v13  ;;  %v4256_v39 = vadd.f32 %v9982_v17, %v9999_v33 }
 0x60b   : > { %11665 = vst [vmem:[#allocation26_spill] sm:$0xff] %v10142_v19  ;;  %v10146_v34 = vpop.f32.mrf.mxu0  ;;  %5444 = vmatprep.mubr.bf16.mxu1 %v5016_v42 }
 0x60c   : > { %v10148_v21 = vpop.f32.mrf.mxu1  ;;  %v4891_v6 = vpack.c.bf16 %v4248_v9, %v4244_v16  ;;  %v4896_v27 = vpack.c.bf16 %v4260_v29, %v4256_v39  ;;  %v11672_v16 = vsub.s32 2, %v11662_v3 }
 0x60d   : > { %v10150_v20 = vpop.f32.mrf.mxu0  ;;  %6457 = vmatmul.mubr.msk.bf16.gmra.mxu0 %vm2587_vm0, %v9971_v51  ;;  %v5020_v51 = vmax.bf16 %v11610_v59, %v4892_v25 }
 0x60e   : > { %11666 = vst [vmem:[#allocation25_spill] sm:$0xff] %v10150_v20  ;;  %v10154_v45 = vpop.f32.mrf.mxu1  ;;  %4854 = vmatprep.mubr.bf16.mxu0 %v11610_v59  ;;  %v10174_v20 = vrot.slane %v9991_v62, %v11669_v58  ;;  %v5019_v9 = vmax.bf16 %v11610_v59, %v4891_v6  ;;  %v4254_v6 = vadd.f32 %v9975_v40, %v10032_v13 }
 0x60f   : > { %11667 = vst [vmem:[#allocation24_spill] sm:$0xff] %v10154_v45  ;;  %v10157_v48 = vpop.f32.mrf.mxu0 }
 0x610   : > { %v10162_v5 = vpop.f32.mrf.mxu1  ;;  %v4563_v25 = vadd.f32 %v10020_v32, %v10174_v20  ;;  %v4258_v32 = vadd.f32 %v9993_v37, %v10032_v13 }
 0x611   : > { %v10166_v42 = vpop.f32.mrf.mxu0 }
 0x612   : > { %11668 = vst [vmem:[#allocation23_spill] sm:$0xff] %v10166_v42  ;;  %v10176_v22 = vpop.f32.mrf.mxu1  ;;  %5445 = vmatmul.mubr.bf16.gmra.mxu1 %v5015_v50  ;;  %v4559_v50 = vadd.f32 %v10001_v7, %v10174_v20  ;;  %v4270_v7 = vadd.f32 %v10044_v56, %v9999_v33  ;;  %v4895_v56 = vpack.c.bf16 %v4258_v32, %v4254_v6 }
 0x613   : > { %11670 = vst [vmem:[#allocation30_spill] sm:$0xff] %v10176_v22  ;;  %v10180_v19 = vpop.f32.mrf.mxu0  ;;  %5452 = vmatprep.mubr.bf16.mxu1 %v5020_v51 }
 0x614   : > { %v10184_v42 = vpop.f32.mrf.mxu1  ;;  %v4878_v29 = vpack.c.bf16 %v4563_v25, %v4559_v50  ;;  %v4573_v25 = vadd.f32 %v10059_v30, %v10174_v20  ;;  %v5023_v32 = vmax.bf16 %v11610_v59, %v4895_v56 }
 0x615   : > { %v10186_v45 = vpop.f32.mrf.mxu0  ;;  %6458 = vmatmul.mubr.msk.bf16.gmra.mxu0 %vm2587_vm0, %v10005_v43  ;;  %v10205_v43 = vrot.slane %v9991_v62, %v11672_v16  ;;  %v4266_v62 = vadd.f32 %v10023_v53, %v9999_v33 }
 0x616   : > { %11671 = vst [vmem:[#allocation29_spill] sm:$0xff] %v10186_v45  ;;  %v10192_v58 = vpop.f32.mrf.mxu1  ;;  %4864 = vmatprep.mubr.bf16.mxu0 %v11610_v59  ;;  %v5024_v45 = vmax.bf16 %v11610_v59, %v4896_v27  ;;  %v5006_v40 = vmax.bf16 %v11610_v59, %v4878_v29 }
 0x617   : > { %v10195_v17 = vpop.f32.mrf.mxu0  ;;  %v4561_v37 = vadd.f32 %v10011_v10, %v10205_v43  ;;  %v4557_v50 = vadd.f32 %v9984_v14, %v10205_v43  ;;  %v4569_v10 = vadd.f32 %v10037_v44, %v10174_v20  ;;  %v4268_v14 = vadd.f32 %v10034_v23, %v10032_v13 }
 0x618   : > { %v10200_v51 = vpop.f32.mrf.mxu1  ;;  %v4571_v23 = vadd.f32 %v10048_v35, %v10205_v43  ;;  %v4579_v35 = vadd.f32 %v10070_v15, %v10174_v20 }
 0x619   : > { %v10209_v39 = vpop.f32.mrf.mxu0  ;;  %v4877_v30 = vpack.c.bf16 %v4561_v37, %v4557_v50  ;;  %v4882_v29 = vpack.c.bf16 %v4573_v25, %v4569_v10  ;;  %v4264_v37 = vadd.f32 %v10014_v52, %v10032_v13  ;;  %v4276_v25 = vadd.f32 %v10061_v47, %v9999_v33 }
 0x61a   : > { %v10214_v22 = vpop.f32.mrf.mxu1  ;;  %5453 = vmatmul.mubr.bf16.gmra.mxu1 %v5019_v9  ;;  %v4900_v9 = vpack.c.bf16 %v4270_v7, %v4266_v62  ;;  %v4583_v50 = vadd.f32 %v10088_v8, %v10174_v20  ;;  %v4567_v10 = vadd.f32 %v10025_v38, %v10205_v43 }
 0x61b   : > { %v10220_v3 = vpop.f32.mrf.mxu0  ;;  %5460 = vmatprep.mubr.bf16.mxu1 %v5024_v45  ;;  %v5005_v56 = vmax.bf16 %v11610_v59, %v4877_v30  ;;  %v5010_v52 = vmax.bf16 %v11610_v59, %v4882_v29  ;;  %v4278_v29 = vadd.f32 %v10067_v26, %v10032_v13  ;;  %v4581_v26 = vadd.f32 %v10079_v61, %v10205_v43 }
 0x61c   : > { %v10224_v27 = vpop.f32.mrf.mxu1  ;;  %v5028_v44 = vmax.bf16 %v11610_v59, %v4900_v9  ;;  %v4589_v61 = vadd.f32 %v10099_v24, %v10174_v20 }
 0x61d   : > { %v10229_v16 = vpop.f32.mrf.mxu0  ;;  %6459 = vmatmul.mubr.msk.bf16.gmra.mxu0 %vm2587_vm0, %v10042_v49  ;;  %v4280_v49 = vadd.f32 %v10075_v63, %v9999_v33  ;;  %v4899_v63 = vpack.c.bf16 %v4268_v14, %v4264_v37  ;;  %v4881_v14 = vpack.c.bf16 %v4571_v23, %v4567_v10  ;;  %v4886_v37 = vpack.c.bf16 %v4583_v50, %v4579_v35 }
 0x61e   : > { %v10235_v53 = vpop.f32.mrf.mxu1  ;;  %5709 = vmatprep.mubr.bf16.mxu0 %v5006_v40  ;;  %v4274_v23 = vadd.f32 %v10053_v1, %v10032_v13  ;;  %v4286_v50 = vadd.f32 %v10090_v12, %v9999_v33  ;;  %v4593_v10 = vadd.f32 %v10117_v0, %v10174_v20  ;;  %v4577_v35 = vadd.f32 %v10063_v55, %v10205_v43 }
 0x61f   : > { %v10237_v45 = vpop.f32.mrf.mxu0  ;;  %v4904_v30 = vpack.c.bf16 %v4280_v49, %v4276_v25  ;;  %v5027_v8 = vmax.bf16 %v11610_v59, %v4899_v63  ;;  %v4290_v49 = vadd.f32 %v10104_v18, %v9999_v33  ;;  %v5009_v63 = vmax.bf16 %v11610_v59, %v4881_v14 }
 0x620   : > { %v10242_v7 = vpop.f32.mrf.mxu1  ;;  %v4903_v18 = vpack.c.bf16 %v4278_v29, %v4274_v23  ;;  %v5014_v1 = vmax.bf16 %v11610_v59, %v4886_v37  ;;  %v4885_v29 = vpack.c.bf16 %v4581_v26, %v4577_v35  ;;  %v4288_v37 = vadd.f32 %v10096_v60, %v10032_v13 }
 0x621   : > { %v10246_v6 = vpop.f32.mrf.mxu0  ;;  %v5032_v15 = vmax.bf16 %v11610_v59, %v4904_v30  ;;  %v4908_v14 = vpack.c.bf16 %v4290_v49, %v4286_v50  ;;  %v4890_v23 = vpack.c.bf16 %v4593_v10, %v4589_v61  ;;  %v4300_v49 = vadd.f32 %v10133_v36, %v9999_v33 }
 0x622   : > { %v10251_v62 = vpop.f32.mrf.mxu1  ;;  %5461 = vmatmul.mubr.bf16.gmra.mxu1 %v5023_v32  ;;  %v5031_v0 = vmax.bf16 %v11610_v59, %v4903_v18  ;;  %v4284_v26 = vadd.f32 %v10084_v46, %v10032_v13  ;;  %v5013_v18 = vmax.bf16 %v11610_v59, %v4885_v29  ;;  %v4591_v60 = vadd.f32 %v10108_v57, %v10205_v43 }
 0x623   : > { %v10258_v40 = vpop.f32.mrf.mxu0  ;;  %5468 = vmatprep.mubr.bf16.mxu1 %v5028_v44  ;;  %v5036_v24 = vmax.bf16 %v11610_v59, %v4908_v14  ;;  %v4296_v10 = vadd.f32 %v10119_v2, %v9999_v33  ;;  %v4603_v35 = vadd.f32 %v10146_v34, %v10174_v20  ;;  %v5018_v46 = vmax.bf16 %v11610_v59, %v4890_v23 }
 0x624   : > { %v10262_v9 = vpop.f32.mrf.mxu1  ;;  %v4907_v36 = vpack.c.bf16 %v4288_v37, %v4284_v26  ;;  %v4587_v61 = vadd.f32 %v10092_v28, %v10205_v43  ;;  %v4599_v57 = vadd.f32 %v10128_v54, %v10174_v20  ;;  %v4298_v23 = vadd.f32 %v10125_v11, %v10032_v13 }
 0x625   : > { %v10267_v32 = vpop.f32.mrf.mxu0  ;;  %5710 = vmatmul.mubr.bf16.vlgmr.msra.gmra.mxu0 %v5005_v56  ;;  %v4912_v29 = vpack.c.bf16 %v4300_v49, %v4296_v10  ;;  %v4310_v49 = vadd.f32 %v10162_v5, %v9999_v33  ;;  %v4601_v11 = vadd.f32 %v10137_v31, %v10205_v43  ;;  %v4609_v31 = vadd.f32 %v10157_v48, %v10174_v20 }
 0x626   : > { %v10271_v47 = vpop.f32.mrf.mxu1  ;;  %5717 = vmatprep.mubr.bf16.mxu0 %v5010_v52  ;;  %v4889_v37 = vpack.c.bf16 %v4591_v60, %v4587_v61  ;;  %v5035_v34 = vmax.bf16 %v11610_v59, %v4907_v36  ;;  %v4894_v26 = vpack.c.bf16 %v4603_v35, %v4599_v57  ;;  %v4294_v60 = vadd.f32 %v10113_v41, %v10032_v13 }
 0x627   : > { %v10273_v44 = vpop.f32.mrf.mxu0  ;;  %v5040_v54 = vmax.bf16 %v11610_v59, %v4912_v29  ;;  %v4306_v35 = vadd.f32 %v10148_v21, %v9999_v33  ;;  %v4613_v61 = vadd.f32 %v10180_v19, %v10174_v20  ;;  %v4597_v57 = vadd.f32 %v10121_v4, %v10205_v43 }
 0x628   : > { %v10278_v38 = vpop.f32.mrf.mxu1  ;;  %v5017_v36 = vmax.bf16 %v11610_v59, %v4889_v37  ;;  %v4911_v5 = vpack.c.bf16 %v4298_v23, %v4294_v60  ;;  %v5022_v41 = vmax.bf16 %v11610_v59, %v4894_v26  ;;  %v11675_v26 = vld [vmem:[#allocation24_spill] sm:$0xff] }
 0x629   : > { %v10282_v56 = vpop.f32.mrf.mxu0  ;;  %v4916_v37 = vpack.c.bf16 %v4310_v49, %v4306_v35  ;;  %v4893_v23 = vpack.c.bf16 %v4601_v11, %v4597_v57  ;;  %v4308_v60 = vadd.f32 %v11675_v26, %v10032_v13  ;;  %v4320_v49 = vadd.f32 %v10200_v51, %v9999_v33  ;;  %v11677_v35 = vld [vmem:[#allocation26_spill] sm:$0xff]  ;;  %v11679_v57 = vld [vmem:[#allocation23_spill] sm:$0xff] }
 0x62a   : > { %v10287_v25 = vpop.f32.mrf.mxu1  ;;  %5469 = vmatmul.mubr.bf16.gmra.mxu1 %v5027_v8  ;;  %v5039_v19 = vmax.bf16 %v11610_v59, %v4911_v5  ;;  %v4304_v11 = vadd.f32 %v11677_v35, %v10032_v13 }
 0x62b   : > { %v10294_v52 = vpop.f32.mrf.mxu0  ;;  %5476 = vmatprep.mubr.bf16.mxu1 %v5032_v15  ;;  %v5044_v48 = vmax.bf16 %v11610_v59, %v4916_v37  ;;  %v5021_v5 = vmax.bf16 %v11610_v59, %v4893_v23  ;;  %v4623_v37 = vadd.f32 %v10220_v3, %v10174_v20 }
 0x62c   : > { %v10298_v30 = vpop.f32.mrf.mxu1  ;;  %v4915_v51 = vpack.c.bf16 %v4308_v60, %v4304_v11 }
 0x62d   : > { %v10303_v8 = vpop.f32.mrf.mxu0  ;;  %5718 = vmatmul.mubr.bf16.gmra.mxu0 %v5009_v63 }
 0x62e   : > { %v10307_v12 = vpop.f32.mrf.mxu1  ;;  %5725 = vmatprep.mubr.bf16.mxu0 %v5014_v1  ;;  %v5043_v3 = vmax.bf16 %v11610_v59, %v4915_v51 }
 0x62f   : > { %v10309_v15 = vpop.f32.mrf.mxu0 }
 0x630   : > { %v10314_v55 = vpop.f32.mrf.mxu1 }
 0x631   : > { %v10318_v63 = vpop.f32.mrf.mxu0 }
 0x632   : > { %v10323_v50 = vpop.f32.mrf.mxu1  ;;  %5477 = vmatmul.mubr.bf16.gmra.mxu1 %v5031_v0 }
 0x633   : > { %v10330_v1 = vpop.f32.mrf.mxu0  ;;  %5484 = vmatprep.mubr.bf16.mxu1 %v5036_v24 }
 0x634   : > { %v10334_v14 = vpop.f32.mrf.mxu1 }
 0x635   : > { %v10339_v0 = vpop.f32.mrf.mxu0  ;;  %5726 = vmatmul.mubr.bf16.gmra.mxu0 %v5013_v18 }
 0x636   : > { %v10343_v2 = vpop.f32.mrf.mxu1  ;;  %5733 = vmatprep.mubr.bf16.mxu0 %v5018_v46 }
 0x637   : > { %v10345_v24 = vpop.f32.mrf.mxu0 }
 0x638   : > { %v10350_v28 = vpop.f32.mrf.mxu1 }
 0x639   : > { %v10354_v18 = vpop.f32.mrf.mxu0 }
 0x63a   : > { %v10359_v10 = vpop.f32.mrf.mxu1  ;;  %5485 = vmatmul.mubr.bf16.gmra.mxu1 %v5035_v34 }
 0x63b   : > { %11673 = vst [vmem:[#allocation28_spill] sm:$0xff] %v10359_v10  ;;  %v10366_v46 = vpop.f32.mrf.mxu0  ;;  %5492 = vmatprep.mubr.bf16.mxu1 %v5040_v54  ;;  %v4898_v10 = vpack.c.bf16 %v4613_v61, %v4609_v31  ;;  %v4611_v61 = vadd.f32 %v11679_v57, %v10205_v43  ;;  %v4316_v31 = vadd.f32 %v10184_v42, %v9999_v33 }
 0x63c   : > { %v10370_v29 = vpop.f32.mrf.mxu1  ;;  %v4619_v42 = vadd.f32 %v10195_v17, %v10174_v20 }
 0x63d   : > { %v10375_v34 = vpop.f32.mrf.mxu0  ;;  %5734 = vmatmul.mubr.bf16.gmra.mxu0 %v5017_v36  ;;  %v5026_v35 = vmax.bf16 %v11610_v59, %v4898_v10  ;;  %v4318_v10 = vadd.f32 %v10192_v58, %v10032_v13  ;;  %v4621_v58 = vadd.f32 %v10209_v39, %v10205_v43  ;;  %v4629_v39 = vadd.f32 %v10237_v45, %v10174_v20 }
 0x63e   : > { %11674 = vst [vmem:[#allocation27_spill] sm:$0xff] %v10375_v34  ;;  %v10379_v21 = vpop.f32.mrf.mxu1  ;;  %5741 = vmatprep.mubr.bf16.mxu0 %v5022_v41  ;;  %v4902_v11 = vpack.c.bf16 %v4623_v37, %v4619_v42  ;;  %v4326_v37 = vadd.f32 %v10224_v27, %v9999_v33 }
 0x63f   : > { %v10381_v54 = vpop.f32.mrf.mxu0 }
 0x640   : > { %v10386_v4 = vpop.f32.mrf.mxu1 }
 0x641   : > { %v10390_v36 = vpop.f32.mrf.mxu0 }
 0x642   : > { %11676 = vst [vmem:[#allocation14_spill] sm:$0xff] %v10390_v36  ;;  %v10395_v41 = vpop.f32.mrf.mxu1  ;;  %5493 = vmatmul.mubr.bf16.gmra.mxu1 %v5039_v19  ;;  %v11680_v19 = vld [vmem:[#allocation25_spill] sm:$0xff] }
 0x643   : > { %11678 = vst [vmem:[#allocation18_spill] sm:$0xff] %v10395_v41  ;;  %v10402_v26 = vpop.f32.mrf.mxu0  ;;  %5500 = vmatprep.mubr.bf16.mxu1 %v5044_v48  ;;  %v4607_v23 = vadd.f32 %v11680_v19, %v10205_v43  ;;  %v4920_v41 = vpack.c.bf16 %v4320_v49, %v4316_v31  ;;  %v4330_v49 = vadd.f32 %v10242_v7, %v9999_v33  ;;  %v11682_v31 = vld [vmem:[#allocation30_spill] sm:$0xff] }
 0x644   : > { %v10406_v34 = vpop.f32.mrf.mxu1 }
 0x645   : > { %v10411_v36 = vpop.f32.mrf.mxu0  ;;  %5742 = vmatmul.mubr.bf16.gmra.mxu0 %v5021_v5  ;;  %v4897_v60 = vpack.c.bf16 %v4611_v61, %v4607_v23  ;;  %v5048_v17 = vmax.bf16 %v11610_v59, %v4920_v41  ;;  %v4314_v61 = vadd.f32 %v11682_v31, %v10032_v13  ;;  %v4633_v41 = vadd.f32 %v10258_v40, %v10174_v20 }
 0x646   : > { %11681 = vst [vmem:[#allocation17_spill] sm:$0xff] %v10411_v36  ;;  %v10415_v57 = vpop.f32.mrf.mxu1  ;;  %5749 = vmatprep.mubr.bf16.mxu0 %v5026_v35  ;;  %v5030_v31 = vmax.bf16 %v11610_v59, %v4902_v11  ;;  %v4328_v11 = vadd.f32 %v10235_v53, %v10032_v13  ;;  %v4631_v53 = vadd.f32 %v10246_v6, %v10205_v43 }
 0x647   : > { %v10417_v48 = vpop.f32.mrf.mxu0  ;;  %v5025_v51 = vmax.bf16 %v11610_v59, %v4897_v60  ;;  %v4919_v7 = vpack.c.bf16 %v4318_v10, %v4314_v61  ;;  %v4906_v61 = vpack.c.bf16 %v4633_v41, %v4629_v39  ;;  %v4336_v41 = vadd.f32 %v10262_v9, %v9999_v33 }
 0x648   : > { %v10422_v19 = vpop.f32.mrf.mxu1  ;;  %v4627_v39 = vadd.f32 %v10229_v16, %v10205_v43  ;;  %v4639_v6 = vadd.f32 %v10273_v44, %v10174_v20 }
 0x649   : > { %v10426_v5 = vpop.f32.mrf.mxu0  ;;  %v5047_v40 = vmax.bf16 %v11610_v59, %v4919_v7 }
 0x64a   : > { %v10431_v35 = vpop.f32.mrf.mxu1  ;;  %5501 = vmatmul.mubr.bf16.gmra.mxu1 %v5043_v3  ;;  %v11684_v3 = vld [vmem:[#allocation29_spill] sm:$0xff] }
 0x64b   : > { %11683 = vst [vmem:[#allocation16_spill] sm:$0xff] %v10431_v35  ;;  %v10438_v23 = vpop.f32.mrf.mxu0  ;;  %5508 = vmatprep.mubr.bf16.mxu1 %v5048_v17  ;;  %v4617_v60 = vadd.f32 %v11684_v3, %v10205_v43  ;;  %v4924_v35 = vpack.c.bf16 %v4330_v49, %v4326_v37  ;;  %v4340_v49 = vadd.f32 %v10278_v38, %v9999_v33 }
 0x64c   : > { %v10442_v42 = vpop.f32.mrf.mxu1 }
 0x64d   : > { %v10447_v36 = vpop.f32.mrf.mxu0  ;;  %5750 = vmatmul.mubr.bf16.gmra.mxu0 %v5025_v51  ;;  %v4901_v10 = vpack.c.bf16 %v4621_v58, %v4617_v60  ;;  %v5052_v45 = vmax.bf16 %v11610_v59, %v4924_v35  ;;  %v4324_v58 = vadd.f32 %v10214_v22, %v10032_v13  ;;  %v4643_v35 = vadd.f32 %v10294_v52, %v10174_v20 }
 0x64e   : > { %v10451_v27 = vpop.f32.mrf.mxu1  ;;  %5757 = vmatprep.mubr.bf16.mxu0 %v5030_v31  ;;  %v5034_v22 = vmax.bf16 %v11610_v59, %v4906_v61  ;;  %v4338_v61 = vadd.f32 %v10271_v47, %v10032_v13  ;;  %v4641_v47 = vadd.f32 %v10282_v56, %v10205_v43  ;;  %v4649_v56 = vadd.f32 %v10309_v15, %v10174_v20 }
 0x64f   : > { %v10453_v17 = vpop.f32.mrf.mxu0  ;;  %v5029_v7 = vmax.bf16 %v11610_v59, %v4901_v10  ;;  %v4923_v38 = vpack.c.bf16 %v4328_v11, %v4324_v58  ;;  %v4928_v10 = vpack.c.bf16 %v4340_v49, %v4336_v41  ;;  %v4905_v11 = vpack.c.bf16 %v4631_v53, %v4627_v39 }
 0x650   : > { %v10458_v3 = vpop.f32.mrf.mxu1  ;;  %v4910_v58 = vpack.c.bf16 %v4643_v35, %v4639_v6  ;;  %v4350_v49 = vadd.f32 %v10314_v55, %v9999_v33  ;;  %v4334_v53 = vadd.f32 %v10251_v62, %v10032_v13  ;;  %v4346_v35 = vadd.f32 %v10298_v30, %v9999_v33 }
 0x651   : > { %v10462_v51 = vpop.f32.mrf.mxu0  ;;  %v5051_v52 = vmax.bf16 %v11610_v59, %v4923_v38  ;;  %v5056_v44 = vmax.bf16 %v11610_v59, %v4928_v10  ;;  %v5033_v38 = vmax.bf16 %v11610_v59, %v4905_v11  ;;  %v4653_v39 = vadd.f32 %v10330_v1, %v10174_v20 }
 0x652   : > { %v10467_v37 = vpop.f32.mrf.mxu1  ;;  %5509 = vmatmul.mubr.bf16.gmra.mxu1 %v5047_v40  ;;  %v4927_v55 = vpack.c.bf16 %v4338_v61, %v4334_v53  ;;  %v5038_v62 = vmax.bf16 %v11610_v59, %v4910_v58  ;;  %v4637_v6 = vadd.f32 %v10267_v32, %v10205_v43  ;;  %v4932_v11 = vpack.c.bf16 %v4350_v49, %v4346_v35 }
 0x653   : > { %v10474_v31 = vpop.f32.mrf.mxu0  ;;  %5516 = vmatprep.mubr.bf16.mxu1 %v5052_v45  ;;  %v4348_v58 = vadd.f32 %v10307_v12, %v10032_v13  ;;  %v4914_v53 = vpack.c.bf16 %v4653_v39, %v4649_v56  ;;  %v4360_v49 = vadd.f32 %v10350_v28, %v9999_v33  ;;  %v4651_v12 = vadd.f32 %v10318_v63, %v10205_v43 }
 0x654   : > { %v10478_v60 = vpop.f32.mrf.mxu1  ;;  %v4909_v61 = vpack.c.bf16 %v4641_v47, %v4637_v6  ;;  %v5055_v1 = vmax.bf16 %v11610_v59, %v4927_v55  ;;  %v5060_v15 = vmax.bf16 %v11610_v59, %v4932_v11  ;;  %v4344_v47 = vadd.f32 %v10287_v25, %v10032_v13 }
 0x655   : > { %v10483_v40 = vpop.f32.mrf.mxu0  ;;  %5758 = vmatmul.mubr.bf16.gmra.mxu0 %v5029_v7  ;;  %v4356_v39 = vadd.f32 %v10334_v14, %v9999_v33  ;;  %v4663_v6 = vadd.f32 %v10366_v46, %v10174_v20  ;;  %v5042_v25 = vmax.bf16 %v11610_v59, %v4914_v53  ;;  %v4647_v56 = vadd.f32 %v10303_v8, %v10205_v43 }
 0x656   : > { %v10487_v9 = vpop.f32.mrf.mxu1  ;;  %5765 = vmatprep.mubr.bf16.mxu0 %v5034_v22  ;;  %v5037_v55 = vmax.bf16 %v11610_v59, %v4909_v61  ;;  %v4931_v28 = vpack.c.bf16 %v4348_v58, %v4344_v47  ;;  %v4659_v63 = vadd.f32 %v10345_v24, %v10174_v20  ;;  %v4358_v53 = vadd.f32 %v10343_v2, %v10032_v13 }
 0x657   : > { %v10489_v45 = vpop.f32.mrf.mxu0  ;;  %v4936_v61 = vpack.c.bf16 %v4360_v49, %v4356_v39  ;;  %v4913_v58 = vpack.c.bf16 %v4651_v12, %v4647_v56  ;;  %v4370_v49 = vadd.f32 %v10386_v4, %v9999_v33  ;;  %v4354_v12 = vadd.f32 %v10323_v50, %v10032_v13 }
 0x658   : > { %v10494_v16 = vpop.f32.mrf.mxu1  ;;  %v5059_v46 = vmax.bf16 %v11610_v59, %v4931_v28  ;;  %v4918_v47 = vpack.c.bf16 %v4663_v6, %v4659_v63  ;;  %v4661_v2 = vadd.f32 %v10354_v18, %v10205_v43  ;;  %v4366_v6 = vadd.f32 %v10370_v29, %v9999_v33 }
 0x659   : > { %v10498_v7 = vpop.f32.mrf.mxu0  ;;  %v5064_v24 = vmax.bf16 %v11610_v59, %v4936_v61  ;;  %v5041_v28 = vmax.bf16 %v11610_v59, %v4913_v58  ;;  %v4935_v4 = vpack.c.bf16 %v4358_v53, %v4354_v12  ;;  %v4673_v56 = vadd.f32 %v10402_v26, %v10174_v20 }
 0x65a   : > { %v10503_v41 = vpop.f32.mrf.mxu1  ;;  %5517 = vmatmul.mubr.bf16.gmra.mxu1 %v5051_v52  ;;  %v5046_v50 = vmax.bf16 %v11610_v59, %v4918_v47  ;;  %v4657_v63 = vadd.f32 %v10339_v0, %v10205_v43  ;;  %v4940_v58 = vpack.c.bf16 %v4370_v49, %v4366_v6  ;;  %v4669_v18 = vadd.f32 %v10381_v54, %v10174_v20  ;;  %v11687_v6 = vld [vmem:[#allocation28_spill] sm:$0xff] }
 0x65b   : > { %v10510_v22 = vpop.f32.mrf.mxu0  ;;  %5524 = vmatprep.mubr.bf16.mxu1 %v5056_v44  ;;  %v5063_v26 = vmax.bf16 %v11610_v59, %v4935_v4  ;;  %v4368_v47 = vadd.f32 %v10379_v21, %v10032_v13  ;;  %v4380_v49 = vadd.f32 %v10422_v19, %v9999_v33  ;;  %v11689_v21 = vld [vmem:[#allocation14_spill] sm:$0xff] }
 0x65c   : > { %v10514_v10 = vpop.f32.mrf.mxu1  ;;  %v4917_v53 = vpack.c.bf16 %v4661_v2, %v4657_v63  ;;  %v4922_v12 = vpack.c.bf16 %v4673_v56, %v4669_v18  ;;  %v5068_v54 = vmax.bf16 %v11610_v59, %v4940_v58  ;;  %v4364_v2 = vadd.f32 %v11687_v6, %v10032_v13 }
 0x65d   : > { %v10519_v52 = vpop.f32.mrf.mxu0  ;;  %5766 = vmatmul.mubr.bf16.gmra.mxu0 %v5033_v38  ;;  %v4671_v56 = vadd.f32 %v11689_v21, %v10205_v43  ;;  %v4376_v63 = vadd.f32 %v10406_v34, %v9999_v33  ;;  %v4683_v58 = vadd.f32 %v10438_v23, %v10174_v20  ;;  %v4679_v34 = vadd.f32 %v10417_v48, %v10174_v20 }
 0x65e   : > { %v10523_v30 = vpop.f32.mrf.mxu1  ;;  %5773 = vmatprep.mubr.bf16.mxu0 %v5038_v62  ;;  %v5045_v4 = vmax.bf16 %v11610_v59, %v4917_v53  ;;  %v4939_v19 = vpack.c.bf16 %v4368_v47, %v4364_v2  ;;  %v5050_v6 = vmax.bf16 %v11610_v59, %v4922_v12  ;;  %v4378_v12 = vadd.f32 %v10415_v57, %v10032_v13 }
 0x65f   : > { %v10525_v44 = vpop.f32.mrf.mxu0  ;;  %v4926_v2 = vpack.c.bf16 %v4683_v58, %v4679_v34  ;;  %v4681_v57 = vadd.f32 %v10426_v5, %v10205_v43  ;;  %v4386_v58 = vadd.f32 %v10442_v42, %v9999_v33  ;;  %v4689_v5 = vadd.f32 %v10453_v17, %v10174_v20 }
 0x660   : > { %v10530_v32 = vpop.f32.mrf.mxu1  ;;  %v5067_v23 = vmax.bf16 %v11610_v59, %v4939_v19 }
 0x661   : > { %v10534_v38 = vpop.f32.mrf.mxu0 }
 0x662   : > { %v10539_v35 = vpop.f32.mrf.mxu1  ;;  %5525 = vmatmul.mubr.bf16.gmra.mxu1 %v5055_v1 }
 0x663   : > { %v10546_v62 = vpop.f32.mrf.mxu0  ;;  %5532 = vmatprep.mubr.bf16.mxu1 %v5060_v15 }
 0x664   : > { %v10550_v11 = vpop.f32.mrf.mxu1 }
 0x665   : > { %v10555_v1 = vpop.f32.mrf.mxu0  ;;  %5774 = vmatmul.mubr.bf16.gmra.mxu0 %v5037_v55 }
 0x666   : > { %v10559_v14 = vpop.f32.mrf.mxu1  ;;  %5781 = vmatprep.mubr.bf16.mxu0 %v5042_v25 }
 0x667   : > { %v10561_v15 = vpop.f32.mrf.mxu0 }
 0x668   : > { %v10566_v8 = vpop.f32.mrf.mxu1 }
 0x669   : > { %v10570_v55 = vpop.f32.mrf.mxu0 }
 0x66a   : > { %v10575_v39 = vpop.f32.mrf.mxu1  ;;  %5533 = vmatmul.mubr.bf16.gmra.mxu1 %v5059_v46 }
 0x66b   : > { %v10582_v25 = vpop.f32.mrf.mxu0  ;;  %5540 = vmatprep.mubr.bf16.mxu1 %v5064_v24 }
 0x66c   : > { %v10586_v61 = vpop.f32.mrf.mxu1 }
 0x66d   : > { %v10591_v46 = vpop.f32.mrf.mxu0  ;;  %5782 = vmatmul.mubr.bf16.gmra.mxu0 %v5041_v28 }
 0x66e   : > { %11685 = vst [vmem:[#allocation15_spill] sm:$0xff] %v10591_v46  ;;  %v10595_v29 = vpop.f32.mrf.mxu1  ;;  %5789 = vmatprep.mubr.bf16.mxu0 %v5046_v50 }
 0x66f   : > { %v10597_v24 = vpop.f32.mrf.mxu0 }
 0x670   : > { %v10602_v0 = vpop.f32.mrf.mxu1 }
 0x671   : > { %v10606_v28 = vpop.f32.mrf.mxu0 }
 0x672   : > { %11686 = vst [vmem:[#allocation22_spill] sm:$0xff] %v10606_v28  ;;  %v10611_v50 = vpop.f32.mrf.mxu1  ;;  %5541 = vmatmul.mubr.bf16.gmra.mxu1 %v5063_v26  ;;  %v11690_v26 = vld [vmem:[#allocation27_spill] sm:$0xff] }
 0x673   : > { %11688 = vst [vmem:[#allocation21_spill] sm:$0xff] %v10611_v50  ;;  %v10618_v18 = vpop.f32.mrf.mxu0  ;;  %5548 = vmatprep.mubr.bf16.mxu1 %v5068_v54  ;;  %v4667_v53 = vadd.f32 %v11690_v26, %v10205_v43  ;;  %v4944_v50 = vpack.c.bf16 %v4380_v49, %v4376_v63  ;;  %v4390_v49 = vadd.f32 %v10458_v3, %v9999_v33  ;;  %v11692_v63 = vld [vmem:[#allocation18_spill] sm:$0xff] }
 0x674   : > { %v10622_v46 = vpop.f32.mrf.mxu1 }
 0x675   : > { %v10627_v28 = vpop.f32.mrf.mxu0  ;;  %5790 = vmatmul.mubr.bf16.gmra.mxu0 %v5045_v4  ;;  %v4921_v47 = vpack.c.bf16 %v4671_v56, %v4667_v53  ;;  %v5072_v48 = vmax.bf16 %v11610_v59, %v4944_v50  ;;  %v4374_v56 = vadd.f32 %v11692_v63, %v10032_v13  ;;  %v4693_v50 = vadd.f32 %v10474_v31, %v10174_v20 }
 0x676   : > { %11691 = vst [vmem:[#allocation20_spill] sm:$0xff] %v10627_v28  ;;  %v10631_v21 = vpop.f32.mrf.mxu1  ;;  %5797 = vmatprep.mubr.bf16.mxu0 %v5050_v6  ;;  %v5054_v63 = vmax.bf16 %v11610_v59, %v4926_v2  ;;  %v4388_v2 = vadd.f32 %v10451_v27, %v10032_v13  ;;  %v4691_v27 = vadd.f32 %v10462_v51, %v10205_v43 }
 0x677   : > { %v10633_v54 = vpop.f32.mrf.mxu0  ;;  %v5049_v19 = vmax.bf16 %v11610_v59, %v4921_v47  ;;  %v4943_v3 = vpack.c.bf16 %v4378_v12, %v4374_v56  ;;  %v4930_v56 = vpack.c.bf16 %v4693_v50, %v4689_v5  ;;  %v4396_v50 = vadd.f32 %v10478_v60, %v9999_v33 }
 0x678   : > { %v10638_v26 = vpop.f32.mrf.mxu1  ;;  %v4699_v51 = vadd.f32 %v10489_v45, %v10174_v20 }
 0x679   : > { %v10642_v4 = vpop.f32.mrf.mxu0  ;;  %v5071_v31 = vmax.bf16 %v11610_v59, %v4943_v3 }
 0x67a   : > { %v10647_v6 = vpop.f32.mrf.mxu1  ;;  %5549 = vmatmul.mubr.bf16.gmra.mxu1 %v5067_v23  ;;  %v11694_v23 = vld [vmem:[#allocation17_spill] sm:$0xff] }
 0x67b   : > { %11693 = vst [vmem:[#allocation19_spill] sm:$0xff] %v10647_v6  ;;  %v10654_v53 = vpop.f32.mrf.mxu0  ;;  %5556 = vmatprep.mubr.bf16.mxu1 %v5072_v48  ;;  %v4677_v47 = vadd.f32 %v11694_v23, %v10205_v43  ;;  %v4948_v6 = vpack.c.bf16 %v4390_v49, %v4386_v58  ;;  %v4400_v49 = vadd.f32 %v10494_v16, %v9999_v33  ;;  %v11695_v58 = vld [vmem:[#allocation16_spill] sm:$0xff] }
 0x67c   : > { %v10658_v34 = vpop.f32.mrf.mxu1 }
 0x67d   : > { %v10663_v28 = vpop.f32.mrf.mxu0  ;;  %5798 = vmatmul.mubr.bf16.gmra.mxu0 %v5049_v19  ;;  %v4925_v12 = vpack.c.bf16 %v4681_v57, %v4677_v47  ;;  %v5076_v17 = vmax.bf16 %v11610_v59, %v4948_v6  ;;  %v4384_v57 = vadd.f32 %v11695_v58, %v10032_v13  ;;  %v4703_v6 = vadd.f32 %v10510_v22, %v10174_v20 }
 0x67e   : > { %v10667_v42 = vpop.f32.mrf.mxu1  ;;  %5805 = vmatprep.mubr.bf16.mxu0 %v5054_v63  ;;  %v5058_v58 = vmax.bf16 %v11610_v59, %v4930_v56  ;;  %v4398_v56 = vadd.f32 %v10487_v9, %v10032_v13  ;;  %v4701_v9 = vadd.f32 %v10498_v7, %v10205_v43  ;;  %v4709_v7 = vadd.f32 %v10525_v44, %v10174_v20 }
 0x67f   : > { %v10669_v48 = vpop.f32.mrf.mxu0  ;;  %v5053_v3 = vmax.bf16 %v11610_v59, %v4925_v12  ;;  %v4947_v16 = vpack.c.bf16 %v4388_v2, %v4384_v57  ;;  %v4687_v12 = vadd.f32 %v10447_v36, %v10205_v43  ;;  %v4934_v57 = vpack.c.bf16 %v4703_v6, %v4699_v51 }
 0x680   : > { %v10674_v23 = vpop.f32.mrf.mxu1  ;;  %v4406_v6 = vadd.f32 %v10514_v10, %v9999_v33  ;;  %v4697_v51 = vadd.f32 %v10483_v40, %v10205_v43 }
 0x681   : > { %v10678_v19 = vpop.f32.mrf.mxu0  ;;  %v4929_v2 = vpack.c.bf16 %v4691_v27, %v4687_v12  ;;  %v5075_v22 = vmax.bf16 %v11610_v59, %v4947_v16  ;;  %v4394_v27 = vadd.f32 %v10467_v37, %v10032_v13  ;;  %v4713_v12 = vadd.f32 %v10546_v62, %v10174_v20 }
 0x682   : > { %v10683_v63 = vpop.f32.mrf.mxu1  ;;  %5557 = vmatmul.mubr.bf16.gmra.mxu1 %v5071_v31  ;;  %v4952_v31 = vpack.c.bf16 %v4400_v49, %v4396_v50  ;;  %v4410_v49 = vadd.f32 %v10530_v32, %v9999_v33  ;;  %v5062_v37 = vmax.bf16 %v11610_v59, %v4934_v57  ;;  %v4408_v57 = vadd.f32 %v10523_v30, %v10032_v13 }
 0x683   : > { %11696 = vst [vmem:[#allocation13_spill] sm:$0xff] %v10683_v63  ;;  %v10690_v47 = vpop.f32.mrf.mxu0  ;;  %5564 = vmatprep.mubr.bf16.mxu1 %v5076_v17  ;;  %v5057_v16 = vmax.bf16 %v11610_v59, %v4929_v2  ;;  %v4951_v32 = vpack.c.bf16 %v4398_v56, %v4394_v27  ;;  %v4933_v56 = vpack.c.bf16 %v4701_v9, %v4697_v51 }
 0x684   : > { %v10694_v5 = vpop.f32.mrf.mxu1  ;;  %v5080_v45 = vmax.bf16 %v11610_v59, %v4952_v31  ;;  %v4956_v2 = vpack.c.bf16 %v4410_v49, %v4406_v6  ;;  %v4938_v27 = vpack.c.bf16 %v4713_v12, %v4709_v7  ;;  %v4420_v49 = vadd.f32 %v10566_v8, %v9999_v33 }
 0x685   : > { %v10699_v63 = vpop.f32.mrf.mxu0  ;;  %5806 = vmatmul.mubr.bf16.gmra.mxu0 %v5053_v3  ;;  %v5079_v62 = vmax.bf16 %v11610_v59, %v4951_v32  ;;  %v4404_v9 = vadd.f32 %v10503_v41, %v10032_v13  ;;  %v5061_v32 = vmax.bf16 %v11610_v59, %v4933_v56  ;;  %v4711_v30 = vadd.f32 %v10534_v38, %v10205_v43 }
 0x686   : > { %v10703_v60 = vpop.f32.mrf.mxu1  ;;  %5813 = vmatprep.mubr.bf16.mxu0 %v5058_v58  ;;  %v5084_v44 = vmax.bf16 %v11610_v59, %v4956_v2  ;;  %v4416_v12 = vadd.f32 %v10550_v11, %v9999_v33  ;;  %v4723_v51 = vadd.f32 %v10582_v25, %v10174_v20  ;;  %v5066_v41 = vmax.bf16 %v11610_v59, %v4938_v27 }
 0x687   : > { %v10705_v17 = vpop.f32.mrf.mxu0  ;;  %v4955_v8 = vpack.c.bf16 %v4408_v57, %v4404_v9  ;;  %v4707_v7 = vadd.f32 %v10519_v52, %v10205_v43  ;;  %v4719_v38 = vadd.f32 %v10561_v15, %v10174_v20  ;;  %v4418_v27 = vadd.f32 %v10559_v14, %v10032_v13 }
 0x688   : > { %v10710_v36 = vpop.f32.mrf.mxu1  ;;  %v4960_v56 = vpack.c.bf16 %v4420_v49, %v4416_v12  ;;  %v4430_v49 = vadd.f32 %v10602_v0, %v9999_v33  ;;  %v4721_v14 = vadd.f32 %v10570_v55, %v10205_v43  ;;  %v4729_v55 = vadd.f32 %v10597_v24, %v10174_v20 }
 0x689   : > { %v10714_v3 = vpop.f32.mrf.mxu0  ;;  %v4937_v57 = vpack.c.bf16 %v4711_v30, %v4707_v7  ;;  %v5083_v25 = vmax.bf16 %v11610_v59, %v4955_v8  ;;  %v4942_v9 = vpack.c.bf16 %v4723_v51, %v4719_v38  ;;  %v4414_v30 = vadd.f32 %v10539_v35, %v10032_v13 }
 0x68a   : > { %v10719_v50 = vpop.f32.mrf.mxu1  ;;  %5565 = vmatmul.mubr.bf16.gmra.mxu1 %v5075_v22  ;;  %v5088_v15 = vmax.bf16 %v11610_v59, %v4960_v56  ;;  %v4426_v51 = vadd.f32 %v10586_v61, %v9999_v33  ;;  %v4733_v7 = vadd.f32 %v10618_v18, %v10174_v20  ;;  %v4717_v38 = vadd.f32 %v10555_v1, %v10205_v43 }
 0x68b   : > { %v10726_v58 = vpop.f32.mrf.mxu0  ;;  %5572 = vmatprep.mubr.bf16.mxu1 %v5080_v45  ;;  %v5065_v8 = vmax.bf16 %v11610_v59, %v4937_v57  ;;  %v4959_v0 = vpack.c.bf16 %v4418_v27, %v4414_v30  ;;  %v5070_v35 = vmax.bf16 %v11610_v59, %v4942_v9  ;;  %v4428_v9 = vadd.f32 %v10595_v29, %v10032_v13  ;;  %v11699_v29 = vld [vmem:[#allocation22_spill] sm:$0xff] }
 0x68c   : > { %v10730_v31 = vpop.f32.mrf.mxu1  ;;  %v4964_v57 = vpack.c.bf16 %v4430_v49, %v4426_v51  ;;  %v4941_v27 = vpack.c.bf16 %v4721_v14, %v4717_v38  ;;  %v4946_v30 = vpack.c.bf16 %v4733_v7, %v4729_v55  ;;  %v4440_v49 = vadd.f32 %v10638_v26, %v9999_v33 }
 0x68d   : > { %v10735_v22 = vpop.f32.mrf.mxu0  ;;  %5814 = vmatmul.mubr.bf16.gmra.mxu0 %v5057_v16  ;;  %v5087_v18 = vmax.bf16 %v11610_v59, %v4959_v0  ;;  %v4424_v14 = vadd.f32 %v10575_v39, %v10032_v13  ;;  %v4731_v7 = vadd.f32 %v11699_v29, %v10205_v43 }
 0x68e   : > { %v10739_v10 = vpop.f32.mrf.mxu1  ;;  %5821 = vmatprep.mubr.bf16.mxu0 %v5062_v37  ;;  %v5092_v24 = vmax.bf16 %v11610_v59, %v4964_v57  ;;  %v5069_v0 = vmax.bf16 %v11610_v59, %v4941_v27  ;;  %v4743_v57 = vadd.f32 %v10654_v53, %v10174_v20  ;;  %v5074_v39 = vmax.bf16 %v11610_v59, %v4946_v30 }
 0x68f   : > { %v10741_v45 = vpop.f32.mrf.mxu0  ;;  %v4963_v26 = vpack.c.bf16 %v4428_v9, %v4424_v14  ;;  %v4438_v30 = vadd.f32 %v10631_v21, %v10032_v13  ;;  %v4741_v21 = vadd.f32 %v10642_v4, %v10205_v43  ;;  %v4749_v4 = vadd.f32 %v10669_v48, %v10174_v20 }
 0x690   : > { %v10746_v40 = vpop.f32.mrf.mxu1 }
 0x691   : > { %v10750_v16 = vpop.f32.mrf.mxu0  ;;  %v5091_v53 = vmax.bf16 %v11610_v59, %v4963_v26 }
 0x692   : > { %v10755_v6 = vpop.f32.mrf.mxu1  ;;  %5573 = vmatmul.mubr.bf16.gmra.mxu1 %v5079_v62 }
 0x693   : > { %v10762_v37 = vpop.f32.mrf.mxu0  ;;  %5580 = vmatprep.mubr.bf16.mxu1 %v5084_v44 }
 0x694   : > { %v10766_v2 = vpop.f32.mrf.mxu1 }
 0x695   : > { %v10771_v62 = vpop.f32.mrf.mxu0  ;;  %5822 = vmatmul.mubr.bf16.gmra.mxu0 %v5061_v32 }
 0x696   : > { %v10775_v11 = vpop.f32.mrf.mxu1  ;;  %5829 = vmatprep.mubr.bf16.mxu0 %v5066_v41 }
 0x697   : > { %v10777_v44 = vpop.f32.mrf.mxu0 }
 0x698   : > { %v10782_v52 = vpop.f32.mrf.mxu1 }
 0x699   : > { %v10786_v32 = vpop.f32.mrf.mxu0 }
 0x69a   : > { %v10791_v12 = vpop.f32.mrf.mxu1  ;;  %5581 = vmatmul.mubr.bf16.gmra.mxu1 %v5083_v25 }
 0x69b   : > { %v10798_v41 = vpop.f32.mrf.mxu0  ;;  %5588 = vmatprep.mubr.bf16.mxu1 %v5088_v15 }
 0x69c   : > { %v10802_v56 = vpop.f32.mrf.mxu1 }
 0x69d   : > { %v10807_v25 = vpop.f32.mrf.mxu0  ;;  %5830 = vmatmul.mubr.bf16.gmra.mxu0 %v5065_v8 }
 0x69e   : > { %11697 = vst [vmem:[#allocation24_spill] sm:$0xff] %v10807_v25  ;;  %v10811_v61 = vpop.f32.mrf.mxu1  ;;  %5837 = vmatprep.mubr.bf16.mxu0 %v5070_v35  ;;  %v4436_v35 = vadd.f32 %v10622_v46, %v9999_v33  ;;  %v4739_v46 = vadd.f32 %v10633_v54, %v10174_v20 }
 0x69f   : > { %v10813_v15 = vpop.f32.mrf.mxu0 }
 0x6a0   : > { %v10818_v1 = vpop.f32.mrf.mxu1  ;;  %v4950_v14 = vpack.c.bf16 %v4743_v57, %v4739_v46  ;;  %v4446_v57 = vadd.f32 %v10658_v34, %v9999_v33 }
 0x6a1   : > { %v10822_v8 = vpop.f32.mrf.mxu0 }
 0x6a2   : > { %v10827_v51 = vpop.f32.mrf.mxu1  ;;  %5589 = vmatmul.mubr.bf16.gmra.mxu1 %v5087_v18  ;;  %v11700_v18 = vld [vmem:[#allocation15_spill] sm:$0xff] }
 0x6a3   : > { %11698 = vst [vmem:[#allocation26_spill] sm:$0xff] %v10827_v51  ;;  %v10834_v38 = vpop.f32.mrf.mxu0  ;;  %5596 = vmatprep.mubr.bf16.mxu1 %v5092_v24  ;;  %v4727_v27 = vadd.f32 %v11700_v18, %v10205_v43  ;;  %v4968_v51 = vpack.c.bf16 %v4440_v49, %v4436_v35  ;;  %v4450_v49 = vadd.f32 %v10674_v23, %v9999_v33  ;;  %v11702_v35 = vld [vmem:[#allocation21_spill] sm:$0xff] }
 0x6a4   : > { %v10838_v55 = vpop.f32.mrf.mxu1 }
 0x6a5   : > { %v10843_v25 = vpop.f32.mrf.mxu0  ;;  %5838 = vmatmul.mubr.bf16.gmra.mxu0 %v5069_v0  ;;  %v4945_v9 = vpack.c.bf16 %v4731_v7, %v4727_v27  ;;  %v5096_v54 = vmax.bf16 %v11610_v59, %v4968_v51  ;;  %v4434_v7 = vadd.f32 %v11702_v35, %v10032_v13  ;;  %v4753_v51 = vadd.f32 %v10690_v47, %v10174_v20 }
 0x6a6   : > { %11701 = vst [vmem:[#allocation23_spill] sm:$0xff] %v10843_v25  ;;  %v10847_v29 = vpop.f32.mrf.mxu1  ;;  %5845 = vmatprep.mubr.bf16.mxu0 %v5074_v39  ;;  %v5078_v35 = vmax.bf16 %v11610_v59, %v4950_v14  ;;  %v4448_v14 = vadd.f32 %v10667_v42, %v10032_v13  ;;  %v4751_v42 = vadd.f32 %v10678_v19, %v10205_v43 }
 0x6a7   : > { %v10849_v24 = vpop.f32.mrf.mxu0  ;;  %v5073_v26 = vmax.bf16 %v11610_v59, %v4945_v9  ;;  %v4967_v23 = vpack.c.bf16 %v4438_v30, %v4434_v7  ;;  %v4954_v7 = vpack.c.bf16 %v4753_v51, %v4749_v4  ;;  %v4456_v51 = vadd.f32 %v10694_v5, %v9999_v33 }
 0x6a8   : > { %v10854_v18 = vpop.f32.mrf.mxu1  ;;  %v4759_v19 = vadd.f32 %v10705_v17, %v10174_v20 }
 0x6a9   : > { %v10858_v0 = vpop.f32.mrf.mxu0  ;;  %v5095_v47 = vmax.bf16 %v11610_v59, %v4967_v23 }
 0x6aa   : > { %v10863_v39 = vpop.f32.mrf.mxu1  ;;  %5597 = vmatmul.mubr.bf16.gmra.mxu1 %v5091_v53  ;;  %v11704_v53 = vld [vmem:[#allocation20_spill] sm:$0xff] }
 0x6ab   : > { %11703 = vst [vmem:[#allocation25_spill] sm:$0xff] %v10863_v39  ;;  %v10870_v27 = vpop.f32.mrf.mxu0  ;;  %5604 = vmatprep.mubr.bf16.mxu1 %v5096_v54  ;;  %v4737_v9 = vadd.f32 %v11704_v53, %v10205_v43  ;;  %v4972_v39 = vpack.c.bf16 %v4450_v49, %v4446_v57  ;;  %v4460_v49 = vadd.f32 %v10710_v36, %v9999_v33  ;;  %v11705_v57 = vld [vmem:[#allocation19_spill] sm:$0xff] }
 0x6ac   : > { %v10874_v46 = vpop.f32.mrf.mxu1 }
 0x6ad   : > { %v10879_v25 = vpop.f32.mrf.mxu0  ;;  %5846 = vmatmul.mubr.bf16.gmra.mxu0 %v5073_v26  ;;  %v4949_v30 = vpack.c.bf16 %v4741_v21, %v4737_v9  ;;  %v5100_v48 = vmax.bf16 %v11610_v59, %v4972_v39  ;;  %v4444_v21 = vadd.f32 %v11705_v57, %v10032_v13  ;;  %v4763_v39 = vadd.f32 %v10726_v58, %v10174_v20 }
 0x6ae   : > { %v10883_v34 = vpop.f32.mrf.mxu1  ;;  %5853 = vmatprep.mubr.bf16.mxu0 %v5078_v35  ;;  %v5082_v57 = vmax.bf16 %v11610_v59, %v4954_v7  ;;  %v4458_v7 = vadd.f32 %v10703_v60, %v10032_v13  ;;  %v4761_v60 = vadd.f32 %v10714_v3, %v10205_v43  ;;  %v4769_v3 = vadd.f32 %v10741_v45, %v10174_v20 }
 0x6af   : > { %v10885_v54 = vpop.f32.mrf.mxu0  ;;  %v5077_v23 = vmax.bf16 %v11610_v59, %v4949_v30  ;;  %v4971_v36 = vpack.c.bf16 %v4448_v14, %v4444_v21  ;;  %v4747_v30 = vadd.f32 %v10663_v28, %v10205_v43  ;;  %v4958_v21 = vpack.c.bf16 %v4763_v39, %v4759_v19 }
 0x6b0   : > { %v10890_v53 = vpop.f32.mrf.mxu1  ;;  %v4466_v39 = vadd.f32 %v10730_v31, %v9999_v33 }
 0x6b1   : > { %v10894_v26 = vpop.f32.mrf.mxu0  ;;  %v4953_v14 = vpack.c.bf16 %v4751_v42, %v4747_v30  ;;  %v5099_v58 = vmax.bf16 %v11610_v59, %v4971_v36 }
 0x6b2   : > { %v10899_v35 = vpop.f32.mrf.mxu1  ;;  %5605 = vmatmul.mubr.bf16.gmra.mxu1 %v5095_v47  ;;  %v4976_v47 = vpack.c.bf16 %v4460_v49, %v4456_v51  ;;  %v4470_v49 = vadd.f32 %v10746_v40, %v9999_v33  ;;  %v11708_v51 = vld [vmem:[#allocation13_spill] sm:$0xff] }
 0x6b3   : > { %11706 = vst [vmem:[#allocation30_spill] sm:$0xff] %v10899_v35  ;;  %v10906_v9 = vpop.f32.mrf.mxu0  ;;  %5612 = vmatprep.mubr.bf16.mxu1 %v5100_v48  ;;  %v4454_v42 = vadd.f32 %v11708_v51, %v10032_v13  ;;  %v5081_v36 = vmax.bf16 %v11610_v59, %v4953_v14  ;;  %v5086_v51 = vmax.bf16 %v11610_v59, %v4958_v21 }
 0x6b4   : > { %v10910_v4 = vpop.f32.mrf.mxu1  ;;  %v5104_v17 = vmax.bf16 %v11610_v59, %v4976_v47  ;;  %v4773_v47 = vadd.f32 %v10762_v37, %v10174_v20  ;;  %v4980_v14 = vpack.c.bf16 %v4470_v49, %v4466_v39  ;;  %v4468_v21 = vadd.f32 %v10739_v10, %v10032_v13 }
 0x6b5   : > { %v10915_v35 = vpop.f32.mrf.mxu0  ;;  %5854 = vmatmul.mubr.bf16.gmra.mxu0 %v5077_v23  ;;  %v4975_v40 = vpack.c.bf16 %v4458_v7, %v4454_v42  ;;  %v4480_v49 = vadd.f32 %v10782_v52, %v9999_v33  ;;  %v4464_v39 = vadd.f32 %v10719_v50, %v10032_v13  ;;  %v4771_v10 = vadd.f32 %v10750_v16, %v10205_v43 }
 0x6b6   : > { %11707 = vst [vmem:[#allocation29_spill] sm:$0xff] %v10915_v35  ;;  %v10919_v5 = vpop.f32.mrf.mxu1  ;;  %5861 = vmatprep.mubr.bf16.mxu0 %v5082_v57  ;;  %v4962_v42 = vpack.c.bf16 %v4773_v47, %v4769_v3  ;;  %v5108_v45 = vmax.bf16 %v11610_v59, %v4980_v14  ;;  %v4476_v47 = vadd.f32 %v10766_v2, %v9999_v33 }
 0x6b7   : > { %v10921_v48 = vpop.f32.mrf.mxu0  ;;  %v5103_v37 = vmax.bf16 %v11610_v59, %v4975_v40  ;;  %v4979_v52 = vpack.c.bf16 %v4468_v21, %v4464_v39  ;;  %v4767_v14 = vadd.f32 %v10735_v22, %v10205_v43  ;;  %v4779_v16 = vadd.f32 %v10777_v44, %v10174_v20 }
 0x6b8   : > { %v10926_v28 = vpop.f32.mrf.mxu1  ;;  %v5090_v50 = vmax.bf16 %v11610_v59, %v4962_v42  ;;  %v4984_v3 = vpack.c.bf16 %v4480_v49, %v4476_v47  ;;  %v4478_v42 = vadd.f32 %v10775_v11, %v10032_v13  ;;  %v4490_v49 = vadd.f32 %v10818_v1, %v9999_v33 }
 0x6b9   : > { %v10930_v23 = vpop.f32.mrf.mxu0  ;;  %v4474_v39 = vadd.f32 %v10755_v6, %v10032_v13  ;;  %v4781_v11 = vadd.f32 %v10786_v32, %v10205_v43  ;;  %v4486_v47 = vadd.f32 %v10802_v56, %v9999_v33  ;;  %v4789_v32 = vadd.f32 %v10813_v15, %v10174_v20 }
 0x6ba   : > { %v10935_v57 = vpop.f32.mrf.mxu1  ;;  %5613 = vmatmul.mubr.bf16.gmra.mxu1 %v5099_v58  ;;  %v4757_v58 = vadd.f32 %v10699_v63, %v10205_v43  ;;  %v5112_v44 = vmax.bf16 %v11610_v59, %v4984_v3 }
 0x6bb   : > { %v10942_v30 = vpop.f32.mrf.mxu0  ;;  %5620 = vmatprep.mubr.bf16.mxu1 %v5104_v17  ;;  %v4983_v1 = vpack.c.bf16 %v4478_v42, %v4474_v39 }
 0x6bc   : > { %v5424_v19 = vpop.f32.mrf.mxu1  ;;  %v4957_v7 = vpack.c.bf16 %v4761_v60, %v4757_v58 }
 0x6bd   : > { %v10949_v35 = vpop.f32.mrf.mxu0  ;;  %5862 = vmatmul.mubr.bf16.gmra.mxu0 %v5081_v36 }
 0x6be   : > { %v10953_v31 = vpop.f32.mrf.mxu1  ;;  %5869 = vmatprep.mubr.bf16.mxu0 %v5086_v51  ;;  %v5085_v40 = vmax.bf16 %v11610_v59, %v4957_v7  ;;  %v4783_v51 = vadd.f32 %v10798_v41, %v10174_v20  ;;  %v5107_v41 = vmax.bf16 %v11610_v59, %v4979_v52 }
 0x6bf   : > { %v10955_v17 = vpop.f32.mrf.mxu0 }
 0x6c0   : > { %v5427_v63 = vpop.f32.mrf.mxu1 }
 0x6c1   : > { %v10962_v36 = vpop.f32.mrf.mxu0  ;;  %v4966_v63 = vpack.c.bf16 %v4783_v51, %v4779_v16  ;;  %v4793_v51 = vadd.f32 %v10834_v38, %v10174_v20  ;;  %v5111_v38 = vmax.bf16 %v11610_v59, %v4983_v1 }
 0x6c2   : > { %v10967_v60 = vpop.f32.mrf.mxu1  ;;  %5621 = vmatmul.mubr.bf16.gmra.mxu1 %v5103_v37  ;;  %v4961_v37 = vpack.c.bf16 %v4771_v10, %v4767_v14  ;;  %v4988_v14 = vpack.c.bf16 %v4490_v49, %v4486_v47  ;;  %v4484_v49 = vadd.f32 %v10791_v12, %v10032_v13  ;;  %v4803_v47 = vadd.f32 %v10870_v27, %v10174_v20 }
 0x6c3   : > { %v10974_v19 = vpop.f32.mrf.mxu0  ;;  %5628 = vmatprep.mubr.bf16.mxu1 %v5108_v45  ;;  %v5094_v6 = vmax.bf16 %v11610_v59, %v4966_v63  ;;  %v4970_v42 = vpack.c.bf16 %v4793_v51, %v4789_v32  ;;  %v4500_v63 = vadd.f32 %v10854_v18, %v9999_v33  ;;  %v11709_v51 = vld [vmem:[#allocation24_spill] sm:$0xff] }
 0x6c4   : > { %v5432_v58 = vpop.f32.mrf.mxu1  ;;  %v5089_v10 = vmax.bf16 %v11610_v59, %v4961_v37  ;;  %v5116_v15 = vmax.bf16 %v11610_v59, %v4988_v14 }
 0x6c5   : > { %v10981_v7 = vpop.f32.mrf.mxu0  ;;  %5870 = vmatmul.mubr.bf16.gmra.mxu0 %v5085_v40  ;;  %v5098_v12 = vmax.bf16 %v11610_v59, %v4970_v42  ;;  %v4510_v42 = vadd.f32 %v10890_v53, %v9999_v33 }
 0x6c6   : > { %v10985_v2 = vpop.f32.mrf.mxu1  ;;  %5877 = vmatprep.mubr.bf16.mxu0 %v5090_v50  ;;  %v4777_v50 = vadd.f32 %v10771_v62, %v10205_v43 }
 0x6c7   : > { %v10987_v21 = vpop.f32.mrf.mxu0 }
 0x6c8   : > { %v5435_v22 = vpop.f32.mrf.mxu1  ;;  %v4965_v16 = vpack.c.bf16 %v4781_v11, %v4777_v50 }
 0x6c9   : > { %v10994_v45 = vpop.f32.mrf.mxu0 }
 0x6ca   : > { %v10999_v40 = vpop.f32.mrf.mxu1  ;;  %5629 = vmatmul.mubr.bf16.gmra.mxu1 %v5107_v41  ;;  %v4488_v41 = vadd.f32 %v10811_v61, %v10032_v13  ;;  %v5093_v39 = vmax.bf16 %v11610_v59, %v4965_v16  ;;  %v4791_v61 = vadd.f32 %v10822_v8, %v10205_v43  ;;  %v4799_v8 = vadd.f32 %v10849_v24, %v10174_v20 }
 0x6cb   : > { %v11006_v52 = vpop.f32.mrf.mxu0  ;;  %5636 = vmatprep.mubr.bf16.mxu1 %v5112_v44  ;;  %v4498_v16 = vadd.f32 %v10847_v29, %v10032_v13  ;;  %v4801_v29 = vadd.f32 %v10858_v0, %v10205_v43  ;;  %v4809_v0 = vadd.f32 %v10885_v54, %v10174_v20  ;;  %v11093_v54 = vld [vmem:[%s11545_s8 + $0x6] ss:$0 sm:$0xff] }
 0x6cc   : > { %v5440_v58 = vpop.f32.mrf.mxu1  ;;  %v4987_v18 = vpack.c.bf16 %v4488_v41, %v4484_v49 }
 0x6cd   : > { %v11013_v3 = vpop.f32.mrf.mxu0  ;;  %5878 = vmatmul.mubr.bf16.gmra.mxu0 %v5089_v10  ;;  %v4496_v10 = vadd.f32 %v10838_v55, %v9999_v33  ;;  %v4787_v58 = vadd.f32 %v11709_v51, %v10205_v43 }
 0x6ce   : > { %v11017_v56 = vpop.f32.mrf.mxu1  ;;  %5885 = vmatprep.mubr.bf16.mxu0 %v5094_v6  ;;  %v5115_v27 = vmax.bf16 %v11610_v59, %v4987_v18  ;;  %v4813_v18 = vadd.f32 %v10906_v9, %v10174_v20 }
 0x6cf   : > { %v11019_v37 = vpop.f32.mrf.mxu0  ;;  %v4992_v6 = vpack.c.bf16 %v4500_v63, %v4496_v10  ;;  %v4969_v14 = vpack.c.bf16 %v4791_v61, %v4787_v58  ;;  %v11710_v63 = vld [vmem:[#allocation26_spill] sm:$0xff]  ;;  %v4506_v61 = vadd.f32 %v10874_v46, %v9999_v33 }
 0x6d0   : > { %v5443_v62 = vpop.f32.mrf.mxu1 }
 0x6d1   : > { %v11026_v22 = vpop.f32.mrf.mxu0  ;;  %v5120_v24 = vmax.bf16 %v11610_v59, %v4992_v6  ;;  %v4996_v58 = vpack.c.bf16 %v4510_v42, %v4506_v61 }
 0x6d2   : > { %v11031_v44 = vpop.f32.mrf.mxu1  ;;  %5637 = vmatmul.mubr.bf16.gmra.mxu1 %v5111_v38  ;;  %v4974_v38 = vpack.c.bf16 %v4803_v47, %v4799_v8 }
 0x6d3   : > { %v11038_v11 = vpop.f32.mrf.mxu0  ;;  %5644 = vmatprep.mubr.bf16.mxu1 %v5116_v15  ;;  %v4494_v15 = vadd.f32 %v11710_v63, %v10032_v13  ;;  %v11712_v63 = vld [vmem:[#allocation25_spill] sm:$0xff] }
 0x6d4   : > { %v5448_v1 = vpop.f32.mrf.mxu1 }
 0x6d5   : > { %v11045_v50 = vpop.f32.mrf.mxu0  ;;  %5886 = vmatmul.mubr.bf16.gmra.mxu0 %v5093_v39  ;;  %v5097_v39 = vmax.bf16 %v11610_v59, %v4969_v14  ;;  %v4991_v53 = vpack.c.bf16 %v4498_v16, %v4494_v15  ;;  %v5102_v1 = vmax.bf16 %v11610_v59, %v4974_v38  ;;  %v4978_v16 = vpack.c.bf16 %v4813_v18, %v4809_v0 }
 0x6d6   : > { %v11049_v55 = vpop.f32.mrf.mxu1  ;;  %5893 = vmatprep.mubr.bf16.mxu0 %v5098_v12  ;;  %v11711_v12 = vld [vmem:[#allocation23_spill] sm:$0xff]  ;;  %v4504_v15 = vadd.f32 %v11712_v63, %v10032_v13  ;;  %v5423_v18 = vadd.f32 %v10935_v57, %v11093_v54 }
 0x6d7   : > { %v11051_v32 = vpop.f32.mrf.mxu0  ;;  %v4797_v51 = vadd.f32 %v11711_v12, %v10205_v43  ;;  %v5119_v9 = vmax.bf16 %v11610_v59, %v4991_v53  ;;  %v5106_v12 = vmax.bf16 %v11610_v59, %v4978_v16 }
 0x6d8   : > { %v5451_v41 = vpop.f32.mrf.mxu1 }
 0x6d9   : > { %v11058_v62 = vpop.f32.mrf.mxu0  ;;  %v4973_v8 = vpack.c.bf16 %v4801_v29, %v4797_v51  ;;  %v4520_v41 = vadd.f32 %v10926_v28, %v9999_v33  ;;  %v4811_v28 = vadd.f32 %v10894_v26, %v10205_v43  ;;  %v4516_v29 = vadd.f32 %v10910_v4, %v9999_v33 }
 0x6da   : > { %v11063_v49 = vpop.f32.mrf.mxu1  ;;  %5645 = vmatmul.mubr.bf16.gmra.mxu1 %v5115_v27  ;;  %v4508_v27 = vadd.f32 %v10883_v34, %v10032_v13  ;;  %v4807_v51 = vadd.f32 %v10879_v25, %v10205_v43  ;;  %v4819_v33 = vadd.f32 %v10921_v48, %v10174_v20  ;;  %v5426_v25 = vadd.f32 %v10953_v31, %v11093_v54 }
 0x6db   : > { %v11070_v10 = vpop.f32.mrf.mxu0  ;;  %5652 = vmatprep.mubr.bf16.mxu1 %v5120_v24  ;;  %v5124_v24 = vmax.bf16 %v11610_v59, %v4996_v58  ;;  %v5101_v34 = vmax.bf16 %v11610_v59, %v4973_v8  ;;  %v5000_v26 = vpack.c.bf16 %v4520_v41, %v4516_v29  ;;  %v5431_v29 = vadd.f32 %v10967_v60, %v11093_v54 }
 0x6dc   : > { %v5456_v47 = vpop.f32.mrf.mxu1  ;;  %v4995_v53 = vpack.c.bf16 %v4508_v27, %v4504_v15  ;;  %v4977_v57 = vpack.c.bf16 %v4811_v28, %v4807_v51  ;;  %v4821_v28 = vadd.f32 %v10930_v23, %v10205_v43  ;;  %v4829_v23 = vadd.f32 %v10955_v17, %v10174_v20 }
 0x6dd   : > { %v11077_v6 = vpop.f32.mrf.mxu0  ;;  %5894 = vmatmul.mubr.bf16.gmra.mxu0 %v5097_v39  ;;  %v4823_v47 = vadd.f32 %v10942_v30, %v10174_v20  ;;  %v4518_v30 = vadd.f32 %v10919_v5, %v10032_v13 }
 0x6de   : > { %v11081_v46 = vpop.f32.mrf.mxu1  ;;  %5901 = vmatprep.mubr.bf16.mxu0 %v5102_v1  ;;  %v5105_v5 = vmax.bf16 %v11610_v59, %v4977_v57 }
 0x6df   : > { %v11083_v14 = vpop.f32.mrf.mxu0  ;;  %v4982_v27 = vpack.c.bf16 %v4823_v47, %v4819_v33  ;;  %v11714_v47 = vld [vmem:[#allocation29_spill] sm:$0xff] }
 0x6e0   : > { %v5459_v38 = vpop.f32.mrf.mxu1 }
 0x6e1   : > { %v11095_v42 = vpop.f32.mrf.mxu0  ;;  %v11713_v38 = vld [vmem:[#allocation30_spill] sm:$0xff] }
 0x6e2   : > { %v11100_v39 = vpop.f32.mrf.mxu1  ;;  %5653 = vmatmul.mubr.bf16.gmra.mxu1 %v5119_v9  ;;  %v5123_v9 = vmax.bf16 %v11610_v59, %v4995_v53  ;;  %v4514_v48 = vadd.f32 %v11713_v38, %v10032_v13  ;;  %v4833_v13 = vadd.f32 %v10974_v19, %v10174_v20 }
 0x6e3   : > { %v11107_v61 = vpop.f32.mrf.mxu0  ;;  %5660 = vmatprep.mubr.bf16.mxu1 %v5124_v24  ;;  %v5128_v24 = vmax.bf16 %v11610_v59, %v5000_v26 }
 0x6e4   : > { %v5464_v1 = vpop.f32.mrf.mxu1  ;;  %v4986_v33 = vpack.c.bf16 %v4833_v13, %v4829_v23 }
 0x6e5   : > { %v5711_v58 = vpop.f32.mrf.mxu0  ;;  %5902 = vmatmul.mubr.bf16.gmra.mxu0 %v5101_v34  ;;  %v4999_v34 = vpack.c.bf16 %v4518_v30, %v4514_v48  ;;  %v4817_v1 = vadd.f32 %v11714_v47, %v10205_v43  ;;  %v4841_v47 = vadd.f32 %v10994_v45, %v10205_v43  ;;  %v4849_v45 = vadd.f32 %v11019_v37, %v10174_v20 }
 0x6e6   : > { %v5712_v4 = vadd.f32 %v5711_v58, %v5423_v18  ;;  %v11118_v0 = vpop.f32.mrf.mxu1  ;;  %5909 = vmatprep.mubr.bf16.mxu0 %v5106_v12  ;;  %v5110_v18 = vmax.bf16 %v11610_v59, %v4982_v27  ;;  %v4831_v27 = vadd.f32 %v10962_v36, %v10205_v43  ;;  %v5114_v48 = vmax.bf16 %v11610_v59, %v4986_v33 }
 0x6e7   : > { %v5713_v8 = vpop.f32.mrf.mxu0  ;;  %v4981_v60 = vpack.c.bf16 %v4821_v28, %v4817_v1  ;;  %v5127_v19 = vmax.bf16 %v11610_v59, %v4999_v34  ;;  %v4839_v36 = vadd.f32 %v10987_v21, %v10174_v20 }
 0x6e8   : > { %7037 = vtanh.f32 %v5712_v4  ;;  %v5467_v16 = vpop.f32.mrf.mxu1  ;;  %v5434_v4 = vadd.f32 %v10985_v2, %v11093_v54  ;;  %v4843_v2 = vadd.f32 %v11006_v52, %v10174_v20 }
 0x6e9   : > { %v5714_v41 = vpop.f32.mrf.mxu0  ;;  %v5109_v17 = vmax.bf16 %v11610_v59, %v4981_v60  ;;  %v5439_v16 = vadd.f32 %v10999_v40, %v11093_v54 }
 0x6ea   : > { %v5715_v63 = vadd.f32 %v5714_v41, %v5426_v25  ;;  %v11128_v15 = vpop.f32.mrf.mxu1  ;;  %5661 = vmatmul.mubr.bf16.gmra.mxu1 %v5123_v9  ;;  %v4990_v28 = vpack.c.bf16 %v4843_v2, %v4839_v36 }
 0x6eb   : > { %5668 = vmatprep.mubr.bf16.mxu1 %v5128_v24  ;;  %v5716_v31 = vpop.f32.mrf.mxu0  ;;  %v4827_v24 = vadd.f32 %v10949_v35, %v10205_v43  ;;  %v5442_v35 = vadd.f32 %v11017_v56, %v11093_v54  ;;  %v4853_v56 = vadd.f32 %v11038_v11, %v10174_v20 }
 0x6ec   : > { %7039 = vtanh.f32 %v5715_v63  ;;  %v5472_v53 = vpop.f32.mrf.mxu1 }
 0x6ed   : > { %v5719_v12 = vpop.f32.mrf.mxu0  ;;  %5910 = vmatmul.mubr.bf16.gmra.mxu0 %v5105_v5  ;;  %v4985_v5 = vpack.c.bf16 %v4831_v27, %v4827_v24 }
 0x6ee   : > { %v5720_v51 = vadd.f32 %v5719_v12, %v5431_v29  ;;  %v11142_v26 = vpop.f32.mrf.mxu1  ;;  %5917 = vmatprep.mubr.bf16.mxu0 %v5110_v18  ;;  %v5447_v12 = vadd.f32 %v11031_v44, %v11093_v54 }
 0x6ef   : > { %v5721_v58 = vpop.f32.mrf.mxu0  ;;  %v5113_v18 = vmax.bf16 %v11610_v59, %v4985_v5 }
 0x6f0   : > { %7041 = vtanh.f32 %v5720_v51  ;;  %v5475_v57 = vpop.f32.mrf.mxu1  ;;  %v5118_v51 = vmax.bf16 %v11610_v59, %v4990_v28  ;;  %v4837_v58 = vadd.f32 %v10981_v7, %v10205_v43  ;;  %v5458_v28 = vadd.f32 %v11081_v46, %v11093_v54 }
 0x6f1   : > { %v5722_v30 = vpop.f32.mrf.mxu0  ;;  %v4994_v57 = vpack.c.bf16 %v4853_v56, %v4849_v45  ;;  %v4873_v46 = vadd.f32 %v11107_v61, %v10174_v20  ;;  %v5466_v45 = vadd.f32 %v11118_v0, %v11093_v54 }
 0x6f2   : > { %v5723_v8 = vadd.f32 %v5722_v30, %v5434_v4  ;;  %v11147_v9 = vpop.f32.mrf.mxu1  ;;  %5669 = vmatmul.mubr.bf16.gmra.mxu1 %v5127_v19  ;;  %v4989_v11 = vpack.c.bf16 %v4841_v47, %v4837_v58  ;;  %v5450_v30 = vadd.f32 %v11049_v55, %v11093_v54  ;;  %v4863_v55 = vadd.f32 %v11070_v10, %v10174_v20 }
 0x6f3   : > { %v5724_v25 = vpop.f32.mrf.mxu0  ;;  %v5463_v47 = vadd.f32 %v11100_v39, %v11093_v54 }
 0x6f4   : > { %7043 = vtanh.f32 %v5723_v8  ;;  %v5480_v38 = vpop.f32.mrf.mxu1  ;;  %v5117_v37 = vmax.bf16 %v11610_v59, %v4989_v11 }
 0x6f5   : > { %v7038_v41 = vpop.eup %7037  ;;  %v5727_v63 = vpop.f32.mrf.mxu0  ;;  %5918 = vmatmul.mubr.bf16.gmra.mxu0 %v5109_v17  ;;  %v5455_v38 = vadd.f32 %v11063_v49, %v11093_v54 }
 0x6f6   : > { %6030 = vst [vmem:[%s11163_s28] sm:$0xff] %v7038_v41  ;;  %v5728_v40 = vadd.f32 %v5727_v63, %v5439_v16  ;;  %v11166_v52 = vpop.f32.mrf.mxu1  ;;  %5925 = vmatprep.mubr.bf16.mxu0 %v5114_v48  ;;  %v4851_v16 = vadd.f32 %v11026_v22, %v10205_v43  ;;  %v5122_v41 = vmax.bf16 %v11610_v59, %v4994_v57 }
 0x6f7   : > { %v5729_v34 = vpop.f32.mrf.mxu0  ;;  %v4847_v63 = vadd.f32 %v11013_v3, %v10205_v43  ;;  %v4859_v22 = vadd.f32 %v11051_v32, %v10174_v20 }
 0x6f8   : > { %7045 = vtanh.f32 %v5728_v40  ;;  %v5483_v31 = vpop.f32.mrf.mxu1 }
 0x6f9   : > { %v7040_v29 = vpop.eup %7039  ;;  %v5730_v21 = vpop.f32.mrf.mxu0  ;;  %v4993_v10 = vpack.c.bf16 %v4851_v16, %v4847_v63  ;;  %v4998_v34 = vpack.c.bf16 %v4863_v55, %v4859_v22 }
 0x6fa   : > { %6031 = vst [vmem:[%s11163_s28 + $0x8] sm:$0xff] %v7040_v29  ;;  %v5731_v13 = vadd.f32 %v5730_v21, %v5442_v35  ;;  %v11171_v53 = vpop.f32.mrf.mxu1 }
 0x6fb   : > { %v5732_v1 = vpop.f32.mrf.mxu0  ;;  %v5121_v32 = vmax.bf16 %v11610_v59, %v4993_v10 }
 0x6fc   : > { %7047 = vtanh.f32 %v5731_v13  ;;  %v5488_v23 = vpop.f32.mrf.mxu1  ;;  %v4861_v13 = vadd.f32 %v11058_v62, %v10205_v43  ;;  %v4869_v62 = vadd.f32 %v11083_v14, %v10174_v20  ;;  %v4871_v14 = vadd.f32 %v11095_v42, %v10205_v43 }
 0x6fd   : > { %v7042_v60 = vpop.eup %7041  ;;  %v5735_v19 = vpop.f32.mrf.mxu0  ;;  %5926 = vmatmul.mubr.bf16.gmra.mxu0 %v5113_v18  ;;  %v4857_v23 = vadd.f32 %v11045_v50, %v10205_v43 }
 0x6fe   : > { %6032 = vst [vmem:[%s11163_s28 + $0x10] sm:$0xff] %v7042_v60  ;;  %v5736_v33 = vadd.f32 %v5735_v19, %v5447_v12  ;;  %v11186_v44 = vpop.f32.mrf.mxu1  ;;  %5933 = vmatprep.mubr.bf16.mxu0 %v5118_v51  ;;  %v5126_v12 = vmax.bf16 %v11610_v59, %v4998_v34  ;;  %v5002_v19 = vpack.c.bf16 %v4873_v46, %v4869_v62 }
 0x6ff   : > { %v5737_v4 = vpop.f32.mrf.mxu0  ;;  %v4997_v61 = vpack.c.bf16 %v4861_v13, %v4857_v23 }
 0x700   : > { %7049 = vtanh.f32 %v5736_v33  ;;  %v5491_v8 = vpop.f32.mrf.mxu1 }
 0x701   : > { %v7044_v7 = vpop.eup %7043  ;;  %v5738_v17 = vpop.f32.mrf.mxu0  ;;  %v5125_v20 = vmax.bf16 %v11610_v59, %v4997_v61  ;;  %v5471_v8 = vadd.f32 %v11128_v15, %v11093_v54  ;;  %v5474_v15 = vadd.f32 %v11142_v26, %v11093_v54 }
 0x702   : > { %6033 = vst [vmem:[%s11163_s28 + $0x18] sm:$0xff] %v7044_v7  ;;  %v5739_v27 = vadd.f32 %v5738_v17, %v5450_v30  ;;  %v11191_v25 = vpop.f32.mrf.mxu1  ;;  %v5130_v7 = vmax.bf16 %v11610_v59, %v5002_v19 }
 0x703   : > { %v5740_v2 = vpop.f32.mrf.mxu0  ;;  %v5495_v61 = vadd.f32 %v11191_v25, %v11093_v54 }
 0x704   : > { %7051 = vtanh.f32 %v5739_v27  ;;  %v5496_v48 = vpop.f32.mrf.mxu1  ;;  %v4867_v27 = vadd.f32 %v11077_v6, %v10205_v43 }
 0x705   : > { %v7046_v24 = vpop.eup %7045  ;;  %v5743_v36 = vpop.f32.mrf.mxu0  ;;  %5934 = vmatmul.mubr.bf16.gmra.mxu0 %v5117_v37 }
 0x706   : > { %6034 = vst [vmem:[%s11163_s28 + $0x20] sm:$0xff] %v7046_v24  ;;  %v5744_v40 = vadd.f32 %v5743_v36, %v5455_v38  ;;  %v11206_v49 = vpop.f32.mrf.mxu1  ;;  %5941 = vmatprep.mubr.bf16.mxu0 %v5122_v41  ;;  %v5001_v42 = vpack.c.bf16 %v4871_v14, %v4867_v27  ;;  %v5479_v36 = vadd.f32 %v11147_v9, %v11093_v54 }
 0x707   : > { %v5745_v5 = vpop.f32.mrf.mxu0 }
 0x708   : > { %7053 = vtanh.f32 %v5744_v40  ;;  %v5499_v35 = vpop.f32.mrf.mxu1  ;;  %v5129_v6 = vmax.bf16 %v11610_v59, %v5001_v42 }
 0x709   : > { %v7048_v3 = vpop.eup %7047  ;;  %v5746_v31 = vpop.f32.mrf.mxu0 }
 0x70a   : > { %6035 = vst [vmem:[%s11163_s28 + $0x28] sm:$0xff] %v7048_v3  ;;  %v5747_v29 = vadd.f32 %v5746_v31, %v5458_v28  ;;  %v11211_v21 = vpop.f32.mrf.mxu1  ;;  %v5482_v28 = vadd.f32 %v11166_v52, %v11093_v54 }
 0x70b   : > { %v5748_v18 = vpop.f32.mrf.mxu0 }
 0x70c   : > { %7055 = vtanh.f32 %v5747_v29  ;;  %v5504_v1 = vpop.f32.mrf.mxu1 }
 0x70d   : > { %v7050_v56 = vpop.eup %7049  ;;  %v5751_v51 = vpop.f32.mrf.mxu0  ;;  %5942 = vmatmul.mubr.bf16.gmra.mxu0 %v5121_v32  ;;  %v5487_v32 = vadd.f32 %v11171_v53, %v11093_v54 }
 0x70e   : > { %6036 = vst [vmem:[%s11163_s28 + $0x30] sm:$0xff] %v7050_v56  ;;  %v5752_v60 = vadd.f32 %v5751_v51, %v5463_v47  ;;  %v11226_v39 = vpop.f32.mrf.mxu1  ;;  %5949 = vmatprep.mubr.bf16.mxu0 %v5126_v12  ;;  %v5490_v12 = vadd.f32 %v11186_v44, %v11093_v54 }
 0x70f   : > { %v5753_v58 = vpop.f32.mrf.mxu0  ;;  %v5506_v42 = vadd.f32 %v11226_v39, %v11093_v54 }
 0x710   : > { %7057 = vtanh.f32 %v5752_v60  ;;  %v5507_v33 = vpop.f32.mrf.mxu1 }
 0x711   : > { %v7052_v50 = vpop.eup %7051  ;;  %v5754_v11 = vpop.f32.mrf.mxu0 }
 0x712   : > { %6037 = vst [vmem:[%s11163_s28 + $0x38] sm:$0xff] %v7052_v50  ;;  %v5755_v4 = vadd.f32 %v5754_v11, %v5466_v45  ;;  %v11231_v57 = vpop.f32.mrf.mxu1  ;;  %v5498_v11 = vadd.f32 %v11206_v49, %v11093_v54 }
 0x713   : > { %v5756_v30 = vpop.f32.mrf.mxu0 }
 0x714   : > { %7059 = vtanh.f32 %v5755_v4  ;;  %v5512_v0 = vpop.f32.mrf.mxu1 }
 0x715   : > { %v7054_v17 = vpop.eup %7053  ;;  %v5759_v37 = vpop.f32.mrf.mxu0  ;;  %5950 = vmatmul.mubr.bf16.gmra.mxu0 %v5125_v20  ;;  %v5503_v0 = vadd.f32 %v11211_v21, %v11093_v54 }
 0x716   : > { %6038 = vst [vmem:[%s11163_s28 + $0x40] sm:$0xff] %v7054_v17  ;;  %v5760_v16 = vadd.f32 %v5759_v37, %v5471_v8  ;;  %v11242_v2 = vpop.f32.mrf.mxu1  ;;  %5957 = vmatprep.mubr.bf16.mxu0 %v5130_v7 }
 0x717   : > { %v5761_v38 = vpop.f32.mrf.mxu0 }
 0x718   : > { %7061 = vtanh.f32 %v5760_v16  ;;  %v5515_v55 = vpop.f32.mrf.mxu1 }
 0x719   : > { %v7056_v48 = vpop.eup %7055  ;;  %v5762_v41 = vpop.f32.mrf.mxu0 }
 0x71a   : > { %6039 = vst [vmem:[%s11163_s28 + $0x48] sm:$0xff] %v7056_v48  ;;  %v5763_v24 = vadd.f32 %v5762_v41, %v5474_v15  ;;  %v11247_v43 = vpop.f32.mrf.mxu1 }
 0x71b   : > { %v5764_v63 = vpop.f32.mrf.mxu0 }
 0x71c   : > { %7063 = vtanh.f32 %v5763_v24  ;;  %v5520_v22 = vpop.f32.mrf.mxu1  ;;  %v5511_v24 = vadd.f32 %v11231_v57, %v11093_v54 }
 0x71d   : > { %v7058_v40 = vpop.eup %7057  ;;  %v5767_v26 = vpop.f32.mrf.mxu0  ;;  %5958 = vmatmul.mubr.bf16.gmra.mxu0 %v5129_v6 }
 0x71e   : > { %6040 = vst [vmem:[%s11163_s28 + $0x50] sm:$0xff] %v7058_v40  ;;  %v5768_v10 = vadd.f32 %v5767_v26, %v5479_v36  ;;  %v11253_v5 = vpop.f32.mrf.mxu1  ;;  %v5514_v26 = vadd.f32 %v11242_v2, %v11093_v54 }
 0x71f   : > { %v5769_v34 = vpop.f32.mrf.mxu0 }
 0x720   : > { %7065 = vtanh.f32 %v5768_v10  ;;  %v5523_v59 = vpop.f32.mrf.mxu1 }
 0x721   : > { %v7060_v35 = vpop.eup %7059  ;;  %v5770_v3 = vpop.f32.mrf.mxu0 }
 0x722   : > { %6041 = vst [vmem:[%s11163_s28 + $0x58] sm:$0xff] %v7060_v35  ;;  %v5771_v9 = vadd.f32 %v5770_v3, %v5482_v28  ;;  %v11258_v31 = vpop.f32.mrf.mxu1  ;;  %v5519_v3 = vadd.f32 %v11247_v43, %v11093_v54 }
 0x723   : > { %v5772_v29 = vpop.f32.mrf.mxu0 }
 0x724   : > { %7067 = vtanh.f32 %v5771_v9  ;;  %v5528_v13 = vpop.f32.mrf.mxu1 }
 0x725   : > { %v7062_v18 = vpop.eup %7061  ;;  %v5775_v47 = vpop.f32.mrf.mxu0 }
 0x726   : > { %6042 = vst [vmem:[%s11163_s28 + $0x60] sm:$0xff] %v7062_v18  ;;  %v5776_v46 = vadd.f32 %v5775_v47, %v5487_v32  ;;  %v11263_v52 = vpop.f32.mrf.mxu1  ;;  %v5522_v47 = vadd.f32 %v11253_v5, %v11093_v54 }
 0x727   : > { %v5777_v1 = vpop.f32.mrf.mxu0 }
 0x728   : > { %7069 = vtanh.f32 %v5776_v46  ;;  %v5531_v56 = vpop.f32.mrf.mxu1 }
 0x729   : > { %v7064_v23 = vpop.eup %7063  ;;  %v5778_v51 = vpop.f32.mrf.mxu0 }
 0x72a   : > { %6043 = vst [vmem:[%s11163_s28 + $0x68] sm:$0xff] %v7064_v23  ;;  %v5779_v62 = vadd.f32 %v5778_v51, %v5490_v12  ;;  %v11268_v53 = vpop.f32.mrf.mxu1  ;;  %v5527_v51 = vadd.f32 %v11258_v31, %v11093_v54 }
 0x72b   : > { %v5780_v60 = vpop.f32.mrf.mxu0 }
 0x72c   : > { %7071 = vtanh.f32 %v5779_v62  ;;  %v5536_v58 = vpop.f32.mrf.mxu1 }
 0x72d   : > { %v7066_v19 = vpop.eup %7065  ;;  %v5783_v45 = vpop.f32.mrf.mxu0 }
 0x72e   : > { %6044 = vst [vmem:[%s11163_s28 + $0x70] sm:$0xff] %v7066_v19  ;;  %v5784_v33 = vadd.f32 %v5783_v45, %v5495_v61  ;;  %v11273_v44 = vpop.f32.mrf.mxu1  ;;  %v5530_v45 = vadd.f32 %v11263_v52, %v11093_v54 }
 0x72f   : > { %v5785_v50 = vpop.f32.mrf.mxu0 }
 0x730   : > { %7073 = vtanh.f32 %v5784_v33  ;;  %v5539_v4 = vpop.f32.mrf.mxu1 }
 0x731   : > { %v7068_v20 = vpop.eup %7067  ;;  %v5786_v14 = vpop.f32.mrf.mxu0 }
 0x732   : > { %6045 = vst [vmem:[%s11163_s28 + $0x78] sm:$0xff] %v7068_v20  ;;  %v5787_v30 = vadd.f32 %v5786_v14, %v5498_v11  ;;  %v11278_v25 = vpop.f32.mrf.mxu1  ;;  %v5535_v14 = vadd.f32 %v11268_v53, %v11093_v54 }
 0x733   : > { %v5788_v8 = vpop.f32.mrf.mxu0 }
 0x734   : > { %7075 = vtanh.f32 %v5787_v30  ;;  %v5544_v7 = vpop.f32.mrf.mxu1 }
 0x735   : > { %v7070_v17 = vpop.eup %7069  ;;  %v5791_v27 = vpop.f32.mrf.mxu0 }
 0x736   : > { %6046 = vst [vmem:[%s11163_s28 + $0x80] sm:$0xff] %v7070_v17  ;;  %v5792_v37 = vadd.f32 %v5791_v27, %v5503_v0  ;;  %v11283_v49 = vpop.f32.mrf.mxu1  ;;  %v5538_v27 = vadd.f32 %v11273_v44, %v11093_v54 }
 0x737   : > { %v5793_v16 = vpop.f32.mrf.mxu0 }
 0x738   : > { %7077 = vtanh.f32 %v5792_v37  ;;  %v5547_v38 = vpop.f32.mrf.mxu1 }
 0x739   : > { %v7072_v15 = vpop.eup %7071  ;;  %v5794_v55 = vpop.f32.mrf.mxu0 }
 0x73a   : > { %6047 = vst [vmem:[%s11163_s28 + $0x88] sm:$0xff] %v7072_v15  ;;  %v5795_v48 = vadd.f32 %v5794_v55, %v5506_v42  ;;  %v11288_v21 = vpop.f32.mrf.mxu1  ;;  %v5543_v55 = vadd.f32 %v11278_v25, %v11093_v54 }
 0x73b   : > { %v5796_v41 = vpop.f32.mrf.mxu0 }
 0x73c   : > { %7079 = vtanh.f32 %v5795_v48  ;;  %v5552_v6 = vpop.f32.mrf.mxu1 }
 0x73d   : > { %v7074_v63 = vpop.eup %7073  ;;  %v5799_v36 = vpop.f32.mrf.mxu0 }
 0x73e   : > { %6048 = vst [vmem:[%s11163_s28 + $0x90] sm:$0xff] %v7074_v63  ;;  %v5800_v22 = vadd.f32 %v5799_v36, %v5511_v24  ;;  %v11293_v39 = vpop.f32.mrf.mxu1  ;;  %v5546_v36 = vadd.f32 %v11283_v49, %v11093_v54 }
 0x73f   : > { %v5801_v40 = vpop.f32.mrf.mxu0 }
 0x740   : > { %7081 = vtanh.f32 %v5800_v22  ;;  %v5555_v10 = vpop.f32.mrf.mxu1 }
 0x741   : > { %v7076_v34 = vpop.eup %7075  ;;  %v5802_v28 = vpop.f32.mrf.mxu0 }
 0x742   : > { %6049 = vst [vmem:[%s11163_s28 + $0x98] sm:$0xff] %v7076_v34  ;;  %v5803_v59 = vadd.f32 %v5802_v28, %v5514_v26  ;;  %v11298_v57 = vpop.f32.mrf.mxu1  ;;  %v5551_v28 = vadd.f32 %v11288_v21, %v11093_v54 }
 0x743   : > { %v5804_v35 = vpop.f32.mrf.mxu0 }
 0x744   : > { %7083 = vtanh.f32 %v5803_v59  ;;  %v5560_v9 = vpop.f32.mrf.mxu1 }
 0x745   : > { %v7078_v29 = vpop.eup %7077  ;;  %v5807_v32 = vpop.f32.mrf.mxu0 }
 0x746   : > { %6050 = vst [vmem:[%s11163_s28 + $0xa0] sm:$0xff] %v7078_v29  ;;  %v5808_v13 = vadd.f32 %v5807_v32, %v5519_v3  ;;  %v11303_v2 = vpop.f32.mrf.mxu1  ;;  %v5554_v32 = vadd.f32 %v11293_v39, %v11093_v54 }
 0x747   : > { %v5809_v18 = vpop.f32.mrf.mxu0 }
 0x748   : > { %7085 = vtanh.f32 %v5808_v13  ;;  %v5563_v46 = vpop.f32.mrf.mxu1 }
 0x749   : > { %v7080_v1 = vpop.eup %7079  ;;  %v5810_v12 = vpop.f32.mrf.mxu0 }
 0x74a   : > { %6051 = vst [vmem:[%s11163_s28 + $0xa8] sm:$0xff] %v7080_v1  ;;  %v5811_v56 = vadd.f32 %v5810_v12, %v5522_v47  ;;  %v11308_v43 = vpop.f32.mrf.mxu1  ;;  %v5559_v12 = vadd.f32 %v11298_v57, %v11093_v54 }
 0x74b   : > { %v5812_v23 = vpop.f32.mrf.mxu0 }
 0x74c   : > { %7087 = vtanh.f32 %v5811_v56  ;;  %v5568_v62 = vpop.f32.mrf.mxu1 }
 0x74d   : > { %v7082_v60 = vpop.eup %7081  ;;  %v5815_v61 = vpop.f32.mrf.mxu0 }
 0x74e   : > { %6052 = vst [vmem:[%s11163_s28 + $0xb0] sm:$0xff] %v7082_v60  ;;  %v5816_v58 = vadd.f32 %v5815_v61, %v5527_v51  ;;  %v11313_v5 = vpop.f32.mrf.mxu1  ;;  %v5562_v61 = vadd.f32 %v11303_v2, %v11093_v54 }
 0x74f   : > { %v5817_v19 = vpop.f32.mrf.mxu0 }
 0x750   : > { %7089 = vtanh.f32 %v5816_v58  ;;  %v5571_v33 = vpop.f32.mrf.mxu1 }
 0x751   : > { %v7084_v50 = vpop.eup %7083  ;;  %v5818_v11 = vpop.f32.mrf.mxu0 }
 0x752   : > { %6053 = vst [vmem:[%s11163_s28 + $0xb8] sm:$0xff] %v7084_v50  ;;  %v5819_v4 = vadd.f32 %v5818_v11, %v5530_v45  ;;  %v11318_v31 = vpop.f32.mrf.mxu1  ;;  %v5567_v11 = vadd.f32 %v11308_v43, %v11093_v54 }
 0x753   : > { %v5820_v20 = vpop.f32.mrf.mxu0 }
 0x754   : > { %7091 = vtanh.f32 %v5819_v4  ;;  %v5576_v30 = vpop.f32.mrf.mxu1 }
 0x755   : > { %v7086_v8 = vpop.eup %7085  ;;  %v5823_v0 = vpop.f32.mrf.mxu0 }
 0x756   : > { %6054 = vst [vmem:[%s11163_s28 + $0xc0] sm:$0xff] %v7086_v8  ;;  %v5824_v7 = vadd.f32 %v5823_v0, %v5535_v14  ;;  %v11323_v52 = vpop.f32.mrf.mxu1  ;;  %v5570_v0 = vadd.f32 %v11313_v5, %v11093_v54 }
 0x757   : > { %v5825_v17 = vpop.f32.mrf.mxu0 }
 0x758   : > { %7093 = vtanh.f32 %v5824_v7  ;;  %v5579_v37 = vpop.f32.mrf.mxu1 }
 0x759   : > { %v7088_v16 = vpop.eup %7087  ;;  %v5826_v42 = vpop.f32.mrf.mxu0 }
 0x75a   : > { %6055 = vst [vmem:[%s11163_s28 + $0xc8] sm:$0xff] %v7088_v16  ;;  %v5827_v38 = vadd.f32 %v5826_v42, %v5538_v27  ;;  %v11328_v53 = vpop.f32.mrf.mxu1  ;;  %v5575_v42 = vadd.f32 %v11318_v31, %v11093_v54 }
 0x75b   : > { %v5828_v15 = vpop.f32.mrf.mxu0 }
 0x75c   : > { %7095 = vtanh.f32 %v5827_v38  ;;  %v5584_v48 = vpop.f32.mrf.mxu1 }
 0x75d   : > { %v7090_v41 = vpop.eup %7089  ;;  %v5831_v24 = vpop.f32.mrf.mxu0 }
 0x75e   : > { %6056 = vst [vmem:[%s11163_s28 + $0xd0] sm:$0xff] %v7090_v41  ;;  %v5832_v6 = vadd.f32 %v5831_v24, %v5543_v55  ;;  %v11333_v44 = vpop.f32.mrf.mxu1  ;;  %v5578_v24 = vadd.f32 %v11323_v52, %v11093_v54 }
 0x75f   : > { %v5833_v63 = vpop.f32.mrf.mxu0 }
 0x760   : > { %7097 = vtanh.f32 %v5832_v6  ;;  %v5587_v22 = vpop.f32.mrf.mxu1 }
 0x761   : > { %v7092_v40 = vpop.eup %7091  ;;  %v5834_v26 = vpop.f32.mrf.mxu0 }
 0x762   : > { %6057 = vst [vmem:[%s11163_s28 + $0xd8] sm:$0xff] %v7092_v40  ;;  %v5835_v10 = vadd.f32 %v5834_v26, %v5546_v36  ;;  %v11338_v25 = vpop.f32.mrf.mxu1  ;;  %v5583_v26 = vadd.f32 %v11328_v53, %v11093_v54 }
 0x763   : > { %v5836_v34 = vpop.f32.mrf.mxu0 }
 0x764   : > { %7099 = vtanh.f32 %v5835_v10  ;;  %v5592_v59 = vpop.f32.mrf.mxu1 }
 0x765   : > { %v7094_v35 = vpop.eup %7093  ;;  %v5839_v3 = vpop.f32.mrf.mxu0 }
 0x766   : > { %6058 = vst [vmem:[%s11163_s28 + $0xe0] sm:$0xff] %v7094_v35  ;;  %v5840_v9 = vadd.f32 %v5839_v3, %v5551_v28  ;;  %v11343_v49 = vpop.f32.mrf.mxu1  ;;  %v5586_v3 = vadd.f32 %v11333_v44, %v11093_v54 }
 0x767   : > { %v5841_v29 = vpop.f32.mrf.mxu0 }
 0x768   : > { %7101 = vtanh.f32 %v5840_v9  ;;  %v5595_v13 = vpop.f32.mrf.mxu1 }
 0x769   : > { %v7096_v18 = vpop.eup %7095  ;;  %v5842_v47 = vpop.f32.mrf.mxu0 }
 0x76a   : > { %6059 = vst [vmem:[%s11163_s28 + $0xe8] sm:$0xff] %v7096_v18  ;;  %v5843_v46 = vadd.f32 %v5842_v47, %v5554_v32  ;;  %v11348_v21 = vpop.f32.mrf.mxu1  ;;  %v5591_v47 = vadd.f32 %v11338_v25, %v11093_v54 }
 0x76b   : > { %v5844_v1 = vpop.f32.mrf.mxu0 }
 0x76c   : > { %7103 = vtanh.f32 %v5843_v46  ;;  %v5600_v56 = vpop.f32.mrf.mxu1 }
 0x76d   : > { %v7098_v23 = vpop.eup %7097  ;;  %v5847_v51 = vpop.f32.mrf.mxu0 }
 0x76e   : > { %6060 = vst [vmem:[%s11163_s28 + $0xf0] sm:$0xff] %v7098_v23  ;;  %v5848_v62 = vadd.f32 %v5847_v51, %v5559_v12  ;;  %v11353_v39 = vpop.f32.mrf.mxu1  ;;  %v5594_v51 = vadd.f32 %v11343_v49, %v11093_v54 }
 0x76f   : > { %v5849_v60 = vpop.f32.mrf.mxu0 }
 0x770   : > { %7105 = vtanh.f32 %v5848_v62  ;;  %v5603_v58 = vpop.f32.mrf.mxu1 }
 0x771   : > { %v7100_v19 = vpop.eup %7099  ;;  %v5850_v45 = vpop.f32.mrf.mxu0 }
 0x772   : > { %6061 = vst [vmem:[%s11163_s28 + $0xf8] sm:$0xff] %v7100_v19  ;;  %v5851_v33 = vadd.f32 %v5850_v45, %v5562_v61  ;;  %v11358_v57 = vpop.f32.mrf.mxu1  ;;  %v5599_v45 = vadd.f32 %v11348_v21, %v11093_v54 }
 0x773   : > { %v5852_v50 = vpop.f32.mrf.mxu0 }
 0x774   : > { %7107 = vtanh.f32 %v5851_v33  ;;  %v5608_v4 = vpop.f32.mrf.mxu1 }
 0x775   : > { %v7102_v20 = vpop.eup %7101  ;;  %v5855_v14 = vpop.f32.mrf.mxu0 }
 0x776   : > { %6062 = vst [vmem:[%s11163_s28 + $0x100] sm:$0xff] %v7102_v20  ;;  %v5856_v30 = vadd.f32 %v5855_v14, %v5567_v11  ;;  %v11363_v2 = vpop.f32.mrf.mxu1  ;;  %v5602_v14 = vadd.f32 %v11353_v39, %v11093_v54 }
 0x777   : > { %v5857_v8 = vpop.f32.mrf.mxu0 }
 0x778   : > { %7109 = vtanh.f32 %v5856_v30  ;;  %v5611_v7 = vpop.f32.mrf.mxu1 }
 0x779   : > { %v7104_v17 = vpop.eup %7103  ;;  %v5858_v27 = vpop.f32.mrf.mxu0 }
 0x77a   : > { %6063 = vst [vmem:[%s11163_s28 + $0x108] sm:$0xff] %v7104_v17  ;;  %v5859_v37 = vadd.f32 %v5858_v27, %v5570_v0  ;;  %v11368_v43 = vpop.f32.mrf.mxu1  ;;  %v5607_v27 = vadd.f32 %v11358_v57, %v11093_v54 }
 0x77b   : > { %v5860_v16 = vpop.f32.mrf.mxu0 }
 0x77c   : > { %7111 = vtanh.f32 %v5859_v37  ;;  %v5616_v38 = vpop.f32.mrf.mxu1 }
 0x77d   : > { %v7106_v15 = vpop.eup %7105  ;;  %v5863_v55 = vpop.f32.mrf.mxu0 }
 0x77e   : > { %6064 = vst [vmem:[%s11163_s28 + $0x110] sm:$0xff] %v7106_v15  ;;  %v5864_v48 = vadd.f32 %v5863_v55, %v5575_v42  ;;  %v11373_v5 = vpop.f32.mrf.mxu1  ;;  %v5610_v55 = vadd.f32 %v11363_v2, %v11093_v54 }
 0x77f   : > { %v5865_v41 = vpop.f32.mrf.mxu0 }
 0x780   : > { %7113 = vtanh.f32 %v5864_v48  ;;  %v5619_v6 = vpop.f32.mrf.mxu1 }
 0x781   : > { %v7108_v63 = vpop.eup %7107  ;;  %v5866_v36 = vpop.f32.mrf.mxu0 }
 0x782   : > { %6065 = vst [vmem:[%s11163_s28 + $0x118] sm:$0xff] %v7108_v63  ;;  %v5867_v22 = vadd.f32 %v5866_v36, %v5578_v24  ;;  %v11378_v31 = vpop.f32.mrf.mxu1  ;;  %v11423_v36 = vld [vmem:[%s11545_s8 + $0x6] ss:$0 sm:$0xff] }
 0x783   : > { %v5868_v40 = vpop.f32.mrf.mxu0 }
 0x784   : > { %7115 = vtanh.f32 %v5867_v22  ;;  %v5624_v10 = vpop.f32.mrf.mxu1  ;;  %v5615_v22 = vadd.f32 %v11423_v36, %v11368_v43 }
 0x785   : > { %v7110_v34 = vpop.eup %7109  ;;  %v5871_v28 = vpop.f32.mrf.mxu0 }
 0x786   : > { %6066 = vst [vmem:[%s11163_s28 + $0x120] sm:$0xff] %v7110_v34  ;;  %v5872_v59 = vadd.f32 %v5871_v28, %v5583_v26  ;;  %v11383_v52 = vpop.f32.mrf.mxu1  ;;  %v5618_v28 = vadd.f32 %v11423_v36, %v11373_v5 }
 0x787   : > { %v5873_v35 = vpop.f32.mrf.mxu0 }
 0x788   : > { %7117 = vtanh.f32 %v5872_v59  ;;  %v5627_v9 = vpop.f32.mrf.mxu1 }
 0x789   : > { %v7112_v29 = vpop.eup %7111  ;;  %v5874_v32 = vpop.f32.mrf.mxu0 }
 0x78a   : > { %6067 = vst [vmem:[%s11163_s28 + $0x128] sm:$0xff] %v7112_v29  ;;  %v5875_v13 = vadd.f32 %v5874_v32, %v5586_v3  ;;  %v11388_v53 = vpop.f32.mrf.mxu1  ;;  %v5623_v32 = vadd.f32 %v11423_v36, %v11378_v31 }
 0x78b   : > { %v5876_v18 = vpop.f32.mrf.mxu0 }
 0x78c   : > { %7119 = vtanh.f32 %v5875_v13  ;;  %v5632_v46 = vpop.f32.mrf.mxu1 }
 0x78d   : > { %v7114_v1 = vpop.eup %7113  ;;  %v5879_v12 = vpop.f32.mrf.mxu0 }
 0x78e   : > { %6068 = vst [vmem:[%s11163_s28 + $0x130] sm:$0xff] %v7114_v1  ;;  %v5880_v56 = vadd.f32 %v5879_v12, %v5591_v47  ;;  %v11393_v44 = vpop.f32.mrf.mxu1  ;;  %v5626_v12 = vadd.f32 %v11423_v36, %v11383_v52 }
 0x78f   : > { %v5881_v23 = vpop.f32.mrf.mxu0 }
 0x790   : > { %7121 = vtanh.f32 %v5880_v56  ;;  %v5635_v62 = vpop.f32.mrf.mxu1 }
 0x791   : > { %v7116_v60 = vpop.eup %7115  ;;  %v5882_v61 = vpop.f32.mrf.mxu0 }
 0x792   : > { %6069 = vst [vmem:[%s11163_s28 + $0x138] sm:$0xff] %v7116_v60  ;;  %v5883_v58 = vadd.f32 %v5882_v61, %v5594_v51  ;;  %v11398_v25 = vpop.f32.mrf.mxu1  ;;  %v5631_v61 = vadd.f32 %v11423_v36, %v11388_v53 }
 0x793   : > { %v5884_v19 = vpop.f32.mrf.mxu0 }
 0x794   : > { %7123 = vtanh.f32 %v5883_v58  ;;  %v5640_v33 = vpop.f32.mrf.mxu1 }
 0x795   : > { %v7118_v50 = vpop.eup %7117  ;;  %v5887_v11 = vpop.f32.mrf.mxu0 }
 0x796   : > { %6070 = vst [vmem:[%s11163_s28 + $0x140] sm:$0xff] %v7118_v50  ;;  %v5888_v4 = vadd.f32 %v5887_v11, %v5599_v45  ;;  %v11403_v49 = vpop.f32.mrf.mxu1  ;;  %v5634_v11 = vadd.f32 %v11423_v36, %v11393_v44 }
 0x797   : > { %v5889_v20 = vpop.f32.mrf.mxu0  ;;  %v5642_v44 = vadd.f32 %v11423_v36, %v11403_v49 }
 0x798   : > { %7125 = vtanh.f32 %v5888_v4  ;;  %v5643_v30 = vpop.f32.mrf.mxu1 }
 0x799   : > { %v7120_v8 = vpop.eup %7119  ;;  %v5890_v0 = vpop.f32.mrf.mxu0 }
 0x79a   : > { %6071 = vst [vmem:[%s11163_s28 + $0x148] sm:$0xff] %v7120_v8  ;;  %v5891_v7 = vadd.f32 %v5890_v0, %v5602_v14  ;;  %v11408_v21 = vpop.f32.mrf.mxu1  ;;  %v5639_v8 = vadd.f32 %v11423_v36, %v11398_v25 }
 0x79b   : > { %v5892_v17 = vpop.f32.mrf.mxu0  ;;  %v5647_v25 = vadd.f32 %v11423_v36, %v11408_v21 }
 0x79c   : > { %7127 = vtanh.f32 %v5891_v7  ;;  %v5648_v37 = vpop.f32.mrf.mxu1 }
 0x79d   : > { %v7122_v16 = vpop.eup %7121  ;;  %v5895_v42 = vpop.f32.mrf.mxu0 }
 0x79e   : > { %6072 = vst [vmem:[%s11163_s28 + $0x150] sm:$0xff] %v7122_v16  ;;  %v5896_v38 = vadd.f32 %v5895_v42, %v5607_v27  ;;  %v11413_v39 = vpop.f32.mrf.mxu1 }
 0x79f   : > { %v5897_v15 = vpop.f32.mrf.mxu0  ;;  %v5650_v49 = vadd.f32 %v11423_v36, %v11413_v39 }
 0x7a0   : > { %7129 = vtanh.f32 %v5896_v38  ;;  %v5651_v48 = vpop.f32.mrf.mxu1 }
 0x7a1   : > { %v7124_v41 = vpop.eup %7123  ;;  %v5898_v24 = vpop.f32.mrf.mxu0 }
 0x7a2   : > { %6073 = vst [vmem:[%s11163_s28 + $0x158] sm:$0xff] %v7124_v41  ;;  %v5899_v6 = vadd.f32 %v5898_v24, %v5610_v55  ;;  %v11418_v57 = vpop.f32.mrf.mxu1 }
 0x7a3   : > { %v5900_v63 = vpop.f32.mrf.mxu0  ;;  %v5655_v21 = vadd.f32 %v11423_v36, %v11418_v57 }
 0x7a4   : > { %7131 = vtanh.f32 %v5899_v6  ;;  %v5656_v54 = vpop.f32.mrf.mxu1 }
 0x7a5   : > { %v7126_v2 = vpop.eup %7125  ;;  %v5903_v40 = vpop.f32.mrf.mxu0 }
 0x7a6   : > { %6074 = vst [vmem:[%s11163_s28 + $0x160] sm:$0xff] %v7126_v2  ;;  %v5904_v26 = vadd.f32 %v5903_v40, %v5615_v22  ;;  %v11428_v10 = vpop.f32.mrf.mxu1 }
 0x7a7   : > { %v5905_v34 = vpop.f32.mrf.mxu0  ;;  %v5658_v39 = vadd.f32 %v11423_v36, %v11428_v10 }
 0x7a8   : > { %7133 = vtanh.f32 %v5904_v26  ;;  %v5659_v59 = vpop.f32.mrf.mxu1 }
 0x7a9   : > { %v7128_v35 = vpop.eup %7127  ;;  %v5906_v3 = vpop.f32.mrf.mxu0 }
 0x7aa   : > { %6075 = vst [vmem:[%s11163_s28 + $0x168] sm:$0xff] %v7128_v35  ;;  %v5907_v9 = vadd.f32 %v5906_v3, %v5618_v28  ;;  %v11433_v43 = vpop.f32.mrf.mxu1 }
 0x7ab   : > { %v5908_v29 = vpop.f32.mrf.mxu0  ;;  %v5663_v57 = vadd.f32 %v11423_v36, %v11433_v43 }
 0x7ac   : > { %7135 = vtanh.f32 %v5907_v9  ;;  %v5664_v13 = vpop.f32.mrf.mxu1 }
 0x7ad   : > { %v7130_v18 = vpop.eup %7129  ;;  %v5911_v47 = vpop.f32.mrf.mxu0 }
 0x7ae   : > { %6076 = vst [vmem:[%s11163_s28 + $0x170] sm:$0xff] %v7130_v18  ;;  %v5912_v46 = vadd.f32 %v5911_v47, %v5623_v32  ;;  %v11438_v5 = vpop.f32.mrf.mxu1 }
 0x7af   : > { %v5913_v1 = vpop.f32.mrf.mxu0  ;;  %v5666_v10 = vadd.f32 %v11423_v36, %v11438_v5 }
 0x7b0   : > { %7137 = vtanh.f32 %v5912_v46  ;;  %v5667_v56 = vpop.f32.mrf.mxu1 }
 0x7b1   : > { %v7132_v23 = vpop.eup %7131  ;;  %v5914_v51 = vpop.f32.mrf.mxu0 }
 0x7b2   : > { %6077 = vst [vmem:[%s11163_s28 + $0x178] sm:$0xff] %v7132_v23  ;;  %v5915_v62 = vadd.f32 %v5914_v51, %v5626_v12  ;;  %v11443_v31 = vpop.f32.mrf.mxu1 }
 0x7b3   : > { %v5916_v60 = vpop.f32.mrf.mxu0  ;;  %v5671_v43 = vadd.f32 %v11423_v36, %v11443_v31 }
 0x7b4   : > { %7139 = vtanh.f32 %v5915_v62  ;;  %v5672_v58 = vpop.f32.mrf.mxu1 }
 0x7b5   : > { %v7134_v19 = vpop.eup %7133  ;;  %v5919_v45 = vpop.f32.mrf.mxu0 }
 0x7b6   : > { %6078 = vst [vmem:[%s11163_s28 + $0x180] sm:$0xff] %v7134_v19  ;;  %v5920_v52 = vadd.f32 %v5919_v45, %v5631_v61  ;;  %v11448_v33 = vpop.f32.mrf.mxu1 }
 0x7b7   : > { %v5921_v50 = vpop.f32.mrf.mxu0  ;;  %v5674_v23 = vadd.f32 %v11423_v36, %v11448_v33 }
 0x7b8   : > { %7141 = vtanh.f32 %v5920_v52  ;;  %v5675_v4 = vpop.f32.mrf.mxu1 }
 0x7b9   : > { %v7136_v20 = vpop.eup %7135  ;;  %v5922_v14 = vpop.f32.mrf.mxu0 }
 0x7ba   : > { %6079 = vst [vmem:[%s11163_s28 + $0x188] sm:$0xff] %v7136_v20  ;;  %v5923_v53 = vadd.f32 %v5922_v14, %v5634_v11 }
 0x7bb   : > { %v5924_v30 = vpop.f32.mrf.mxu0 }
 0x7bc   : > { %7143 = vtanh.f32 %v5923_v53 }
 0x7bd   : > { %v7138_v0 = vpop.eup %7137  ;;  %v5927_v7 = vpop.f32.mrf.mxu0 }
 0x7be   : > { %6080 = vst [vmem:[%s11163_s28 + $0x190] sm:$0xff] %v7138_v0  ;;  %v5928_v17 = vadd.f32 %v5927_v7, %v5639_v8 }
 0x7bf   : > { %v5929_v27 = vpop.f32.mrf.mxu0 }
 0x7c0   : > { %7145 = vtanh.f32 %v5928_v17 }
 0x7c1   : > { %v7140_v37 = vpop.eup %7139  ;;  %v5930_v16 = vpop.f32.mrf.mxu0 }
 0x7c2   : > { %6081 = vst [vmem:[%s11163_s28 + $0x198] sm:$0xff] %v7140_v37  ;;  %v5931_v42 = vadd.f32 %v5930_v16, %v5642_v44 }
 0x7c3   : > { %v5932_v38 = vpop.f32.mrf.mxu0 }
 0x7c4   : > { %7147 = vtanh.f32 %v5931_v42 }
 0x7c5   : > { %v7142_v15 = vpop.eup %7141  ;;  %v5935_v55 = vpop.f32.mrf.mxu0 }
 0x7c6   : > { %6082 = vst [vmem:[%s11163_s28 + $0x1a0] sm:$0xff] %v7142_v15  ;;  %v5936_v48 = vadd.f32 %v5935_v55, %v5647_v25 }
 0x7c7   : > { %v5937_v41 = vpop.f32.mrf.mxu0 }
 0x7c8   : > { %7149 = vtanh.f32 %v5936_v48 }
 0x7c9   : > { %v7144_v24 = vpop.eup %7143  ;;  %v5938_v6 = vpop.f32.mrf.mxu0 }
 0x7ca   : > { %6083 = vst [vmem:[%s11163_s28 + $0x1a8] sm:$0xff] %v7144_v24  ;;  %v5939_v63 = vadd.f32 %v5938_v6, %v5650_v49 }
 0x7cb   : > { %v5940_v22 = vpop.f32.mrf.mxu0 }
 0x7cc   : > { %7151 = vtanh.f32 %v5939_v63 }
 0x7cd   : > { %v7146_v54 = vpop.eup %7145  ;;  %v5943_v2 = vpop.f32.mrf.mxu0 }
 0x7ce   : > { %6084 = vst [vmem:[%s11163_s28 + $0x1b0] sm:$0xff] %v7146_v54  ;;  %v5944_v40 = vadd.f32 %v5943_v2, %v5655_v21 }
 0x7cf   : > { %v5945_v26 = vpop.f32.mrf.mxu0 }
 0x7d0   : > { %7153 = vtanh.f32 %v5944_v40 }
 0x7d1   : > { %v7148_v34 = vpop.eup %7147  ;;  %v5946_v28 = vpop.f32.mrf.mxu0 }
 0x7d2   : > { %6085 = vst [vmem:[%s11163_s28 + $0x1b8] sm:$0xff] %v7148_v34  ;;  %v5947_v59 = vadd.f32 %v5946_v28, %v5658_v39 }
 0x7d3   : > { %v5948_v35 = vpop.f32.mrf.mxu0 }
 0x7d4   : > { %7155 = vtanh.f32 %v5947_v59 }
 0x7d5   : > { %v7150_v3 = vpop.eup %7149  ;;  %v5951_v9 = vpop.f32.mrf.mxu0 }
 0x7d6   : > { %6086 = vst [vmem:[%s11163_s28 + $0x1c0] sm:$0xff] %v7150_v3  ;;  %v5952_v29 = vadd.f32 %v5951_v9, %v5663_v57 }
 0x7d7   : > { %v5953_v32 = vpop.f32.mrf.mxu0 }
 0x7d8   : > { %7157 = vtanh.f32 %v5952_v29 }
 0x7d9   : > { %v7152_v13 = vpop.eup %7151  ;;  %v5954_v18 = vpop.f32.mrf.mxu0 }
 0x7da   : > { %6087 = vst [vmem:[%s11163_s28 + $0x1c8] sm:$0xff] %v7152_v13  ;;  %v5955_v47 = vadd.f32 %v5954_v18, %v5666_v10 }
 0x7db   : > { %v5956_v46 = vpop.f32.mrf.mxu0 }
 0x7dc   : > { %7159 = vtanh.f32 %v5955_v47 }
 0x7dd   : > { %v7154_v1 = vpop.eup %7153  ;;  %v5959_v12 = vpop.f32.mrf.mxu0 }
 0x7de   : > { %6088 = vst [vmem:[%s11163_s28 + $0x1d0] sm:$0xff] %v7154_v1  ;;  %v5960_v56 = vadd.f32 %v5959_v12, %v5671_v43 }
 0x7df   : > { %v5961_v5 = vpop.f32.mrf.mxu0 }
 0x7e0   : > { %7161 = vtanh.f32 %v5960_v56 }
 0x7e1   : > { %v7156_v51 = vpop.eup %7155  ;;  %v5962_v62 = vpop.f32.mrf.mxu0 }
 0x7e2   : > { %6089 = vst [vmem:[%s11163_s28 + $0x1d8] sm:$0xff] %v7156_v51  ;;  %v5963_v31 = vadd.f32 %v5962_v62, %v5674_v23 }
 0x7e3   : > { %v5964_v60 = vpop.f32.mrf.mxu0 }
 0x7e4   : > { %7163 = vtanh.f32 %v5963_v31 }
 0x7e5   : > { %v7158_v61 = vpop.eup %7157 }
 0x7e6   : > { %6090 = vst [vmem:[%s11163_s28 + $0x1e0] sm:$0xff] %v7158_v61 }
 0x7e9   : > { %v7160_v58 = vpop.eup %7159 }
 0x7ea   : > { %6091 = vst [vmem:[%s11163_s28 + $0x1e8] sm:$0xff] %v7160_v58 }
 0x7ed   : > { %v7162_v19 = vpop.eup %7161 }
 0x7ee   : > { %6092 = vst [vmem:[%s11163_s28 + $0x1f0] sm:$0xff] %v7162_v19 }
 0x7f1   : > { %v7164_v36 = vpop.eup %7163 }
 0x7f2   : > { %6093 = vst [vmem:[%s11163_s28 + $0x1f8] sm:$0xff] %v7164_v36 }
 0x7f3   : > { %7260 = shalt.err (!%p7257_p9)
}
 0x7f4   : > { %s7261_s27 = scalar_lea.hbm %s11491_s26, 8192  ;;  %s7265_s23 = scalar_lea.hbm %s11546_s9, 16384 }
 0x7f5   : > { %p7262_p13 = scmp.ne.s32.totalorder %s11491_s26, %s7261_s27  ;;  %p7266_p4 = scmp.lt.s32.totalorder %s11491_s26, %s11546_s9 }
 0x7f6   : > { %p7267_p8 = scmp.lt.s32.totalorder %s7265_s23, %s7261_s27 }
 0x7f7   : > { %p7263_p5 = pnand %p7262_p13, %p11715_p10 }
 0x7f8   : > { %p7268_p3 = por %p7267_p8, %p7266_p4 }
 0x7f9   : > { %p7264_p0 = pneg %p7263_p5 }
 0x7fb   : > { %p7269_p11 = pnand %p7268_p3, %p7264_p0 }
 0x7fd   : > { %7272 = shalt.err (!%p7269_p11)
}
 0x7fe   : > { %s7326_s19 = smov 128   ;;  %s7327_s29 = smov 8  }
 0x7ff   : > { %6831 = dma.vmem_to_hbm [thread:$0]  (%p11715_p10), %s11493_s15, 8192, %s11491_s26, %s6095_s22, %s7326_s19, %s7326_s19, %s7327_s29  }
 0x800 PF: > { %s6123_s25 = sand.u32 1, %s7303_s30   ;;  %p11716_p1 = scmp.ne.s32.totalorder %s11579_s16, 0 }
 0x801   : > { %p11717_p2 = scmp.ge.s32.totalorder %s7315_s12, 2  ;;  %s6124_s13 = scalar_lea.sflag [#allocation4], %s6123_s25 }
 0x803   : > { %p6845_p6 = pnand %p11717_p2, %p11716_p1 }
 0x805   : > { %p6846_p12 = pneg %p6845_p6 }
 0x807   : > { %7298 = dma.done.wait (%p6846_p12), %s6124_s13, 8192  }
 0x808   : > { %7300 = vsyncadd (%p6846_p12), %s6124_s13, 4294959104  ;;  %s11718_s5 = sld [smem:[#allocation12_spill]]  ;;  %p23_p7 = scmp.ge.s32.totalorder %s7450_s18, 4  }
 0x809   : > { %s11719_s30 = smov %s7307_s10  ;;  %s11720_s10 = smov %s7311_s11 }
 0x80a   : > { %s11722_s12 = smov %s7450_s18  ;;  %25 = sbr.rel (!%p23_p7) target bundleno = 9 (0x9), region = 110 }
 0x80e   : > { %s11721_s11 = smov %s11718_s5 }
 0x80f   :  { %6129 = vsyncpa [#allocation3], 1 }
 0x810   :  { %6131 = vsyncpa [#allocation3 + $0x1], 1 }
 0x811   :  { %6132 = vsyncpa [#allocation6], 1 }
 0x812   :  { %6133 = vsyncpa [#allocation4], 1 }
 0x813   :  { %6135 = vsyncpa [#allocation4 + $0x1], 1 }

</bundles_post_ra>
